<compile_context>
chip_gen: v7x
topology: tpu7x:2x2x1
jax: 0.10.0
libtpu: 0.0.40
codegen_flags: <defaults>
</compile_context>

<pallas_src>
import math

import numpy as np

import jax
import jax.numpy as jnp
from jax.experimental import pallas as pl
from jax.experimental.pallas import tpu as pltpu

# ----------------------------- static configuration -----------------------------
NU, NPR = 8, 8                 # number of user / product nodes
N_NODES = NU + NPR
USER_DIM = 16
PRODUCT_DIM = 12
HIDDEN = 32
EXPANDED = HIDDEN * 2
P_DIMS = 5                     # num_personality_dims
NUM_HEADS = 4
HEAD_DIM = HIDDEN // NUM_HEADS

EPS_BN = 1e-5
EPS_LN = 1e-5

_VMEM = pl.BlockSpec(memory_space=pltpu.MemorySpace.VMEM)


def _param_order():
    names = ['user_norm',
             'user_l1_w', 'user_l1_b', 'user_l2_w', 'user_l2_b',
             'user_l3_w', 'user_l3_b', 'user_bn1', 'user_bn2',
             'attn_v_w', 'attn_v_b', 'attn_o_w', 'attn_o_b',
             'prod_norm', 'prod_l1_w', 'prod_l1_b', 'prod_bn1',
             'prod_l2_w', 'prod_l2_b', 'prod_l3_w', 'prod_l3_b', 'prod_bn2']
    for i in range(3):
        names += [f'g{i}_sage_wl', f'g{i}_sage_bl', f'g{i}_xw', f'g{i}_xb']
        if i != 1:                                   # GATv2 layers
            names += [f'g{i}_att', f'g{i}_gat_bias']
        names += [f'g{i}_ln']
    names += ['fc1_w', 'fc1_b', 'fc_bn1', 'fc2_w', 'fc2_b', 'fc_bn2',
              'fc3_w', 'fc3_b', 'out_ln']
    return names


PARAM_ORDER = _param_order()


# ------------------------------- in-kernel helpers -------------------------------
def _gelu(x):
    # tanh-approx GELU (see header note).
    c = math.sqrt(2.0 / math.pi)
    return 0.5 * x * (1.0 + jnp.tanh(c * (x + 0.044715 * x * x * x)))


def _mm(a, b):
    return jnp.dot(a, b, preferred_element_type=jnp.float32)


def _bn(x, sb):
    # folded BatchNorm (eval): sb = [scale ; shift], shape (2, dim)
    return x * sb[0:1, :] + sb[1:2, :]


def _layernorm(x, gb):
    # gb = [gamma ; beta], shape (2, dim)
    mu = jnp.mean(x, axis=-1, keepdims=True)
    var = jnp.mean((x - mu) ** 2, axis=-1, keepdims=True)
    return (x - mu) * jax.lax.rsqrt(var + EPS_LN) * gb[0:1, :] + gb[1:2, :]


def _masked_softmax(logits, mask):
    logits = jnp.where(mask > 0.0, logits, -1e9)
    logits = logits - jnp.max(logits, axis=1, keepdims=True)
    p = jnp.exp(logits) * mask
    denom = jnp.maximum(jnp.sum(p, axis=1, keepdims=True), 1e-6)
    return p * pl.reciprocal(denom, approx=True)


def _gatv2(xl, xr, att, mask, bias, hm):
    # GATv2Conv: e_ij = att_h . LeakyReLU(lin_r(x_i) + lin_l(x_j)), softmax over j,
    # out_i(head h) = sum_j alpha_ij lin_l(x_j)_h ; heads land on disjoint lane
    # blocks via accumulation with head lane masks hm (passed in, no constants).
    acc = None
    for h in range(NUM_HEADS):
        sl = slice(h * HEAD_DIM, (h + 1) * HEAD_DIM)
        e = xr[:, sl][:, None, :] + xl[:, sl][None, :, :]       # (N, N, HEAD_DIM)
        e = jnp.where(e > 0.0, e, 0.2 * e)                      # LeakyReLU(0.2)
        a_h = att[h:h + 1, :].reshape(1, 1, HEAD_DIM)
        logits = jnp.sum(e * a_h, axis=-1)                      # (N, N)
        alpha = _masked_softmax(logits, mask)
        term = _mm(alpha, xl) * hm[h:h + 1, :]                  # keep head-h lanes
        acc = term if acc is None else acc + term
    return acc + bias


def _transformer_conv(q, k, v, skip, mask, hm):
    # TransformerConv: alpha = softmax_j((q_i . k_j)/sqrt(C)) over incoming edges,
    # out_i = sum_j alpha v_j (per head) + lin_skip(x_i).
    scale = 1.0 / math.sqrt(HEAD_DIM)
    acc = None
    for h in range(NUM_HEADS):
        sl = slice(h * HEAD_DIM, (h + 1) * HEAD_DIM)
        logits = jax.lax.dot_general(
            q[:, sl], k[:, sl], (((1,), (1,)), ((), ())),
            preferred_element_type=jnp.float32) * scale
        alpha = _masked_softmax(logits, mask)
        term = _mm(alpha, v) * hm[h:h + 1, :]
        acc = term if acc is None else acc + term
    return acc + skip


# ---------------------------------- fused kernel ----------------------------------
def _fused_forward_kernel(*refs):
    out_ref = refs[-1]
    a_mean_ref, adj_ref, adj_self_ref, hm_ref, xu_ref, xp_ref = refs[:6]
    p = {name: r[...] for name, r in zip(PARAM_ORDER, refs[6:-1])}

    a_mean = a_mean_ref[...]          # (N, N) SAGE mean aggregation matrix
    adj = adj_ref[...]                # (N, N) TransformerConv mask (no self-loops)
    adj_self = adj_self_ref[...]      # (N, N) GATv2 mask (with self-loops)
    hm = hm_ref[...]                  # (NUM_HEADS, HIDDEN) head lane masks

    # ------------------------------- user branch -------------------------------
    xu = _bn(xu_ref[...], p['user_norm'])
    uid = _mm(xu, p['user_l1_w']) + p['user_l1_b']
    xu = _gelu(uid)
    xu = _mm(xu, p['user_l2_w']) + p['user_l2_b']
    xu = _gelu(_bn(xu, p['user_bn1']) + uid)
    xui = xu
    xu = _mm(xu, p['user_l3_w']) + p['user_l3_b']
    xu = _gelu(_bn(xu, p['user_bn2']) + xui)
    # MHA over seq-len 1: attn = out_proj(v_proj(x)); then residual add.
    v_attn = _mm(xu, p['attn_v_w']) + p['attn_v_b']
    xu = xu + _mm(v_attn, p['attn_o_w']) + p['attn_o_b']

    # ------------------------------ product branch -----------------------------
    xp = _bn(xp_ref[...], p['prod_norm'])
    xp = _mm(xp, p['prod_l1_w']) + p['prod_l1_b']
    xp = _gelu(_bn(xp, p['prod_bn1']))
    pid = _mm(xp, p['prod_l2_w']) + p['prod_l2_b']
    xp = _gelu(pid)
    xp = _mm(xp, p['prod_l3_w']) + p['prod_l3_b']
    xp = _gelu(_bn(xp, p['prod_bn2']) + pid)

    x = jnp.concatenate([xu, xp], axis=0)                # (N, HIDDEN)

    # ---- 3 GNN layers: 0.6*SAGE + 0.4*GAT -> LN -> GELU -> +0.8*identity ----
    for i in range(3):
        identity = x
        agg = _mm(a_mean, x)                             # SAGE mean aggregation
        # One packed matmul for every projection that reads x.
        xproj = _mm(x, p[f'g{i}_xw']) + p[f'g{i}_xb']
        wr_x = xproj[:, 0:HIDDEN]                        # SAGE lin_r(x)
        x_sage = _mm(agg, p[f'g{i}_sage_wl']) + p[f'g{i}_sage_bl'] + wr_x
        if i == 1:  # TransformerConv
            q = xproj[:, HIDDEN:2 * HIDDEN]
            k = xproj[:, 2 * HIDDEN:3 * HIDDEN]
            vv = xproj[:, 3 * HIDDEN:4 * HIDDEN]
            skip = xproj[:, 4 * HIDDEN:5 * HIDDEN]
            x_gat = _transformer_conv(q, k, vv, skip, adj, hm)
        else:       # GATv2Conv
            xl = xproj[:, HIDDEN:2 * HIDDEN]             # lin_l(x)  (source)
            xr = xproj[:, 2 * HIDDEN:3 * HIDDEN]         # lin_r(x)  (target)
            x_gat = _gatv2(xl, xr, p[f'g{i}_att'], adj_self,
                           p[f'g{i}_gat_bias'], hm)
        mix = 0.6 * x_sage + 0.4 * x_gat
        x = _gelu(_layernorm(mix, p[f'g{i}_ln'])) + 0.8 * identity

    # ------------------------- output head (users only) ------------------------
    ue = jnp.concatenate([x[0:NU, :], xu], axis=1)       # (NU, 2*HIDDEN)
    h1 = _gelu(_bn(_mm(ue, p['fc1_w']) + p['fc1_b'], p['fc_bn1']))
    h2 = _gelu(_bn(_mm(h1, p['fc2_w']) + p['fc2_b'], p['fc_bn2']))
    o = _mm(h2, p['fc3_w']) + p['fc3_b']
    o = _layernorm(o, p['out_ln'])
    out_ref[...] = jax.nn.sigmoid(o)


def forward(params, x_user, x_product, a_mean, adj, adj_self, head_mask):
    inputs = [a_mean, adj, adj_self, head_mask, x_user, x_product] + \
             [params[k] for k in PARAM_ORDER]
    return pl.pallas_call(
        _fused_forward_kernel,
        out_shape=jax.ShapeDtypeStruct((NU, P_DIMS), jnp.float32),
        in_specs=[_VMEM] * len(inputs),
        out_specs=_VMEM,
    )(*inputs)


# ------------------------------ parameter creation -------------------------------
def init_params(key):
    keys = iter(jax.random.split(key, 80))

    def lin(in_dim, out_dim, scale=0.1):
        kw, kb = jax.random.split(next(keys))
        w = (scale * jax.random.normal(kw, (in_dim, out_dim))).astype(jnp.float32)
        b = (scale * jax.random.normal(kb, (1, out_dim))).astype(jnp.float32)
        return w, b

    def bn(dim):
        k1, k2, k3, k4 = jax.random.split(next(keys), 4)
        gamma = 1.0 + 0.1 * jax.random.normal(k1, (dim,))
        beta = 0.1 * jax.random.normal(k2, (dim,))
        mean = 0.1 * jax.random.normal(k3, (dim,))
        var = 1.0 + 0.1 * jax.random.uniform(k4, (dim,))
        scale = gamma / jnp.sqrt(var + EPS_BN)
        shift = beta - mean * scale
        return jnp.stack([scale, shift]).astype(jnp.float32)      # (2, dim)

    def ln(dim):
        k1, k2 = jax.random.split(next(keys))
        g = 1.0 + 0.1 * jax.random.normal(k1, (dim,))
        b = 0.1 * jax.random.normal(k2, (dim,))
        return jnp.stack([g, b]).astype(jnp.float32)              # (2, dim)

    p = {}
    # user branch
    p['user_norm'] = bn(USER_DIM)
    p['user_l1_w'], p['user_l1_b'] = lin(USER_DIM, HIDDEN)
    p['user_l2_w'], p['user_l2_b'] = lin(HIDDEN, HIDDEN)
    p['user_l3_w'], p['user_l3_b'] = lin(HIDDEN, HIDDEN)
    p['user_bn1'] = bn(HIDDEN)
    p['user_bn2'] = bn(HIDDEN)
    p['attn_v_w'], p['attn_v_b'] = lin(HIDDEN, HIDDEN)
    p['attn_o_w'], p['attn_o_b'] = lin(HIDDEN, HIDDEN)
    # product branch
    p['prod_norm'] = bn(PRODUCT_DIM)
    p['prod_l1_w'], p['prod_l1_b'] = lin(PRODUCT_DIM, EXPANDED)
    p['prod_bn1'] = bn(EXPANDED)
    p['prod_l2_w'], p['prod_l2_b'] = lin(EXPANDED, HIDDEN)
    p['prod_l3_w'], p['prod_l3_b'] = lin(HIDDEN, HIDDEN)
    p['prod_bn2'] = bn(HIDDEN)
    # GNN layers (packed x-projections)
    zero_b = jnp.zeros((1, HIDDEN), jnp.float32)         # SAGE lin_r has no bias
    for i in range(3):
        wl, bl = lin(HIDDEN, HIDDEN)                     # SAGE lin_l (with bias)
        wr, _ = lin(HIDDEN, HIDDEN)                      # SAGE lin_r (no bias)
        p[f'g{i}_sage_wl'] = wl
        p[f'g{i}_sage_bl'] = bl
        if i == 1:   # TransformerConv: [wr | q | k | v | skip]  -> (32, 160)
            qw, qb = lin(HIDDEN, HIDDEN)
            kw_, kb_ = lin(HIDDEN, HIDDEN)
            vw, vb = lin(HIDDEN, HIDDEN)
            sw, sb = lin(HIDDEN, HIDDEN)
            p[f'g{i}_xw'] = jnp.concatenate([wr, qw, kw_, vw, sw], axis=1)
            p[f'g{i}_xb'] = jnp.concatenate([zero_b, qb, kb_, vb, sb], axis=1)
        else:        # GATv2Conv: [wr | lin_l | lin_r]  -> (32, 96)
            lw, lb = lin(HIDDEN, HIDDEN)
            rw, rb = lin(HIDDEN, HIDDEN)
            p[f'g{i}_xw'] = jnp.concatenate([wr, lw, rw], axis=1)
            p[f'g{i}_xb'] = jnp.concatenate([zero_b, lb, rb], axis=1)
            p[f'g{i}_att'] = (0.1 * jax.random.normal(
                next(keys), (NUM_HEADS, HEAD_DIM))).astype(jnp.float32)
            p[f'g{i}_gat_bias'] = (0.1 * jax.random.normal(
                next(keys), (1, HIDDEN))).astype(jnp.float32)
        p[f'g{i}_ln'] = ln(HIDDEN)
    # output head
    p['fc1_w'], p['fc1_b'] = lin(2 * HIDDEN, EXPANDED)
    p['fc_bn1'] = bn(EXPANDED)
    p['fc2_w'], p['fc2_b'] = lin(EXPANDED, HIDDEN)
    p['fc_bn2'] = bn(HIDDEN)
    p['fc3_w'], p['fc3_b'] = lin(HIDDEN, P_DIMS)
    p['out_ln'] = ln(P_DIMS)
    return p


# ------------------------------ graph preprocessing -------------------------------
def build_edge_index():
    # deterministic bipartite user<->product graph (no self-loops, no duplicates)
    edges = []
    for u in range(NU):
        for off in (0, 1, 3):
            pnode = NU + (u + off) % NPR
            edges.append((u, pnode))
            edges.append((pnode, u))
    return np.asarray(edges, dtype=np.int32).T            # (2, E)


def build_graph_tensors(edge_index):
    # Precomputed once per (static) graph outside jit.
    n = N_NODES
    counts = np.zeros((n, n), np.float32)
    np.add.at(counts, (edge_index[1], edge_index[0]), 1.0)   # dst <- src
    deg = counts.sum(axis=1, keepdims=True)
    a_mean = (counts / np.maximum(deg, 1.0)).astype(np.float32)   # SAGE mean agg
    adj = (counts > 0).astype(np.float32)                         # Transformer mask
    eye = np.eye(n, dtype=np.float32)
    adj_self = np.minimum(adj * (1.0 - eye) + eye, 1.0).astype(np.float32)
    return jnp.asarray(a_mean), jnp.asarray(adj), jnp.asarray(adj_self)


def build_head_mask():
    # (NUM_HEADS, HIDDEN) one-hot-per-head lane mask, passed as a kernel input
    # (must NOT be closed over inside the kernel -> would become a captured const).
    col_head = np.arange(HIDDEN) // HEAD_DIM
    hm = (col_head[None, :] == np.arange(NUM_HEADS)[:, None]).astype(np.float32)
    return jnp.asarray(hm)


# ------------------------------------- main ---------------------------------------
if __name__ == "__main__":
    key = jax.random.PRNGKey(0)
    kp, ku, kx = jax.random.split(key, 3)
    params = init_params(kp)
    x_user = jax.random.normal(ku, (NU, USER_DIM), jnp.float32)
    x_product = jax.random.normal(kx, (NPR, PRODUCT_DIM), jnp.float32)
    a_mean, adj, adj_self = build_graph_tensors(build_edge_index())
    head_mask = build_head_mask()

    out = jax.jit(forward)(params, x_user, x_product,
                           a_mean, adj, adj_self, head_mask)
    out = jax.block_until_ready(out)

    assert out.shape == (NU, P_DIMS), out.shape
    assert bool(jnp.all(jnp.isfinite(out)))
    assert bool(jnp.all((out >= 0.0) & (out <= 1.0)))     # sigmoid output
    print("KERNEL_OK")
</pallas_src>

<mosaic_0001>
module attributes {stable_mosaic.version = 11 : i64} {
  func.func @_fused_forward_kernel(%arg0: memref<16x16xf32, #tpu.memory_space<vmem>>, %arg1: memref<16x16xf32, #tpu.memory_space<vmem>>, %arg2: memref<16x16xf32, #tpu.memory_space<vmem>>, %arg3: memref<4x32xf32, #tpu.memory_space<vmem>>, %arg4: memref<8x16xf32, #tpu.memory_space<vmem>>, %arg5: memref<8x12xf32, #tpu.memory_space<vmem>>, %arg6: memref<2x16xf32, #tpu.memory_space<vmem>>, %arg7: memref<16x32xf32, #tpu.memory_space<vmem>>, %arg8: memref<1x32xf32, #tpu.memory_space<vmem>>, %arg9: memref<32x32xf32, #tpu.memory_space<vmem>>, %arg10: memref<1x32xf32, #tpu.memory_space<vmem>>, %arg11: memref<32x32xf32, #tpu.memory_space<vmem>>, %arg12: memref<1x32xf32, #tpu.memory_space<vmem>>, %arg13: memref<2x32xf32, #tpu.memory_space<vmem>>, %arg14: memref<2x32xf32, #tpu.memory_space<vmem>>, %arg15: memref<32x32xf32, #tpu.memory_space<vmem>>, %arg16: memref<1x32xf32, #tpu.memory_space<vmem>>, %arg17: memref<32x32xf32, #tpu.memory_space<vmem>>, %arg18: memref<1x32xf32, #tpu.memory_space<vmem>>, %arg19: memref<2x12xf32, #tpu.memory_space<vmem>>, %arg20: memref<12x64xf32, #tpu.memory_space<vmem>>, %arg21: memref<1x64xf32, #tpu.memory_space<vmem>>, %arg22: memref<2x64xf32, #tpu.memory_space<vmem>>, %arg23: memref<64x32xf32, #tpu.memory_space<vmem>>, %arg24: memref<1x32xf32, #tpu.memory_space<vmem>>, %arg25: memref<32x32xf32, #tpu.memory_space<vmem>>, %arg26: memref<1x32xf32, #tpu.memory_space<vmem>>, %arg27: memref<2x32xf32, #tpu.memory_space<vmem>>, %arg28: memref<32x32xf32, #tpu.memory_space<vmem>>, %arg29: memref<1x32xf32, #tpu.memory_space<vmem>>, %arg30: memref<32x96xf32, #tpu.memory_space<vmem>>, %arg31: memref<1x96xf32, #tpu.memory_space<vmem>>, %arg32: memref<4x8xf32, #tpu.memory_space<vmem>>, %arg33: memref<1x32xf32, #tpu.memory_space<vmem>>, %arg34: memref<2x32xf32, #tpu.memory_space<vmem>>, %arg35: memref<32x32xf32, #tpu.memory_space<vmem>>, %arg36: memref<1x32xf32, #tpu.memory_space<vmem>>, %arg37: memref<32x160xf32, #tpu.memory_space<vmem>>, %arg38: memref<1x160xf32, #tpu.memory_space<vmem>>, %arg39: memref<2x32xf32, #tpu.memory_space<vmem>>, %arg40: memref<32x32xf32, #tpu.memory_space<vmem>>, %arg41: memref<1x32xf32, #tpu.memory_space<vmem>>, %arg42: memref<32x96xf32, #tpu.memory_space<vmem>>, %arg43: memref<1x96xf32, #tpu.memory_space<vmem>>, %arg44: memref<4x8xf32, #tpu.memory_space<vmem>>, %arg45: memref<1x32xf32, #tpu.memory_space<vmem>>, %arg46: memref<2x32xf32, #tpu.memory_space<vmem>>, %arg47: memref<64x64xf32, #tpu.memory_space<vmem>>, %arg48: memref<1x64xf32, #tpu.memory_space<vmem>>, %arg49: memref<2x64xf32, #tpu.memory_space<vmem>>, %arg50: memref<64x32xf32, #tpu.memory_space<vmem>>, %arg51: memref<1x32xf32, #tpu.memory_space<vmem>>, %arg52: memref<2x32xf32, #tpu.memory_space<vmem>>, %arg53: memref<32x5xf32, #tpu.memory_space<vmem>>, %arg54: memref<1x5xf32, #tpu.memory_space<vmem>>, %arg55: memref<2x5xf32, #tpu.memory_space<vmem>>, %arg56: memref<8x5xf32, #tpu.memory_space<vmem>>) attributes {dimension_semantics = [], scalar_prefetch = 0 : i64, scratch_operands = 0 : i64, tpu.core_type = #tpu.core_type<tc>} {
    %c0 = arith.constant 0 : index
    %c0_0 = arith.constant 0 : index
    %0 = vector.load %arg6[%c0, %c0_0] : memref<2x16xf32, #tpu.memory_space<vmem>>, vector<2x16xf32>
    %c0_1 = arith.constant 0 : index
    %c0_2 = arith.constant 0 : index
    %1 = vector.load %arg7[%c0_1, %c0_2] : memref<16x32xf32, #tpu.memory_space<vmem>>, vector<16x32xf32>
    %c0_3 = arith.constant 0 : index
    %c0_4 = arith.constant 0 : index
    %2 = vector.load %arg8[%c0_3, %c0_4] : memref<1x32xf32, #tpu.memory_space<vmem>>, vector<1x32xf32>
    %c0_5 = arith.constant 0 : index
    %c0_6 = arith.constant 0 : index
    %3 = vector.load %arg9[%c0_5, %c0_6] : memref<32x32xf32, #tpu.memory_space<vmem>>, vector<32x32xf32>
    %c0_7 = arith.constant 0 : index
    %c0_8 = arith.constant 0 : index
    %4 = vector.load %arg10[%c0_7, %c0_8] : memref<1x32xf32, #tpu.memory_space<vmem>>, vector<1x32xf32>
    %c0_9 = arith.constant 0 : index
    %c0_10 = arith.constant 0 : index
    %5 = vector.load %arg11[%c0_9, %c0_10] : memref<32x32xf32, #tpu.memory_space<vmem>>, vector<32x32xf32>
    %c0_11 = arith.constant 0 : index
    %c0_12 = arith.constant 0 : index
    %6 = vector.load %arg12[%c0_11, %c0_12] : memref<1x32xf32, #tpu.memory_space<vmem>>, vector<1x32xf32>
    %c0_13 = arith.constant 0 : index
    %c0_14 = arith.constant 0 : index
    %7 = vector.load %arg13[%c0_13, %c0_14] : memref<2x32xf32, #tpu.memory_space<vmem>>, vector<2x32xf32>
    %c0_15 = arith.constant 0 : index
    %c0_16 = arith.constant 0 : index
    %8 = vector.load %arg14[%c0_15, %c0_16] : memref<2x32xf32, #tpu.memory_space<vmem>>, vector<2x32xf32>
    %c0_17 = arith.constant 0 : index
    %c0_18 = arith.constant 0 : index
    %9 = vector.load %arg15[%c0_17, %c0_18] : memref<32x32xf32, #tpu.memory_space<vmem>>, vector<32x32xf32>
    %c0_19 = arith.constant 0 : index
    %c0_20 = arith.constant 0 : index
    %10 = vector.load %arg16[%c0_19, %c0_20] : memref<1x32xf32, #tpu.memory_space<vmem>>, vector<1x32xf32>
    %c0_21 = arith.constant 0 : index
    %c0_22 = arith.constant 0 : index
    %11 = vector.load %arg17[%c0_21, %c0_22] : memref<32x32xf32, #tpu.memory_space<vmem>>, vector<32x32xf32>
    %c0_23 = arith.constant 0 : index
    %c0_24 = arith.constant 0 : index
    %12 = vector.load %arg18[%c0_23, %c0_24] : memref<1x32xf32, #tpu.memory_space<vmem>>, vector<1x32xf32>
    %c0_25 = arith.constant 0 : index
    %c0_26 = arith.constant 0 : index
    %13 = vector.load %arg19[%c0_25, %c0_26] : memref<2x12xf32, #tpu.memory_space<vmem>>, vector<2x12xf32>
    %c0_27 = arith.constant 0 : index
    %c0_28 = arith.constant 0 : index
    %14 = vector.load %arg20[%c0_27, %c0_28] : memref<12x64xf32, #tpu.memory_space<vmem>>, vector<12x64xf32>
    %c0_29 = arith.constant 0 : index
    %c0_30 = arith.constant 0 : index
    %15 = vector.load %arg21[%c0_29, %c0_30] : memref<1x64xf32, #tpu.memory_space<vmem>>, vector<1x64xf32>
    %c0_31 = arith.constant 0 : index
    %c0_32 = arith.constant 0 : index
    %16 = vector.load %arg22[%c0_31, %c0_32] : memref<2x64xf32, #tpu.memory_space<vmem>>, vector<2x64xf32>
    %c0_33 = arith.constant 0 : index
    %c0_34 = arith.constant 0 : index
    %17 = vector.load %arg23[%c0_33, %c0_34] : memref<64x32xf32, #tpu.memory_space<vmem>>, vector<64x32xf32>
    %c0_35 = arith.constant 0 : index
    %c0_36 = arith.constant 0 : index
    %18 = vector.load %arg24[%c0_35, %c0_36] : memref<1x32xf32, #tpu.memory_space<vmem>>, vector<1x32xf32>
    %c0_37 = arith.constant 0 : index
    %c0_38 = arith.constant 0 : index
    %19 = vector.load %arg25[%c0_37, %c0_38] : memref<32x32xf32, #tpu.memory_space<vmem>>, vector<32x32xf32>
    %c0_39 = arith.constant 0 : index
    %c0_40 = arith.constant 0 : index
    %20 = vector.load %arg26[%c0_39, %c0_40] : memref<1x32xf32, #tpu.memory_space<vmem>>, vector<1x32xf32>
    %c0_41 = arith.constant 0 : index
    %c0_42 = arith.constant 0 : index
    %21 = vector.load %arg27[%c0_41, %c0_42] : memref<2x32xf32, #tpu.memory_space<vmem>>, vector<2x32xf32>
    %c0_43 = arith.constant 0 : index
    %c0_44 = arith.constant 0 : index
    %22 = vector.load %arg28[%c0_43, %c0_44] : memref<32x32xf32, #tpu.memory_space<vmem>>, vector<32x32xf32>
    %c0_45 = arith.constant 0 : index
    %c0_46 = arith.constant 0 : index
    %23 = vector.load %arg29[%c0_45, %c0_46] : memref<1x32xf32, #tpu.memory_space<vmem>>, vector<1x32xf32>
    %c0_47 = arith.constant 0 : index
    %c0_48 = arith.constant 0 : index
    %24 = vector.load %arg30[%c0_47, %c0_48] : memref<32x96xf32, #tpu.memory_space<vmem>>, vector<32x96xf32>
    %c0_49 = arith.constant 0 : index
    %c0_50 = arith.constant 0 : index
    %25 = vector.load %arg31[%c0_49, %c0_50] : memref<1x96xf32, #tpu.memory_space<vmem>>, vector<1x96xf32>
    %c0_51 = arith.constant 0 : index
    %c0_52 = arith.constant 0 : index
    %26 = vector.load %arg32[%c0_51, %c0_52] : memref<4x8xf32, #tpu.memory_space<vmem>>, vector<4x8xf32>
    %c0_53 = arith.constant 0 : index
    %c0_54 = arith.constant 0 : index
    %27 = vector.load %arg33[%c0_53, %c0_54] : memref<1x32xf32, #tpu.memory_space<vmem>>, vector<1x32xf32>
    %c0_55 = arith.constant 0 : index
    %c0_56 = arith.constant 0 : index
    %28 = vector.load %arg34[%c0_55, %c0_56] : memref<2x32xf32, #tpu.memory_space<vmem>>, vector<2x32xf32>
    %c0_57 = arith.constant 0 : index
    %c0_58 = arith.constant 0 : index
    %29 = vector.load %arg35[%c0_57, %c0_58] : memref<32x32xf32, #tpu.memory_space<vmem>>, vector<32x32xf32>
    %c0_59 = arith.constant 0 : index
    %c0_60 = arith.constant 0 : index
    %30 = vector.load %arg36[%c0_59, %c0_60] : memref<1x32xf32, #tpu.memory_space<vmem>>, vector<1x32xf32>
    %c0_61 = arith.constant 0 : index
    %c0_62 = arith.constant 0 : index
    %31 = vector.load %arg37[%c0_61, %c0_62] : memref<32x160xf32, #tpu.memory_space<vmem>>, vector<32x160xf32>
    %c0_63 = arith.constant 0 : index
    %c0_64 = arith.constant 0 : index
    %32 = vector.load %arg38[%c0_63, %c0_64] : memref<1x160xf32, #tpu.memory_space<vmem>>, vector<1x160xf32>
    %c0_65 = arith.constant 0 : index
    %c0_66 = arith.constant 0 : index
    %33 = vector.load %arg39[%c0_65, %c0_66] : memref<2x32xf32, #tpu.memory_space<vmem>>, vector<2x32xf32>
    %c0_67 = arith.constant 0 : index
    %c0_68 = arith.constant 0 : index
    %34 = vector.load %arg40[%c0_67, %c0_68] : memref<32x32xf32, #tpu.memory_space<vmem>>, vector<32x32xf32>
    %c0_69 = arith.constant 0 : index
    %c0_70 = arith.constant 0 : index
    %35 = vector.load %arg41[%c0_69, %c0_70] : memref<1x32xf32, #tpu.memory_space<vmem>>, vector<1x32xf32>
    %c0_71 = arith.constant 0 : index
    %c0_72 = arith.constant 0 : index
    %36 = vector.load %arg42[%c0_71, %c0_72] : memref<32x96xf32, #tpu.memory_space<vmem>>, vector<32x96xf32>
    %c0_73 = arith.constant 0 : index
    %c0_74 = arith.constant 0 : index
    %37 = vector.load %arg43[%c0_73, %c0_74] : memref<1x96xf32, #tpu.memory_space<vmem>>, vector<1x96xf32>
    %c0_75 = arith.constant 0 : index
    %c0_76 = arith.constant 0 : index
    %38 = vector.load %arg44[%c0_75, %c0_76] : memref<4x8xf32, #tpu.memory_space<vmem>>, vector<4x8xf32>
    %c0_77 = arith.constant 0 : index
    %c0_78 = arith.constant 0 : index
    %39 = vector.load %arg45[%c0_77, %c0_78] : memref<1x32xf32, #tpu.memory_space<vmem>>, vector<1x32xf32>
    %c0_79 = arith.constant 0 : index
    %c0_80 = arith.constant 0 : index
    %40 = vector.load %arg46[%c0_79, %c0_80] : memref<2x32xf32, #tpu.memory_space<vmem>>, vector<2x32xf32>
    %c0_81 = arith.constant 0 : index
    %c0_82 = arith.constant 0 : index
    %41 = vector.load %arg47[%c0_81, %c0_82] : memref<64x64xf32, #tpu.memory_space<vmem>>, vector<64x64xf32>
    %c0_83 = arith.constant 0 : index
    %c0_84 = arith.constant 0 : index
    %42 = vector.load %arg48[%c0_83, %c0_84] : memref<1x64xf32, #tpu.memory_space<vmem>>, vector<1x64xf32>
    %c0_85 = arith.constant 0 : index
    %c0_86 = arith.constant 0 : index
    %43 = vector.load %arg49[%c0_85, %c0_86] : memref<2x64xf32, #tpu.memory_space<vmem>>, vector<2x64xf32>
    %c0_87 = arith.constant 0 : index
    %c0_88 = arith.constant 0 : index
    %44 = vector.load %arg50[%c0_87, %c0_88] : memref<64x32xf32, #tpu.memory_space<vmem>>, vector<64x32xf32>
    %c0_89 = arith.constant 0 : index
    %c0_90 = arith.constant 0 : index
    %45 = vector.load %arg51[%c0_89, %c0_90] : memref<1x32xf32, #tpu.memory_space<vmem>>, vector<1x32xf32>
    %c0_91 = arith.constant 0 : index
    %c0_92 = arith.constant 0 : index
    %46 = vector.load %arg52[%c0_91, %c0_92] : memref<2x32xf32, #tpu.memory_space<vmem>>, vector<2x32xf32>
    %c0_93 = arith.constant 0 : index
    %c0_94 = arith.constant 0 : index
    %47 = vector.load %arg53[%c0_93, %c0_94] : memref<32x5xf32, #tpu.memory_space<vmem>>, vector<32x5xf32>
    %c0_95 = arith.constant 0 : index
    %c0_96 = arith.constant 0 : index
    %48 = vector.load %arg54[%c0_95, %c0_96] : memref<1x5xf32, #tpu.memory_space<vmem>>, vector<1x5xf32>
    %c0_97 = arith.constant 0 : index
    %c0_98 = arith.constant 0 : index
    %49 = vector.load %arg55[%c0_97, %c0_98] : memref<2x5xf32, #tpu.memory_space<vmem>>, vector<2x5xf32>
    %c0_99 = arith.constant 0 : index
    %c0_100 = arith.constant 0 : index
    %50 = vector.load %arg0[%c0_99, %c0_100] : memref<16x16xf32, #tpu.memory_space<vmem>>, vector<16x16xf32>
    %c0_101 = arith.constant 0 : index
    %c0_102 = arith.constant 0 : index
    %51 = vector.load %arg1[%c0_101, %c0_102] : memref<16x16xf32, #tpu.memory_space<vmem>>, vector<16x16xf32>
    %c0_103 = arith.constant 0 : index
    %c0_104 = arith.constant 0 : index
    %52 = vector.load %arg2[%c0_103, %c0_104] : memref<16x16xf32, #tpu.memory_space<vmem>>, vector<16x16xf32>
    %c0_105 = arith.constant 0 : index
    %c0_106 = arith.constant 0 : index
    %53 = vector.load %arg3[%c0_105, %c0_106] : memref<4x32xf32, #tpu.memory_space<vmem>>, vector<4x32xf32>
    %c0_107 = arith.constant 0 : index
    %c0_108 = arith.constant 0 : index
    %54 = vector.load %arg4[%c0_107, %c0_108] : memref<8x16xf32, #tpu.memory_space<vmem>>, vector<8x16xf32>
    %55 = vector.extract_strided_slice %0 {offsets = [0, 0], sizes = [1, 16], strides = [1, 1]} : vector<2x16xf32> to vector<1x16xf32>
    %56 = vector.broadcast %55 : vector<1x16xf32> to vector<8x16xf32>
    %57 = arith.mulf %54, %56 : vector<8x16xf32>
    %58 = vector.extract_strided_slice %0 {offsets = [1, 0], sizes = [1, 16], strides = [1, 1]} : vector<2x16xf32> to vector<1x16xf32>
    %59 = vector.broadcast %58 : vector<1x16xf32> to vector<8x16xf32>
    %60 = arith.addf %57, %59 : vector<8x16xf32>
    %cst = arith.constant dense<0.000000e+00> : vector<8x32xf32>
    %61 = tpu.matmul %60, %1, %cst {dimension_numbers = #tpu.dot_dimension_numbers<[1], [0], [0], [1], [0, 0, 1, 1], [], []>} : vector<8x16xf32>, vector<16x32xf32>, vector<8x32xf32> -> vector<8x32xf32>
    %62 = vector.broadcast %2 : vector<1x32xf32> to vector<8x32xf32>
    %63 = arith.addf %61, %62 : vector<8x32xf32>
    %cst_109 = arith.constant 5.000000e-01 : f32
    %64 = vector.broadcast %cst_109 : f32 to vector<8x32xf32>
    %65 = arith.mulf %64, %63 : vector<8x32xf32>
    %cst_110 = arith.constant 4.471500e-02 : f32
    %66 = vector.broadcast %cst_110 : f32 to vector<8x32xf32>
    %67 = arith.mulf %66, %63 : vector<8x32xf32>
    %68 = arith.mulf %67, %63 : vector<8x32xf32>
    %69 = arith.mulf %68, %63 : vector<8x32xf32>
    %70 = arith.addf %63, %69 : vector<8x32xf32>
    %cst_111 = arith.constant 0.797884583 : f32
    %71 = vector.broadcast %cst_111 : f32 to vector<8x32xf32>
    %72 = arith.mulf %71, %70 : vector<8x32xf32>
    %73 = math.tanh %72 : vector<8x32xf32>
    %cst_112 = arith.constant 1.000000e+00 : f32
    %74 = vector.broadcast %cst_112 : f32 to vector<8x32xf32>
    %75 = arith.addf %74, %73 : vector<8x32xf32>
    %76 = arith.mulf %65, %75 : vector<8x32xf32>
    %cst_113 = arith.constant dense<0.000000e+00> : vector<8x32xf32>
    %77 = tpu.matmul %76, %3, %cst_113 {dimension_numbers = #tpu.dot_dimension_numbers<[1], [0], [0], [1], [0, 0, 1, 1], [], []>} : vector<8x32xf32>, vector<32x32xf32>, vector<8x32xf32> -> vector<8x32xf32>
    %78 = vector.broadcast %4 : vector<1x32xf32> to vector<8x32xf32>
    %79 = arith.addf %77, %78 : vector<8x32xf32>
    %80 = vector.extract_strided_slice %7 {offsets = [0, 0], sizes = [1, 32], strides = [1, 1]} : vector<2x32xf32> to vector<1x32xf32>
    %81 = vector.broadcast %80 : vector<1x32xf32> to vector<8x32xf32>
    %82 = arith.mulf %79, %81 : vector<8x32xf32>
    %83 = vector.extract_strided_slice %7 {offsets = [1, 0], sizes = [1, 32], strides = [1, 1]} : vector<2x32xf32> to vector<1x32xf32>
    %84 = vector.broadcast %83 : vector<1x32xf32> to vector<8x32xf32>
    %85 = arith.addf %82, %84 : vector<8x32xf32>
    %86 = arith.addf %85, %63 : vector<8x32xf32>
    %cst_114 = arith.constant 5.000000e-01 : f32
    %87 = vector.broadcast %cst_114 : f32 to vector<8x32xf32>
    %88 = arith.mulf %87, %86 : vector<8x32xf32>
    %cst_115 = arith.constant 4.471500e-02 : f32
    %89 = vector.broadcast %cst_115 : f32 to vector<8x32xf32>
    %90 = arith.mulf %89, %86 : vector<8x32xf32>
    %91 = arith.mulf %90, %86 : vector<8x32xf32>
    %92 = arith.mulf %91, %86 : vector<8x32xf32>
    %93 = arith.addf %86, %92 : vector<8x32xf32>
    %cst_116 = arith.constant 0.797884583 : f32
    %94 = vector.broadcast %cst_116 : f32 to vector<8x32xf32>
    %95 = arith.mulf %94, %93 : vector<8x32xf32>
    %96 = math.tanh %95 : vector<8x32xf32>
    %cst_117 = arith.constant 1.000000e+00 : f32
    %97 = vector.broadcast %cst_117 : f32 to vector<8x32xf32>
    %98 = arith.addf %97, %96 : vector<8x32xf32>
    %99 = arith.mulf %88, %98 : vector<8x32xf32>
    %cst_118 = arith.constant dense<0.000000e+00> : vector<8x32xf32>
    %100 = tpu.matmul %99, %5, %cst_118 {dimension_numbers = #tpu.dot_dimension_numbers<[1], [0], [0], [1], [0, 0, 1, 1], [], []>} : vector<8x32xf32>, vector<32x32xf32>, vector<8x32xf32> -> vector<8x32xf32>
    %101 = vector.broadcast %6 : vector<1x32xf32> to vector<8x32xf32>
    %102 = arith.addf %100, %101 : vector<8x32xf32>
    %103 = vector.extract_strided_slice %8 {offsets = [0, 0], sizes = [1, 32], strides = [1, 1]} : vector<2x32xf32> to vector<1x32xf32>
    %104 = vector.broadcast %103 : vector<1x32xf32> to vector<8x32xf32>
    %105 = arith.mulf %102, %104 : vector<8x32xf32>
    %106 = vector.extract_strided_slice %8 {offsets = [1, 0], sizes = [1, 32], strides = [1, 1]} : vector<2x32xf32> to vector<1x32xf32>
    %107 = vector.broadcast %106 : vector<1x32xf32> to vector<8x32xf32>
    %108 = arith.addf %105, %107 : vector<8x32xf32>
    %109 = arith.addf %108, %99 : vector<8x32xf32>
    %cst_119 = arith.constant 5.000000e-01 : f32
    %110 = vector.broadcast %cst_119 : f32 to vector<8x32xf32>
    %111 = arith.mulf %110, %109 : vector<8x32xf32>
    %cst_120 = arith.constant 4.471500e-02 : f32
    %112 = vector.broadcast %cst_120 : f32 to vector<8x32xf32>
    %113 = arith.mulf %112, %109 : vector<8x32xf32>
    %114 = arith.mulf %113, %109 : vector<8x32xf32>
    %115 = arith.mulf %114, %109 : vector<8x32xf32>
    %116 = arith.addf %109, %115 : vector<8x32xf32>
    %cst_121 = arith.constant 0.797884583 : f32
    %117 = vector.broadcast %cst_121 : f32 to vector<8x32xf32>
    %118 = arith.mulf %117, %116 : vector<8x32xf32>
    %119 = math.tanh %118 : vector<8x32xf32>
    %cst_122 = arith.constant 1.000000e+00 : f32
    %120 = vector.broadcast %cst_122 : f32 to vector<8x32xf32>
    %121 = arith.addf %120, %119 : vector<8x32xf32>
    %122 = arith.mulf %111, %121 : vector<8x32xf32>
    %cst_123 = arith.constant dense<0.000000e+00> : vector<8x32xf32>
    %123 = tpu.matmul %122, %9, %cst_123 {dimension_numbers = #tpu.dot_dimension_numbers<[1], [0], [0], [1], [0, 0, 1, 1], [], []>} : vector<8x32xf32>, vector<32x32xf32>, vector<8x32xf32> -> vector<8x32xf32>
    %124 = vector.broadcast %10 : vector<1x32xf32> to vector<8x32xf32>
    %125 = arith.addf %123, %124 : vector<8x32xf32>
    %cst_124 = arith.constant dense<0.000000e+00> : vector<8x32xf32>
    %126 = tpu.matmul %125, %11, %cst_124 {dimension_numbers = #tpu.dot_dimension_numbers<[1], [0], [0], [1], [0, 0, 1, 1], [], []>} : vector<8x32xf32>, vector<32x32xf32>, vector<8x32xf32> -> vector<8x32xf32>
    %127 = arith.addf %122, %126 : vector<8x32xf32>
    %128 = vector.broadcast %12 : vector<1x32xf32> to vector<8x32xf32>
    %129 = arith.addf %127, %128 : vector<8x32xf32>
    %c0_125 = arith.constant 0 : index
    %c0_126 = arith.constant 0 : index
    %130 = vector.load %arg5[%c0_125, %c0_126] : memref<8x12xf32, #tpu.memory_space<vmem>>, vector<8x12xf32>
    %131 = vector.extract_strided_slice %13 {offsets = [0, 0], sizes = [1, 12], strides = [1, 1]} : vector<2x12xf32> to vector<1x12xf32>
    %132 = vector.broadcast %131 : vector<1x12xf32> to vector<8x12xf32>
    %133 = arith.mulf %130, %132 : vector<8x12xf32>
    %134 = vector.extract_strided_slice %13 {offsets = [1, 0], sizes = [1, 12], strides = [1, 1]} : vector<2x12xf32> to vector<1x12xf32>
    %135 = vector.broadcast %134 : vector<1x12xf32> to vector<8x12xf32>
    %136 = arith.addf %133, %135 : vector<8x12xf32>
    %cst_127 = arith.constant dense<0.000000e+00> : vector<8x64xf32>
    %137 = tpu.matmul %136, %14, %cst_127 {dimension_numbers = #tpu.dot_dimension_numbers<[1], [0], [0], [1], [0, 0, 1, 1], [], []>} : vector<8x12xf32>, vector<12x64xf32>, vector<8x64xf32> -> vector<8x64xf32>
    %138 = vector.broadcast %15 : vector<1x64xf32> to vector<8x64xf32>
    %139 = arith.addf %137, %138 : vector<8x64xf32>
    %140 = vector.extract_strided_slice %16 {offsets = [0, 0], sizes = [1, 64], strides = [1, 1]} : vector<2x64xf32> to vector<1x64xf32>
    %141 = vector.broadcast %140 : vector<1x64xf32> to vector<8x64xf32>
    %142 = arith.mulf %139, %141 : vector<8x64xf32>
    %143 = vector.extract_strided_slice %16 {offsets = [1, 0], sizes = [1, 64], strides = [1, 1]} : vector<2x64xf32> to vector<1x64xf32>
    %144 = vector.broadcast %143 : vector<1x64xf32> to vector<8x64xf32>
    %145 = arith.addf %142, %144 : vector<8x64xf32>
    %cst_128 = arith.constant 5.000000e-01 : f32
    %146 = vector.broadcast %cst_128 : f32 to vector<8x64xf32>
    %147 = arith.mulf %146, %145 : vector<8x64xf32>
    %cst_129 = arith.constant 4.471500e-02 : f32
    %148 = vector.broadcast %cst_129 : f32 to vector<8x64xf32>
    %149 = arith.mulf %148, %145 : vector<8x64xf32>
    %150 = arith.mulf %149, %145 : vector<8x64xf32>
    %151 = arith.mulf %150, %145 : vector<8x64xf32>
    %152 = arith.addf %145, %151 : vector<8x64xf32>
    %cst_130 = arith.constant 0.797884583 : f32
    %153 = vector.broadcast %cst_130 : f32 to vector<8x64xf32>
    %154 = arith.mulf %153, %152 : vector<8x64xf32>
    %155 = math.tanh %154 : vector<8x64xf32>
    %cst_131 = arith.constant 1.000000e+00 : f32
    %156 = vector.broadcast %cst_131 : f32 to vector<8x64xf32>
    %157 = arith.addf %156, %155 : vector<8x64xf32>
    %158 = arith.mulf %147, %157 : vector<8x64xf32>
    %cst_132 = arith.constant dense<0.000000e+00> : vector<8x32xf32>
    %159 = tpu.matmul %158, %17, %cst_132 {dimension_numbers = #tpu.dot_dimension_numbers<[1], [0], [0], [1], [0, 0, 1, 1], [], []>} : vector<8x64xf32>, vector<64x32xf32>, vector<8x32xf32> -> vector<8x32xf32>
    %160 = vector.broadcast %18 : vector<1x32xf32> to vector<8x32xf32>
    %161 = arith.addf %159, %160 : vector<8x32xf32>
    %cst_133 = arith.constant 5.000000e-01 : f32
    %162 = vector.broadcast %cst_133 : f32 to vector<8x32xf32>
    %163 = arith.mulf %162, %161 : vector<8x32xf32>
    %cst_134 = arith.constant 4.471500e-02 : f32
    %164 = vector.broadcast %cst_134 : f32 to vector<8x32xf32>
    %165 = arith.mulf %164, %161 : vector<8x32xf32>
    %166 = arith.mulf %165, %161 : vector<8x32xf32>
    %167 = arith.mulf %166, %161 : vector<8x32xf32>
    %168 = arith.addf %161, %167 : vector<8x32xf32>
    %cst_135 = arith.constant 0.797884583 : f32
    %169 = vector.broadcast %cst_135 : f32 to vector<8x32xf32>
    %170 = arith.mulf %169, %168 : vector<8x32xf32>
    %171 = math.tanh %170 : vector<8x32xf32>
    %cst_136 = arith.constant 1.000000e+00 : f32
    %172 = vector.broadcast %cst_136 : f32 to vector<8x32xf32>
    %173 = arith.addf %172, %171 : vector<8x32xf32>
    %174 = arith.mulf %163, %173 : vector<8x32xf32>
    %cst_137 = arith.constant dense<0.000000e+00> : vector<8x32xf32>
    %175 = tpu.matmul %174, %19, %cst_137 {dimension_numbers = #tpu.dot_dimension_numbers<[1], [0], [0], [1], [0, 0, 1, 1], [], []>} : vector<8x32xf32>, vector<32x32xf32>, vector<8x32xf32> -> vector<8x32xf32>
    %176 = vector.broadcast %20 : vector<1x32xf32> to vector<8x32xf32>
    %177 = arith.addf %175, %176 : vector<8x32xf32>
    %178 = vector.extract_strided_slice %21 {offsets = [0, 0], sizes = [1, 32], strides = [1, 1]} : vector<2x32xf32> to vector<1x32xf32>
    %179 = vector.broadcast %178 : vector<1x32xf32> to vector<8x32xf32>
    %180 = arith.mulf %177, %179 : vector<8x32xf32>
    %181 = vector.extract_strided_slice %21 {offsets = [1, 0], sizes = [1, 32], strides = [1, 1]} : vector<2x32xf32> to vector<1x32xf32>
    %182 = vector.broadcast %181 : vector<1x32xf32> to vector<8x32xf32>
    %183 = arith.addf %180, %182 : vector<8x32xf32>
    %184 = arith.addf %183, %161 : vector<8x32xf32>
    %cst_138 = arith.constant 5.000000e-01 : f32
    %185 = vector.broadcast %cst_138 : f32 to vector<8x32xf32>
    %186 = arith.mulf %185, %184 : vector<8x32xf32>
    %cst_139 = arith.constant 4.471500e-02 : f32
    %187 = vector.broadcast %cst_139 : f32 to vector<8x32xf32>
    %188 = arith.mulf %187, %184 : vector<8x32xf32>
    %189 = arith.mulf %188, %184 : vector<8x32xf32>
    %190 = arith.mulf %189, %184 : vector<8x32xf32>
    %191 = arith.addf %184, %190 : vector<8x32xf32>
    %cst_140 = arith.constant 0.797884583 : f32
    %192 = vector.broadcast %cst_140 : f32 to vector<8x32xf32>
    %193 = arith.mulf %192, %191 : vector<8x32xf32>
    %194 = math.tanh %193 : vector<8x32xf32>
    %cst_141 = arith.constant 1.000000e+00 : f32
    %195 = vector.broadcast %cst_141 : f32 to vector<8x32xf32>
    %196 = arith.addf %195, %194 : vector<8x32xf32>
    %197 = arith.mulf %186, %196 : vector<8x32xf32>
    %198 = tpu.concatenate %129, %197 in 0 : vector<8x32xf32>, vector<8x32xf32> -> vector<16x32xf32>
    %cst_142 = arith.constant dense<0.000000e+00> : vector<16x32xf32>
    %199 = tpu.matmul %50, %198, %cst_142 {dimension_numbers = #tpu.dot_dimension_numbers<[1], [0], [0], [1], [0, 0, 1, 1], [], []>} : vector<16x16xf32>, vector<16x32xf32>, vector<16x32xf32> -> vector<16x32xf32>
    %cst_143 = arith.constant dense<0.000000e+00> : vector<16x96xf32>
    %200 = tpu.matmul %198, %24, %cst_143 {dimension_numbers = #tpu.dot_dimension_numbers<[1], [0], [0], [1], [0, 0, 1, 1], [], []>} : vector<16x32xf32>, vector<32x96xf32>, vector<16x96xf32> -> vector<16x96xf32>
    %201 = vector.broadcast %25 : vector<1x96xf32> to vector<16x96xf32>
    %202 = arith.addf %200, %201 : vector<16x96xf32>
    %203 = vector.extract_strided_slice %202 {offsets = [0, 0], sizes = [16, 32], strides = [1, 1]} : vector<16x96xf32> to vector<16x32xf32>
    %cst_144 = arith.constant dense<0.000000e+00> : vector<16x32xf32>
    %204 = tpu.matmul %199, %22, %cst_144 {dimension_numbers = #tpu.dot_dimension_numbers<[1], [0], [0], [1], [0, 0, 1, 1], [], []>} : vector<16x32xf32>, vector<32x32xf32>, vector<16x32xf32> -> vector<16x32xf32>
    %205 = vector.broadcast %23 : vector<1x32xf32> to vector<16x32xf32>
    %206 = arith.addf %204, %205 : vector<16x32xf32>
    %207 = arith.addf %206, %203 : vector<16x32xf32>
    %208 = vector.extract_strided_slice %202 {offsets = [0, 32], sizes = [16, 32], strides = [1, 1]} : vector<16x96xf32> to vector<16x32xf32>
    %209 = vector.extract_strided_slice %202 {offsets = [0, 64], sizes = [16, 32], strides = [1, 1]} : vector<16x96xf32> to vector<16x32xf32>
    %210 = vector.extract_strided_slice %209 {offsets = [0, 0], sizes = [16, 8], strides = [1, 1]} : vector<16x32xf32> to vector<16x8xf32>
    %211 = vector.shape_cast %210 : vector<16x8xf32> to vector<16x1x8xf32>
    %212 = vector.extract_strided_slice %208 {offsets = [0, 0], sizes = [16, 8], strides = [1, 1]} : vector<16x32xf32> to vector<16x8xf32>
    %213 = vector.shape_cast %212 : vector<16x8xf32> to vector<1x16x8xf32>
    %214 = vector.broadcast %211 : vector<16x1x8xf32> to vector<16x16x8xf32>
    %215 = vector.broadcast %213 : vector<1x16x8xf32> to vector<16x16x8xf32>
    %216 = arith.addf %214, %215 : vector<16x16x8xf32>
    %cst_145 = arith.constant 0.000000e+00 : f32
    %217 = vector.broadcast %cst_145 : f32 to vector<16x16x8xf32>
    %218 = arith.cmpf ogt, %216, %217 : vector<16x16x8xf32>
    %cst_146 = arith.constant 2.000000e-01 : f32
    %219 = vector.broadcast %cst_146 : f32 to vector<16x16x8xf32>
    %220 = arith.mulf %219, %216 : vector<16x16x8xf32>
    %221 = arith.select %218, %216, %220 : vector<16x16x8xi1>, vector<16x16x8xf32>
    %222 = vector.extract_strided_slice %26 {offsets = [0, 0], sizes = [1, 8], strides = [1, 1]} : vector<4x8xf32> to vector<1x8xf32>
    %223 = vector.shape_cast %222 : vector<1x8xf32> to vector<1x1x8xf32>
    %224 = vector.broadcast %223 : vector<1x1x8xf32> to vector<16x16x8xf32>
    %225 = arith.mulf %221, %224 : vector<16x16x8xf32>
    %cst_147 = arith.constant dense<0.000000e+00> : vector<16x16xf32>
    %226 = vector.multi_reduction <add>, %225, %cst_147 [2] : vector<16x16x8xf32> to vector<16x16xf32>
    %cst_148 = arith.constant 0.000000e+00 : f32
    %227 = vector.broadcast %cst_148 : f32 to vector<16x16xf32>
    %228 = arith.cmpf ogt, %52, %227 : vector<16x16xf32>
    %cst_149 = arith.constant -1.000000e+09 : f32
    %229 = vector.broadcast %cst_149 : f32 to vector<16x16xf32>
    %230 = arith.select %228, %226, %229 : vector<16x16xi1>, vector<16x16xf32>
    %cst_150 = arith.constant dense<0xFF800000> : vector<16xf32>
    %231 = vector.multi_reduction <maximumf>, %230, %cst_150 [1] : vector<16x16xf32> to vector<16xf32>
    %232 = vector.shape_cast %231 : vector<16xf32> to vector<16x1xf32>
    %233 = vector.broadcast %232 : vector<16x1xf32> to vector<16x16xf32>
    %234 = arith.subf %230, %233 : vector<16x16xf32>
    %235 = math.exp %234 : vector<16x16xf32>
    %236 = arith.mulf %235, %52 : vector<16x16xf32>
    %cst_151 = arith.constant dense<0.000000e+00> : vector<16xf32>
    %237 = vector.multi_reduction <add>, %236, %cst_151 [1] : vector<16x16xf32> to vector<16xf32>
    %238 = vector.shape_cast %237 : vector<16xf32> to vector<16x1xf32>
    %cst_152 = arith.constant 9.99999997E-7 : f32
    %239 = vector.broadcast %cst_152 : f32 to vector<16x1xf32>
    %240 = arith.maximumf %238, %239 : vector<16x1xf32>
    %241 = tpu.reciprocal %240 {approx = true} : vector<16x1xf32> -> vector<16x1xf32>
    %242 = vector.broadcast %241 : vector<16x1xf32> to vector<16x16xf32>
    %243 = arith.mulf %236, %242 : vector<16x16xf32>
    %cst_153 = arith.constant dense<0.000000e+00> : vector<16x32xf32>
    %244 = tpu.matmul %243, %208, %cst_153 {dimension_numbers = #tpu.dot_dimension_numbers<[1], [0], [0], [1], [0, 0, 1, 1], [], []>} : vector<16x16xf32>, vector<16x32xf32>, vector<16x32xf32> -> vector<16x32xf32>
    %245 = vector.extract_strided_slice %53 {offsets = [0, 0], sizes = [1, 32], strides = [1, 1]} : vector<4x32xf32> to vector<1x32xf32>
    %246 = vector.broadcast %245 : vector<1x32xf32> to vector<16x32xf32>
    %247 = arith.mulf %244, %246 : vector<16x32xf32>
    %248 = vector.extract_strided_slice %209 {offsets = [0, 8], sizes = [16, 8], strides = [1, 1]} : vector<16x32xf32> to vector<16x8xf32>
    %249 = vector.shape_cast %248 : vector<16x8xf32> to vector<16x1x8xf32>
    %250 = vector.extract_strided_slice %208 {offsets = [0, 8], sizes = [16, 8], strides = [1, 1]} : vector<16x32xf32> to vector<16x8xf32>
    %251 = vector.shape_cast %250 : vector<16x8xf32> to vector<1x16x8xf32>
    %252 = vector.broadcast %249 : vector<16x1x8xf32> to vector<16x16x8xf32>
    %253 = vector.broadcast %251 : vector<1x16x8xf32> to vector<16x16x8xf32>
    %254 = arith.addf %252, %253 : vector<16x16x8xf32>
    %cst_154 = arith.constant 0.000000e+00 : f32
    %255 = vector.broadcast %cst_154 : f32 to vector<16x16x8xf32>
    %256 = arith.cmpf ogt, %254, %255 : vector<16x16x8xf32>
    %cst_155 = arith.constant 2.000000e-01 : f32
    %257 = vector.broadcast %cst_155 : f32 to vector<16x16x8xf32>
    %258 = arith.mulf %257, %254 : vector<16x16x8xf32>
    %259 = arith.select %256, %254, %258 : vector<16x16x8xi1>, vector<16x16x8xf32>
    %260 = vector.extract_strided_slice %26 {offsets = [1, 0], sizes = [1, 8], strides = [1, 1]} : vector<4x8xf32> to vector<1x8xf32>
    %261 = vector.shape_cast %260 : vector<1x8xf32> to vector<1x1x8xf32>
    %262 = vector.broadcast %261 : vector<1x1x8xf32> to vector<16x16x8xf32>
    %263 = arith.mulf %259, %262 : vector<16x16x8xf32>
    %cst_156 = arith.constant dense<0.000000e+00> : vector<16x16xf32>
    %264 = vector.multi_reduction <add>, %263, %cst_156 [2] : vector<16x16x8xf32> to vector<16x16xf32>
    %cst_157 = arith.constant 0.000000e+00 : f32
    %265 = vector.broadcast %cst_157 : f32 to vector<16x16xf32>
    %266 = arith.cmpf ogt, %52, %265 : vector<16x16xf32>
    %cst_158 = arith.constant -1.000000e+09 : f32
    %267 = vector.broadcast %cst_158 : f32 to vector<16x16xf32>
    %268 = arith.select %266, %264, %267 : vector<16x16xi1>, vector<16x16xf32>
    %cst_159 = arith.constant dense<0xFF800000> : vector<16xf32>
    %269 = vector.multi_reduction <maximumf>, %268, %cst_159 [1] : vector<16x16xf32> to vector<16xf32>
    %270 = vector.shape_cast %269 : vector<16xf32> to vector<16x1xf32>
    %271 = vector.broadcast %270 : vector<16x1xf32> to vector<16x16xf32>
    %272 = arith.subf %268, %271 : vector<16x16xf32>
    %273 = math.exp %272 : vector<16x16xf32>
    %274 = arith.mulf %273, %52 : vector<16x16xf32>
    %cst_160 = arith.constant dense<0.000000e+00> : vector<16xf32>
    %275 = vector.multi_reduction <add>, %274, %cst_160 [1] : vector<16x16xf32> to vector<16xf32>
    %276 = vector.shape_cast %275 : vector<16xf32> to vector<16x1xf32>
    %cst_161 = arith.constant 9.99999997E-7 : f32
    %277 = vector.broadcast %cst_161 : f32 to vector<16x1xf32>
    %278 = arith.maximumf %276, %277 : vector<16x1xf32>
    %279 = tpu.reciprocal %278 {approx = true} : vector<16x1xf32> -> vector<16x1xf32>
    %280 = vector.broadcast %279 : vector<16x1xf32> to vector<16x16xf32>
    %281 = arith.mulf %274, %280 : vector<16x16xf32>
    %cst_162 = arith.constant dense<0.000000e+00> : vector<16x32xf32>
    %282 = tpu.matmul %281, %208, %cst_162 {dimension_numbers = #tpu.dot_dimension_numbers<[1], [0], [0], [1], [0, 0, 1, 1], [], []>} : vector<16x16xf32>, vector<16x32xf32>, vector<16x32xf32> -> vector<16x32xf32>
    %283 = vector.extract_strided_slice %53 {offsets = [1, 0], sizes = [1, 32], strides = [1, 1]} : vector<4x32xf32> to vector<1x32xf32>
    %284 = vector.broadcast %283 : vector<1x32xf32> to vector<16x32xf32>
    %285 = arith.mulf %282, %284 : vector<16x32xf32>
    %286 = arith.addf %247, %285 : vector<16x32xf32>
    %287 = vector.extract_strided_slice %209 {offsets = [0, 16], sizes = [16, 8], strides = [1, 1]} : vector<16x32xf32> to vector<16x8xf32>
    %288 = vector.shape_cast %287 : vector<16x8xf32> to vector<16x1x8xf32>
    %289 = vector.extract_strided_slice %208 {offsets = [0, 16], sizes = [16, 8], strides = [1, 1]} : vector<16x32xf32> to vector<16x8xf32>
    %290 = vector.shape_cast %289 : vector<16x8xf32> to vector<1x16x8xf32>
    %291 = vector.broadcast %288 : vector<16x1x8xf32> to vector<16x16x8xf32>
    %292 = vector.broadcast %290 : vector<1x16x8xf32> to vector<16x16x8xf32>
    %293 = arith.addf %291, %292 : vector<16x16x8xf32>
    %cst_163 = arith.constant 0.000000e+00 : f32
    %294 = vector.broadcast %cst_163 : f32 to vector<16x16x8xf32>
    %295 = arith.cmpf ogt, %293, %294 : vector<16x16x8xf32>
    %cst_164 = arith.constant 2.000000e-01 : f32
    %296 = vector.broadcast %cst_164 : f32 to vector<16x16x8xf32>
    %297 = arith.mulf %296, %293 : vector<16x16x8xf32>
    %298 = arith.select %295, %293, %297 : vector<16x16x8xi1>, vector<16x16x8xf32>
    %299 = vector.extract_strided_slice %26 {offsets = [2, 0], sizes = [1, 8], strides = [1, 1]} : vector<4x8xf32> to vector<1x8xf32>
    %300 = vector.shape_cast %299 : vector<1x8xf32> to vector<1x1x8xf32>
    %301 = vector.broadcast %300 : vector<1x1x8xf32> to vector<16x16x8xf32>
    %302 = arith.mulf %298, %301 : vector<16x16x8xf32>
    %cst_165 = arith.constant dense<0.000000e+00> : vector<16x16xf32>
    %303 = vector.multi_reduction <add>, %302, %cst_165 [2] : vector<16x16x8xf32> to vector<16x16xf32>
    %cst_166 = arith.constant 0.000000e+00 : f32
    %304 = vector.broadcast %cst_166 : f32 to vector<16x16xf32>
    %305 = arith.cmpf ogt, %52, %304 : vector<16x16xf32>
    %cst_167 = arith.constant -1.000000e+09 : f32
    %306 = vector.broadcast %cst_167 : f32 to vector<16x16xf32>
    %307 = arith.select %305, %303, %306 : vector<16x16xi1>, vector<16x16xf32>
    %cst_168 = arith.constant dense<0xFF800000> : vector<16xf32>
    %308 = vector.multi_reduction <maximumf>, %307, %cst_168 [1] : vector<16x16xf32> to vector<16xf32>
    %309 = vector.shape_cast %308 : vector<16xf32> to vector<16x1xf32>
    %310 = vector.broadcast %309 : vector<16x1xf32> to vector<16x16xf32>
    %311 = arith.subf %307, %310 : vector<16x16xf32>
    %312 = math.exp %311 : vector<16x16xf32>
    %313 = arith.mulf %312, %52 : vector<16x16xf32>
    %cst_169 = arith.constant dense<0.000000e+00> : vector<16xf32>
    %314 = vector.multi_reduction <add>, %313, %cst_169 [1] : vector<16x16xf32> to vector<16xf32>
    %315 = vector.shape_cast %314 : vector<16xf32> to vector<16x1xf32>
    %cst_170 = arith.constant 9.99999997E-7 : f32
    %316 = vector.broadcast %cst_170 : f32 to vector<16x1xf32>
    %317 = arith.maximumf %315, %316 : vector<16x1xf32>
    %318 = tpu.reciprocal %317 {approx = true} : vector<16x1xf32> -> vector<16x1xf32>
    %319 = vector.broadcast %318 : vector<16x1xf32> to vector<16x16xf32>
    %320 = arith.mulf %313, %319 : vector<16x16xf32>
    %cst_171 = arith.constant dense<0.000000e+00> : vector<16x32xf32>
    %321 = tpu.matmul %320, %208, %cst_171 {dimension_numbers = #tpu.dot_dimension_numbers<[1], [0], [0], [1], [0, 0, 1, 1], [], []>} : vector<16x16xf32>, vector<16x32xf32>, vector<16x32xf32> -> vector<16x32xf32>
    %322 = vector.extract_strided_slice %53 {offsets = [2, 0], sizes = [1, 32], strides = [1, 1]} : vector<4x32xf32> to vector<1x32xf32>
    %323 = vector.broadcast %322 : vector<1x32xf32> to vector<16x32xf32>
    %324 = arith.mulf %321, %323 : vector<16x32xf32>
    %325 = arith.addf %286, %324 : vector<16x32xf32>
    %326 = vector.extract_strided_slice %209 {offsets = [0, 24], sizes = [16, 8], strides = [1, 1]} : vector<16x32xf32> to vector<16x8xf32>
    %327 = vector.shape_cast %326 : vector<16x8xf32> to vector<16x1x8xf32>
    %328 = vector.extract_strided_slice %208 {offsets = [0, 24], sizes = [16, 8], strides = [1, 1]} : vector<16x32xf32> to vector<16x8xf32>
    %329 = vector.shape_cast %328 : vector<16x8xf32> to vector<1x16x8xf32>
    %330 = vector.broadcast %327 : vector<16x1x8xf32> to vector<16x16x8xf32>
    %331 = vector.broadcast %329 : vector<1x16x8xf32> to vector<16x16x8xf32>
    %332 = arith.addf %330, %331 : vector<16x16x8xf32>
    %cst_172 = arith.constant 0.000000e+00 : f32
    %333 = vector.broadcast %cst_172 : f32 to vector<16x16x8xf32>
    %334 = arith.cmpf ogt, %332, %333 : vector<16x16x8xf32>
    %cst_173 = arith.constant 2.000000e-01 : f32
    %335 = vector.broadcast %cst_173 : f32 to vector<16x16x8xf32>
    %336 = arith.mulf %335, %332 : vector<16x16x8xf32>
    %337 = arith.select %334, %332, %336 : vector<16x16x8xi1>, vector<16x16x8xf32>
    %338 = vector.extract_strided_slice %26 {offsets = [3, 0], sizes = [1, 8], strides = [1, 1]} : vector<4x8xf32> to vector<1x8xf32>
    %339 = vector.shape_cast %338 : vector<1x8xf32> to vector<1x1x8xf32>
    %340 = vector.broadcast %339 : vector<1x1x8xf32> to vector<16x16x8xf32>
    %341 = arith.mulf %337, %340 : vector<16x16x8xf32>
    %cst_174 = arith.constant dense<0.000000e+00> : vector<16x16xf32>
    %342 = vector.multi_reduction <add>, %341, %cst_174 [2] : vector<16x16x8xf32> to vector<16x16xf32>
    %cst_175 = arith.constant 0.000000e+00 : f32
    %343 = vector.broadcast %cst_175 : f32 to vector<16x16xf32>
    %344 = arith.cmpf ogt, %52, %343 : vector<16x16xf32>
    %cst_176 = arith.constant -1.000000e+09 : f32
    %345 = vector.broadcast %cst_176 : f32 to vector<16x16xf32>
    %346 = arith.select %344, %342, %345 : vector<16x16xi1>, vector<16x16xf32>
    %cst_177 = arith.constant dense<0xFF800000> : vector<16xf32>
    %347 = vector.multi_reduction <maximumf>, %346, %cst_177 [1] : vector<16x16xf32> to vector<16xf32>
    %348 = vector.shape_cast %347 : vector<16xf32> to vector<16x1xf32>
    %349 = vector.broadcast %348 : vector<16x1xf32> to vector<16x16xf32>
    %350 = arith.subf %346, %349 : vector<16x16xf32>
    %351 = math.exp %350 : vector<16x16xf32>
    %352 = arith.mulf %351, %52 : vector<16x16xf32>
    %cst_178 = arith.constant dense<0.000000e+00> : vector<16xf32>
    %353 = vector.multi_reduction <add>, %352, %cst_178 [1] : vector<16x16xf32> to vector<16xf32>
    %354 = vector.shape_cast %353 : vector<16xf32> to vector<16x1xf32>
    %cst_179 = arith.constant 9.99999997E-7 : f32
    %355 = vector.broadcast %cst_179 : f32 to vector<16x1xf32>
    %356 = arith.maximumf %354, %355 : vector<16x1xf32>
    %357 = tpu.reciprocal %356 {approx = true} : vector<16x1xf32> -> vector<16x1xf32>
    %358 = vector.broadcast %357 : vector<16x1xf32> to vector<16x16xf32>
    %359 = arith.mulf %352, %358 : vector<16x16xf32>
    %cst_180 = arith.constant dense<0.000000e+00> : vector<16x32xf32>
    %360 = tpu.matmul %359, %208, %cst_180 {dimension_numbers = #tpu.dot_dimension_numbers<[1], [0], [0], [1], [0, 0, 1, 1], [], []>} : vector<16x16xf32>, vector<16x32xf32>, vector<16x32xf32> -> vector<16x32xf32>
    %361 = vector.extract_strided_slice %53 {offsets = [3, 0], sizes = [1, 32], strides = [1, 1]} : vector<4x32xf32> to vector<1x32xf32>
    %362 = vector.broadcast %361 : vector<1x32xf32> to vector<16x32xf32>
    %363 = arith.mulf %360, %362 : vector<16x32xf32>
    %364 = arith.addf %325, %363 : vector<16x32xf32>
    %365 = vector.broadcast %27 : vector<1x32xf32> to vector<16x32xf32>
    %366 = arith.addf %364, %365 : vector<16x32xf32>
    %cst_181 = arith.constant 6.000000e-01 : f32
    %367 = vector.broadcast %cst_181 : f32 to vector<16x32xf32>
    %368 = arith.mulf %367, %207 : vector<16x32xf32>
    %cst_182 = arith.constant 4.000000e-01 : f32
    %369 = vector.broadcast %cst_182 : f32 to vector<16x32xf32>
    %370 = arith.mulf %369, %366 : vector<16x32xf32>
    %371 = arith.addf %368, %370 : vector<16x32xf32>
    %cst_183 = arith.constant dense<0.000000e+00> : vector<16xf32>
    %372 = vector.multi_reduction <add>, %371, %cst_183 [1] : vector<16x32xf32> to vector<16xf32>
    %373 = vector.shape_cast %372 : vector<16xf32> to vector<16x1xf32>
    %cst_184 = arith.constant 3.200000e+01 : f32
    %374 = vector.broadcast %cst_184 : f32 to vector<16x1xf32>
    %375 = arith.divf %373, %374 : vector<16x1xf32>
    %376 = vector.broadcast %375 : vector<16x1xf32> to vector<16x32xf32>
    %377 = arith.subf %371, %376 : vector<16x32xf32>
    %378 = arith.mulf %377, %377 : vector<16x32xf32>
    %cst_185 = arith.constant dense<0.000000e+00> : vector<16xf32>
    %379 = vector.multi_reduction <add>, %378, %cst_185 [1] : vector<16x32xf32> to vector<16xf32>
    %380 = vector.shape_cast %379 : vector<16xf32> to vector<16x1xf32>
    %cst_186 = arith.constant 3.200000e+01 : f32
    %381 = vector.broadcast %cst_186 : f32 to vector<16x1xf32>
    %382 = arith.divf %380, %381 : vector<16x1xf32>
    %383 = vector.broadcast %375 : vector<16x1xf32> to vector<16x32xf32>
    %384 = arith.subf %371, %383 : vector<16x32xf32>
    %cst_187 = arith.constant 9.99999974E-6 : f32
    %385 = vector.broadcast %cst_187 : f32 to vector<16x1xf32>
    %386 = arith.addf %382, %385 : vector<16x1xf32>
    %387 = math.rsqrt %386 : vector<16x1xf32>
    %388 = vector.broadcast %387 : vector<16x1xf32> to vector<16x32xf32>
    %389 = arith.mulf %384, %388 : vector<16x32xf32>
    %390 = vector.extract_strided_slice %28 {offsets = [0, 0], sizes = [1, 32], strides = [1, 1]} : vector<2x32xf32> to vector<1x32xf32>
    %391 = vector.broadcast %390 : vector<1x32xf32> to vector<16x32xf32>
    %392 = arith.mulf %389, %391 : vector<16x32xf32>
    %393 = vector.extract_strided_slice %28 {offsets = [1, 0], sizes = [1, 32], strides = [1, 1]} : vector<2x32xf32> to vector<1x32xf32>
    %394 = vector.broadcast %393 : vector<1x32xf32> to vector<16x32xf32>
    %395 = arith.addf %392, %394 : vector<16x32xf32>
    %cst_188 = arith.constant 5.000000e-01 : f32
    %396 = vector.broadcast %cst_188 : f32 to vector<16x32xf32>
    %397 = arith.mulf %396, %395 : vector<16x32xf32>
    %cst_189 = arith.constant 4.471500e-02 : f32
    %398 = vector.broadcast %cst_189 : f32 to vector<16x32xf32>
    %399 = arith.mulf %398, %395 : vector<16x32xf32>
    %400 = arith.mulf %399, %395 : vector<16x32xf32>
    %401 = arith.mulf %400, %395 : vector<16x32xf32>
    %402 = arith.addf %395, %401 : vector<16x32xf32>
    %cst_190 = arith.constant 0.797884583 : f32
    %403 = vector.broadcast %cst_190 : f32 to vector<16x32xf32>
    %404 = arith.mulf %403, %402 : vector<16x32xf32>
    %405 = math.tanh %404 : vector<16x32xf32>
    %cst_191 = arith.constant 1.000000e+00 : f32
    %406 = vector.broadcast %cst_191 : f32 to vector<16x32xf32>
    %407 = arith.addf %406, %405 : vector<16x32xf32>
    %408 = arith.mulf %397, %407 : vector<16x32xf32>
    %cst_192 = arith.constant 8.000000e-01 : f32
    %409 = vector.broadcast %cst_192 : f32 to vector<16x32xf32>
    %410 = arith.mulf %409, %198 : vector<16x32xf32>
    %411 = arith.addf %408, %410 : vector<16x32xf32>
    %cst_193 = arith.constant dense<0.000000e+00> : vector<16x32xf32>
    %412 = tpu.matmul %50, %411, %cst_193 {dimension_numbers = #tpu.dot_dimension_numbers<[1], [0], [0], [1], [0, 0, 1, 1], [], []>} : vector<16x16xf32>, vector<16x32xf32>, vector<16x32xf32> -> vector<16x32xf32>
    %cst_194 = arith.constant dense<0.000000e+00> : vector<16x160xf32>
    %413 = tpu.matmul %411, %31, %cst_194 {dimension_numbers = #tpu.dot_dimension_numbers<[1], [0], [0], [1], [0, 0, 1, 1], [], []>} : vector<16x32xf32>, vector<32x160xf32>, vector<16x160xf32> -> vector<16x160xf32>
    %414 = vector.broadcast %32 : vector<1x160xf32> to vector<16x160xf32>
    %415 = arith.addf %413, %414 : vector<16x160xf32>
    %416 = vector.extract_strided_slice %415 {offsets = [0, 0], sizes = [16, 32], strides = [1, 1]} : vector<16x160xf32> to vector<16x32xf32>
    %cst_195 = arith.constant dense<0.000000e+00> : vector<16x32xf32>
    %417 = tpu.matmul %412, %29, %cst_195 {dimension_numbers = #tpu.dot_dimension_numbers<[1], [0], [0], [1], [0, 0, 1, 1], [], []>} : vector<16x32xf32>, vector<32x32xf32>, vector<16x32xf32> -> vector<16x32xf32>
    %418 = vector.broadcast %30 : vector<1x32xf32> to vector<16x32xf32>
    %419 = arith.addf %417, %418 : vector<16x32xf32>
    %420 = arith.addf %419, %416 : vector<16x32xf32>
    %421 = vector.extract_strided_slice %415 {offsets = [0, 32], sizes = [16, 32], strides = [1, 1]} : vector<16x160xf32> to vector<16x32xf32>
    %422 = vector.extract_strided_slice %415 {offsets = [0, 64], sizes = [16, 32], strides = [1, 1]} : vector<16x160xf32> to vector<16x32xf32>
    %423 = vector.extract_strided_slice %415 {offsets = [0, 96], sizes = [16, 32], strides = [1, 1]} : vector<16x160xf32> to vector<16x32xf32>
    %424 = vector.extract_strided_slice %415 {offsets = [0, 128], sizes = [16, 32], strides = [1, 1]} : vector<16x160xf32> to vector<16x32xf32>
    %425 = vector.extract_strided_slice %421 {offsets = [0, 0], sizes = [16, 8], strides = [1, 1]} : vector<16x32xf32> to vector<16x8xf32>
    %426 = vector.extract_strided_slice %422 {offsets = [0, 0], sizes = [16, 8], strides = [1, 1]} : vector<16x32xf32> to vector<16x8xf32>
    %cst_196 = arith.constant dense<0.000000e+00> : vector<16x16xf32>
    %427 = tpu.matmul %425, %426, %cst_196 {dimension_numbers = #tpu.dot_dimension_numbers<[1], [1], [0], [0], [0, 0, 1, 0], [], []>} : vector<16x8xf32>, vector<16x8xf32>, vector<16x16xf32> -> vector<16x16xf32>
    %cst_197 = arith.constant 0.353553385 : f32
    %428 = vector.broadcast %cst_197 : f32 to vector<16x16xf32>
    %429 = arith.mulf %427, %428 : vector<16x16xf32>
    %cst_198 = arith.constant 0.000000e+00 : f32
    %430 = vector.broadcast %cst_198 : f32 to vector<16x16xf32>
    %431 = arith.cmpf ogt, %51, %430 : vector<16x16xf32>
    %cst_199 = arith.constant -1.000000e+09 : f32
    %432 = vector.broadcast %cst_199 : f32 to vector<16x16xf32>
    %433 = arith.select %431, %429, %432 : vector<16x16xi1>, vector<16x16xf32>
    %cst_200 = arith.constant dense<0xFF800000> : vector<16xf32>
    %434 = vector.multi_reduction <maximumf>, %433, %cst_200 [1] : vector<16x16xf32> to vector<16xf32>
    %435 = vector.shape_cast %434 : vector<16xf32> to vector<16x1xf32>
    %436 = vector.broadcast %435 : vector<16x1xf32> to vector<16x16xf32>
    %437 = arith.subf %433, %436 : vector<16x16xf32>
    %438 = math.exp %437 : vector<16x16xf32>
    %439 = arith.mulf %438, %51 : vector<16x16xf32>
    %cst_201 = arith.constant dense<0.000000e+00> : vector<16xf32>
    %440 = vector.multi_reduction <add>, %439, %cst_201 [1] : vector<16x16xf32> to vector<16xf32>
    %441 = vector.shape_cast %440 : vector<16xf32> to vector<16x1xf32>
    %cst_202 = arith.constant 9.99999997E-7 : f32
    %442 = vector.broadcast %cst_202 : f32 to vector<16x1xf32>
    %443 = arith.maximumf %441, %442 : vector<16x1xf32>
    %444 = tpu.reciprocal %443 {approx = true} : vector<16x1xf32> -> vector<16x1xf32>
    %445 = vector.broadcast %444 : vector<16x1xf32> to vector<16x16xf32>
    %446 = arith.mulf %439, %445 : vector<16x16xf32>
    %cst_203 = arith.constant dense<0.000000e+00> : vector<16x32xf32>
    %447 = tpu.matmul %446, %423, %cst_203 {dimension_numbers = #tpu.dot_dimension_numbers<[1], [0], [0], [1], [0, 0, 1, 1], [], []>} : vector<16x16xf32>, vector<16x32xf32>, vector<16x32xf32> -> vector<16x32xf32>
    %448 = vector.extract_strided_slice %53 {offsets = [0, 0], sizes = [1, 32], strides = [1, 1]} : vector<4x32xf32> to vector<1x32xf32>
    %449 = vector.broadcast %448 : vector<1x32xf32> to vector<16x32xf32>
    %450 = arith.mulf %447, %449 : vector<16x32xf32>
    %451 = vector.extract_strided_slice %421 {offsets = [0, 8], sizes = [16, 8], strides = [1, 1]} : vector<16x32xf32> to vector<16x8xf32>
    %452 = vector.extract_strided_slice %422 {offsets = [0, 8], sizes = [16, 8], strides = [1, 1]} : vector<16x32xf32> to vector<16x8xf32>
    %cst_204 = arith.constant dense<0.000000e+00> : vector<16x16xf32>
    %453 = tpu.matmul %451, %452, %cst_204 {dimension_numbers = #tpu.dot_dimension_numbers<[1], [1], [0], [0], [0, 0, 1, 0], [], []>} : vector<16x8xf32>, vector<16x8xf32>, vector<16x16xf32> -> vector<16x16xf32>
    %cst_205 = arith.constant 0.353553385 : f32
    %454 = vector.broadcast %cst_205 : f32 to vector<16x16xf32>
    %455 = arith.mulf %453, %454 : vector<16x16xf32>
    %cst_206 = arith.constant 0.000000e+00 : f32
    %456 = vector.broadcast %cst_206 : f32 to vector<16x16xf32>
    %457 = arith.cmpf ogt, %51, %456 : vector<16x16xf32>
    %cst_207 = arith.constant -1.000000e+09 : f32
    %458 = vector.broadcast %cst_207 : f32 to vector<16x16xf32>
    %459 = arith.select %457, %455, %458 : vector<16x16xi1>, vector<16x16xf32>
    %cst_208 = arith.constant dense<0xFF800000> : vector<16xf32>
    %460 = vector.multi_reduction <maximumf>, %459, %cst_208 [1] : vector<16x16xf32> to vector<16xf32>
    %461 = vector.shape_cast %460 : vector<16xf32> to vector<16x1xf32>
    %462 = vector.broadcast %461 : vector<16x1xf32> to vector<16x16xf32>
    %463 = arith.subf %459, %462 : vector<16x16xf32>
    %464 = math.exp %463 : vector<16x16xf32>
    %465 = arith.mulf %464, %51 : vector<16x16xf32>
    %cst_209 = arith.constant dense<0.000000e+00> : vector<16xf32>
    %466 = vector.multi_reduction <add>, %465, %cst_209 [1] : vector<16x16xf32> to vector<16xf32>
    %467 = vector.shape_cast %466 : vector<16xf32> to vector<16x1xf32>
    %cst_210 = arith.constant 9.99999997E-7 : f32
    %468 = vector.broadcast %cst_210 : f32 to vector<16x1xf32>
    %469 = arith.maximumf %467, %468 : vector<16x1xf32>
    %470 = tpu.reciprocal %469 {approx = true} : vector<16x1xf32> -> vector<16x1xf32>
    %471 = vector.broadcast %470 : vector<16x1xf32> to vector<16x16xf32>
    %472 = arith.mulf %465, %471 : vector<16x16xf32>
    %cst_211 = arith.constant dense<0.000000e+00> : vector<16x32xf32>
    %473 = tpu.matmul %472, %423, %cst_211 {dimension_numbers = #tpu.dot_dimension_numbers<[1], [0], [0], [1], [0, 0, 1, 1], [], []>} : vector<16x16xf32>, vector<16x32xf32>, vector<16x32xf32> -> vector<16x32xf32>
    %474 = vector.extract_strided_slice %53 {offsets = [1, 0], sizes = [1, 32], strides = [1, 1]} : vector<4x32xf32> to vector<1x32xf32>
    %475 = vector.broadcast %474 : vector<1x32xf32> to vector<16x32xf32>
    %476 = arith.mulf %473, %475 : vector<16x32xf32>
    %477 = arith.addf %450, %476 : vector<16x32xf32>
    %478 = vector.extract_strided_slice %421 {offsets = [0, 16], sizes = [16, 8], strides = [1, 1]} : vector<16x32xf32> to vector<16x8xf32>
    %479 = vector.extract_strided_slice %422 {offsets = [0, 16], sizes = [16, 8], strides = [1, 1]} : vector<16x32xf32> to vector<16x8xf32>
    %cst_212 = arith.constant dense<0.000000e+00> : vector<16x16xf32>
    %480 = tpu.matmul %478, %479, %cst_212 {dimension_numbers = #tpu.dot_dimension_numbers<[1], [1], [0], [0], [0, 0, 1, 0], [], []>} : vector<16x8xf32>, vector<16x8xf32>, vector<16x16xf32> -> vector<16x16xf32>
    %cst_213 = arith.constant 0.353553385 : f32
    %481 = vector.broadcast %cst_213 : f32 to vector<16x16xf32>
    %482 = arith.mulf %480, %481 : vector<16x16xf32>
    %cst_214 = arith.constant 0.000000e+00 : f32
    %483 = vector.broadcast %cst_214 : f32 to vector<16x16xf32>
    %484 = arith.cmpf ogt, %51, %483 : vector<16x16xf32>
    %cst_215 = arith.constant -1.000000e+09 : f32
    %485 = vector.broadcast %cst_215 : f32 to vector<16x16xf32>
    %486 = arith.select %484, %482, %485 : vector<16x16xi1>, vector<16x16xf32>
    %cst_216 = arith.constant dense<0xFF800000> : vector<16xf32>
    %487 = vector.multi_reduction <maximumf>, %486, %cst_216 [1] : vector<16x16xf32> to vector<16xf32>
    %488 = vector.shape_cast %487 : vector<16xf32> to vector<16x1xf32>
    %489 = vector.broadcast %488 : vector<16x1xf32> to vector<16x16xf32>
    %490 = arith.subf %486, %489 : vector<16x16xf32>
    %491 = math.exp %490 : vector<16x16xf32>
    %492 = arith.mulf %491, %51 : vector<16x16xf32>
    %cst_217 = arith.constant dense<0.000000e+00> : vector<16xf32>
    %493 = vector.multi_reduction <add>, %492, %cst_217 [1] : vector<16x16xf32> to vector<16xf32>
    %494 = vector.shape_cast %493 : vector<16xf32> to vector<16x1xf32>
    %cst_218 = arith.constant 9.99999997E-7 : f32
    %495 = vector.broadcast %cst_218 : f32 to vector<16x1xf32>
    %496 = arith.maximumf %494, %495 : vector<16x1xf32>
    %497 = tpu.reciprocal %496 {approx = true} : vector<16x1xf32> -> vector<16x1xf32>
    %498 = vector.broadcast %497 : vector<16x1xf32> to vector<16x16xf32>
    %499 = arith.mulf %492, %498 : vector<16x16xf32>
    %cst_219 = arith.constant dense<0.000000e+00> : vector<16x32xf32>
    %500 = tpu.matmul %499, %423, %cst_219 {dimension_numbers = #tpu.dot_dimension_numbers<[1], [0], [0], [1], [0, 0, 1, 1], [], []>} : vector<16x16xf32>, vector<16x32xf32>, vector<16x32xf32> -> vector<16x32xf32>
    %501 = vector.extract_strided_slice %53 {offsets = [2, 0], sizes = [1, 32], strides = [1, 1]} : vector<4x32xf32> to vector<1x32xf32>
    %502 = vector.broadcast %501 : vector<1x32xf32> to vector<16x32xf32>
    %503 = arith.mulf %500, %502 : vector<16x32xf32>
    %504 = arith.addf %477, %503 : vector<16x32xf32>
    %505 = vector.extract_strided_slice %421 {offsets = [0, 24], sizes = [16, 8], strides = [1, 1]} : vector<16x32xf32> to vector<16x8xf32>
    %506 = vector.extract_strided_slice %422 {offsets = [0, 24], sizes = [16, 8], strides = [1, 1]} : vector<16x32xf32> to vector<16x8xf32>
    %cst_220 = arith.constant dense<0.000000e+00> : vector<16x16xf32>
    %507 = tpu.matmul %505, %506, %cst_220 {dimension_numbers = #tpu.dot_dimension_numbers<[1], [1], [0], [0], [0, 0, 1, 0], [], []>} : vector<16x8xf32>, vector<16x8xf32>, vector<16x16xf32> -> vector<16x16xf32>
    %cst_221 = arith.constant 0.353553385 : f32
    %508 = vector.broadcast %cst_221 : f32 to vector<16x16xf32>
    %509 = arith.mulf %507, %508 : vector<16x16xf32>
    %cst_222 = arith.constant 0.000000e+00 : f32
    %510 = vector.broadcast %cst_222 : f32 to vector<16x16xf32>
    %511 = arith.cmpf ogt, %51, %510 : vector<16x16xf32>
    %cst_223 = arith.constant -1.000000e+09 : f32
    %512 = vector.broadcast %cst_223 : f32 to vector<16x16xf32>
    %513 = arith.select %511, %509, %512 : vector<16x16xi1>, vector<16x16xf32>
    %cst_224 = arith.constant dense<0xFF800000> : vector<16xf32>
    %514 = vector.multi_reduction <maximumf>, %513, %cst_224 [1] : vector<16x16xf32> to vector<16xf32>
    %515 = vector.shape_cast %514 : vector<16xf32> to vector<16x1xf32>
    %516 = vector.broadcast %515 : vector<16x1xf32> to vector<16x16xf32>
    %517 = arith.subf %513, %516 : vector<16x16xf32>
    %518 = math.exp %517 : vector<16x16xf32>
    %519 = arith.mulf %518, %51 : vector<16x16xf32>
    %cst_225 = arith.constant dense<0.000000e+00> : vector<16xf32>
    %520 = vector.multi_reduction <add>, %519, %cst_225 [1] : vector<16x16xf32> to vector<16xf32>
    %521 = vector.shape_cast %520 : vector<16xf32> to vector<16x1xf32>
    %cst_226 = arith.constant 9.99999997E-7 : f32
    %522 = vector.broadcast %cst_226 : f32 to vector<16x1xf32>
    %523 = arith.maximumf %521, %522 : vector<16x1xf32>
    %524 = tpu.reciprocal %523 {approx = true} : vector<16x1xf32> -> vector<16x1xf32>
    %525 = vector.broadcast %524 : vector<16x1xf32> to vector<16x16xf32>
    %526 = arith.mulf %519, %525 : vector<16x16xf32>
    %cst_227 = arith.constant dense<0.000000e+00> : vector<16x32xf32>
    %527 = tpu.matmul %526, %423, %cst_227 {dimension_numbers = #tpu.dot_dimension_numbers<[1], [0], [0], [1], [0, 0, 1, 1], [], []>} : vector<16x16xf32>, vector<16x32xf32>, vector<16x32xf32> -> vector<16x32xf32>
    %528 = vector.extract_strided_slice %53 {offsets = [3, 0], sizes = [1, 32], strides = [1, 1]} : vector<4x32xf32> to vector<1x32xf32>
    %529 = vector.broadcast %528 : vector<1x32xf32> to vector<16x32xf32>
    %530 = arith.mulf %527, %529 : vector<16x32xf32>
    %531 = arith.addf %504, %530 : vector<16x32xf32>
    %532 = arith.addf %531, %424 : vector<16x32xf32>
    %cst_228 = arith.constant 6.000000e-01 : f32
    %533 = vector.broadcast %cst_228 : f32 to vector<16x32xf32>
    %534 = arith.mulf %533, %420 : vector<16x32xf32>
    %cst_229 = arith.constant 4.000000e-01 : f32
    %535 = vector.broadcast %cst_229 : f32 to vector<16x32xf32>
    %536 = arith.mulf %535, %532 : vector<16x32xf32>
    %537 = arith.addf %534, %536 : vector<16x32xf32>
    %cst_230 = arith.constant dense<0.000000e+00> : vector<16xf32>
    %538 = vector.multi_reduction <add>, %537, %cst_230 [1] : vector<16x32xf32> to vector<16xf32>
    %539 = vector.shape_cast %538 : vector<16xf32> to vector<16x1xf32>
    %cst_231 = arith.constant 3.200000e+01 : f32
    %540 = vector.broadcast %cst_231 : f32 to vector<16x1xf32>
    %541 = arith.divf %539, %540 : vector<16x1xf32>
    %542 = vector.broadcast %541 : vector<16x1xf32> to vector<16x32xf32>
    %543 = arith.subf %537, %542 : vector<16x32xf32>
    %544 = arith.mulf %543, %543 : vector<16x32xf32>
    %cst_232 = arith.constant dense<0.000000e+00> : vector<16xf32>
    %545 = vector.multi_reduction <add>, %544, %cst_232 [1] : vector<16x32xf32> to vector<16xf32>
    %546 = vector.shape_cast %545 : vector<16xf32> to vector<16x1xf32>
    %cst_233 = arith.constant 3.200000e+01 : f32
    %547 = vector.broadcast %cst_233 : f32 to vector<16x1xf32>
    %548 = arith.divf %546, %547 : vector<16x1xf32>
    %549 = vector.broadcast %541 : vector<16x1xf32> to vector<16x32xf32>
    %550 = arith.subf %537, %549 : vector<16x32xf32>
    %cst_234 = arith.constant 9.99999974E-6 : f32
    %551 = vector.broadcast %cst_234 : f32 to vector<16x1xf32>
    %552 = arith.addf %548, %551 : vector<16x1xf32>
    %553 = math.rsqrt %552 : vector<16x1xf32>
    %554 = vector.broadcast %553 : vector<16x1xf32> to vector<16x32xf32>
    %555 = arith.mulf %550, %554 : vector<16x32xf32>
    %556 = vector.extract_strided_slice %33 {offsets = [0, 0], sizes = [1, 32], strides = [1, 1]} : vector<2x32xf32> to vector<1x32xf32>
    %557 = vector.broadcast %556 : vector<1x32xf32> to vector<16x32xf32>
    %558 = arith.mulf %555, %557 : vector<16x32xf32>
    %559 = vector.extract_strided_slice %33 {offsets = [1, 0], sizes = [1, 32], strides = [1, 1]} : vector<2x32xf32> to vector<1x32xf32>
    %560 = vector.broadcast %559 : vector<1x32xf32> to vector<16x32xf32>
    %561 = arith.addf %558, %560 : vector<16x32xf32>
    %cst_235 = arith.constant 5.000000e-01 : f32
    %562 = vector.broadcast %cst_235 : f32 to vector<16x32xf32>
    %563 = arith.mulf %562, %561 : vector<16x32xf32>
    %cst_236 = arith.constant 4.471500e-02 : f32
    %564 = vector.broadcast %cst_236 : f32 to vector<16x32xf32>
    %565 = arith.mulf %564, %561 : vector<16x32xf32>
    %566 = arith.mulf %565, %561 : vector<16x32xf32>
    %567 = arith.mulf %566, %561 : vector<16x32xf32>
    %568 = arith.addf %561, %567 : vector<16x32xf32>
    %cst_237 = arith.constant 0.797884583 : f32
    %569 = vector.broadcast %cst_237 : f32 to vector<16x32xf32>
    %570 = arith.mulf %569, %568 : vector<16x32xf32>
    %571 = math.tanh %570 : vector<16x32xf32>
    %cst_238 = arith.constant 1.000000e+00 : f32
    %572 = vector.broadcast %cst_238 : f32 to vector<16x32xf32>
    %573 = arith.addf %572, %571 : vector<16x32xf32>
    %574 = arith.mulf %563, %573 : vector<16x32xf32>
    %cst_239 = arith.constant 8.000000e-01 : f32
    %575 = vector.broadcast %cst_239 : f32 to vector<16x32xf32>
    %576 = arith.mulf %575, %411 : vector<16x32xf32>
    %577 = arith.addf %574, %576 : vector<16x32xf32>
    %cst_240 = arith.constant dense<0.000000e+00> : vector<16x32xf32>
    %578 = tpu.matmul %50, %577, %cst_240 {dimension_numbers = #tpu.dot_dimension_numbers<[1], [0], [0], [1], [0, 0, 1, 1], [], []>} : vector<16x16xf32>, vector<16x32xf32>, vector<16x32xf32> -> vector<16x32xf32>
    %cst_241 = arith.constant dense<0.000000e+00> : vector<16x96xf32>
    %579 = tpu.matmul %577, %36, %cst_241 {dimension_numbers = #tpu.dot_dimension_numbers<[1], [0], [0], [1], [0, 0, 1, 1], [], []>} : vector<16x32xf32>, vector<32x96xf32>, vector<16x96xf32> -> vector<16x96xf32>
    %580 = vector.broadcast %37 : vector<1x96xf32> to vector<16x96xf32>
    %581 = arith.addf %579, %580 : vector<16x96xf32>
    %582 = vector.extract_strided_slice %581 {offsets = [0, 0], sizes = [16, 32], strides = [1, 1]} : vector<16x96xf32> to vector<16x32xf32>
    %cst_242 = arith.constant dense<0.000000e+00> : vector<16x32xf32>
    %583 = tpu.matmul %578, %34, %cst_242 {dimension_numbers = #tpu.dot_dimension_numbers<[1], [0], [0], [1], [0, 0, 1, 1], [], []>} : vector<16x32xf32>, vector<32x32xf32>, vector<16x32xf32> -> vector<16x32xf32>
    %584 = vector.broadcast %35 : vector<1x32xf32> to vector<16x32xf32>
    %585 = arith.addf %583, %584 : vector<16x32xf32>
    %586 = arith.addf %585, %582 : vector<16x32xf32>
    %587 = vector.extract_strided_slice %581 {offsets = [0, 32], sizes = [16, 32], strides = [1, 1]} : vector<16x96xf32> to vector<16x32xf32>
    %588 = vector.extract_strided_slice %581 {offsets = [0, 64], sizes = [16, 32], strides = [1, 1]} : vector<16x96xf32> to vector<16x32xf32>
    %589 = vector.extract_strided_slice %588 {offsets = [0, 0], sizes = [16, 8], strides = [1, 1]} : vector<16x32xf32> to vector<16x8xf32>
    %590 = vector.shape_cast %589 : vector<16x8xf32> to vector<16x1x8xf32>
    %591 = vector.extract_strided_slice %587 {offsets = [0, 0], sizes = [16, 8], strides = [1, 1]} : vector<16x32xf32> to vector<16x8xf32>
    %592 = vector.shape_cast %591 : vector<16x8xf32> to vector<1x16x8xf32>
    %593 = vector.broadcast %590 : vector<16x1x8xf32> to vector<16x16x8xf32>
    %594 = vector.broadcast %592 : vector<1x16x8xf32> to vector<16x16x8xf32>
    %595 = arith.addf %593, %594 : vector<16x16x8xf32>
    %cst_243 = arith.constant 0.000000e+00 : f32
    %596 = vector.broadcast %cst_243 : f32 to vector<16x16x8xf32>
    %597 = arith.cmpf ogt, %595, %596 : vector<16x16x8xf32>
    %cst_244 = arith.constant 2.000000e-01 : f32
    %598 = vector.broadcast %cst_244 : f32 to vector<16x16x8xf32>
    %599 = arith.mulf %598, %595 : vector<16x16x8xf32>
    %600 = arith.select %597, %595, %599 : vector<16x16x8xi1>, vector<16x16x8xf32>
    %601 = vector.extract_strided_slice %38 {offsets = [0, 0], sizes = [1, 8], strides = [1, 1]} : vector<4x8xf32> to vector<1x8xf32>
    %602 = vector.shape_cast %601 : vector<1x8xf32> to vector<1x1x8xf32>
    %603 = vector.broadcast %602 : vector<1x1x8xf32> to vector<16x16x8xf32>
    %604 = arith.mulf %600, %603 : vector<16x16x8xf32>
    %cst_245 = arith.constant dense<0.000000e+00> : vector<16x16xf32>
    %605 = vector.multi_reduction <add>, %604, %cst_245 [2] : vector<16x16x8xf32> to vector<16x16xf32>
    %cst_246 = arith.constant 0.000000e+00 : f32
    %606 = vector.broadcast %cst_246 : f32 to vector<16x16xf32>
    %607 = arith.cmpf ogt, %52, %606 : vector<16x16xf32>
    %cst_247 = arith.constant -1.000000e+09 : f32
    %608 = vector.broadcast %cst_247 : f32 to vector<16x16xf32>
    %609 = arith.select %607, %605, %608 : vector<16x16xi1>, vector<16x16xf32>
    %cst_248 = arith.constant dense<0xFF800000> : vector<16xf32>
    %610 = vector.multi_reduction <maximumf>, %609, %cst_248 [1] : vector<16x16xf32> to vector<16xf32>
    %611 = vector.shape_cast %610 : vector<16xf32> to vector<16x1xf32>
    %612 = vector.broadcast %611 : vector<16x1xf32> to vector<16x16xf32>
    %613 = arith.subf %609, %612 : vector<16x16xf32>
    %614 = math.exp %613 : vector<16x16xf32>
    %615 = arith.mulf %614, %52 : vector<16x16xf32>
    %cst_249 = arith.constant dense<0.000000e+00> : vector<16xf32>
    %616 = vector.multi_reduction <add>, %615, %cst_249 [1] : vector<16x16xf32> to vector<16xf32>
    %617 = vector.shape_cast %616 : vector<16xf32> to vector<16x1xf32>
    %cst_250 = arith.constant 9.99999997E-7 : f32
    %618 = vector.broadcast %cst_250 : f32 to vector<16x1xf32>
    %619 = arith.maximumf %617, %618 : vector<16x1xf32>
    %620 = tpu.reciprocal %619 {approx = true} : vector<16x1xf32> -> vector<16x1xf32>
    %621 = vector.broadcast %620 : vector<16x1xf32> to vector<16x16xf32>
    %622 = arith.mulf %615, %621 : vector<16x16xf32>
    %cst_251 = arith.constant dense<0.000000e+00> : vector<16x32xf32>
    %623 = tpu.matmul %622, %587, %cst_251 {dimension_numbers = #tpu.dot_dimension_numbers<[1], [0], [0], [1], [0, 0, 1, 1], [], []>} : vector<16x16xf32>, vector<16x32xf32>, vector<16x32xf32> -> vector<16x32xf32>
    %624 = vector.extract_strided_slice %53 {offsets = [0, 0], sizes = [1, 32], strides = [1, 1]} : vector<4x32xf32> to vector<1x32xf32>
    %625 = vector.broadcast %624 : vector<1x32xf32> to vector<16x32xf32>
    %626 = arith.mulf %623, %625 : vector<16x32xf32>
    %627 = vector.extract_strided_slice %588 {offsets = [0, 8], sizes = [16, 8], strides = [1, 1]} : vector<16x32xf32> to vector<16x8xf32>
    %628 = vector.shape_cast %627 : vector<16x8xf32> to vector<16x1x8xf32>
    %629 = vector.extract_strided_slice %587 {offsets = [0, 8], sizes = [16, 8], strides = [1, 1]} : vector<16x32xf32> to vector<16x8xf32>
    %630 = vector.shape_cast %629 : vector<16x8xf32> to vector<1x16x8xf32>
    %631 = vector.broadcast %628 : vector<16x1x8xf32> to vector<16x16x8xf32>
    %632 = vector.broadcast %630 : vector<1x16x8xf32> to vector<16x16x8xf32>
    %633 = arith.addf %631, %632 : vector<16x16x8xf32>
    %cst_252 = arith.constant 0.000000e+00 : f32
    %634 = vector.broadcast %cst_252 : f32 to vector<16x16x8xf32>
    %635 = arith.cmpf ogt, %633, %634 : vector<16x16x8xf32>
    %cst_253 = arith.constant 2.000000e-01 : f32
    %636 = vector.broadcast %cst_253 : f32 to vector<16x16x8xf32>
    %637 = arith.mulf %636, %633 : vector<16x16x8xf32>
    %638 = arith.select %635, %633, %637 : vector<16x16x8xi1>, vector<16x16x8xf32>
    %639 = vector.extract_strided_slice %38 {offsets = [1, 0], sizes = [1, 8], strides = [1, 1]} : vector<4x8xf32> to vector<1x8xf32>
    %640 = vector.shape_cast %639 : vector<1x8xf32> to vector<1x1x8xf32>
    %641 = vector.broadcast %640 : vector<1x1x8xf32> to vector<16x16x8xf32>
    %642 = arith.mulf %638, %641 : vector<16x16x8xf32>
    %cst_254 = arith.constant dense<0.000000e+00> : vector<16x16xf32>
    %643 = vector.multi_reduction <add>, %642, %cst_254 [2] : vector<16x16x8xf32> to vector<16x16xf32>
    %cst_255 = arith.constant 0.000000e+00 : f32
    %644 = vector.broadcast %cst_255 : f32 to vector<16x16xf32>
    %645 = arith.cmpf ogt, %52, %644 : vector<16x16xf32>
    %cst_256 = arith.constant -1.000000e+09 : f32
    %646 = vector.broadcast %cst_256 : f32 to vector<16x16xf32>
    %647 = arith.select %645, %643, %646 : vector<16x16xi1>, vector<16x16xf32>
    %cst_257 = arith.constant dense<0xFF800000> : vector<16xf32>
    %648 = vector.multi_reduction <maximumf>, %647, %cst_257 [1] : vector<16x16xf32> to vector<16xf32>
    %649 = vector.shape_cast %648 : vector<16xf32> to vector<16x1xf32>
    %650 = vector.broadcast %649 : vector<16x1xf32> to vector<16x16xf32>
    %651 = arith.subf %647, %650 : vector<16x16xf32>
    %652 = math.exp %651 : vector<16x16xf32>
    %653 = arith.mulf %652, %52 : vector<16x16xf32>
    %cst_258 = arith.constant dense<0.000000e+00> : vector<16xf32>
    %654 = vector.multi_reduction <add>, %653, %cst_258 [1] : vector<16x16xf32> to vector<16xf32>
    %655 = vector.shape_cast %654 : vector<16xf32> to vector<16x1xf32>
    %cst_259 = arith.constant 9.99999997E-7 : f32
    %656 = vector.broadcast %cst_259 : f32 to vector<16x1xf32>
    %657 = arith.maximumf %655, %656 : vector<16x1xf32>
    %658 = tpu.reciprocal %657 {approx = true} : vector<16x1xf32> -> vector<16x1xf32>
    %659 = vector.broadcast %658 : vector<16x1xf32> to vector<16x16xf32>
    %660 = arith.mulf %653, %659 : vector<16x16xf32>
    %cst_260 = arith.constant dense<0.000000e+00> : vector<16x32xf32>
    %661 = tpu.matmul %660, %587, %cst_260 {dimension_numbers = #tpu.dot_dimension_numbers<[1], [0], [0], [1], [0, 0, 1, 1], [], []>} : vector<16x16xf32>, vector<16x32xf32>, vector<16x32xf32> -> vector<16x32xf32>
    %662 = vector.extract_strided_slice %53 {offsets = [1, 0], sizes = [1, 32], strides = [1, 1]} : vector<4x32xf32> to vector<1x32xf32>
    %663 = vector.broadcast %662 : vector<1x32xf32> to vector<16x32xf32>
    %664 = arith.mulf %661, %663 : vector<16x32xf32>
    %665 = arith.addf %626, %664 : vector<16x32xf32>
    %666 = vector.extract_strided_slice %588 {offsets = [0, 16], sizes = [16, 8], strides = [1, 1]} : vector<16x32xf32> to vector<16x8xf32>
    %667 = vector.shape_cast %666 : vector<16x8xf32> to vector<16x1x8xf32>
    %668 = vector.extract_strided_slice %587 {offsets = [0, 16], sizes = [16, 8], strides = [1, 1]} : vector<16x32xf32> to vector<16x8xf32>
    %669 = vector.shape_cast %668 : vector<16x8xf32> to vector<1x16x8xf32>
    %670 = vector.broadcast %667 : vector<16x1x8xf32> to vector<16x16x8xf32>
    %671 = vector.broadcast %669 : vector<1x16x8xf32> to vector<16x16x8xf32>
    %672 = arith.addf %670, %671 : vector<16x16x8xf32>
    %cst_261 = arith.constant 0.000000e+00 : f32
    %673 = vector.broadcast %cst_261 : f32 to vector<16x16x8xf32>
    %674 = arith.cmpf ogt, %672, %673 : vector<16x16x8xf32>
    %cst_262 = arith.constant 2.000000e-01 : f32
    %675 = vector.broadcast %cst_262 : f32 to vector<16x16x8xf32>
    %676 = arith.mulf %675, %672 : vector<16x16x8xf32>
    %677 = arith.select %674, %672, %676 : vector<16x16x8xi1>, vector<16x16x8xf32>
    %678 = vector.extract_strided_slice %38 {offsets = [2, 0], sizes = [1, 8], strides = [1, 1]} : vector<4x8xf32> to vector<1x8xf32>
    %679 = vector.shape_cast %678 : vector<1x8xf32> to vector<1x1x8xf32>
    %680 = vector.broadcast %679 : vector<1x1x8xf32> to vector<16x16x8xf32>
    %681 = arith.mulf %677, %680 : vector<16x16x8xf32>
    %cst_263 = arith.constant dense<0.000000e+00> : vector<16x16xf32>
    %682 = vector.multi_reduction <add>, %681, %cst_263 [2] : vector<16x16x8xf32> to vector<16x16xf32>
    %cst_264 = arith.constant 0.000000e+00 : f32
    %683 = vector.broadcast %cst_264 : f32 to vector<16x16xf32>
    %684 = arith.cmpf ogt, %52, %683 : vector<16x16xf32>
    %cst_265 = arith.constant -1.000000e+09 : f32
    %685 = vector.broadcast %cst_265 : f32 to vector<16x16xf32>
    %686 = arith.select %684, %682, %685 : vector<16x16xi1>, vector<16x16xf32>
    %cst_266 = arith.constant dense<0xFF800000> : vector<16xf32>
    %687 = vector.multi_reduction <maximumf>, %686, %cst_266 [1] : vector<16x16xf32> to vector<16xf32>
    %688 = vector.shape_cast %687 : vector<16xf32> to vector<16x1xf32>
    %689 = vector.broadcast %688 : vector<16x1xf32> to vector<16x16xf32>
    %690 = arith.subf %686, %689 : vector<16x16xf32>
    %691 = math.exp %690 : vector<16x16xf32>
    %692 = arith.mulf %691, %52 : vector<16x16xf32>
    %cst_267 = arith.constant dense<0.000000e+00> : vector<16xf32>
    %693 = vector.multi_reduction <add>, %692, %cst_267 [1] : vector<16x16xf32> to vector<16xf32>
    %694 = vector.shape_cast %693 : vector<16xf32> to vector<16x1xf32>
    %cst_268 = arith.constant 9.99999997E-7 : f32
    %695 = vector.broadcast %cst_268 : f32 to vector<16x1xf32>
    %696 = arith.maximumf %694, %695 : vector<16x1xf32>
    %697 = tpu.reciprocal %696 {approx = true} : vector<16x1xf32> -> vector<16x1xf32>
    %698 = vector.broadcast %697 : vector<16x1xf32> to vector<16x16xf32>
    %699 = arith.mulf %692, %698 : vector<16x16xf32>
    %cst_269 = arith.constant dense<0.000000e+00> : vector<16x32xf32>
    %700 = tpu.matmul %699, %587, %cst_269 {dimension_numbers = #tpu.dot_dimension_numbers<[1], [0], [0], [1], [0, 0, 1, 1], [], []>} : vector<16x16xf32>, vector<16x32xf32>, vector<16x32xf32> -> vector<16x32xf32>
    %701 = vector.extract_strided_slice %53 {offsets = [2, 0], sizes = [1, 32], strides = [1, 1]} : vector<4x32xf32> to vector<1x32xf32>
    %702 = vector.broadcast %701 : vector<1x32xf32> to vector<16x32xf32>
    %703 = arith.mulf %700, %702 : vector<16x32xf32>
    %704 = arith.addf %665, %703 : vector<16x32xf32>
    %705 = vector.extract_strided_slice %588 {offsets = [0, 24], sizes = [16, 8], strides = [1, 1]} : vector<16x32xf32> to vector<16x8xf32>
    %706 = vector.shape_cast %705 : vector<16x8xf32> to vector<16x1x8xf32>
    %707 = vector.extract_strided_slice %587 {offsets = [0, 24], sizes = [16, 8], strides = [1, 1]} : vector<16x32xf32> to vector<16x8xf32>
    %708 = vector.shape_cast %707 : vector<16x8xf32> to vector<1x16x8xf32>
    %709 = vector.broadcast %706 : vector<16x1x8xf32> to vector<16x16x8xf32>
    %710 = vector.broadcast %708 : vector<1x16x8xf32> to vector<16x16x8xf32>
    %711 = arith.addf %709, %710 : vector<16x16x8xf32>
    %cst_270 = arith.constant 0.000000e+00 : f32
    %712 = vector.broadcast %cst_270 : f32 to vector<16x16x8xf32>
    %713 = arith.cmpf ogt, %711, %712 : vector<16x16x8xf32>
    %cst_271 = arith.constant 2.000000e-01 : f32
    %714 = vector.broadcast %cst_271 : f32 to vector<16x16x8xf32>
    %715 = arith.mulf %714, %711 : vector<16x16x8xf32>
    %716 = arith.select %713, %711, %715 : vector<16x16x8xi1>, vector<16x16x8xf32>
    %717 = vector.extract_strided_slice %38 {offsets = [3, 0], sizes = [1, 8], strides = [1, 1]} : vector<4x8xf32> to vector<1x8xf32>
    %718 = vector.shape_cast %717 : vector<1x8xf32> to vector<1x1x8xf32>
    %719 = vector.broadcast %718 : vector<1x1x8xf32> to vector<16x16x8xf32>
    %720 = arith.mulf %716, %719 : vector<16x16x8xf32>
    %cst_272 = arith.constant dense<0.000000e+00> : vector<16x16xf32>
    %721 = vector.multi_reduction <add>, %720, %cst_272 [2] : vector<16x16x8xf32> to vector<16x16xf32>
    %cst_273 = arith.constant 0.000000e+00 : f32
    %722 = vector.broadcast %cst_273 : f32 to vector<16x16xf32>
    %723 = arith.cmpf ogt, %52, %722 : vector<16x16xf32>
    %cst_274 = arith.constant -1.000000e+09 : f32
    %724 = vector.broadcast %cst_274 : f32 to vector<16x16xf32>
    %725 = arith.select %723, %721, %724 : vector<16x16xi1>, vector<16x16xf32>
    %cst_275 = arith.constant dense<0xFF800000> : vector<16xf32>
    %726 = vector.multi_reduction <maximumf>, %725, %cst_275 [1] : vector<16x16xf32> to vector<16xf32>
    %727 = vector.shape_cast %726 : vector<16xf32> to vector<16x1xf32>
    %728 = vector.broadcast %727 : vector<16x1xf32> to vector<16x16xf32>
    %729 = arith.subf %725, %728 : vector<16x16xf32>
    %730 = math.exp %729 : vector<16x16xf32>
    %731 = arith.mulf %730, %52 : vector<16x16xf32>
    %cst_276 = arith.constant dense<0.000000e+00> : vector<16xf32>
    %732 = vector.multi_reduction <add>, %731, %cst_276 [1] : vector<16x16xf32> to vector<16xf32>
    %733 = vector.shape_cast %732 : vector<16xf32> to vector<16x1xf32>
    %cst_277 = arith.constant 9.99999997E-7 : f32
    %734 = vector.broadcast %cst_277 : f32 to vector<16x1xf32>
    %735 = arith.maximumf %733, %734 : vector<16x1xf32>
    %736 = tpu.reciprocal %735 {approx = true} : vector<16x1xf32> -> vector<16x1xf32>
    %737 = vector.broadcast %736 : vector<16x1xf32> to vector<16x16xf32>
    %738 = arith.mulf %731, %737 : vector<16x16xf32>
    %cst_278 = arith.constant dense<0.000000e+00> : vector<16x32xf32>
    %739 = tpu.matmul %738, %587, %cst_278 {dimension_numbers = #tpu.dot_dimension_numbers<[1], [0], [0], [1], [0, 0, 1, 1], [], []>} : vector<16x16xf32>, vector<16x32xf32>, vector<16x32xf32> -> vector<16x32xf32>
    %740 = vector.extract_strided_slice %53 {offsets = [3, 0], sizes = [1, 32], strides = [1, 1]} : vector<4x32xf32> to vector<1x32xf32>
    %741 = vector.broadcast %740 : vector<1x32xf32> to vector<16x32xf32>
    %742 = arith.mulf %739, %741 : vector<16x32xf32>
    %743 = arith.addf %704, %742 : vector<16x32xf32>
    %744 = vector.broadcast %39 : vector<1x32xf32> to vector<16x32xf32>
    %745 = arith.addf %743, %744 : vector<16x32xf32>
    %cst_279 = arith.constant 6.000000e-01 : f32
    %746 = vector.broadcast %cst_279 : f32 to vector<16x32xf32>
    %747 = arith.mulf %746, %586 : vector<16x32xf32>
    %cst_280 = arith.constant 4.000000e-01 : f32
    %748 = vector.broadcast %cst_280 : f32 to vector<16x32xf32>
    %749 = arith.mulf %748, %745 : vector<16x32xf32>
    %750 = arith.addf %747, %749 : vector<16x32xf32>
    %cst_281 = arith.constant dense<0.000000e+00> : vector<16xf32>
    %751 = vector.multi_reduction <add>, %750, %cst_281 [1] : vector<16x32xf32> to vector<16xf32>
    %752 = vector.shape_cast %751 : vector<16xf32> to vector<16x1xf32>
    %cst_282 = arith.constant 3.200000e+01 : f32
    %753 = vector.broadcast %cst_282 : f32 to vector<16x1xf32>
    %754 = arith.divf %752, %753 : vector<16x1xf32>
    %755 = vector.broadcast %754 : vector<16x1xf32> to vector<16x32xf32>
    %756 = arith.subf %750, %755 : vector<16x32xf32>
    %757 = arith.mulf %756, %756 : vector<16x32xf32>
    %cst_283 = arith.constant dense<0.000000e+00> : vector<16xf32>
    %758 = vector.multi_reduction <add>, %757, %cst_283 [1] : vector<16x32xf32> to vector<16xf32>
    %759 = vector.shape_cast %758 : vector<16xf32> to vector<16x1xf32>
    %cst_284 = arith.constant 3.200000e+01 : f32
    %760 = vector.broadcast %cst_284 : f32 to vector<16x1xf32>
    %761 = arith.divf %759, %760 : vector<16x1xf32>
    %762 = vector.broadcast %754 : vector<16x1xf32> to vector<16x32xf32>
    %763 = arith.subf %750, %762 : vector<16x32xf32>
    %cst_285 = arith.constant 9.99999974E-6 : f32
    %764 = vector.broadcast %cst_285 : f32 to vector<16x1xf32>
    %765 = arith.addf %761, %764 : vector<16x1xf32>
    %766 = math.rsqrt %765 : vector<16x1xf32>
    %767 = vector.broadcast %766 : vector<16x1xf32> to vector<16x32xf32>
    %768 = arith.mulf %763, %767 : vector<16x32xf32>
    %769 = vector.extract_strided_slice %40 {offsets = [0, 0], sizes = [1, 32], strides = [1, 1]} : vector<2x32xf32> to vector<1x32xf32>
    %770 = vector.broadcast %769 : vector<1x32xf32> to vector<16x32xf32>
    %771 = arith.mulf %768, %770 : vector<16x32xf32>
    %772 = vector.extract_strided_slice %40 {offsets = [1, 0], sizes = [1, 32], strides = [1, 1]} : vector<2x32xf32> to vector<1x32xf32>
    %773 = vector.broadcast %772 : vector<1x32xf32> to vector<16x32xf32>
    %774 = arith.addf %771, %773 : vector<16x32xf32>
    %cst_286 = arith.constant 5.000000e-01 : f32
    %775 = vector.broadcast %cst_286 : f32 to vector<16x32xf32>
    %776 = arith.mulf %775, %774 : vector<16x32xf32>
    %cst_287 = arith.constant 4.471500e-02 : f32
    %777 = vector.broadcast %cst_287 : f32 to vector<16x32xf32>
    %778 = arith.mulf %777, %774 : vector<16x32xf32>
    %779 = arith.mulf %778, %774 : vector<16x32xf32>
    %780 = arith.mulf %779, %774 : vector<16x32xf32>
    %781 = arith.addf %774, %780 : vector<16x32xf32>
    %cst_288 = arith.constant 0.797884583 : f32
    %782 = vector.broadcast %cst_288 : f32 to vector<16x32xf32>
    %783 = arith.mulf %782, %781 : vector<16x32xf32>
    %784 = math.tanh %783 : vector<16x32xf32>
    %cst_289 = arith.constant 1.000000e+00 : f32
    %785 = vector.broadcast %cst_289 : f32 to vector<16x32xf32>
    %786 = arith.addf %785, %784 : vector<16x32xf32>
    %787 = arith.mulf %776, %786 : vector<16x32xf32>
    %cst_290 = arith.constant 8.000000e-01 : f32
    %788 = vector.broadcast %cst_290 : f32 to vector<16x32xf32>
    %789 = arith.mulf %788, %577 : vector<16x32xf32>
    %790 = arith.addf %787, %789 : vector<16x32xf32>
    %791 = vector.extract_strided_slice %790 {offsets = [0, 0], sizes = [8, 32], strides = [1, 1]} : vector<16x32xf32> to vector<8x32xf32>
    %792 = tpu.concatenate %791, %129 in 1 : vector<8x32xf32>, vector<8x32xf32> -> vector<8x64xf32>
    %cst_291 = arith.constant dense<0.000000e+00> : vector<8x64xf32>
    %793 = tpu.matmul %792, %41, %cst_291 {dimension_numbers = #tpu.dot_dimension_numbers<[1], [0], [0], [1], [0, 0, 1, 1], [], []>} : vector<8x64xf32>, vector<64x64xf32>, vector<8x64xf32> -> vector<8x64xf32>
    %794 = vector.broadcast %42 : vector<1x64xf32> to vector<8x64xf32>
    %795 = arith.addf %793, %794 : vector<8x64xf32>
    %796 = vector.extract_strided_slice %43 {offsets = [0, 0], sizes = [1, 64], strides = [1, 1]} : vector<2x64xf32> to vector<1x64xf32>
    %797 = vector.broadcast %796 : vector<1x64xf32> to vector<8x64xf32>
    %798 = arith.mulf %795, %797 : vector<8x64xf32>
    %799 = vector.extract_strided_slice %43 {offsets = [1, 0], sizes = [1, 64], strides = [1, 1]} : vector<2x64xf32> to vector<1x64xf32>
    %800 = vector.broadcast %799 : vector<1x64xf32> to vector<8x64xf32>
    %801 = arith.addf %798, %800 : vector<8x64xf32>
    %cst_292 = arith.constant 5.000000e-01 : f32
    %802 = vector.broadcast %cst_292 : f32 to vector<8x64xf32>
    %803 = arith.mulf %802, %801 : vector<8x64xf32>
    %cst_293 = arith.constant 4.471500e-02 : f32
    %804 = vector.broadcast %cst_293 : f32 to vector<8x64xf32>
    %805 = arith.mulf %804, %801 : vector<8x64xf32>
    %806 = arith.mulf %805, %801 : vector<8x64xf32>
    %807 = arith.mulf %806, %801 : vector<8x64xf32>
    %808 = arith.addf %801, %807 : vector<8x64xf32>
    %cst_294 = arith.constant 0.797884583 : f32
    %809 = vector.broadcast %cst_294 : f32 to vector<8x64xf32>
    %810 = arith.mulf %809, %808 : vector<8x64xf32>
    %811 = math.tanh %810 : vector<8x64xf32>
    %cst_295 = arith.constant 1.000000e+00 : f32
    %812 = vector.broadcast %cst_295 : f32 to vector<8x64xf32>
    %813 = arith.addf %812, %811 : vector<8x64xf32>
    %814 = arith.mulf %803, %813 : vector<8x64xf32>
    %cst_296 = arith.constant dense<0.000000e+00> : vector<8x32xf32>
    %815 = tpu.matmul %814, %44, %cst_296 {dimension_numbers = #tpu.dot_dimension_numbers<[1], [0], [0], [1], [0, 0, 1, 1], [], []>} : vector<8x64xf32>, vector<64x32xf32>, vector<8x32xf32> -> vector<8x32xf32>
    %816 = vector.broadcast %45 : vector<1x32xf32> to vector<8x32xf32>
    %817 = arith.addf %815, %816 : vector<8x32xf32>
    %818 = vector.extract_strided_slice %46 {offsets = [0, 0], sizes = [1, 32], strides = [1, 1]} : vector<2x32xf32> to vector<1x32xf32>
    %819 = vector.broadcast %818 : vector<1x32xf32> to vector<8x32xf32>
    %820 = arith.mulf %817, %819 : vector<8x32xf32>
    %821 = vector.extract_strided_slice %46 {offsets = [1, 0], sizes = [1, 32], strides = [1, 1]} : vector<2x32xf32> to vector<1x32xf32>
    %822 = vector.broadcast %821 : vector<1x32xf32> to vector<8x32xf32>
    %823 = arith.addf %820, %822 : vector<8x32xf32>
    %cst_297 = arith.constant 5.000000e-01 : f32
    %824 = vector.broadcast %cst_297 : f32 to vector<8x32xf32>
    %825 = arith.mulf %824, %823 : vector<8x32xf32>
    %cst_298 = arith.constant 4.471500e-02 : f32
    %826 = vector.broadcast %cst_298 : f32 to vector<8x32xf32>
    %827 = arith.mulf %826, %823 : vector<8x32xf32>
    %828 = arith.mulf %827, %823 : vector<8x32xf32>
    %829 = arith.mulf %828, %823 : vector<8x32xf32>
    %830 = arith.addf %823, %829 : vector<8x32xf32>
    %cst_299 = arith.constant 0.797884583 : f32
    %831 = vector.broadcast %cst_299 : f32 to vector<8x32xf32>
    %832 = arith.mulf %831, %830 : vector<8x32xf32>
    %833 = math.tanh %832 : vector<8x32xf32>
    %cst_300 = arith.constant 1.000000e+00 : f32
    %834 = vector.broadcast %cst_300 : f32 to vector<8x32xf32>
    %835 = arith.addf %834, %833 : vector<8x32xf32>
    %836 = arith.mulf %825, %835 : vector<8x32xf32>
    %cst_301 = arith.constant dense<0.000000e+00> : vector<8x5xf32>
    %837 = tpu.matmul %836, %47, %cst_301 {dimension_numbers = #tpu.dot_dimension_numbers<[1], [0], [0], [1], [0, 0, 1, 1], [], []>} : vector<8x32xf32>, vector<32x5xf32>, vector<8x5xf32> -> vector<8x5xf32>
    %838 = vector.broadcast %48 : vector<1x5xf32> to vector<8x5xf32>
    %839 = arith.addf %837, %838 : vector<8x5xf32>
    %cst_302 = arith.constant dense<0.000000e+00> : vector<8xf32>
    %840 = vector.multi_reduction <add>, %839, %cst_302 [1] : vector<8x5xf32> to vector<8xf32>
    %841 = vector.shape_cast %840 : vector<8xf32> to vector<8x1xf32>
    %cst_303 = arith.constant 5.000000e+00 : f32
    %842 = vector.broadcast %cst_303 : f32 to vector<8x1xf32>
    %843 = arith.divf %841, %842 : vector<8x1xf32>
    %844 = vector.broadcast %843 : vector<8x1xf32> to vector<8x5xf32>
    %845 = arith.subf %839, %844 : vector<8x5xf32>
    %846 = arith.mulf %845, %845 : vector<8x5xf32>
    %cst_304 = arith.constant dense<0.000000e+00> : vector<8xf32>
    %847 = vector.multi_reduction <add>, %846, %cst_304 [1] : vector<8x5xf32> to vector<8xf32>
    %848 = vector.shape_cast %847 : vector<8xf32> to vector<8x1xf32>
    %cst_305 = arith.constant 5.000000e+00 : f32
    %849 = vector.broadcast %cst_305 : f32 to vector<8x1xf32>
    %850 = arith.divf %848, %849 : vector<8x1xf32>
    %851 = vector.broadcast %843 : vector<8x1xf32> to vector<8x5xf32>
    %852 = arith.subf %839, %851 : vector<8x5xf32>
    %cst_306 = arith.constant 9.99999974E-6 : f32
    %853 = vector.broadcast %cst_306 : f32 to vector<8x1xf32>
    %854 = arith.addf %850, %853 : vector<8x1xf32>
    %855 = math.rsqrt %854 : vector<8x1xf32>
    %856 = vector.broadcast %855 : vector<8x1xf32> to vector<8x5xf32>
    %857 = arith.mulf %852, %856 : vector<8x5xf32>
    %858 = vector.extract_strided_slice %49 {offsets = [0, 0], sizes = [1, 5], strides = [1, 1]} : vector<2x5xf32> to vector<1x5xf32>
    %859 = vector.broadcast %858 : vector<1x5xf32> to vector<8x5xf32>
    %860 = arith.mulf %857, %859 : vector<8x5xf32>
    %861 = vector.extract_strided_slice %49 {offsets = [1, 0], sizes = [1, 5], strides = [1, 1]} : vector<2x5xf32> to vector<1x5xf32>
    %862 = vector.broadcast %861 : vector<1x5xf32> to vector<8x5xf32>
    %863 = arith.addf %860, %862 : vector<8x5xf32>
    %864 = arith.negf %863 : vector<8x5xf32>
    %865 = math.exp %864 : vector<8x5xf32>
    %cst_307 = arith.constant 1.000000e+00 : f32
    %866 = vector.broadcast %cst_307 : f32 to vector<8x5xf32>
    %867 = arith.addf %866, %865 : vector<8x5xf32>
    %868 = arith.divf %866, %867 : vector<8x5xf32>
    %c0_308 = arith.constant 0 : index
    %c0_309 = arith.constant 0 : index
    %869 = vector.load %arg56[%c0_308, %c0_309] : memref<8x5xf32, #tpu.memory_space<vmem>>, vector<8x5xf32>
    tpu.vector_store %arg56[%c0_308, %c0_309], %868 {strides = array<i32>} : memref<8x5xf32, #tpu.memory_space<vmem>>, vector<8x5xf32>,
    return
  }
}

</mosaic_0001>

<bundles_post_ra>
// kernel: forward.1
= control target key start
LH: loop header
LB: loop body
LE: loop exit
PB: predicated region body
PF: predicated region fallthrough
CT: control target
= control target key end

     0   :  { %s10971_s6 = smov 1   ;;  %s10972_s10 = smov 2   ;;  %s15213_s0 = inlined_call_operand.smem [shape: u32[57], index: -1, kind: input, shape index: {}] }
   0x1   :  { %s11091_s5 = sld [smem:[%s15213_s0]]   ;;  %s10973_s14 = smov 3  }
   0x2   :  { %s11096_s9 = sld [smem:[%s15213_s0 + %s10971_s6]]   ;;  %s10974_s18 = smov 4  }
   0x3   :  { %s11101_s13 = sld [smem:[%s15213_s0 + %s10972_s10]]   ;;  %s10975_s22 = smov 5  }
   0x4   :  { %s11106_s17 = sld [smem:[%s15213_s0 + %s10973_s14]]   ;;  %s10976_s26 = smov 6  }
   0x5   :  { %s11111_s21 = sld [smem:[%s15213_s0 + %s10974_s18]]   ;;  %s10977_s30 = smov 7  }
   0x6   :  { %s11116_s25 = sld [smem:[%s15213_s0 + %s10975_s22]]   ;;  %s10978_s4 = smov 8  }
   0x7   :  { %15299 = sst [smem:[#allocation84_spill]] %s11091_s5  ;;  %s10979_s10 = smov 9  }
   0x8   :  { %15300 = sst [smem:[#allocation85_spill]] %s11096_s9  ;;  %s10980_s15 = smov 10  }
   0x9   :  { %15301 = sst [smem:[#allocation86_spill]] %s11101_s13  ;;  %s10981_s20 = smov 11  }
   0xa   :  { %15302 = sst [smem:[#allocation87_spill]] %s11106_s17  ;;  %s10983_s1 = smov 13  }
   0xb   :  { %15303 = sst [smem:[#allocation88_spill]] %s11111_s21  ;;  %s10984_s7 = smov 14  }
   0xc   :  { %15304 = sst [smem:[#allocation89_spill]] %s11116_s25  ;;  %s10986_s22 = smov 16  }
   0xd   :  { %s11121_s29 = sld [smem:[%s15213_s0 + %s10976_s26]]   ;;  %s10982_s26 = smov 12  }
   0xe   :  { %s11126_s3 = sld [smem:[%s15213_s0 + %s10977_s30]]   ;;  %s10987_s28 = smov 17  }
   0xf   :  { %s11131_s8 = sld [smem:[%s15213_s0 + %s10978_s4]]  }
  0x10   :  { %s11136_s14 = sld [smem:[%s15213_s0 + %s10979_s10]]  }
  0x11   :  { %s11141_s19 = sld [smem:[%s15213_s0 + %s10980_s15]]   ;;  %s10985_s15 = smov 15  }
  0x12   :  { %s11146_s24 = sld [smem:[%s15213_s0 + %s10981_s20]]  }
  0x13   :  { %15305 = sst [smem:[#allocation90_spill]] %s11121_s29 }
  0x14   :  { %15306 = sst [smem:[#allocation91_spill]] %s11126_s3 }
  0x15   :  { %15307 = sst [smem:[#allocation92_spill]] %s11131_s8 }
  0x16   :  { %15308 = sst [smem:[#allocation93_spill]] %s11136_s14 }
  0x17   :  { %s11151_s30 = sld [smem:[%s15213_s0 + %s10982_s26]]  }
  0x18   :  { %15309 = sst [smem:[#allocation94_spill]] %s11146_s24 }
  0x19   :  { %s11156_s6 = sld [smem:[%s15213_s0 + %s10983_s1]]  }
  0x1a   :  { %s11161_s12 = sld [smem:[%s15213_s0 + %s10984_s7]]   ;;  %s10988_s7 = smov 18  }
  0x1b   :  { %s11166_s20 = sld [smem:[%s15213_s0 + %s10985_s15]]   ;;  %s10989_s15 = smov 19  }
  0x1c   :  { %s11171_s27 = sld [smem:[%s15213_s0 + %s10986_s22]]   ;;  %s10990_s22 = smov 20  }
  0x1d   :  { %15310 = sst [smem:[#allocation95_spill]] %s11151_s30 }
  0x1e   :  { %s11176_s4 = sld [smem:[%s15213_s0 + %s10987_s28]]   ;;  %s10991_s28 = smov 21  }
  0x1f   :  { %s11181_s9 = sld [smem:[%s15213_s0 + %s10988_s7]]   ;;  %s10992_s7 = smov 22  }
  0x20   :  { %15311 = sst [smem:[#allocation96_spill]] %s11161_s12 }
  0x21   :  { %s11186_s17 = sld [smem:[%s15213_s0 + %s10989_s15]]   ;;  %s10993_s15 = smov 23  }
  0x22   :  { %15312 = sst [smem:[#allocation97_spill]] %s11171_s27 }
  0x23   :  { %s11191_s13 = sld [smem:[%s15213_s0 + %s10990_s22]]   ;;  %s10994_s22 = smov 24  }
  0x24   :  { %s11196_s5 = sld [smem:[%s15213_s0 + %s10991_s28]]   ;;  %s10995_s28 = smov 25  }
  0x25   :  { %15313 = sst [smem:[#allocation98_spill]] %s11181_s9 }
  0x26   :  { %s11201_s25 = sld [smem:[%s15213_s0 + %s10992_s7]]   ;;  %s10996_s7 = smov 26  }
  0x27   :  { %s11206_s24 = sld [smem:[%s15213_s0 + %s10993_s15]]   ;;  %s10997_s15 = smov 27  }
  0x28   :  { %s11211_s14 = sld [smem:[%s15213_s0 + %s10994_s22]]   ;;  %s10998_s22 = smov 28  }
  0x29   :  { %15314 = sst [smem:[#allocation99_spill]] %s11191_s13 }
  0x2a   :  { %s11216_s21 = sld [smem:[%s15213_s0 + %s10995_s28]]   ;;  %s10999_s28 = smov 29  }
  0x2b   :  { %s11221_s29 = sld [smem:[%s15213_s0 + %s10996_s7]]   ;;  %s11000_s7 = smov 30  }
  0x2c   :  { %15315 = sst [smem:[#allocation100_spill]] %s11201_s25 }
  0x2d   :  { %15316 = sst [smem:[#allocation101_spill]] %s11206_s24 }
  0x2e   :  { %s11226_s24 = sld [smem:[%s15213_s0 + %s10997_s15]]   ;;  %s11001_s15 = smov 31  }
  0x2f   :  { %s11231_s3 = sld [smem:[%s15213_s0 + %s10998_s22]]   ;;  %s11002_s22 = smov 32  }
  0x30   :  { %15317 = sst [smem:[#allocation102_spill]] %s11216_s21 }
  0x31   :  { %15318 = sst [smem:[#allocation103_spill]] %s11221_s29 }
  0x32   :  { %s11236_s21 = sld [smem:[%s15213_s0 + %s10999_s28]]   ;;  %s11003_s28 = smov 33  }
  0x33   :  { %s11241_s29 = sld [smem:[%s15213_s0 + %s11000_s7]]   ;;  %s11004_s7 = smov 34  }
  0x34   :  { %s11246_s25 = sld [smem:[%s15213_s0 + %s11001_s15]]   ;;  %s11005_s15 = smov 35  }
  0x35   :  { %15319 = sst [smem:[#allocation104_spill]] %s11231_s3 }
  0x36   :  { %s11251_s3 = sld [smem:[%s15213_s0 + %s11002_s22]]   ;;  %s11006_s22 = smov 36  }
  0x37   :  { %s11256_s13 = sld [smem:[%s15213_s0 + %s11003_s28]]   ;;  %s11007_s28 = smov 37  }
  0x38   :  { %s11266_s9 = sld [smem:[%s15213_s0 + %s11005_s15]]   ;;  %s11009_s15 = smov 39  }
  0x39   :  { %15320 = sst [smem:[#allocation105_spill]] %s11241_s29 }
  0x3a   :  { %s11261_s29 = sld [smem:[%s15213_s0 + %s11004_s7]]   ;;  %s11008_s7 = smov 38  }
  0x3b   :  { %s11276_s27 = sld [smem:[%s15213_s0 + %s11007_s28]]   ;;  %s11011_s28 = smov 41  }
  0x3c   :  { %15321 = sst [smem:[#allocation106_spill]] %s11251_s3 }
  0x3d   :  { %s11271_s3 = sld [smem:[%s15213_s0 + %s11006_s22]]   ;;  %s11010_s22 = smov 40  }
  0x3e   :  { %s11286_s12 = sld [smem:[%s15213_s0 + %s11009_s15]]   ;;  %s11013_s15 = smov 43  }
  0x40   :  { %15322 = sst [smem:[#allocation107_spill]] %s11261_s29 }
  0x41   :  { %15324 = sst [smem:[#allocation109_spill]] %s11276_s27 }
  0x42   :  { %s11281_s29 = sld [smem:[%s15213_s0 + %s11008_s7]]   ;;  %s11012_s7 = smov 42  }
  0x43   :  { %15323 = sst [smem:[#allocation108_spill]] %s11271_s3 }
  0x44   :  { %15325 = sst [smem:[#allocation110_spill]] %s11286_s12 }
  0x45   :  { %s11291_s3 = sld [smem:[%s15213_s0 + %s11010_s22]]   ;;  %s11014_s22 = smov 44  }
  0x46   :  { %s11296_s27 = sld [smem:[%s15213_s0 + %s11011_s28]]   ;;  %s11015_s28 = smov 45  }
  0x47   :  { %s11301_s30 = sld [smem:[%s15213_s0 + %s11012_s7]]   ;;  %s11016_s7 = smov 46  }
  0x48   :  { %s11306_s12 = sld [smem:[%s15213_s0 + %s11013_s15]]   ;;  %s11017_s15 = smov 47  }
  0x49   :  { %s11316_s8 = sld [smem:[%s15213_s0 + %s11015_s28]]   ;;  %s11019_s28 = smov 49  }
  0x4b   :  { %15326 = sst [smem:[#allocation111_spill]] %s11291_s3 }
  0x4c   :  { %s11311_s3 = sld [smem:[%s15213_s0 + %s11014_s22]]   ;;  %s11018_s22 = smov 48  }
  0x4d   :  { %15327 = sst [smem:[#allocation112_spill]] %s11301_s30 }
  0x4e   :  { %15328 = sst [smem:[#allocation113_spill]] %s11306_s12 }
  0x4f   :  { %15330 = sst [smem:[#allocation115_spill]] %s11316_s8 }
  0x50   :  { %s11321_s30 = sld [smem:[%s15213_s0 + %s11016_s7]]   ;;  %s11020_s7 = smov 50  }
  0x51   :  { %s11326_s12 = sld [smem:[%s15213_s0 + %s11017_s15]]   ;;  %s11021_s15 = smov 51  }
  0x52   :  { %15329 = sst [smem:[#allocation114_spill]] %s11311_s3 }
  0x53   :  { %s11331_s3 = sld [smem:[%s15213_s0 + %s11018_s22]]   ;;  %s11022_s22 = smov 52  }
  0x54   :  { %s11336_s8 = sld [smem:[%s15213_s0 + %s11019_s28]]   ;;  %s11023_s28 = smov 53  }
  0x56   :  { %15331 = sst [smem:[#allocation116_spill]] %s11321_s30 }
  0x57   :  { %15332 = sst [smem:[#allocation117_spill]] %s11326_s12 }
  0x58   :  { %s11341_s30 = sld [smem:[%s15213_s0 + %s11020_s7]]   ;;  %s11024_s7 = smov 54  }
  0x59   :  { %15333 = sst [smem:[#allocation118_spill]] %s11331_s3 }
  0x5a   :  { %15334 = sst [smem:[#allocation119_spill]] %s11336_s8 }
  0x5b   :  { %s11346_s12 = sld [smem:[%s15213_s0 + %s11021_s15]]   ;;  %s11025_s15 = smov 55  }
  0x5c   :  { %s11351_s3 = sld [smem:[%s15213_s0 + %s11022_s22]]   ;;  %s11026_s22 = smov 56  }
  0x5d   :  { %s11356_s8 = sld [smem:[%s15213_s0 + %s11023_s28]]  }
  0x5e   :  { %15335 = sst [smem:[#allocation120_spill]] %s11341_s30 }
  0x5f   :  { %s11361_s30 = sld [smem:[%s15213_s0 + %s11024_s7]]  }
  0x61   :  { %15336 = sst [smem:[#allocation121_spill]] %s11346_s12 }
  0x62   :  { %15337 = sst [smem:[#allocation122_spill]] %s11351_s3 }
  0x63   :  { %s11366_s12 = sld [smem:[%s15213_s0 + %s11025_s15]]  }
  0x64   :  { %s11371_s3 = sld [smem:[%s15213_s0 + %s11026_s22]]  }
  0x65   :  { %118 = vsyncpa [#allocation3], 0 }
  0x66   :  { %119 = vsyncpa [#allocation6], 0 }
  0x67   :  { %120 = vsyncpa [#allocation9], 0 }
  0x68   :  { %121 = vsyncpa [#allocation12], 0 }
  0x69   :  { %122 = vsyncpa [#allocation15], 0 }
  0x6a   :  { %123 = vsyncpa [#allocation18], 0 }
  0x6b   :  { %124 = vsyncpa [#allocation21], 0 }
  0x6c   :  { %125 = vsyncpa [#allocation24], 0 }
  0x6d   :  { %126 = vsyncpa [#allocation27], 0 }
  0x6e   :  { %127 = vsyncpa [#allocation30], 0 }
  0x6f   :  { %128 = vsyncpa [#allocation33], 0 }
  0x70   :  { %129 = vsyncpa [#allocation36], 0 }
  0x71   :  { %130 = vsyncpa [#allocation39], 0 }
  0x72   :  { %131 = vsyncpa [#allocation42], 0 }
  0x73   :  { %132 = vsyncpa [#allocation45], 0 }
  0x74   :  { %133 = vsyncpa [#allocation48], 0 }
  0x75   :  { %134 = vsyncpa [#allocation51], 0 }
  0x76   :  { %135 = vsyncpa [#allocation54], 0 }
  0x77   :  { %136 = vsyncpa [#allocation57], 0 }
  0x78   :  { %137 = vsyncpa [#allocation60], 0 }
  0x79   :  { %138 = vsyncpa [#allocation4], 0  ;;  %s11027_s0 = smov [#allocation5]   ;;  %s11028_s1 = smov [#allocation8]  }
  0x7a   :  { %s173_s28 = sshll.u32 %s11027_s0, 4  ;;  %s195_s2 = sshll.u32 %s11028_s1, 4  ;;  %s174_s28 = int_to_ptr.vmem [resolvable:$true] %s173_s28  ;;  %s196_s2 = int_to_ptr.vmem [resolvable:$true] %s195_s2 }
  0x7b   :  { %s10049_s7 = scalar_lea.hbm %s11141_s19, 16 }
  0x7c   :  { %p10050_p0 = scmp.ne.s32.totalorder %s11141_s19, %s10049_s7  ;;  %p10053_p1 = scmp.lt.u32.totalorder %s10049_s7, %s11141_s19 }
  0x7e   :  { %p10055_p2 = pnand %p10053_p1, %p10050_p0 }
  0x80   :  { %10058 = shalt.err (!%p10055_p2)
}
  0x81   :  { %s10059_s10 = scalar_lea.vmem %s174_s28, 16  ;;  %s10063_s11 = scalar_lea.vmem %s174_s28, 32 }
  0x82   :  { %p10060_p3 = scmp.ne.s32.totalorder %s174_s28, %s10059_s10  ;;  %p10064_p4 = scmp.lt.s32.totalorder %s174_s28, %s174_s28 }
  0x83   :  { %p10065_p5 = scmp.lt.s32.totalorder %s10063_s11, %s10059_s10 }
  0x85   :  { %p10066_p6 = por %p10065_p5, %p10064_p4 }
  0x87   :  { %p10067_p7 = pnand %p10066_p6, %p10060_p3 }
  0x89   :  { %10070 = shalt.err (!%p10067_p7)
}
  0x8a   :  { %176 = dma.hbm_to_vmem [thread:$0]  %s11141_s19, 16, %s174_s28, [#allocation6]  }
  0x8b   :  { %s10071_s15 = scalar_lea.hbm %s11156_s6, 32 }
  0x8c   :  { %p10072_p8 = scmp.ne.s32.totalorder %s11156_s6, %s10071_s15  ;;  %p10075_p9 = scmp.lt.u32.totalorder %s10071_s15, %s11156_s6 }
  0x8e   :  { %p10077_p10 = pnand %p10075_p9, %p10072_p8 }
  0x90   :  { %10080 = shalt.err (!%p10077_p10)
}
  0x91   :  { %s10081_s16 = scalar_lea.vmem %s196_s2, 32  ;;  %p10086_p12 = scmp.lt.s32.totalorder %s196_s2, %s196_s2 }
  0x92   :  { %p10082_p11 = scmp.ne.s32.totalorder %s196_s2, %s10081_s16  ;;  %p10087_p13 = scmp.lt.s32.totalorder %s10081_s16, %s10081_s16 }
  0x94   :  { %p10088_p0 = por %p10087_p13, %p10086_p12 }
  0x96   :  { %p10089_p1 = pnand %p10088_p0, %p10082_p11 }
  0x98   :  { %10092 = shalt.err (!%p10089_p1)
}
  0x99   :  { %198 = dma.hbm_to_vmem [thread:$0]  %s11156_s6, 32, %s196_s2, [#allocation9]  }
  0x9a   :  { %s11029_s18 = smov [#allocation11]   ;;  %s10093_s19 = scalar_lea.hbm %s11166_s20, 512 }
  0x9b   :  { %s214_s22 = sshll.u32 %s11029_s18, 4  ;;  %p10094_p2 = scmp.ne.s32.totalorder %s11166_s20, %s10093_s19  ;;  %s215_s22 = int_to_ptr.vmem [resolvable:$true] %s214_s22 }
  0x9c   :  { %p10097_p3 = scmp.lt.u32.totalorder %s10093_s19, %s11166_s20 }
  0x9e   :  { %p10099_p4 = pnand %p10097_p3, %p10094_p2 }
  0xa0   :  { %10102 = shalt.err (!%p10099_p4)
}
  0xa1   :  { %s10103_s23 = scalar_lea.vmem %s215_s22, 512  ;;  %p10108_p6 = scmp.lt.s32.totalorder %s215_s22, %s215_s22 }
  0xa2   :  { %p10104_p5 = scmp.ne.s32.totalorder %s215_s22, %s10103_s23  ;;  %p10109_p7 = scmp.lt.s32.totalorder %s10103_s23, %s10103_s23 }
  0xa4   :  { %p10110_p8 = por %p10109_p7, %p10108_p6 }
  0xa6   :  { %p10111_p9 = pnand %p10110_p8, %p10104_p5 }
  0xa8   :  { %10114 = shalt.err (!%p10111_p9)
}
  0xa9   :  { %s11030_s26 = smov 128   ;;  %s11031_s6 = smov 8  }
  0xaa   :  { %220 = dma.hbm_to_vmem [thread:$0]  %s11166_s20, 512, %s215_s22, [#allocation12], %s11030_s26, %s11030_s26, %s11031_s6  }
  0xab   :  { %s11032_s0 = smov [#allocation14]   ;;  %s11033_s1 = smov [#allocation17]  }
  0xac   :  { %s236_s28 = sshll.u32 %s11032_s0, 4  ;;  %s259_s2 = sshll.u32 %s11033_s1, 4  ;;  %s237_s28 = int_to_ptr.vmem [resolvable:$true] %s236_s28  ;;  %s260_s2 = int_to_ptr.vmem [resolvable:$true] %s259_s2 }
  0xad   :  { %s10115_s7 = scalar_lea.hbm %s11176_s4, 512 }
  0xae   :  { %p10116_p10 = scmp.ne.s32.totalorder %s11176_s4, %s10115_s7  ;;  %p10119_p11 = scmp.lt.u32.totalorder %s10115_s7, %s11176_s4 }
  0xb0   :  { %p10121_p12 = pnand %p10119_p11, %p10116_p10 }
  0xb2   :  { %10124 = shalt.err (!%p10121_p12)
}
  0xb3   :  { %s10125_s10 = scalar_lea.vmem %s237_s28, 512  ;;  %p10130_p0 = scmp.lt.s32.totalorder %s237_s28, %s237_s28 }
  0xb4   :  { %p10126_p13 = scmp.ne.s32.totalorder %s237_s28, %s10125_s10  ;;  %p10131_p1 = scmp.lt.s32.totalorder %s10125_s10, %s10125_s10 }
  0xb6   :  { %p10132_p2 = por %p10131_p1, %p10130_p0 }
  0xb8   :  { %p10133_p3 = pnand %p10132_p2, %p10126_p13 }
  0xba   :  { %10136 = shalt.err (!%p10133_p3)
}
  0xbb   :  { %242 = dma.hbm_to_vmem [thread:$0]  %s11176_s4, 512, %s237_s28, [#allocation15], %s11030_s26, %s11030_s26, %s11031_s6  }
  0xbc   :  { %s10137_s20 = scalar_lea.hbm %s11186_s17, 32 }
  0xbd   :  { %p10138_p4 = scmp.ne.s32.totalorder %s11186_s17, %s10137_s20  ;;  %p10141_p5 = scmp.lt.u32.totalorder %s10137_s20, %s11186_s17 }
  0xbf   :  { %p10143_p6 = pnand %p10141_p5, %p10138_p4 }
  0xc1   :  { %10146 = shalt.err (!%p10143_p6)
}
  0xc2   :  { %s10147_s11 = scalar_lea.vmem %s260_s2, 32  ;;  %p10152_p8 = scmp.lt.s32.totalorder %s260_s2, %s260_s2 }
  0xc3   :  { %p10148_p7 = scmp.ne.s32.totalorder %s260_s2, %s10147_s11  ;;  %p10153_p9 = scmp.lt.s32.totalorder %s10147_s11, %s10147_s11 }
  0xc5   :  { %p10154_p10 = por %p10153_p9, %p10152_p8 }
  0xc7   :  { %p10155_p11 = pnand %p10154_p10, %p10148_p7 }
  0xc9   :  { %10158 = shalt.err (!%p10155_p11)
}
  0xca   :  { %262 = dma.hbm_to_vmem [thread:$0]  %s11186_s17, 32, %s260_s2, [#allocation18]  }
  0xcb   :  { %s11034_s15 = smov [#allocation20]   ;;  %s11035_s16 = smov [#allocation23]  }
  0xcc   :  { %s281_s4 = sshll.u32 %s11034_s15, 4  ;;  %s303_s18 = sshll.u32 %s11035_s16, 4  ;;  %s282_s4 = int_to_ptr.vmem [resolvable:$true] %s281_s4  ;;  %s304_s18 = int_to_ptr.vmem [resolvable:$true] %s303_s18 }
  0xcd   :  { %s10159_s22 = scalar_lea.hbm %s11196_s5, 16 }
  0xce   :  { %p10160_p12 = scmp.ne.s32.totalorder %s11196_s5, %s10159_s22  ;;  %p10163_p13 = scmp.lt.u32.totalorder %s10159_s22, %s11196_s5 }
  0xd0   :  { %p10165_p0 = pnand %p10163_p13, %p10160_p12 }
  0xd2   :  { %10168 = shalt.err (!%p10165_p0)
}
  0xd3   :  { %s10169_s19 = scalar_lea.vmem %s282_s4, 16  ;;  %s10173_s23 = scalar_lea.vmem %s282_s4, 32 }
  0xd4   :  { %p10170_p1 = scmp.ne.s32.totalorder %s282_s4, %s10169_s19  ;;  %p10174_p2 = scmp.lt.s32.totalorder %s282_s4, %s282_s4 }
  0xd5   :  { %p10175_p3 = scmp.lt.s32.totalorder %s10173_s23, %s10169_s19 }
  0xd7   :  { %p10176_p4 = por %p10175_p3, %p10174_p2 }
  0xd9   :  { %p10177_p5 = pnand %p10176_p4, %p10170_p1 }
  0xdb   :  { %10180 = shalt.err (!%p10177_p5)
}
  0xdc   :  { %284 = dma.hbm_to_vmem [thread:$0]  %s11196_s5, 16, %s282_s4, [#allocation21]  }
  0xdd   :  { %s10181_s17 = scalar_lea.hbm %s11211_s14, 16 }
  0xde   :  { %p10182_p6 = scmp.ne.s32.totalorder %s11211_s14, %s10181_s17  ;;  %p10185_p7 = scmp.lt.u32.totalorder %s10181_s17, %s11211_s14 }
  0xe0   :  { %p10187_p8 = pnand %p10185_p7, %p10182_p6 }
  0xe2   :  { %10190 = shalt.err (!%p10187_p8)
}
  0xe3   :  { %s10191_s0 = scalar_lea.vmem %s304_s18, 16  ;;  %s10195_s28 = scalar_lea.vmem %s304_s18, 32 }
  0xe4   :  { %p10192_p9 = scmp.ne.s32.totalorder %s304_s18, %s10191_s0  ;;  %p10196_p10 = scmp.lt.s32.totalorder %s304_s18, %s304_s18 }
  0xe5   :  { %p10197_p11 = scmp.lt.s32.totalorder %s10195_s28, %s10191_s0 }
  0xe7   :  { %p10198_p12 = por %p10197_p11, %p10196_p10 }
  0xe9   :  { %p10199_p13 = pnand %p10198_p12, %p10192_p9 }
  0xeb   :  { %10202 = shalt.err (!%p10199_p13)
}
  0xec   :  { %306 = dma.hbm_to_vmem [thread:$0]  %s11211_s14, 16, %s304_s18, [#allocation24]  }
  0xed   :  { %s11036_s5 = smov [#allocation26]   ;;  %s11037_s2 = smov [#allocation29]  }
  0xee   :  { %s325_s1 = sshll.u32 %s11036_s5, 4  ;;  %s347_s7 = sshll.u32 %s11037_s2, 4  ;;  %s326_s1 = int_to_ptr.vmem [resolvable:$true] %s325_s1  ;;  %s348_s7 = int_to_ptr.vmem [resolvable:$true] %s347_s7 }
  0xef   :  { %s10203_s10 = scalar_lea.hbm %s11226_s24, 32 }
  0xf0   :  { %p10204_p0 = scmp.ne.s32.totalorder %s11226_s24, %s10203_s10  ;;  %p10207_p1 = scmp.lt.u32.totalorder %s10203_s10, %s11226_s24 }
  0xf2   :  { %p10209_p2 = pnand %p10207_p1, %p10204_p0 }
  0xf4   :  { %10212 = shalt.err (!%p10209_p2)
}
  0xf5   :  { %s10213_s20 = scalar_lea.vmem %s326_s1, 32  ;;  %p10218_p4 = scmp.lt.s32.totalorder %s326_s1, %s326_s1 }
  0xf6   :  { %p10214_p3 = scmp.ne.s32.totalorder %s326_s1, %s10213_s20  ;;  %p10219_p5 = scmp.lt.s32.totalorder %s10213_s20, %s10213_s20 }
  0xf8   :  { %p10220_p6 = por %p10219_p5, %p10218_p4 }
  0xfa   :  { %p10221_p7 = pnand %p10220_p6, %p10214_p3 }
  0xfc   :  { %10224 = shalt.err (!%p10221_p7)
}
  0xfd   :  { %328 = dma.hbm_to_vmem [thread:$0]  %s11226_s24, 32, %s326_s1, [#allocation27]  }
  0xfe   :  { %s10225_s14 = scalar_lea.hbm %s11236_s21, 16 }
  0xff   :  { %p10226_p8 = scmp.ne.s32.totalorder %s11236_s21, %s10225_s14  ;;  %p10229_p9 = scmp.lt.u32.totalorder %s10225_s14, %s11236_s21 }
 0x101   :  { %p10231_p10 = pnand %p10229_p9, %p10226_p8 }
 0x103   :  { %10234 = shalt.err (!%p10231_p10)
}
 0x104   :  { %s10235_s11 = scalar_lea.vmem %s348_s7, 16  ;;  %s10239_s15 = scalar_lea.vmem %s348_s7, 32 }
 0x105   :  { %p10236_p11 = scmp.ne.s32.totalorder %s348_s7, %s10235_s11  ;;  %p10240_p12 = scmp.lt.s32.totalorder %s348_s7, %s348_s7 }
 0x106   :  { %p10241_p13 = scmp.lt.s32.totalorder %s10239_s15, %s10235_s11 }
 0x108   :  { %p10242_p0 = por %p10241_p13, %p10240_p12 }
 0x10a   :  { %p10243_p1 = pnand %p10242_p0, %p10236_p11 }
 0x10c   :  { %10246 = shalt.err (!%p10243_p1)
}
 0x10d   :  { %350 = dma.hbm_to_vmem [thread:$0]  %s11236_s21, 16, %s348_s7, [#allocation30]  }
 0x10e   :  { %s11038_s24 = smov [#allocation32]   ;;  %s11039_s16 = smov [#allocation35]  }
 0x10f   :  { %s369_s4 = sshll.u32 %s11038_s24, 4  ;;  %s389_s18 = sshll.u32 %s11039_s16, 4  ;;  %s370_s4 = int_to_ptr.vmem [resolvable:$true] %s369_s4  ;;  %s390_s18 = int_to_ptr.vmem [resolvable:$true] %s389_s18 }
 0x110   :  { %s10247_s22 = scalar_lea.hbm %s11246_s25, 16 }
 0x111   :  { %p10248_p2 = scmp.ne.s32.totalorder %s11246_s25, %s10247_s22  ;;  %p10251_p3 = scmp.lt.u32.totalorder %s10247_s22, %s11246_s25 }
 0x113   :  { %p10253_p4 = pnand %p10251_p3, %p10248_p2 }
 0x115   :  { %10256 = shalt.err (!%p10253_p4)
}
 0x116   :  { %s10257_s19 = scalar_lea.vmem %s370_s4, 16  ;;  %s10261_s23 = scalar_lea.vmem %s370_s4, 32 }
 0x117   :  { %p10258_p5 = scmp.ne.s32.totalorder %s370_s4, %s10257_s19  ;;  %p10262_p6 = scmp.lt.s32.totalorder %s370_s4, %s370_s4 }
 0x118   :  { %p10263_p7 = scmp.lt.s32.totalorder %s10261_s23, %s10257_s19 }
 0x11a   :  { %p10264_p8 = por %p10263_p7, %p10262_p6 }
 0x11c   :  { %p10265_p9 = pnand %p10264_p8, %p10258_p5 }
 0x11e   :  { %10268 = shalt.err (!%p10265_p9)
}
 0x11f   :  { %372 = dma.hbm_to_vmem [thread:$0]  %s11246_s25, 16, %s370_s4, [#allocation33]  }
 0x120   :  { %s10269_s21 = scalar_lea.hbm %s11256_s13, 16 }
 0x121   :  { %p10270_p10 = scmp.ne.s32.totalorder %s11256_s13, %s10269_s21  ;;  %p10273_p11 = scmp.lt.u32.totalorder %s10269_s21, %s11256_s13 }
 0x123   :  { %p10275_p12 = pnand %p10273_p11, %p10270_p10 }
 0x125   :  { %10278 = shalt.err (!%p10275_p12)
}
 0x126   :  { %s10279_s17 = scalar_lea.vmem %s390_s18, 16  ;;  %s10283_s0 = scalar_lea.vmem %s390_s18, 32 }
 0x127   :  { %p10280_p13 = scmp.ne.s32.totalorder %s390_s18, %s10279_s17  ;;  %p10284_p0 = scmp.lt.s32.totalorder %s390_s18, %s390_s18 }
 0x128   :  { %p10285_p1 = scmp.lt.s32.totalorder %s10283_s0, %s10279_s17 }
 0x12a   :  { %p10286_p2 = por %p10285_p1, %p10284_p0 }
 0x12c   :  { %p10287_p3 = pnand %p10286_p2, %p10280_p13 }
 0x12e   :  { %10290 = shalt.err (!%p10287_p3)
}
 0x12f   :  { %392 = dma.hbm_to_vmem [thread:$0]  %s11256_s13, 16, %s390_s18, [#allocation36]  }
 0x130   :  { %s11040_s25 = smov [#allocation38]   ;;  %s11041_s5 = smov [#allocation41]  }
 0x131   :  { %s408_s28 = sshll.u32 %s11040_s25, 4  ;;  %s433_s1 = sshll.u32 %s11041_s5, 4  ;;  %s409_s28 = int_to_ptr.vmem [resolvable:$true] %s408_s28  ;;  %s434_s1 = int_to_ptr.vmem [resolvable:$true] %s433_s1 }
 0x132   :  { %s10291_s2 = scalar_lea.hbm %s11266_s9, 512 }
 0x133   :  { %p10292_p4 = scmp.ne.s32.totalorder %s11266_s9, %s10291_s2  ;;  %p10295_p5 = scmp.lt.u32.totalorder %s10291_s2, %s11266_s9 }
 0x135   :  { %p10297_p6 = pnand %p10295_p5, %p10292_p4 }
 0x137   :  { %10300 = shalt.err (!%p10297_p6)
}
 0x138   :  { %s10301_s7 = scalar_lea.vmem %s409_s28, 512  ;;  %p10306_p8 = scmp.lt.s32.totalorder %s409_s28, %s409_s28 }
 0x139   :  { %p10302_p7 = scmp.ne.s32.totalorder %s409_s28, %s10301_s7  ;;  %p10307_p9 = scmp.lt.s32.totalorder %s10301_s7, %s10301_s7 }
 0x13b   :  { %p10308_p10 = por %p10307_p9, %p10306_p8 }
 0x13d   :  { %p10309_p11 = pnand %p10308_p10, %p10302_p7 }
 0x13f   :  { %10312 = shalt.err (!%p10309_p11)
}
 0x140   :  { %414 = dma.hbm_to_vmem [thread:$0]  %s11266_s9, 512, %s409_s28, [#allocation39], %s11030_s26, %s11030_s26, %s11031_s6  }
 0x141   :  { %s10313_s13 = scalar_lea.hbm %s11281_s29, 32 }
 0x142   :  { %p10314_p12 = scmp.ne.s32.totalorder %s11281_s29, %s10313_s13  ;;  %p10317_p13 = scmp.lt.u32.totalorder %s10313_s13, %s11281_s29 }
 0x144   :  { %p10319_p0 = pnand %p10317_p13, %p10314_p12 }
 0x146   :  { %10322 = shalt.err (!%p10319_p0)
}
 0x147   :  { %s10323_s10 = scalar_lea.vmem %s434_s1, 32  ;;  %p10328_p2 = scmp.lt.s32.totalorder %s434_s1, %s434_s1 }
 0x148   :  { %p10324_p1 = scmp.ne.s32.totalorder %s434_s1, %s10323_s10  ;;  %p10329_p3 = scmp.lt.s32.totalorder %s10323_s10, %s10323_s10 }
 0x14a   :  { %p10330_p4 = por %p10329_p3, %p10328_p2 }
 0x14c   :  { %p10331_p5 = pnand %p10330_p4, %p10324_p1 }
 0x14e   :  { %10334 = shalt.err (!%p10331_p5)
}
 0x14f   :  { %436 = dma.hbm_to_vmem [thread:$0]  %s11281_s29, 32, %s434_s1, [#allocation42]  }
 0x150   :  { %s11042_s20 = smov [#allocation44]   ;;  %s11043_s14 = smov [#allocation47]  }
 0x151   :  { %s455_s9 = sshll.u32 %s11042_s20, 4  ;;  %s477_s11 = sshll.u32 %s11043_s14, 4  ;;  %s456_s9 = int_to_ptr.vmem [resolvable:$true] %s455_s9  ;;  %s478_s11 = int_to_ptr.vmem [resolvable:$true] %s477_s11 }
 0x152   :  { %s10335_s15 = scalar_lea.hbm %s11296_s27, 16 }
 0x153   :  { %p10336_p6 = scmp.ne.s32.totalorder %s11296_s27, %s10335_s15  ;;  %p10339_p7 = scmp.lt.u32.totalorder %s10335_s15, %s11296_s27 }
 0x155   :  { %p10341_p8 = pnand %p10339_p7, %p10336_p6 }
 0x157   :  { %10344 = shalt.err (!%p10341_p8)
}
 0x158   :  { %s10345_s24 = scalar_lea.vmem %s456_s9, 16  ;;  %s10349_s4 = scalar_lea.vmem %s456_s9, 32 }
 0x159   :  { %p10346_p9 = scmp.ne.s32.totalorder %s456_s9, %s10345_s24  ;;  %p10350_p10 = scmp.lt.s32.totalorder %s456_s9, %s456_s9 }
 0x15a   :  { %p10351_p11 = scmp.lt.s32.totalorder %s10349_s4, %s10345_s24 }
 0x15c   :  { %p10352_p12 = por %p10351_p11, %p10350_p10 }
 0x15e   :  { %p10353_p13 = pnand %p10352_p12, %p10346_p9 }
 0x160   :  { %10356 = shalt.err (!%p10353_p13)
}
 0x161   :  { %s15338_s29 = sld [smem:[#allocation113_spill]] }
 0x162   :  { %458 = dma.hbm_to_vmem [thread:$0]  %s11296_s27, 16, %s456_s9, [#allocation45]  }
 0x167   :  { %s10357_s16 = scalar_lea.hbm %s15338_s29, 16 }
 0x168   :  { %p10358_p0 = scmp.ne.s32.totalorder %s15338_s29, %s10357_s16  ;;  %p10361_p1 = scmp.lt.u32.totalorder %s10357_s16, %s15338_s29 }
 0x16a   :  { %p10363_p2 = pnand %p10361_p1, %p10358_p0 }
 0x16c   :  { %10366 = shalt.err (!%p10363_p2)
}
 0x16d   :  { %s10367_s18 = scalar_lea.vmem %s478_s11, 16  ;;  %s10371_s22 = scalar_lea.vmem %s478_s11, 32 }
 0x16e   :  { %p10368_p3 = scmp.ne.s32.totalorder %s478_s11, %s10367_s18  ;;  %p10372_p4 = scmp.lt.s32.totalorder %s478_s11, %s478_s11 }
 0x16f   :  { %p10373_p5 = scmp.lt.s32.totalorder %s10371_s22, %s10367_s18 }
 0x171   :  { %p10374_p6 = por %p10373_p5, %p10372_p4 }
 0x173   :  { %p10375_p7 = pnand %p10374_p6, %p10368_p3 }
 0x175   :  { %10378 = shalt.err (!%p10375_p7)
}
 0x176   :  { %s15339_s19 = sld [smem:[#allocation115_spill]]  ;;  %s11044_s27 = smov [#allocation50]  }
 0x177   :  { %480 = dma.hbm_to_vmem [thread:$0]  %s15338_s29, 16, %s478_s11, [#allocation48]  }
 0x178   :  { %s497_s23 = sshll.u32 %s11044_s27, 4  ;;  %s11045_s21 = smov [#allocation53]   ;;  %s498_s23 = int_to_ptr.vmem [resolvable:$true] %s497_s23 }
 0x179   :  { %s519_s17 = sshll.u32 %s11045_s21, 4  ;;  %s520_s17 = int_to_ptr.vmem [resolvable:$true] %s519_s17 }
 0x17c   :  { %s10379_s0 = scalar_lea.hbm %s15339_s19, 16 }
 0x17d   :  { %p10380_p8 = scmp.ne.s32.totalorder %s15339_s19, %s10379_s0  ;;  %p10383_p9 = scmp.lt.u32.totalorder %s10379_s0, %s15339_s19 }
 0x17f   :  { %p10385_p10 = pnand %p10383_p9, %p10380_p8 }
 0x181   :  { %10388 = shalt.err (!%p10385_p10)
}
 0x182   :  { %s10389_s25 = scalar_lea.vmem %s498_s23, 16  ;;  %s10393_s28 = scalar_lea.vmem %s498_s23, 32 }
 0x183   :  { %p10390_p11 = scmp.ne.s32.totalorder %s498_s23, %s10389_s25  ;;  %p10394_p12 = scmp.lt.s32.totalorder %s498_s23, %s498_s23 }
 0x184   :  { %p10395_p13 = scmp.lt.s32.totalorder %s10393_s28, %s10389_s25 }
 0x186   :  { %p10396_p0 = por %p10395_p13, %p10394_p12 }
 0x188   :  { %p10397_p1 = pnand %p10396_p0, %p10390_p11 }
 0x18a   :  { %10400 = shalt.err (!%p10397_p1)
}
 0x18b   :  { %s15340_s5 = sld [smem:[#allocation118_spill]] }
 0x18c   :  { %500 = dma.hbm_to_vmem [thread:$0]  %s15339_s19, 16, %s498_s23, [#allocation51]  }
 0x191   :  { %s10401_s1 = scalar_lea.hbm %s15340_s5, 16 }
 0x192   :  { %p10402_p2 = scmp.ne.s32.totalorder %s15340_s5, %s10401_s1  ;;  %p10405_p3 = scmp.lt.u32.totalorder %s10401_s1, %s15340_s5 }
 0x194   :  { %p10407_p4 = pnand %p10405_p3, %p10402_p2 }
 0x196   :  { %10410 = shalt.err (!%p10407_p4)
}
 0x197   :  { %s10411_s2 = scalar_lea.vmem %s520_s17, 16  ;;  %s10415_s7 = scalar_lea.vmem %s520_s17, 32 }
 0x198   :  { %p10412_p5 = scmp.ne.s32.totalorder %s520_s17, %s10411_s2  ;;  %p10416_p6 = scmp.lt.s32.totalorder %s520_s17, %s520_s17 }
 0x199   :  { %p10417_p7 = scmp.lt.s32.totalorder %s10415_s7, %s10411_s2 }
 0x19b   :  { %p10418_p8 = por %p10417_p7, %p10416_p6 }
 0x19d   :  { %p10419_p9 = pnand %p10418_p8, %p10412_p5 }
 0x19f   :  { %10422 = shalt.err (!%p10419_p9)
}
 0x1a0   :  { %s15341_s13 = sld [smem:[#allocation121_spill]]  ;;  %s11046_s10 = smov [#allocation56]  }
 0x1a1   :  { %522 = dma.hbm_to_vmem [thread:$0]  %s15340_s5, 16, %s520_s17, [#allocation54]  }
 0x1a2   :  { %s541_s20 = sshll.u32 %s11046_s10, 4  ;;  %s11047_s9 = smov [#allocation59]   ;;  %s542_s20 = int_to_ptr.vmem [resolvable:$true] %s541_s20 }
 0x1a3   :  { %s563_s14 = sshll.u32 %s11047_s9, 4  ;;  %s564_s14 = int_to_ptr.vmem [resolvable:$true] %s563_s14 }
 0x1a6   :  { %s10423_s11 = scalar_lea.hbm %s15341_s13, 16 }
 0x1a7   :  { %p10424_p10 = scmp.ne.s32.totalorder %s15341_s13, %s10423_s11  ;;  %p10427_p11 = scmp.lt.u32.totalorder %s10423_s11, %s15341_s13 }
 0x1a9   :  { %p10429_p12 = pnand %p10427_p11, %p10424_p10 }
 0x1ab   :  { %10432 = shalt.err (!%p10429_p12)
}
 0x1ac   :  { %s10433_s15 = scalar_lea.vmem %s542_s20, 16  ;;  %s10437_s24 = scalar_lea.vmem %s542_s20, 32 }
 0x1ad   :  { %p10434_p13 = scmp.ne.s32.totalorder %s542_s20, %s10433_s15  ;;  %p10438_p0 = scmp.lt.s32.totalorder %s542_s20, %s542_s20 }
 0x1ae   :  { %p10439_p1 = scmp.lt.s32.totalorder %s10437_s24, %s10433_s15 }
 0x1b0   :  { %p10440_p2 = por %p10439_p1, %p10438_p0 }
 0x1b2   :  { %p10441_p3 = pnand %p10440_p2, %p10434_p13 }
 0x1b4   :  { %10444 = shalt.err (!%p10441_p3)
}
 0x1b5   :  { %544 = dma.hbm_to_vmem [thread:$0]  %s15341_s13, 16, %s542_s20, [#allocation57]  }
 0x1b6   :  { %s10445_s4 = scalar_lea.hbm %s11361_s30, 16 }
 0x1b7   :  { %p10446_p4 = scmp.ne.s32.totalorder %s11361_s30, %s10445_s4  ;;  %p10449_p5 = scmp.lt.u32.totalorder %s10445_s4, %s11361_s30 }
 0x1b9   :  { %p10451_p6 = pnand %p10449_p5, %p10446_p4 }
 0x1bb   :  { %10454 = shalt.err (!%p10451_p6)
}
 0x1bc   :  { %s10455_s29 = scalar_lea.vmem %s564_s14, 16  ;;  %s10459_s16 = scalar_lea.vmem %s564_s14, 32 }
 0x1bd   :  { %p10456_p7 = scmp.ne.s32.totalorder %s564_s14, %s10455_s29  ;;  %p10460_p8 = scmp.lt.s32.totalorder %s564_s14, %s564_s14 }
 0x1be   :  { %p10461_p9 = scmp.lt.s32.totalorder %s10459_s16, %s10455_s29 }
 0x1c0   :  { %p10462_p10 = por %p10461_p9, %p10460_p8 }
 0x1c2   :  { %p10463_p11 = pnand %p10462_p10, %p10456_p7 }
 0x1c4   :  { %10466 = shalt.err (!%p10463_p11)
}
 0x1c5   :  { %s15342_s18 = sld [smem:[#allocation92_spill]]  ;;  %s11048_s22 = smov [#allocation2]  }
 0x1c6   :  { %566 = dma.hbm_to_vmem [thread:$0]  %s11361_s30, 16, %s564_s14, [#allocation60]  }
 0x1c7   :  { %s161_s19 = sshll.u32 %s11048_s22, 4  ;;  %s11049_s27 = smov [#allocation7]   ;;  %s162_s19 = int_to_ptr.vmem [resolvable:$true] %s161_s19 }
 0x1c8   :  { %s185_s23 = sshll.u32 %s11049_s27, 4  ;;  %s186_s23 = int_to_ptr.vmem [resolvable:$true] %s185_s23 }
 0x1cb   :  { %s10467_s21 = scalar_lea.hbm %s15342_s18, 16 }
 0x1cc   :  { %p10468_p12 = scmp.ne.s32.totalorder %s15342_s18, %s10467_s21  ;;  %p10471_p13 = scmp.lt.u32.totalorder %s10467_s21, %s15342_s18 }
 0x1ce   :  { %p10473_p0 = pnand %p10471_p13, %p10468_p12 }
 0x1d0   :  { %10476 = shalt.err (!%p10473_p0)
}
 0x1d1   :  { %s10477_s17 = scalar_lea.vmem %s162_s19, 16  ;;  %s10481_s0 = scalar_lea.vmem %s162_s19, 32 }
 0x1d2   :  { %p10478_p1 = scmp.ne.s32.totalorder %s162_s19, %s10477_s17  ;;  %p10482_p2 = scmp.lt.s32.totalorder %s162_s19, %s162_s19 }
 0x1d3   :  { %p10483_p3 = scmp.lt.s32.totalorder %s10481_s0, %s10477_s17 }
 0x1d5   :  { %p10484_p4 = por %p10483_p3, %p10482_p2 }
 0x1d7   :  { %p10485_p5 = pnand %p10484_p4, %p10478_p1 }
 0x1d9   :  { %10488 = shalt.err (!%p10485_p5)
}
 0x1da   :  { %s15343_s30 = sld [smem:[#allocation95_spill]] }
 0x1db   :  { %164 = dma.hbm_to_vmem [thread:$0]  %s15342_s18, 16, %s162_s19, [#allocation3]  }
 0x1e0   :  { %s10489_s25 = scalar_lea.hbm %s15343_s30, 16 }
 0x1e1   :  { %p10490_p6 = scmp.ne.s32.totalorder %s15343_s30, %s10489_s25  ;;  %p10493_p7 = scmp.lt.u32.totalorder %s10489_s25, %s15343_s30 }
 0x1e3   :  { %p10495_p8 = pnand %p10493_p7, %p10490_p6 }
 0x1e5   :  { %10498 = shalt.err (!%p10495_p8)
}
 0x1e6   :  { %s10499_s28 = scalar_lea.vmem %s186_s23, 16  ;;  %s10503_s5 = scalar_lea.vmem %s186_s23, 32 }
 0x1e7   :  { %p10500_p9 = scmp.ne.s32.totalorder %s186_s23, %s10499_s28  ;;  %p10504_p10 = scmp.lt.s32.totalorder %s186_s23, %s186_s23 }
 0x1e8   :  { %p10505_p11 = scmp.lt.s32.totalorder %s10503_s5, %s10499_s28 }
 0x1ea   :  { %p10506_p12 = por %p10505_p11, %p10504_p10 }
 0x1ec   :  { %p10507_p13 = pnand %p10506_p12, %p10500_p9 }
 0x1ee   :  { %10510 = shalt.err (!%p10507_p13)
}
 0x1ef   :  { %s15344_s1 = sld [smem:[#allocation96_spill]]  ;;  %s11050_s2 = smov [#allocation10]  }
 0x1f0   :  { %188 = dma.hbm_to_vmem [thread:$0]  %s15343_s30, 16, %s186_s23, [#allocation6]  }
 0x1f1   :  { %s205_s7 = sshll.u32 %s11050_s2, 4  ;;  %s11051_s13 = smov [#allocation13]   ;;  %s206_s7 = int_to_ptr.vmem [resolvable:$true] %s205_s7 }
 0x1f2   :  { %s227_s10 = sshll.u32 %s11051_s13, 4  ;;  %s228_s10 = int_to_ptr.vmem [resolvable:$true] %s227_s10 }
 0x1f5   :  { %s10511_s20 = scalar_lea.hbm %s15344_s1, 32 }
 0x1f6   :  { %p10512_p0 = scmp.ne.s32.totalorder %s15344_s1, %s10511_s20  ;;  %p10515_p1 = scmp.lt.u32.totalorder %s10511_s20, %s15344_s1 }
 0x1f8   :  { %p10517_p2 = pnand %p10515_p1, %p10512_p0 }
 0x1fa   :  { %10520 = shalt.err (!%p10517_p2)
}
 0x1fb   :  { %s10521_s9 = scalar_lea.vmem %s206_s7, 32  ;;  %p10526_p4 = scmp.lt.s32.totalorder %s206_s7, %s206_s7 }
 0x1fc   :  { %p10522_p3 = scmp.ne.s32.totalorder %s206_s7, %s10521_s9  ;;  %p10527_p5 = scmp.lt.s32.totalorder %s10521_s9, %s10521_s9 }
 0x1fe   :  { %p10528_p6 = por %p10527_p5, %p10526_p4 }
 0x200   :  { %p10529_p7 = pnand %p10528_p6, %p10522_p3 }
 0x202   :  { %10532 = shalt.err (!%p10529_p7)
}
 0x203   :  { %s15345_s14 = sld [smem:[#allocation97_spill]] }
 0x204   :  { %208 = dma.hbm_to_vmem [thread:$0]  %s15344_s1, 32, %s206_s7, [#allocation9]  }
 0x209   :  { %s10533_s11 = scalar_lea.hbm %s15345_s14, 16 }
 0x20a   :  { %p10534_p8 = scmp.ne.s32.totalorder %s15345_s14, %s10533_s11  ;;  %p10537_p9 = scmp.lt.u32.totalorder %s10533_s11, %s15345_s14 }
 0x20c   :  { %p10539_p10 = pnand %p10537_p9, %p10534_p8 }
 0x20e   :  { %10542 = shalt.err (!%p10539_p10)
}
 0x20f   :  { %s10543_s15 = scalar_lea.vmem %s228_s10, 16  ;;  %s10547_s24 = scalar_lea.vmem %s228_s10, 32 }
 0x210   :  { %p10544_p11 = scmp.ne.s32.totalorder %s228_s10, %s10543_s15  ;;  %p10548_p12 = scmp.lt.s32.totalorder %s228_s10, %s228_s10 }
 0x211   :  { %p10549_p13 = scmp.lt.s32.totalorder %s10547_s24, %s10543_s15 }
 0x213   :  { %p10550_p0 = por %p10549_p13, %p10548_p12 }
 0x215   :  { %p10551_p1 = pnand %p10550_p0, %p10544_p11 }
 0x217   :  { %10554 = shalt.err (!%p10551_p1)
}
 0x218   :  { %s15346_s4 = sld [smem:[#allocation98_spill]]  ;;  %s11052_s29 = smov [#allocation16]  }
 0x219   :  { %230 = dma.hbm_to_vmem [thread:$0]  %s15345_s14, 16, %s228_s10, [#allocation12]  }
 0x21a   :  { %s249_s16 = sshll.u32 %s11052_s29, 4  ;;  %s11053_s18 = smov [#allocation19]   ;;  %s250_s16 = int_to_ptr.vmem [resolvable:$true] %s249_s16 }
 0x21b   :  { %s268_s22 = sshll.u32 %s11053_s18, 4  ;;  %s269_s22 = int_to_ptr.vmem [resolvable:$true] %s268_s22 }
 0x21e   :  { %s10555_s19 = scalar_lea.hbm %s15346_s4, 16 }
 0x21f   :  { %p10556_p2 = scmp.ne.s32.totalorder %s15346_s4, %s10555_s19  ;;  %p10559_p3 = scmp.lt.u32.totalorder %s10555_s19, %s15346_s4 }
 0x221   :  { %p10561_p4 = pnand %p10559_p3, %p10556_p2 }
 0x223   :  { %10564 = shalt.err (!%p10561_p4)
}
 0x224   :  { %s10565_s27 = scalar_lea.vmem %s250_s16, 16  ;;  %s10569_s23 = scalar_lea.vmem %s250_s16, 32 }
 0x225   :  { %p10566_p5 = scmp.ne.s32.totalorder %s250_s16, %s10565_s27  ;;  %p10570_p6 = scmp.lt.s32.totalorder %s250_s16, %s250_s16 }
 0x226   :  { %p10571_p7 = scmp.lt.s32.totalorder %s10569_s23, %s10565_s27 }
 0x228   :  { %p10572_p8 = por %p10571_p7, %p10570_p6 }
 0x22a   :  { %p10573_p9 = pnand %p10572_p8, %p10566_p5 }
 0x22c   :  { %10576 = shalt.err (!%p10573_p9)
}
 0x22d   :  { %s15347_s21 = sld [smem:[#allocation99_spill]] }
 0x22e   :  { %252 = dma.hbm_to_vmem [thread:$0]  %s15346_s4, 16, %s250_s16, [#allocation15]  }
 0x233   :  { %s10577_s17 = scalar_lea.hbm %s15347_s21, 256 }
 0x234   :  { %p10578_p10 = scmp.ne.s32.totalorder %s15347_s21, %s10577_s17  ;;  %p10581_p11 = scmp.lt.u32.totalorder %s10577_s17, %s15347_s21 }
 0x236   :  { %p10583_p12 = pnand %p10581_p11, %p10578_p10 }
 0x238   :  { %10586 = shalt.err (!%p10583_p12)
}
 0x239   :  { %s10587_s0 = scalar_lea.vmem %s269_s22, 256  ;;  %p10592_p0 = scmp.lt.s32.totalorder %s269_s22, %s269_s22 }
 0x23a   :  { %p10588_p13 = scmp.ne.s32.totalorder %s269_s22, %s10587_s0  ;;  %p10593_p1 = scmp.lt.s32.totalorder %s10587_s0, %s10587_s0 }
 0x23c   :  { %p10594_p2 = por %p10593_p1, %p10592_p0 }
 0x23e   :  { %p10595_p3 = pnand %p10594_p2, %p10588_p13 }
 0x240   :  { %10598 = shalt.err (!%p10595_p3)
}
 0x241   :  { %s15348_s30 = sld [smem:[#allocation100_spill]]  ;;  %s11054_s25 = smov [#allocation22]  }
 0x242   :  { %274 = dma.hbm_to_vmem [thread:$0]  %s15347_s21, 256, %s269_s22, [#allocation18], %s11030_s26, %s11030_s26, %s11031_s6  }
 0x243   :  { %s291_s28 = sshll.u32 %s11054_s25, 4  ;;  %s11055_s5 = smov [#allocation25]   ;;  %s292_s28 = int_to_ptr.vmem [resolvable:$true] %s291_s28 }
 0x244   :  { %s315_s1 = sshll.u32 %s11055_s5, 4  ;;  %s316_s1 = int_to_ptr.vmem [resolvable:$true] %s315_s1 }
 0x247   :  { %s10599_s2 = scalar_lea.hbm %s15348_s30, 32 }
 0x248   :  { %p10600_p4 = scmp.ne.s32.totalorder %s15348_s30, %s10599_s2  ;;  %p10603_p5 = scmp.lt.u32.totalorder %s10599_s2, %s15348_s30 }
 0x24a   :  { %p10605_p6 = pnand %p10603_p5, %p10600_p4 }
 0x24c   :  { %10608 = shalt.err (!%p10605_p6)
}
 0x24d   :  { %s10609_s7 = scalar_lea.vmem %s292_s28, 32  ;;  %p10614_p8 = scmp.lt.s32.totalorder %s292_s28, %s292_s28 }
 0x24e   :  { %p10610_p7 = scmp.ne.s32.totalorder %s292_s28, %s10609_s7  ;;  %p10615_p9 = scmp.lt.s32.totalorder %s10609_s7, %s10609_s7 }
 0x250   :  { %p10616_p10 = por %p10615_p9, %p10614_p8 }
 0x252   :  { %p10617_p11 = pnand %p10616_p10, %p10610_p7 }
 0x254   :  { %10620 = shalt.err (!%p10617_p11)
}
 0x255   :  { %s15349_s13 = sld [smem:[#allocation103_spill]] }
 0x256   :  { %294 = dma.hbm_to_vmem [thread:$0]  %s15348_s30, 32, %s292_s28, [#allocation21]  }
 0x25b   :  { %s10621_s10 = scalar_lea.hbm %s15349_s13, 16 }
 0x25c   :  { %p10622_p12 = scmp.ne.s32.totalorder %s15349_s13, %s10621_s10  ;;  %p10625_p13 = scmp.lt.u32.totalorder %s10621_s10, %s15349_s13 }
 0x25e   :  { %p10627_p0 = pnand %p10625_p13, %p10622_p12 }
 0x260   :  { %10630 = shalt.err (!%p10627_p0)
}
 0x261   :  { %s10631_s20 = scalar_lea.vmem %s316_s1, 16  ;;  %s10635_s9 = scalar_lea.vmem %s316_s1, 32 }
 0x262   :  { %p10632_p1 = scmp.ne.s32.totalorder %s316_s1, %s10631_s20  ;;  %p10636_p2 = scmp.lt.s32.totalorder %s316_s1, %s316_s1 }
 0x263   :  { %p10637_p3 = scmp.lt.s32.totalorder %s10635_s9, %s10631_s20 }
 0x265   :  { %p10638_p4 = por %p10637_p3, %p10636_p2 }
 0x267   :  { %p10639_p5 = pnand %p10638_p4, %p10632_p1 }
 0x269   :  { %10642 = shalt.err (!%p10639_p5)
}
 0x26a   :  { %s15350_s14 = sld [smem:[#allocation104_spill]]  ;;  %s11056_s11 = smov [#allocation28]  }
 0x26b   :  { %318 = dma.hbm_to_vmem [thread:$0]  %s15349_s13, 16, %s316_s1, [#allocation24]  }
 0x26c   :  { %s334_s15 = sshll.u32 %s11056_s11, 4  ;;  %s11057_s24 = smov [#allocation31]   ;;  %s335_s15 = int_to_ptr.vmem [resolvable:$true] %s334_s15 }
 0x26d   :  { %s356_s4 = sshll.u32 %s11057_s24, 4  ;;  %s357_s4 = int_to_ptr.vmem [resolvable:$true] %s356_s4 }
 0x270   :  { %s10643_s29 = scalar_lea.hbm %s15350_s14, 512 }
 0x271   :  { %p10644_p6 = scmp.ne.s32.totalorder %s15350_s14, %s10643_s29  ;;  %p10647_p7 = scmp.lt.u32.totalorder %s10643_s29, %s15350_s14 }
 0x273   :  { %p10649_p8 = pnand %p10647_p7, %p10644_p6 }
 0x275   :  { %10652 = shalt.err (!%p10649_p8)
}
 0x276   :  { %s10653_s16 = scalar_lea.vmem %s335_s15, 512  ;;  %p10658_p10 = scmp.lt.s32.totalorder %s335_s15, %s335_s15 }
 0x277   :  { %p10654_p9 = scmp.ne.s32.totalorder %s335_s15, %s10653_s16  ;;  %p10659_p11 = scmp.lt.s32.totalorder %s10653_s16, %s10653_s16 }
 0x279   :  { %p10660_p12 = por %p10659_p11, %p10658_p10 }
 0x27b   :  { %p10661_p13 = pnand %p10660_p12, %p10654_p9 }
 0x27d   :  { %10664 = shalt.err (!%p10661_p13)
}
 0x27e   :  { %s15351_s18 = sld [smem:[#allocation105_spill]] }
 0x27f   :  { %340 = dma.hbm_to_vmem [thread:$0]  %s15350_s14, 512, %s335_s15, [#allocation27], %s11030_s26, %s11030_s26, %s11031_s6  }
 0x284   :  { %s10665_s22 = scalar_lea.hbm %s15351_s18, 512 }
 0x285   :  { %p10666_p0 = scmp.ne.s32.totalorder %s15351_s18, %s10665_s22  ;;  %p10669_p1 = scmp.lt.u32.totalorder %s10665_s22, %s15351_s18 }
 0x287   :  { %p10671_p2 = pnand %p10669_p1, %p10666_p0 }
 0x289   :  { %10674 = shalt.err (!%p10671_p2)
}
 0x28a   :  { %s10675_s19 = scalar_lea.vmem %s357_s4, 512  ;;  %p10680_p4 = scmp.lt.s32.totalorder %s357_s4, %s357_s4 }
 0x28b   :  { %p10676_p3 = scmp.ne.s32.totalorder %s357_s4, %s10675_s19  ;;  %p10681_p5 = scmp.lt.s32.totalorder %s10675_s19, %s10675_s19 }
 0x28d   :  { %p10682_p6 = por %p10681_p5, %p10680_p4 }
 0x28f   :  { %p10683_p7 = pnand %p10682_p6, %p10676_p3 }
 0x291   :  { %10686 = shalt.err (!%p10683_p7)
}
 0x292   :  { %s15352_s27 = sld [smem:[#allocation106_spill]]  ;;  %s11058_s23 = smov [#allocation34]  }
 0x293   :  { %362 = dma.hbm_to_vmem [thread:$0]  %s15351_s18, 512, %s357_s4, [#allocation30], %s11030_s26, %s11030_s26, %s11031_s6  }
 0x294   :  { %s379_s21 = sshll.u32 %s11058_s23, 4  ;;  %s11059_s17 = smov [#allocation37]   ;;  %s380_s21 = int_to_ptr.vmem [resolvable:$true] %s379_s21 }
 0x295   :  { %s399_s0 = sshll.u32 %s11059_s17, 4  ;;  %s400_s0 = int_to_ptr.vmem [resolvable:$true] %s399_s0 }
 0x298   :  { %s10687_s30 = scalar_lea.hbm %s15352_s27, 64 }
 0x299   :  { %p10688_p8 = scmp.ne.s32.totalorder %s15352_s27, %s10687_s30  ;;  %p10691_p9 = scmp.lt.u32.totalorder %s10687_s30, %s15352_s27 }
 0x29b   :  { %p10693_p10 = pnand %p10691_p9, %p10688_p8 }
 0x29d   :  { %10696 = shalt.err (!%p10693_p10)
}
 0x29e   :  { %s10697_s25 = scalar_lea.vmem %s380_s21, 64  ;;  %p10702_p12 = scmp.lt.s32.totalorder %s380_s21, %s380_s21 }
 0x29f   :  { %p10698_p11 = scmp.ne.s32.totalorder %s380_s21, %s10697_s25  ;;  %p10703_p13 = scmp.lt.s32.totalorder %s10697_s25, %s10697_s25 }
 0x2a1   :  { %p10704_p0 = por %p10703_p13, %p10702_p12 }
 0x2a3   :  { %p10705_p1 = pnand %p10704_p0, %p10698_p11 }
 0x2a5   :  { %10708 = shalt.err (!%p10705_p1)
}
 0x2a6   :  { %s15353_s28 = sld [smem:[#allocation107_spill]] }
 0x2a7   :  { %382 = dma.hbm_to_vmem [thread:$0]  %s15352_s27, 64, %s380_s21, [#allocation33]  }
 0x2ac   :  { %s10709_s5 = scalar_lea.hbm %s15353_s28, 32 }
 0x2ad   :  { %p10710_p2 = scmp.ne.s32.totalorder %s15353_s28, %s10709_s5  ;;  %p10713_p3 = scmp.lt.u32.totalorder %s10709_s5, %s15353_s28 }
 0x2af   :  { %p10715_p4 = pnand %p10713_p3, %p10710_p2 }
 0x2b1   :  { %10718 = shalt.err (!%p10715_p4)
}
 0x2b2   :  { %s10719_s1 = scalar_lea.vmem %s400_s0, 32  ;;  %p10724_p6 = scmp.lt.s32.totalorder %s400_s0, %s400_s0 }
 0x2b3   :  { %p10720_p5 = scmp.ne.s32.totalorder %s400_s0, %s10719_s1  ;;  %p10725_p7 = scmp.lt.s32.totalorder %s10719_s1, %s10719_s1 }
 0x2b5   :  { %p10726_p8 = por %p10725_p7, %p10724_p6 }
 0x2b7   :  { %p10727_p9 = pnand %p10726_p8, %p10720_p5 }
 0x2b9   :  { %10730 = shalt.err (!%p10727_p9)
}
 0x2ba   :  { %s15354_s2 = sld [smem:[#allocation108_spill]]  ;;  %s11060_s7 = smov [#allocation40]  }
 0x2bb   :  { %402 = dma.hbm_to_vmem [thread:$0]  %s15353_s28, 32, %s400_s0, [#allocation36]  }
 0x2bc   :  { %s421_s13 = sshll.u32 %s11060_s7, 4  ;;  %s11061_s10 = smov [#allocation43]   ;;  %s422_s13 = int_to_ptr.vmem [resolvable:$true] %s421_s13 }
 0x2bd   :  { %s443_s20 = sshll.u32 %s11061_s10, 4  ;;  %s444_s20 = int_to_ptr.vmem [resolvable:$true] %s443_s20 }
 0x2c0   :  { %s10731_s9 = scalar_lea.hbm %s15354_s2, 16 }
 0x2c1   :  { %p10732_p10 = scmp.ne.s32.totalorder %s15354_s2, %s10731_s9  ;;  %p10735_p11 = scmp.lt.u32.totalorder %s10731_s9, %s15354_s2 }
 0x2c3   :  { %p10737_p12 = pnand %p10735_p11, %p10732_p10 }
 0x2c5   :  { %10740 = shalt.err (!%p10737_p12)
}
 0x2c6   :  { %s10741_s14 = scalar_lea.vmem %s422_s13, 16  ;;  %s10745_s11 = scalar_lea.vmem %s422_s13, 32 }
 0x2c7   :  { %p10742_p13 = scmp.ne.s32.totalorder %s422_s13, %s10741_s14  ;;  %p10746_p0 = scmp.lt.s32.totalorder %s422_s13, %s422_s13 }
 0x2c8   :  { %p10747_p1 = scmp.lt.s32.totalorder %s10745_s11, %s10741_s14 }
 0x2ca   :  { %p10748_p2 = por %p10747_p1, %p10746_p0 }
 0x2cc   :  { %p10749_p3 = pnand %p10748_p2, %p10742_p13 }
 0x2ce   :  { %10752 = shalt.err (!%p10749_p3)
}
 0x2cf   :  { %s15355_s15 = sld [smem:[#allocation110_spill]] }
 0x2d0   :  { %424 = dma.hbm_to_vmem [thread:$0]  %s15354_s2, 16, %s422_s13, [#allocation39]  }
 0x2d5   :  { %s10753_s24 = scalar_lea.hbm %s15355_s15, 32 }
 0x2d6   :  { %p10754_p4 = scmp.ne.s32.totalorder %s15355_s15, %s10753_s24  ;;  %p10757_p5 = scmp.lt.u32.totalorder %s10753_s24, %s15355_s15 }
 0x2d8   :  { %p10759_p6 = pnand %p10757_p5, %p10754_p4 }
 0x2da   :  { %10762 = shalt.err (!%p10759_p6)
}
 0x2db   :  { %s10763_s4 = scalar_lea.vmem %s444_s20, 32  ;;  %p10768_p8 = scmp.lt.s32.totalorder %s444_s20, %s444_s20 }
 0x2dc   :  { %p10764_p7 = scmp.ne.s32.totalorder %s444_s20, %s10763_s4  ;;  %p10769_p9 = scmp.lt.s32.totalorder %s10763_s4, %s10763_s4 }
 0x2de   :  { %p10770_p10 = por %p10769_p9, %p10768_p8 }
 0x2e0   :  { %p10771_p11 = pnand %p10770_p10, %p10764_p7 }
 0x2e2   :  { %10774 = shalt.err (!%p10771_p11)
}
 0x2e3   :  { %s15356_s29 = sld [smem:[#allocation112_spill]]  ;;  %s11062_s16 = smov [#allocation46]  }
 0x2e4   :  { %446 = dma.hbm_to_vmem [thread:$0]  %s15355_s15, 32, %s444_s20, [#allocation42]  }
 0x2e5   :  { %s464_s18 = sshll.u32 %s11062_s16, 4  ;;  %s11063_s22 = smov [#allocation49]   ;;  %s465_s18 = int_to_ptr.vmem [resolvable:$true] %s464_s18 }
 0x2e6   :  { %s487_s19 = sshll.u32 %s11063_s22, 4  ;;  %s488_s19 = int_to_ptr.vmem [resolvable:$true] %s487_s19 }
 0x2e9   :  { %s10775_s27 = scalar_lea.hbm %s15356_s29, 512 }
 0x2ea   :  { %p10776_p12 = scmp.ne.s32.totalorder %s15356_s29, %s10775_s27  ;;  %p10779_p13 = scmp.lt.u32.totalorder %s10775_s27, %s15356_s29 }
 0x2ec   :  { %p10781_p0 = pnand %p10779_p13, %p10776_p12 }
 0x2ee   :  { %10784 = shalt.err (!%p10781_p0)
}
 0x2ef   :  { %s10785_s23 = scalar_lea.vmem %s465_s18, 512  ;;  %p10790_p2 = scmp.lt.s32.totalorder %s465_s18, %s465_s18 }
 0x2f0   :  { %p10786_p1 = scmp.ne.s32.totalorder %s465_s18, %s10785_s23  ;;  %p10791_p3 = scmp.lt.s32.totalorder %s10785_s23, %s10785_s23 }
 0x2f2   :  { %p10792_p4 = por %p10791_p3, %p10790_p2 }
 0x2f4   :  { %p10793_p5 = pnand %p10792_p4, %p10786_p1 }
 0x2f6   :  { %10796 = shalt.err (!%p10793_p5)
}
 0x2f7   :  { %s15357_s21 = sld [smem:[#allocation114_spill]] }
 0x2f8   :  { %470 = dma.hbm_to_vmem [thread:$0]  %s15356_s29, 512, %s465_s18, [#allocation45], %s11030_s26, %s11030_s26, %s11031_s6  }
 0x2fd   :  { %s10797_s17 = scalar_lea.hbm %s15357_s21, 64 }
 0x2fe   :  { %p10798_p6 = scmp.ne.s32.totalorder %s15357_s21, %s10797_s17  ;;  %p10801_p7 = scmp.lt.u32.totalorder %s10797_s17, %s15357_s21 }
 0x300   :  { %p10803_p8 = pnand %p10801_p7, %p10798_p6 }
 0x302   :  { %10806 = shalt.err (!%p10803_p8)
}
 0x303   :  { %s10807_s0 = scalar_lea.vmem %s488_s19, 64  ;;  %p10812_p10 = scmp.lt.s32.totalorder %s488_s19, %s488_s19 }
 0x304   :  { %p10808_p9 = scmp.ne.s32.totalorder %s488_s19, %s10807_s0  ;;  %p10813_p11 = scmp.lt.s32.totalorder %s10807_s0, %s10807_s0 }
 0x306   :  { %p10814_p12 = por %p10813_p11, %p10812_p10 }
 0x308   :  { %p10815_p13 = pnand %p10814_p12, %p10808_p9 }
 0x30a   :  { %10818 = shalt.err (!%p10815_p13)
}
 0x30b   :  { %s15358_s30 = sld [smem:[#allocation116_spill]]  ;;  %s11064_s25 = smov [#allocation52]  }
 0x30c   :  { %490 = dma.hbm_to_vmem [thread:$0]  %s15357_s21, 64, %s488_s19, [#allocation48]  }
 0x30d   :  { %s507_s26 = sshll.u32 %s11064_s25, 4  ;;  %s11065_s6 = smov [#allocation55]   ;;  %s508_s26 = int_to_ptr.vmem [resolvable:$true] %s507_s26 }
 0x30e   :  { %s529_s28 = sshll.u32 %s11065_s6, 4  ;;  %s530_s28 = int_to_ptr.vmem [resolvable:$true] %s529_s28 }
 0x311   :  { %s10819_s5 = scalar_lea.hbm %s15358_s30, 32 }
 0x312   :  { %p10820_p0 = scmp.ne.s32.totalorder %s15358_s30, %s10819_s5  ;;  %p10823_p1 = scmp.lt.u32.totalorder %s10819_s5, %s15358_s30 }
 0x314   :  { %p10825_p2 = pnand %p10823_p1, %p10820_p0 }
 0x316   :  { %10828 = shalt.err (!%p10825_p2)
}
 0x317   :  { %s10829_s1 = scalar_lea.vmem %s508_s26, 32  ;;  %p10834_p4 = scmp.lt.s32.totalorder %s508_s26, %s508_s26 }
 0x318   :  { %p10830_p3 = scmp.ne.s32.totalorder %s508_s26, %s10829_s1  ;;  %p10835_p5 = scmp.lt.s32.totalorder %s10829_s1, %s10829_s1 }
 0x31a   :  { %p10836_p6 = por %p10835_p5, %p10834_p4 }
 0x31c   :  { %p10837_p7 = pnand %p10836_p6, %p10830_p3 }
 0x31e   :  { %10840 = shalt.err (!%p10837_p7)
}
 0x31f   :  { %s15359_s2 = sld [smem:[#allocation119_spill]] }
 0x320   :  { %510 = dma.hbm_to_vmem [thread:$0]  %s15358_s30, 32, %s508_s26, [#allocation51]  }
 0x325   :  { %s10841_s7 = scalar_lea.hbm %s15359_s2, 32 }
 0x326   :  { %p10842_p8 = scmp.ne.s32.totalorder %s15359_s2, %s10841_s7  ;;  %p10845_p9 = scmp.lt.u32.totalorder %s10841_s7, %s15359_s2 }
 0x328   :  { %p10847_p10 = pnand %p10845_p9, %p10842_p8 }
 0x32a   :  { %10850 = shalt.err (!%p10847_p10)
}
 0x32b   :  { %s10851_s13 = scalar_lea.vmem %s530_s28, 32  ;;  %p10856_p12 = scmp.lt.s32.totalorder %s530_s28, %s530_s28 }
 0x32c   :  { %p10852_p11 = scmp.ne.s32.totalorder %s530_s28, %s10851_s13  ;;  %p10857_p13 = scmp.lt.s32.totalorder %s10851_s13, %s10851_s13 }
 0x32e   :  { %p10858_p0 = por %p10857_p13, %p10856_p12 }
 0x330   :  { %p10859_p1 = pnand %p10858_p0, %p10852_p11 }
 0x332   :  { %10862 = shalt.err (!%p10859_p1)
}
 0x333   :  { %s15360_s10 = sld [smem:[#allocation122_spill]]  ;;  %s11066_s20 = smov [#allocation58]  }
 0x334   :  { %532 = dma.hbm_to_vmem [thread:$0]  %s15359_s2, 32, %s530_s28, [#allocation54]  }
 0x335   :  { %s551_s9 = sshll.u32 %s11066_s20, 4  ;;  %s11067_s14 = smov [#allocation61]   ;;  %s552_s9 = int_to_ptr.vmem [resolvable:$true] %s551_s9 }
 0x336   :  { %s573_s11 = sshll.u32 %s11067_s14, 4  ;;  %s574_s11 = int_to_ptr.vmem [resolvable:$true] %s573_s11 }
 0x339   :  { %s10863_s15 = scalar_lea.hbm %s15360_s10, 32 }
 0x33a   :  { %p10864_p2 = scmp.ne.s32.totalorder %s15360_s10, %s10863_s15  ;;  %p10867_p3 = scmp.lt.u32.totalorder %s10863_s15, %s15360_s10 }
 0x33c   :  { %p10869_p4 = pnand %p10867_p3, %p10864_p2 }
 0x33e   :  { %10872 = shalt.err (!%p10869_p4)
}
 0x33f   :  { %s10873_s24 = scalar_lea.vmem %s552_s9, 32  ;;  %p10878_p6 = scmp.lt.s32.totalorder %s552_s9, %s552_s9 }
 0x340   :  { %p10874_p5 = scmp.ne.s32.totalorder %s552_s9, %s10873_s24  ;;  %p10879_p7 = scmp.lt.s32.totalorder %s10873_s24, %s10873_s24 }
 0x342   :  { %p10880_p8 = por %p10879_p7, %p10878_p6 }
 0x344   :  { %p10881_p9 = pnand %p10880_p8, %p10874_p5 }
 0x346   :  { %10884 = shalt.err (!%p10881_p9)
}
 0x347   :  { %554 = dma.hbm_to_vmem [thread:$0]  %s15360_s10, 32, %s552_s9, [#allocation57]  }
 0x348   :  { %s10885_s4 = scalar_lea.hbm %s11366_s12, 32 }
 0x349   :  { %p10886_p10 = scmp.ne.s32.totalorder %s11366_s12, %s10885_s4  ;;  %p10889_p11 = scmp.lt.u32.totalorder %s10885_s4, %s11366_s12 }
 0x34b   :  { %p10891_p12 = pnand %p10889_p11, %p10886_p10 }
 0x34d   :  { %10894 = shalt.err (!%p10891_p12)
}
 0x34e   :  { %s10895_s29 = scalar_lea.vmem %s574_s11, 32  ;;  %p10900_p0 = scmp.lt.s32.totalorder %s574_s11, %s574_s11 }
 0x34f   :  { %p10896_p13 = scmp.ne.s32.totalorder %s574_s11, %s10895_s29  ;;  %p10901_p1 = scmp.lt.s32.totalorder %s10895_s29, %s10895_s29 }
 0x351   :  { %p10902_p2 = por %p10901_p1, %p10900_p0 }
 0x353   :  { %p10903_p3 = pnand %p10902_p2, %p10896_p13 }
 0x355   :  { %10906 = shalt.err (!%p10903_p3)
}
 0x356   :  { %576 = dma.hbm_to_vmem [thread:$0]  %s11366_s12, 32, %s574_s11, [#allocation60]  }
 0x357   :  { %10929 = dma.done.wait [#allocation3], 16  }
 0x358   :  { %10930 = vsyncadd [#allocation3], 4294967280 }
 0x359   :  { %10931 = dma.done.wait [#allocation6], 32  }
 0x35a   :  { %10932 = vsyncadd [#allocation6], 4294967264 }
 0x35b   :  { %10933 = dma.done.wait [#allocation9], 64  }
 0x35c   :  { %10934 = vsyncadd [#allocation9], 4294967232 }
 0x35d   :  { %10935 = dma.done.wait [#allocation12], 528  }
 0x35e   :  { %10936 = vsyncadd [#allocation12], 4294966768 }
 0x35f   :  { %10937 = dma.done.wait [#allocation15], 528  }
 0x360   :  { %10938 = vsyncadd [#allocation15], 4294966768 }
 0x361   :  { %10939 = dma.done.wait [#allocation18], 288  }
 0x362   :  { %10940 = vsyncadd [#allocation18], 4294967008 }
 0x363   :  { %10941 = dma.done.wait [#allocation21], 48  }
 0x364   :  { %10942 = vsyncadd [#allocation21], 4294967248 }
 0x365   :  { %10943 = dma.done.wait [#allocation24], 32  }
 0x366   :  { %10944 = vsyncadd [#allocation24], 4294967264 }
 0x367   :  { %10945 = dma.done.wait [#allocation27], 544  }
 0x368   :  { %10946 = vsyncadd [#allocation27], 4294966752 }
 0x369   :  { %10947 = dma.done.wait [#allocation30], 528  }
 0x36a   :  { %10948 = vsyncadd [#allocation30], 4294966768 }
 0x36b   :  { %10949 = dma.done.wait [#allocation33], 80  }
 0x36c   :  { %10950 = vsyncadd [#allocation33], 4294967216 }
 0x36d   :  { %10951 = dma.done.wait [#allocation36], 48  }
 0x36e   :  { %10952 = vsyncadd [#allocation36], 4294967248 }
 0x36f   :  { %10953 = dma.done.wait [#allocation39], 528  }
 0x370   :  { %10954 = vsyncadd [#allocation39], 4294966768 }
 0x371   :  { %10955 = dma.done.wait [#allocation42], 64  }
 0x372   :  { %10956 = vsyncadd [#allocation42], 4294967232 }
 0x373   :  { %10957 = dma.done.wait [#allocation45], 528  }
 0x374   :  { %10958 = vsyncadd [#allocation45], 4294966768 }
 0x375   :  { %10959 = dma.done.wait [#allocation48], 80  }
 0x376   :  { %10960 = vsyncadd [#allocation48], 4294967216 }
 0x377   :  { %10961 = dma.done.wait [#allocation51], 48  }
 0x378   :  { %10962 = vsyncadd [#allocation51], 4294967248 }
 0x379   :  { %10963 = dma.done.wait [#allocation54], 48  }
 0x37a   :  { %10964 = vsyncadd [#allocation54], 4294967248 }
 0x37b   :  { %10965 = dma.done.wait [#allocation57], 48  }
 0x37c   :  { %10966 = vsyncadd [#allocation57], 4294967248 }
 0x37d   :  { %10967 = dma.done.wait [#allocation60], 48  }
 0x37e   :  { %10968 = vsyncadd [#allocation60], 4294967248  ;;  %s15361_s12 = sld [smem:[#allocation91_spill]]  ;;  %s15362_s16 = sld [smem:[#allocation90_spill]]  ;;  %v15253_v0 = vlaneseq  ;;  %v15249_v1 = vmov 0.0|0.0   ;;  %vm15277_vm0 = vmmov 0  }
 0x37f   :  { %s15363_s18 = sld [smem:[#allocation88_spill]]  ;;  %9549 = vmatprep.subr.bf16.mxu0 %v15249_v1  ;;  %v15251_v2 = vmov 0.0   ;;  %9552 = vmatprep.subr.bf16.mxu1 %v15249_v1  ;;  %s15366_s22 = sld [smem:[#allocation93_spill]]  ;;  %vm831_vm1 = vcmask 130048   ;;  %v8966_v21 = vld [vmem:[#allocation2] ss:$0 sm:$0xff] }
 0x380   :  { %9228 = vmatprep.mubr.msk.f32.mxu0 %vm15277_vm0, %v15251_v2  ;;  %v11554_v3 = vshrl.u32 %v15253_v0, 7  ;;  %9239 = vmatprep.mubr.msk.f32.mxu1 %vm15277_vm0, %v15251_v2  ;;  %s15368_s19 = sld [smem:[#allocation94_spill]]  ;;  %vm15279_vm2 = vcmask 261120   ;;  %v708_v40 = vld [vmem:[#allocation8] sm:$0x3]  ;;  %v710_v59 = vld [vmem:[#allocation11] sm:$0xff] }
 0x381   :  { %v8968_v41 = vld [vmem:[#allocation5] ss:$0 sm:$0xff]  ;;  %v711_v60 = vld [vmem:[#allocation11 + $0x8] sm:$0xff]  ;;  %v712_v61 = vld [vmem:[#allocation11 + $0x10] sm:$0xff]  ;;  %s15369_s27 = sld [smem:[#allocation89_spill]]  ;;  %vm1294_vm3 = vcmask 1043456  }
 0x382   :  { %15364 = vst [vmem:[#allocation123_spill] sm:$0xff] %v11554_v3  ;;  %v11560_v4 = vsub.s32 0, %v11554_v3  ;;  %v11563_v5 = vsub.s32 1, %v11554_v3  ;;  %v9565_v62 = vpack.c.bf16 %v711_v60, %v710_v59  ;;  %v713_v63 = vld [vmem:[#allocation11 + $0x18] sm:$0xff]  ;;  %s15370_s23 = sld [smem:[#allocation101_spill]]  ;;  %vm11071_vm4 = vmmov 1  }
 0x383   :  { %vm9578_vm5 = vmpackc.low %vm1294_vm3, %vm11071_vm4  ;;  %vm1290_vm6 = vcmask 97280   ;;  %s15371_s21 = sld [smem:[#allocation102_spill]]  ;;  %vm15276_vm7 = vcmask 523264   ;;  %s15372_s17 = sld [smem:[#allocation84_spill]] }
 0x384   :  { %15365 = vst [vmem:[#allocation124_spill] sm:$0xff] %v11560_v4  ;;  %15367 = vst [vmem:[#allocation125_spill] sm:$0xff] %v11563_v5  ;;  %v695_v6 = vld [vmem:[%s15361_s12] sm:$0xff]  ;;  %v696_v7 = vld [vmem:[%s15361_s12 + $0x8] sm:$0xff]  ;;  %v997_v42 = vrot.slane %v708_v40, %v11560_v4  ;;  %v1002_v45 = vrot.slane %v708_v40, %v11563_v5  ;;  %s11072_s0 = smov 64   ;;  %s11073_s30 = smov 80  }
 0x385   :  { %v694_v8 = vld [vmem:[%s15362_s16] sm:$0x3]  ;;  %v9550_v9 = vpack.c.bf16 %v696_v7, %v695_v6  ;;  %v699_v16 = vld [vmem:[%s15366_s22 + $0x8] sm:$0xff]  ;;  %v700_v17 = vld [vmem:[%s15366_s22 + $0x10] sm:$0xff]  ;;  %v9568_v6 = vpack.c.bf16 %v713_v63, %v712_v61  ;;  %s11074_s25 = smov 72   ;;  %s11075_s26 = smov 88  }
 0x386   :  { %v814_v10 = vld [vmem:[%s15363_s18] sm:$0xff]  ;;  %v818_v11 = vrot.slane %v694_v8, %v11560_v4  ;;  %v823_v12 = vrot.slane %v694_v8, %v11563_v5  ;;  %v701_v19 = vld [vmem:[%s15366_s22 + $0x18] sm:$0xff]  ;;  %v704_v35 = vld [vmem:[%s15368_s19 + $0x8] sm:$0xff]  ;;  %s11076_s6 = smov 32   ;;  %s11078_s28 = smov 56  }
 0x387   :  { %9551 = vmatpush3.bf16.msra.mxu0 %v9550_v9  ;;  %v698_v15 = vld [vmem:[%s15366_s22] sm:$0xff]  ;;  %v9556_v20 = vpack.c.bf16 %v701_v19, %v700_v17  ;;  %v705_v36 = vld [vmem:[%s15368_s19 + $0x10] sm:$0xff]  ;;  %v706_v38 = vld [vmem:[%s15368_s19 + $0x18] sm:$0xff]  ;;  %s11079_s5 = smov 48   ;;  %s11080_s1 = smov 40  }
 0x388   :  { %v819_v13 = vmul.f32 %v818_v11, %v814_v10  ;;  %9558 = vmatprep.subr.bf16.mxu0 %v15249_v1  ;;  %v9553_v18 = vpack.c.bf16 %v699_v16, %v698_v15  ;;  %v703_v34 = vld [vmem:[%s15368_s19] sm:$0xff]  ;;  %v9562_v39 = vpack.c.bf16 %v706_v38, %v705_v36  ;;  %v715_v7 = vld [vmem:[#allocation14] sm:$0xff]  ;;  %v716_v8 = vld [vmem:[#allocation14 + $0x8] sm:$0xff]  ;;  %s15439_s2 = sld [smem:[#allocation86_spill]]  ;;  %s11081_s7 = smov 96  }
 0x389   :  { %v9559_v37 = vpack.c.bf16 %v704_v35, %v703_v34  ;;  %v9571_v9 = vpack.c.bf16 %v716_v8, %v715_v7  ;;  %v709_v10 = vld [vmem:[#allocation10] sm:$0x3]  ;;  %v8970_v11 = vld [vmem:[#allocation7] ss:$0 sm:$0xff]  ;;  %v717_v38 = vld [vmem:[#allocation14 + $0x10] sm:$0xff]  ;;  %s15481_s13 = sld [smem:[#allocation87_spill]] }
 0x38a   :  { %v824_v14 = vadd.f32 %v823_v12, %v819_v13  ;;  %9554 = vmatpush3.bf16.msra.mxu1 %v9553_v18  ;;  %v1096_v12 = vrot.slane %v709_v10, %v11560_v4  ;;  %v1101_v15 = vrot.slane %v709_v10, %v11563_v5  ;;  %v730_v59 = vld [vmem:[%s15370_s23 + $0x28] sm:$0xff]  ;;  %v731_v63 = vld [vmem:[%s15370_s23 + $0x30] sm:$0xff]  ;;  %s15493_s10 = sld [smem:[#allocation109_spill]]  ;;  %s15499_s9 = sld [smem:[#allocation111_spill]] }
 0x38b   :  { %9555 = vmatprep.subr.bf16.mxu1 %v15249_v1  ;;  %s15496_s20 = sld [smem:[#allocation85_spill]]  ;;  %s15577_s11 = sld [smem:[#allocation120_spill]] }
 0x38c   :  { %9229 = vmatmul.mubr.msk.f32.vlgmr.msra.gmra.mrb[0].mxu0 %vm831_vm1, %v824_v14  ;;  %s15571_s14 = sld [smem:[#allocation117_spill]] }
 0x38d   :  { %9250 = vmatprep.mubr.msk.f32.mxu0 %vm15277_vm0, %v15251_v2  ;;  %9560 = vmatpush3.bf16.msra.mxu0 %v9559_v37 }
 0x38e   :  { %9557 = vmatpush3.bf16.msra.mxu1 %v9556_v20  ;;  %9561 = vmatprep.subr.bf16.mxu0 %v15249_v1 }
 0x38f   :  { %9564 = vmatprep.subr.bf16.mxu1 %v15249_v1 }
 0x391   :  { %9563 = vmatpush3.bf16.msra.mxu0 %v9562_v39  ;;  %v718_v39 = vld [vmem:[#allocation14 + $0x18] sm:$0xff] }
 0x392   :  { %9570 = vmatprep.subr.bf16.mxu0 %v15249_v1  ;;  %v9574_v40 = vpack.c.bf16 %v718_v39, %v717_v38  ;;  %v807_v39 = vld [vmem:[%s15372_s17] sm:$0xff] }
 0x45f   :  { %v901_v22 = vpop.f32.mrb[0].mxu0 }
 0x460   :  { %v902_v23 = vadd.f32 %v8966_v21, %v901_v22  ;;  %v9230_v24 = vpop.f32.mrb[1].mxu0 }
 0x462   :  { %v906_v25 = vmul.f32 0.044715, %v902_v23  ;;  %v905_v31 = vmul.f32 0.5, %v902_v23 }
 0x464   :  { %v907_v26 = vmul.f32 %v906_v25, %v902_v23  ;;  %v720_v25 = vld [vmem:[#allocation17] sm:$0x3] }
 0x465   :  { %v1282_v34 = vrot.slane %v720_v25, %v11563_v5 }
 0x466   :  { %v908_v27 = vmul.f32 %v907_v26, %v902_v23  ;;  %v1277_v26 = vrot.slane %v720_v25, %v11560_v4  ;;  %v8979_v25 = vld [vmem:[#allocation23] ss:$0 sm:$0xff] }
 0x468   :  { %v909_v28 = vadd.f32 %v908_v27, %v902_v23  ;;  %v1273_v27 = vld [vmem:[%s15369_s27] sm:$0xff] }
 0x46a   :  { %v910_v29 = vmul.f32 0.7978846, %v909_v28  ;;  %v721_v28 = vld [vmem:[#allocation19] sm:$0xff] }
 0x46c   :  { %9907 = vtanh.f32 %v910_v29  ;;  %v722_v29 = vld [vmem:[#allocation19 + $0x8] sm:$0xf] }
 0x46d   :  { %v9577_v35 = vpack.c.bf16 %v722_v29, %v721_v28 }
 0x476   :  { %v9908_v30 = vpop.eup %9907 }
 0x477   :  { %v912_v32 = vadd.f32 1.0, %v9908_v30 }
 0x479   :  { %v913_v33 = vmul.f32 %v912_v32, %v905_v31 }
 0x47b   :  { %9240 = vmatmul.mubr.msk.f32.vlgmr.msra.gmra.mrb[0].mxu1 %vm15279_vm2, %v913_v33  ;;  %v1278_v33 = vmul.f32 %v1277_v26, %v1273_v27 }
 0x47c   :  { %9261 = vmatprep.mubr.msk.f32.mxu1 %vm15277_vm0, %v15251_v2  ;;  %9566 = vmatpush3.bf16.msra.mxu1 %v9565_v62 }
 0x47d   :  { %9567 = vmatprep.subr.bf16.mxu1 %v15249_v1  ;;  %v1283_v37 = vadd.f32 %v1282_v34, %v1278_v33 }
 0x480   :  { %9569 = vmatpush3.bf16.msra.mxu1 %v9568_v6  ;;  %v732_v6 = vld [vmem:[%s15370_s23 + $0x38] sm:$0xff] }
 0x481   :  { %9576 = vmatprep.subr.bf16.mxu1 %v15249_v1  ;;  %v9590_v8 = vpack.c.bf16 %v732_v6, %v731_v63  ;;  %v8975_v63 = vld [vmem:[#allocation16] ss:$0 sm:$0xff] }
 0x54e   :  { %v990_v43 = vpop.f32.mrb[0].mxu1 }
 0x54f   :  { %v991_v44 = vadd.f32 %v8968_v41, %v990_v43  ;;  %v9241_v46 = vpop.f32.mrb[1].mxu1  ;;  %v725_v41 = vld [vmem:[%s15370_s23] sm:$0xff]  ;;  %v8972_v43 = vld [vmem:[#allocation13] ss:$0 sm:$0xff] }
 0x551   :  { %v998_v47 = vmul.f32 %v997_v42, %v991_v44  ;;  %v726_v42 = vld [vmem:[%s15370_s23 + $0x8] sm:$0xff] }
 0x552   :  { %v9581_v46 = vpack.c.bf16 %v726_v42, %v725_v41  ;;  %v741_v41 = vld [vmem:[#allocation28 + $0x8] sm:$0xff]  ;;  %v742_v42 = vld [vmem:[#allocation28 + $0x10] sm:$0xff] }
 0x553   :  { %v1003_v48 = vadd.f32 %v1002_v45, %v998_v47  ;;  %v724_v45 = vld [vmem:[#allocation22] sm:$0x3] }
 0x555   :  { %v1004_v49 = vadd.f32 %v1003_v48, %v902_v23 }
 0x557   :  { %v1006_v50 = vmul.f32 0.044715, %v1004_v49  ;;  %v1005_v56 = vmul.f32 0.5, %v1004_v49 }
 0x559   :  { %v1007_v51 = vmul.f32 %v1006_v50, %v1004_v49  ;;  %v728_v50 = vld [vmem:[%s15370_s23 + $0x18] sm:$0xff] }
 0x55b   :  { %v1008_v52 = vmul.f32 %v1007_v51, %v1004_v49  ;;  %v8976_v51 = vld [vmem:[#allocation20] ss:$0 sm:$0xff] }
 0x55d   :  { %v1009_v53 = vadd.f32 %v1008_v52, %v1004_v49  ;;  %v727_v49 = vld [vmem:[%s15370_s23 + $0x10] sm:$0xff]  ;;  %v1371_v52 = vrot.slane %v724_v45, %v11560_v4 }
 0x55f   :  { %v1010_v54 = vmul.f32 0.7978846, %v1009_v53 }
 0x561   :  { %9909 = vtanh.f32 %v1010_v54  ;;  %v9584_v54 = vpack.c.bf16 %v728_v50, %v727_v49 }
 0x56b   :  { %v9910_v55 = vpop.eup %9909 }
 0x56c   :  { %v1012_v57 = vadd.f32 1.0, %v9910_v55 }
 0x56e   :  { %v1013_v58 = vmul.f32 %v1012_v57, %v1005_v56  ;;  %v1376_v56 = vrot.slane %v724_v45, %v11563_v5 }
 0x570   :  { %9251 = vmatmul.mubr.msk.f32.vlgmr.msra.gmra.mrb[2].mxu0 %vm15279_vm2, %v1013_v58 }
 0x571   :  { %9272 = vmatprep.mubr.msk.f32.mxu0 %vm15277_vm0, %v15251_v2  ;;  %9572 = vmatpush3.bf16.msra.mxu0 %v9571_v9 }
 0x572   :  { %9573 = vmatprep.subr.bf16.mxu0 %v15249_v1 }
 0x575   :  { %9575 = vmatpush3.bf16.msra.mxu0 %v9574_v40  ;;  %v740_v40 = vld [vmem:[#allocation28] sm:$0xff] }
 0x576   :  { %9580 = vmatprep.subr.bf16.mxu0 %v15249_v1 }
 0x643   :  { %v1089_v13 = vpop.f32.mrb[2].mxu0 }
 0x644   :  { %v1090_v14 = vadd.f32 %v8970_v11, %v1089_v13  ;;  %v9252_v16 = vpop.f32.mrb[3].mxu0 }
 0x646   :  { %v1097_v17 = vmul.f32 %v1096_v12, %v1090_v14 }
 0x648   :  { %v1102_v18 = vadd.f32 %v1101_v15, %v1097_v17  ;;  %v734_v17 = vld [vmem:[%s15371_s21] sm:$0xff] }
 0x64a   :  { %v1103_v19 = vadd.f32 %v1102_v18, %v1013_v58  ;;  %v729_v58 = vld [vmem:[%s15370_s23 + $0x20] sm:$0xff]  ;;  %v735_v18 = vld [vmem:[%s15371_s21 + $0x8] sm:$0xff] }
 0x64b   :  { %v9587_v61 = vpack.c.bf16 %v730_v59, %v729_v58 }
 0x64c   :  { %v1105_v20 = vmul.f32 0.044715, %v1103_v19  ;;  %v1104_v31 = vmul.f32 0.5, %v1103_v19 }
 0x64e   :  { %v1106_v21 = vmul.f32 %v1105_v20, %v1103_v19  ;;  %v9593_v20 = vpack.c.bf16 %v735_v18, %v734_v17  ;;  %v750_v17 = vld [vmem:[#allocation34] sm:$0xf]  ;;  %v11654_v18 = vsub.s32 2, %v11554_v3 }
 0x650   :  { %v1107_v22 = vmul.f32 %v1106_v21, %v1103_v19  ;;  %v737_v21 = vld [vmem:[%s15371_s21 + $0x18] sm:$0xff]  ;;  %15375 = vst [vmem:[#allocation128_spill] sm:$0xff] %v11654_v18 }
 0x652   :  { %v1108_v23 = vadd.f32 %v1107_v22, %v1103_v19  ;;  %v736_v19 = vld [vmem:[%s15371_s21 + $0x10] sm:$0xff] }
 0x653   :  { %v9596_v22 = vpack.c.bf16 %v737_v21, %v736_v19  ;;  %v2149_v19 = vrot.slane %v750_v17, %v11560_v4  ;;  %v2740_v21 = vrot.slane %v750_v17, %v11563_v5 }
 0x654   :  { %v1109_v24 = vmul.f32 0.7978846, %v1108_v23 }
 0x655   :  { %2151 = vrot.lane.b32.xlu1 %v2149_v19, %s11072_s0 }
 0x656   :  { %9911 = vtanh.f32 %v1109_v24 }
 0x659   :  { %2742 = vrot.lane.b32.xlu1 %v2740_v21, %s11074_s25 }
 0x660   :  { %v9912_v30 = vpop.eup %9911 }
 0x661   :  { %v1111_v32 = vadd.f32 1.0, %v9912_v30 }
 0x663   :  { %v11603_v36 = vmul.f32 %v1111_v32, %v1104_v31 }
 0x665   :  { %9262 = vmatmul.mubr.msk.f32.vlgmr.msra.gmra.mrb[2].mxu1 %vm15279_vm2, %v11603_v36 }
 0x666   :  { %9579 = vmatpush3.bf16.msk.msra.mxu1 %vm9578_vm5, %v9577_v35  ;;  %9279 = vmatprep.mubr.msk.f32.mxu1 %vm15277_vm0, %v15251_v2 }
 0x667   :  { %9592 = vmatprep.subr.bf16.mxu1 %v15249_v1 }
 0x669   :  { %9280 = vmatmul.mubr.msk.f32.vlgmr.msra.gmra.mrb[4].mxu1 %vm1290_vm6, %v1283_v37 }
 0x66a   :  { %9309 = vmatprep.mubr.msk.f32.mxu1 %vm15277_vm0, %v15251_v2  ;;  %9594 = vmatpush3.bf16.msra.mxu1 %v9593_v20  ;;  %v3313_v20 = vrot.slane %v750_v17, %v11654_v18 }
 0x66b   :  { %9595 = vmatprep.subr.bf16.mxu1 %v15249_v1 }
 0x66c   :  { %3315 = vrot.lane.b32.xlu0 %v3313_v20, %s11073_s30 }
 0x66e   :  { %9597 = vmatpush3.bf16.msra.mxu1 %v9596_v22  ;;  %v11663_v22 = vsub.s32 3, %v11554_v3 }
 0x670   :  { %15376 = vst [vmem:[#allocation129_spill] sm:$0xff] %v11663_v22 }
 0x738   :  { %v1188_v44 = vpop.f32.mrb[2].mxu1 }
 0x739   :  { %v1189_v47 = vadd.f32 %v8972_v43, %v1188_v44  ;;  %v9263_v48 = vpop.f32.mrb[3].mxu1  ;;  %v9610_v43 = vpack.c.bf16 %v741_v41, %v740_v40  ;;  %v743_v44 = vld [vmem:[#allocation28 + $0x18] sm:$0xff]  ;;  %v11685_v40 = vpop.permute.xlu0 %3315 }
 0x73a   :  { %v9614_v45 = vpack.c.bf16 %v743_v44, %v742_v42 }
 0x73b   :  { %9273 = vmatmul.mubr.msk.f32.vlgmr.msra.gmra.mrb[4].mxu0 %vm15279_vm2, %v1189_v47  ;;  %v8981_v47 = vld [vmem:[#allocation25] ss:$0 sm:$0xff] }
 0x73c   :  { %v1364_v53 = vpop.f32.mrb[4].mxu1  ;;  %9582 = vmatpush3.bf16.msra.mxu0 %v9581_v46  ;;  %9298 = vmatprep.mubr.msk.f32.mxu0 %vm15277_vm0, %v15251_v2  ;;  %v739_v46 = vld [vmem:[#allocation26] sm:$0x3] }
 0x73d   :  { %v1365_v55 = vadd.f32 %v8976_v51, %v1364_v53  ;;  %v9281_v57 = vpop.f32.mrb[5].mxu1  ;;  %9583 = vmatprep.subr.bf16.mxu0 %v15249_v1  ;;  %v1558_v48 = vrot.slane %v739_v46, %v11560_v4  ;;  %v1563_v51 = vrot.slane %v739_v46, %v11563_v5 }
 0x73f   :  { %v1372_v60 = vmul.f32 %v1371_v52, %v1365_v55 }
 0x740   :  { %9585 = vmatpush3.bf16.msra.mxu0 %v9584_v54 }
 0x741   :  { %v1377_v62 = vadd.f32 %v1376_v56, %v1372_v60  ;;  %9586 = vmatprep.subr.bf16.mxu0 %v15249_v1 }
 0x743   :  { %v1379_v7 = vmul.f32 0.044715, %v1377_v62  ;;  %v1378_v14 = vmul.f32 0.5, %v1377_v62 }
 0x744   :  { %9588 = vmatpush3.bf16.msra.mxu0 %v9587_v61 }
 0x745   :  { %v1380_v9 = vmul.f32 %v1379_v7, %v1377_v62  ;;  %9589 = vmatprep.subr.bf16.mxu0 %v15249_v1 }
 0x747   :  { %v1381_v10 = vmul.f32 %v1380_v9, %v1377_v62  ;;  %v746_v9 = vld [vmem:[#allocation31 + $0x8] sm:$0xff] }
 0x748   :  { %9591 = vmatpush3.bf16.msra.mxu0 %v9590_v8  ;;  %v745_v8 = vld [vmem:[#allocation31] sm:$0xff] }
 0x749   :  { %v1382_v11 = vadd.f32 %v1381_v10, %v1377_v62  ;;  %9611 = vmatprep.subr.bf16.mxu0 %v9610_v43 }
 0x74b   :  { %v1383_v12 = vmul.f32 0.7978846, %v1382_v11 }
 0x74d   :  { %9913 = vtanh.f32 %v1383_v12 }
 0x757   :  { %v9914_v13 = vpop.eup %9913 }
 0x758   :  { %v1385_v15 = vadd.f32 1.0, %v9914_v13  ;;  %v9602_v13 = vpack.c.bf16 %v746_v9, %v745_v8 }
 0x75a   :  { %v1386_v16 = vmul.f32 %v1385_v15, %v1378_v14  ;;  %v747_v14 = vld [vmem:[#allocation31 + $0x10] sm:$0xff]  ;;  %v748_v15 = vld [vmem:[#allocation31 + $0x18] sm:$0xff] }
 0x75c   :  { %9299 = vmatmul.mubr.msk.f32.vlgmr.msra.gmra.mrb[6].mxu0 %vm15276_vm7, %v1386_v16  ;;  %v808_v16 = vld [vmem:[%s15372_s17 + $0x8] sm:$0xff] }
 0x75d   :  { %9613 = vmatpush3.bf16.msra.mxu0 %v9610_v43 }
 0x75e   :  { %9615 = vmatprep.subr.bf16.mxu0 %v9614_v45 }
 0x761   :  { %9617 = vmatpush3.bf16.msra.mxu0 %v9614_v45 }
 0x80e   :  { %v1261_v23 = vpop.f32.mrb[4].mxu0 }
 0x80f   :  { %v9274_v24 = vpop.f32.mrb[5].mxu0  ;;  %v1265_v61 = vadd.f32 %v1261_v23, %v11603_v36  ;;  %v9606_v36 = vpack.c.bf16 %v748_v15, %v747_v14  ;;  %v3886_v23 = vrot.slane %v750_v17, %v11663_v22 }
 0x811   :  { %v11641_v10 = vadd.f32 %v8975_v63, %v1265_v61  ;;  %3888 = vrot.lane.b32.xlu1 %v3886_v23, %s11075_s26 }
 0x813   :  { %15373 = vst [vmem:[#allocation126_spill] sm:$0xff] %v11641_v10 }
 0x82f   :  { %v1463_v26 = vpop.f32.mrb[6].mxu0 }
 0x830   :  { %v1464_v27 = vadd.f32 %v8979_v25, %v1463_v26  ;;  %v9300_v28 = vpop.f32.mrb[7].mxu0  ;;  %v8985_v26 = vld [vmem:[#allocation32] ss:$0 sm:$0xff] }
 0x832   :  { %v1468_v29 = vmul.f32 0.044715, %v1464_v27  ;;  %v1467_v35 = vmul.f32 0.5, %v1464_v27 }
 0x834   :  { %v1469_v30 = vmul.f32 %v1468_v29, %v1464_v27 }
 0x836   :  { %v1470_v31 = vmul.f32 %v1469_v30, %v1464_v27 }
 0x838   :  { %v1471_v32 = vadd.f32 %v1470_v31, %v1464_v27  ;;  %v11077_v31 = vmov 1966171168  }
 0x83a   :  { %v1472_v33 = vmul.f32 0.7978846, %v1471_v32  ;;  %v1836_v32 = vunpack.c.l.s4 %v11077_v31 }
 0x83c   :  { %9915 = vtanh.f32 %v1472_v33  ;;  %v1837_v33 = vunpack.c.0.s8 %v1836_v32 }
 0x846   :  { %v9916_v34 = vpop.eup %9915 }
 0x847   :  { %v1474_v37 = vadd.f32 1.0, %v9916_v34  ;;  %v11678_v34 = vsub.s32 %v1837_v33, %v11554_v3 }
 0x849   :  { %v1475_v38 = vmul.f32 %v1474_v37, %v1467_v35  ;;  %15379 = vst [vmem:[#allocation132_spill] sm:$0xff] %v11678_v34 }
 0x84b   :  { %9310 = vmatmul.mubr.msk.f32.vlgmr.msra.gmra.mrb[6].mxu1 %vm15279_vm2, %v1475_v38 }
 0x84c   :  { %9316 = vmatprep.mubr.msk.f32.mxu1 %vm831_vm1, %v807_v39 }
 0x91e   :  { %v1551_v49 = vpop.f32.mrb[6].mxu1 }
 0x91f   :  { %v1552_v50 = vadd.f32 %v8981_v47, %v1551_v49  ;;  %v9311_v52 = vpop.f32.mrb[7].mxu1 }
 0x921   :  { %v1559_v53 = vmul.f32 %v1558_v48, %v1552_v50 }
 0x923   :  { %v1564_v54 = vadd.f32 %v1563_v51, %v1559_v53 }
 0x925   :  { %v1565_v55 = vadd.f32 %v1564_v54, %v1464_v27 }
 0x927   :  { %v1567_v56 = vmul.f32 0.044715, %v1565_v55  ;;  %v1566_v6 = vmul.f32 0.5, %v1565_v55 }
 0x929   :  { %v1568_v57 = vmul.f32 %v1567_v56, %v1565_v55 }
 0x92b   :  { %v1569_v58 = vmul.f32 %v1568_v57, %v1565_v55  ;;  %v11703_v57 = vpop.permute.xlu1 %2151 }
 0x92d   :  { %v1570_v59 = vadd.f32 %v1569_v58, %v1565_v55 }
 0x92f   :  { %v1571_v60 = vmul.f32 0.7978846, %v1570_v59 }
 0x931   :  { %9917 = vtanh.f32 %v1571_v60 }
 0x93b   :  { %v9918_v62 = vpop.eup %9917 }
 0x93c   :  { %v1573_v7 = vadd.f32 1.0, %v9918_v62 }
 0x93e   :  { %v11643_v11 = vmul.f32 %v1573_v7, %v1566_v6 }
 0x940   :  { %15374 = vst [vmem:[#allocation127_spill] sm:$0xff] %v11643_v11  ;;  %v9598_v12 = vpack.c.bf16 %v11643_v11, %v11641_v10 }
 0x942   :  { %9599 = vmatprep.subr.bf16.mxu1 %v9598_v12 }
 0x943   :  { %9601 = vmatpush3.bf16.msra.mxu1 %v9598_v12 }
 0x944   :  { %9603 = vmatprep.subr.bf16.mxu1 %v9602_v13 }
 0x946   :  { %9317 = vmatmul.mubr.msk.f32.vlgmr.msra.gmra.mrb[8].mxu1 %vm831_vm1, %v808_v16 }
 0x947   :  { %9605 = vmatpush3.bf16.msra.mxu1 %v9602_v13  ;;  %9327 = vmatprep.mubr.msk.f32.mxu1 %vm15279_vm2, %v11641_v10 }
 0x948   :  { %9607 = vmatprep.subr.bf16.mxu1 %v9606_v36 }
 0x94b   :  { %9609 = vmatpush3.bf16.msra.mxu1 %v9606_v36 }
 0x94e   :  { %9328 = vmatmul.mubr.msk.f32.vlgmr.msra.gmra.mrb[10].mxu1 %vm15279_vm2, %v11643_v11 }
 0xa19   :  { %v9318_v24 = vpop.f32.mrb[8].mxu1 }
 0xa1a   :  { %v1647_v25 = vpop.f32.mrb[9].mxu1 }
 0xa1b   :  { %9338 = vmatprep.mubr.msk.f32.mxu0 %vm15279_vm2, %v1647_v25 }
 0xa1c   :  { %9339 = vmatmul.mubr.msk.f32.vlgmr.msra.gmra.mrb[8].mxu0 %vm15279_vm2, %v9318_v24 }
 0xa21   :  { %v9329_v27 = vpop.f32.mrb[10].mxu1 }
 0xa22   :  { %v11669_v28 = vadd.f32 %v9329_v27, %v8985_v26  ;;  %v1734_v29 = vpop.f32.mrb[11].mxu1 }
 0xa23   :  { %v11673_v30 = vadd.f32 %v8985_v26, %v1734_v29 }
 0xa24   :  { %15377 = vst [vmem:[#allocation130_spill] sm:$0xff] %v11669_v28  ;;  %2014 = vrot.lane.b32.xlu0 %v11669_v28, %s11076_s6  ;;  %v1890_v39 = vrot.slane %v11669_v28, %v11678_v34 }
 0xa25   :  { %15378 = vst [vmem:[#allocation131_spill] sm:$0xff] %v11673_v30  ;;  %v1841_v35 = vrot.slane %v11673_v30, %v11678_v34 }
 0xa26   :  { %v1898_v43 = vcombine.high %v1890_v39, %v1890_v39  ;;  %v1906_v46 = vrot.slane %v1890_v39, %v11678_v34  ;;  %v1834_v39 = vcombine.high %v11673_v30, %v11673_v30 }
 0xa27   :  { %v1849_v37 = vcombine.high %v1841_v35, %v1841_v35  ;;  %v1857_v38 = vrot.slane %v1841_v35, %v11678_v34 }
 0xa28   :  { %2012 = vrot.lane.b32.xlu0 %v11673_v30, %s11076_s6  ;;  %v11697_v51 = vrot.slane %v1898_v43, %v11678_v34  ;;  %v1967_v56 = vrot.slane %v1906_v46, %v11560_v4  ;;  %v1928_v16 = vcombine.high %v1906_v46, %v1906_v46 }
 0xa29   :  { %v1871_v41 = vrot.slane %v1849_v37, %v11678_v34  ;;  %v1879_v42 = vcombine.high %v1857_v38, %v1857_v38  ;;  %v1935_v44 = vrot.slane %v1857_v38, %v11560_v4 }
 0xa2a   :  { %v1971_v6 = vrot.slane %v11697_v51, %v11560_v4  ;;  %v1975_v27 = vrot.slane %v1928_v16, %v11560_v4 }
 0xa2b   :  { %v1939_v45 = vrot.slane %v1871_v41, %v11560_v4  ;;  %v1943_v50 = vrot.slane %v1879_v42, %v11560_v4  ;;  %v1881_v61 = vcombine.high %v1871_v41, %v1871_v41 }
 0xa2d   :  { %v1947_v15 = vrot.slane %v1881_v61, %v11560_v4 }
 0xa96   :  { %v11691_v47 = vpop.permute.xlu0 %2014 }
 0xa97   :  { %v2019_v48 = vadd.f32 %v11691_v47, %v1935_v44  ;;  %v2021_v49 = vadd.f32 %v11691_v47, %v1939_v45  ;;  %v2023_v54 = vadd.f32 %v11691_v47, %v1943_v50  ;;  %v2035_v63 = vadd.f32 %v11691_v47, %v1967_v56 }
 0xa98   :  { %v2037_v20 = vadd.f32 %v11691_v47, %v1971_v6  ;;  %v2025_v26 = vadd.f32 %v11691_v47, %v1947_v15  ;;  %v2039_v41 = vadd.f32 %v11691_v47, %v1975_v27 }
 0xa99   :  { %vm2051_vm8 = vcmp.gt.f32.partialorder %v2019_v48, 0.0  ;;  %v2083_v52 = vmul.f32 0.2, %v2019_v48  ;;  %v2085_v53 = vmul.f32 0.2, %v2021_v49  ;;  %vm2053_vm9 = vcmp.gt.f32.partialorder %v2021_v49, 0.0 }
 0xa9a   :  { %v11700_v55 = vpop.permute.xlu0 %2012  ;;  %v2087_v9 = vmul.f32 0.2, %v2023_v54  ;;  %vm2055_vm11 = vcmp.gt.f32.partialorder %v2023_v54, 0.0  ;;  %v2099_v19 = vmul.f32 0.2, %v2035_v63  ;;  %vm2067_vm13 = vcmp.gt.f32.partialorder %v2035_v63, 0.0 }
 0xa9b   :  { %v11705_v58 = vsel %vm2051_vm8, %v2019_v48, %v2083_v52  ;;  %v2018_v59 = vadd.f32 %v11700_v55, %v1935_v44  ;;  %v2020_v60 = vadd.f32 %v11700_v55, %v1939_v45  ;;  %v11714_v8 = vsel %vm2053_vm9, %v2021_v49, %v2085_v53 }
 0xa9c   :  { %v2155_v62 = vmul.f32 %v11703_v57, %v11705_v58  ;;  %v2022_v13 = vadd.f32 %v11700_v55, %v1943_v50  ;;  %v2157_v17 = vmul.f32 %v11703_v57, %v11714_v8  ;;  %v11726_v21 = vsel %vm2055_vm11, %v2023_v54, %v2087_v9 }
 0xa9d   :  { %vm2050_vm10 = vcmp.gt.f32.partialorder %v2018_v59, 0.0  ;;  %v2082_v7 = vmul.f32 0.2, %v2018_v59  ;;  %vm2052_vm12 = vcmp.gt.f32.partialorder %v2020_v60, 0.0  ;;  %v2084_v12 = vmul.f32 0.2, %v2020_v60 }
 0xa9e   :  { %2220 = vrot.lane.b32.xlu1 %v2155_v62, %s11072_s0  ;;  %v2086_v24 = vmul.f32 0.2, %v2022_v13  ;;  %v2034_v25 = vadd.f32 %v11700_v55, %v1967_v56  ;;  %vm2054_vm14 = vcmp.gt.f32.partialorder %v2022_v13, 0.0  ;;  %v2159_v29 = vmul.f32 %v11703_v57, %v11726_v21 }
 0xa9f   :  { %v11718_v14 = vsel %vm2050_vm10, %v2018_v59, %v2082_v7  ;;  %v11728_v23 = vsel %vm2052_vm12, %v2020_v60, %v2084_v12  ;;  %v2101_v32 = vmul.f32 0.2, %v2037_v20  ;;  %v2036_v33 = vadd.f32 %v11700_v55, %v1971_v6 }
 0xaa0   :  { %v2154_v36 = vmul.f32 %v11703_v57, %v11718_v14  ;;  %v2156_v31 = vmul.f32 %v11703_v57, %v11728_v23  ;;  %v11740_v35 = vsel %vm2067_vm13, %v2035_v63, %v2099_v19  ;;  %v11742_v37 = vsel %vm2054_vm14, %v2022_v13, %v2086_v24 }
 0xaa1   :  { %vm2069_vm15 = vcmp.gt.f32.partialorder %v2037_v20, 0.0  ;;  %v2098_v38 = vmul.f32 0.2, %v2034_v25  ;;  %vm2066_vm3 = vcmp.gt.f32.partialorder %v2034_v25, 0.0  ;;  %v2171_v42 = vmul.f32 %v11703_v57, %v11740_v35 }
 0xaa2   :  { %2218 = vrot.lane.b32.xlu0 %v2154_v36, %s11072_s0  ;;  %2224 = vrot.lane.b32.xlu1 %v2157_v17, %s11072_s0  ;;  %v2158_v43 = vmul.f32 %v11703_v57, %v11742_v37  ;;  %v11753_v44 = vsel %vm2069_vm15, %v2037_v20, %v2101_v32  ;;  %v2100_v45 = vmul.f32 0.2, %v2036_v33  ;;  %vm2068_vm4 = vcmp.gt.f32.partialorder %v2036_v33, 0.0  ;;  %v11798_v20 = vpop.permute.xlu1 %2742 }
 0xaa3   :  { %v11755_v46 = vsel %vm2066_vm3, %v2034_v25, %v2098_v38  ;;  %v2089_v48 = vmul.f32 0.2, %v2025_v26  ;;  %v2024_v49 = vadd.f32 %v11700_v55, %v1947_v15  ;;  %vm2057_vm5 = vcmp.gt.f32.partialorder %v2025_v26, 0.0 }
 0xaa4   :  { %v1848_v50 = vrot.slane %v1834_v39, %v11678_v34  ;;  %v2173_v52 = vmul.f32 %v11703_v57, %v11753_v44  ;;  %v2170_v53 = vmul.f32 %v11703_v57, %v11755_v46  ;;  %v11765_v54 = vsel %vm2068_vm4, %v2036_v33, %v2100_v45 }
 0xaa5   :  { %v11767_v56 = vsel %vm2057_vm5, %v2025_v26, %v2089_v48  ;;  %v2103_v59 = vmul.f32 0.2, %v2039_v41  ;;  %v2088_v60 = vmul.f32 0.2, %v2024_v49  ;;  %v2038_v61 = vadd.f32 %v11700_v55, %v1975_v27 }
 0xaa6   :  { %2228 = vrot.lane.b32.xlu1 %v2159_v29, %s11072_s0  ;;  %2222 = vrot.lane.b32.xlu0 %v2156_v31, %s11072_s0  ;;  %vm2071_vm6 = vcmp.gt.f32.partialorder %v2039_v41, 0.0  ;;  %vm2056_vm8 = vcmp.gt.f32.partialorder %v2024_v49, 0.0  ;;  %v11773_v62 = vrot.slane %v1848_v50, %v11678_v34  ;;  %v2172_v63 = vmul.f32 %v11703_v57, %v11765_v54 }
 0xaa7   :  { %v2161_v6 = vmul.f32 %v11703_v57, %v11767_v56  ;;  %v11779_v7 = vsel %vm2071_vm6, %v2039_v41, %v2103_v59  ;;  %v11781_v9 = vsel %vm2056_vm8, %v2024_v49, %v2088_v60  ;;  %v2102_v12 = vmul.f32 0.2, %v2038_v61 }
 0xaa8   :  { %vm2070_vm9 = vcmp.gt.f32.partialorder %v2038_v61, 0.0  ;;  %v1951_v13 = vrot.slane %v11773_v62, %v11560_v4  ;;  %v1930_v15 = vcombine.high %v11697_v51, %v11697_v51  ;;  %v2175_v16 = vmul.f32 %v11703_v57, %v11779_v7 }
 0xaa9   :  { %v2160_v36 = vmul.f32 %v11703_v57, %v11781_v9  ;;  %v11793_v17 = vsel %vm2070_vm9, %v2038_v61, %v2102_v12  ;;  %v2746_v51 = vmul.f32 %v11798_v20, %v11705_v58  ;;  %v2748_v31 = vmul.f32 %v11798_v20, %v11714_v8 }
 0xaaa   :  { %2252 = vrot.lane.b32.xlu1 %v2171_v42, %s11072_s0  ;;  %2226 = vrot.lane.b32.xlu0 %v2158_v43, %s11072_s0  ;;  %v2027_v19 = vadd.f32 %v11691_v47, %v1951_v13  ;;  %v1979_v24 = vrot.slane %v1930_v15, %v11560_v4  ;;  %v2174_v25 = vmul.f32 %v11703_v57, %v11793_v17 }
 0xaab   :  { %v2026_v29 = vadd.f32 %v11700_v55, %v1951_v13  ;;  %v2745_v32 = vmul.f32 %v11798_v20, %v11718_v14  ;;  %v1883_v42 = vcombine.high %v11669_v28, %v11669_v28  ;;  %v1850_v43 = vcombine.high %v1848_v50, %v1848_v50 }
 0xaac   :  { %v2091_v26 = vmul.f32 0.2, %v2027_v19  ;;  %v2041_v27 = vadd.f32 %v11691_v47, %v1979_v24  ;;  %vm2059_vm10 = vcmp.gt.f32.partialorder %v2027_v19, 0.0  ;;  %v2040_v41 = vadd.f32 %v11700_v55, %v1979_v24 }
 0xaad   :  { %v2090_v39 = vmul.f32 0.2, %v2026_v29  ;;  %vm2058_vm12 = vcmp.gt.f32.partialorder %v2026_v29, 0.0  ;;  %v2747_v45 = vmul.f32 %v11798_v20, %v11728_v23  ;;  %v1897_v59 = vrot.slane %v1883_v42, %v11678_v34 }
 0xaae   :  { %2256 = vrot.lane.b32.xlu1 %v2173_v52, %s11072_s0  ;;  %2250 = vrot.lane.b32.xlu0 %v2170_v53, %s11072_s0  ;;  %v11813_v33 = vsel %vm2059_vm10, %v2027_v19, %v2091_v26  ;;  %v2105_v38 = vmul.f32 0.2, %v2041_v27  ;;  %vm2073_vm11 = vcmp.gt.f32.partialorder %v2041_v27, 0.0  ;;  %v2104_v53 = vmul.f32 0.2, %v2040_v41 }
 0xaaf   :  { %v2163_v48 = vmul.f32 %v11703_v57, %v11813_v33  ;;  %v11826_v52 = vsel %vm2058_vm12, %v2026_v29, %v2090_v39  ;;  %vm2072_vm13 = vcmp.gt.f32.partialorder %v2040_v41, 0.0  ;;  %v11832_v50 = vrot.slane %v1850_v43, %v11678_v34 }
 0xab0   :  { %v11824_v49 = vsel %vm2073_vm11, %v2041_v27, %v2105_v38  ;;  %v2162_v61 = vmul.f32 %v11703_v57, %v11826_v52  ;;  %v11845_v12 = vrot.slane %v1897_v59, %v11678_v34  ;;  %v2750_v13 = vmul.f32 %v11798_v20, %v11726_v21 }
 0xab1   :  { %v2177_v60 = vmul.f32 %v11703_v57, %v11824_v49  ;;  %v2762_v19 = vmul.f32 %v11798_v20, %v11740_v35  ;;  %v2749_v24 = vmul.f32 %v11798_v20, %v11742_v37  ;;  %v2764_v27 = vmul.f32 %v11798_v20, %v11753_v44 }
 0xab2   :  { %2254 = vrot.lane.b32.xlu0 %v2172_v63, %s11072_s0  ;;  %2232 = vrot.lane.b32.xlu1 %v2161_v6, %s11072_s0  ;;  %v11838_v63 = vsel %vm2072_vm13, %v2040_v41, %v2104_v53  ;;  %v1955_v6 = vrot.slane %v11832_v50, %v11560_v4  ;;  %v2761_v29 = vmul.f32 %v11798_v20, %v11755_v46 }
 0xab3   :  { %v2176_v15 = vmul.f32 %v11703_v57, %v11838_v63  ;;  %v2763_v41 = vmul.f32 %v11798_v20, %v11765_v54  ;;  %v3338_v2 = vmul.f32 %v11685_v40, %v11793_v17 }
 0xab4   :  { %v2028_v26 = vadd.f32 %v11700_v55, %v1955_v6 }
 0xab6   :  { %2260 = vrot.lane.b32.xlu1 %v2175_v16, %s11072_s0  ;;  %2230 = vrot.lane.b32.xlu0 %v2160_v36, %s11072_s0  ;;  %v2029_v16 = vadd.f32 %v11691_v47, %v1955_v6  ;;  %v1983_v36 = vrot.slane %v11845_v12, %v11560_v4  ;;  %v2092_v38 = vmul.f32 0.2, %v2028_v26  ;;  %vm2060_vm3 = vcmp.gt.f32.partialorder %v2028_v26, 0.0 }
 0xab7   :  { %v1899_v6 = vcombine.high %v1897_v59, %v1897_v59  ;;  %v2766_v59 = vmul.f32 %v11798_v20, %v11779_v7 }
 0xab8   :  { %vm2061_vm14 = vcmp.gt.f32.partialorder %v2029_v16, 0.0  ;;  %v2042_v39 = vadd.f32 %v11700_v55, %v1983_v36 }
 0xaba   :  { %2811 = vrot.lane.b32.xlu1 %v2746_v51, %s11078_s28  ;;  %2258 = vrot.lane.b32.xlu0 %v2174_v25, %s11072_s0  ;;  %v2093_v51 = vmul.f32 0.2, %v2029_v16  ;;  %v2043_v25 = vadd.f32 %v11691_v47, %v1983_v36  ;;  %vm2074_vm4 = vcmp.gt.f32.partialorder %v2042_v39, 0.0 }
 0xabc   :  { %vm2075_vm15 = vcmp.gt.f32.partialorder %v2043_v25, 0.0 }
 0xabe   :  { %2815 = vrot.lane.b32.xlu1 %v2748_v31, %s11078_s28  ;;  %2809 = vrot.lane.b32.xlu0 %v2745_v32, %s11078_s28  ;;  %v11868_v31 = vsel %vm2061_vm14, %v2029_v16, %v2093_v51  ;;  %v2107_v32 = vmul.f32 0.2, %v2043_v25 }
 0xabf   :  { %v2165_v42 = vmul.f32 %v11703_v57, %v11868_v31 }
 0xac0   :  { %v11877_v43 = vsel %vm2075_vm15, %v2043_v25, %v2107_v32  ;;  %v3319_v25 = vmul.f32 %v11685_v40, %v11705_v58 }
 0xac1   :  { %v2179_v53 = vmul.f32 %v11703_v57, %v11877_v43 }
 0xac2   :  { %2813 = vrot.lane.b32.xlu0 %v2747_v45, %s11078_s28  ;;  %2236 = vrot.lane.b32.xlu1 %v2163_v48, %s11072_s0  ;;  %v11879_v45 = vsel %vm2060_vm3, %v2028_v26, %v2092_v38  ;;  %v2106_v48 = vmul.f32 0.2, %v2042_v39  ;;  %v2765_v26 = vmul.f32 %v11798_v20, %v11793_v17  ;;  %v3321_v38 = vmul.f32 %v11685_v40, %v11714_v8 }
 0xac3   :  { %vm2314_vm3 = vcmask 64512  }
 0xac6   :  { %2264 = vrot.lane.b32.xlu1 %v2177_v60, %s11072_s0  ;;  %2234 = vrot.lane.b32.xlu0 %v2162_v61, %s11072_s0  ;;  %v2164_v60 = vmul.f32 %v11703_v57, %v11879_v45  ;;  %v11887_v61 = vsel %vm2074_vm4, %v2042_v39, %v2106_v48  ;;  %v3318_v39 = vmul.f32 %v11685_v40, %v11718_v14  ;;  %vm2456_vm4 = vcmask 130112  }
 0xac7   :  { %v2178_v16 = vmul.f32 %v11703_v57, %v11887_v61 }
 0xaca   :  { %2819 = vrot.lane.b32.xlu1 %v2750_v13, %s11078_s28  ;;  %2262 = vrot.lane.b32.xlu0 %v2176_v15, %s11072_s0  ;;  %v1880_v13 = vcombine.high %v11773_v62, %v11773_v62  ;;  %v2752_v15 = vmul.f32 %v11798_v20, %v11767_v56  ;;  %v2751_v62 = vmul.f32 %v11798_v20, %v11781_v9 }
 0xacc   :  { %v1959_v36 = vrot.slane %v1880_v13, %v11560_v4 }
 0xace   :  { %2843 = vrot.lane.b32.xlu1 %v2762_v19, %s11078_s28  ;;  %2817 = vrot.lane.b32.xlu0 %v2749_v24, %s11078_s28  ;;  %v11901_v19 = vrot.slane %v1899_v6, %v11678_v34  ;;  %v2031_v24 = vadd.f32 %v11691_v47, %v1959_v36  ;;  %v2030_v32 = vadd.f32 %v11700_v55, %v1959_v36 }
 0xacf   :  { %v3320_v6 = vmul.f32 %v11685_v40, %v11728_v23 }
 0xad0   :  { %v1987_v51 = vrot.slane %v11901_v19, %v11560_v4  ;;  %vm2063_vm5 = vcmp.gt.f32.partialorder %v2031_v24, 0.0  ;;  %v2094_v48 = vmul.f32 0.2, %v2030_v32  ;;  %vm2062_vm8 = vcmp.gt.f32.partialorder %v2030_v32, 0.0 }
 0xad2   :  { %2847 = vrot.lane.b32.xlu1 %v2764_v27, %s11078_s28  ;;  %2841 = vrot.lane.b32.xlu0 %v2761_v29, %s11078_s28  ;;  %v2095_v27 = vmul.f32 0.2, %v2031_v24  ;;  %v2045_v29 = vadd.f32 %v11691_v47, %v1987_v51 }
 0xad4   :  { %vm2077_vm6 = vcmp.gt.f32.partialorder %v2045_v29, 0.0 }
 0xad6   :  { %2845 = vrot.lane.b32.xlu0 %v2763_v41, %s11078_s28  ;;  %2240 = vrot.lane.b32.xlu1 %v2165_v42, %s11072_s0  ;;  %v11924_v41 = vsel %vm2063_vm5, %v2031_v24, %v2095_v27  ;;  %v2109_v42 = vmul.f32 0.2, %v2045_v29  ;;  %v1882_v27 = vcombine.high %v11832_v50, %v11832_v50  ;;  %v2767_v50 = vmul.f32 %v11798_v20, %v11838_v63 }
 0xad7   :  { %vm2593_vm5 = vcmask 1041409  }
 0xad8   :  { %v11933_v13 = vsel %vm2077_vm6, %v2045_v29, %v2109_v42  ;;  %v2768_v29 = vmul.f32 %v11798_v20, %v11824_v49  ;;  %v3323_v42 = vmul.f32 %v11685_v40, %v11726_v21  ;;  %vm2595_vm6 = vcmask 1042434  }
 0xada   :  { %2268 = vrot.lane.b32.xlu1 %v2179_v53, %s11072_s0  ;;  %2238 = vrot.lane.b32.xlu0 %v2164_v60, %s11072_s0  ;;  %v2044_v53 = vadd.f32 %v11700_v55, %v1987_v51  ;;  %v2167_v60 = vmul.f32 %v11703_v57, %v11924_v41 }
 0xadc   :  { %vm2076_vm9 = vcmp.gt.f32.partialorder %v2044_v53, 0.0 }
 0xade   :  { %2823 = vrot.lane.b32.xlu1 %v2752_v15, %s11078_s28  ;;  %2266 = vrot.lane.b32.xlu0 %v2178_v16, %s11072_s0  ;;  %v11935_v15 = vsel %vm2062_vm8, %v2030_v32, %v2094_v48  ;;  %v2108_v16 = vmul.f32 0.2, %v2044_v53  ;;  %v2753_v32 = vmul.f32 %v11798_v20, %v11826_v52  ;;  %vm2597_vm8 = vcmask 1043459  }
 0xadf   :  { %v2166_v24 = vmul.f32 %v11703_v57, %v11935_v15 }
 0xae0   :  { %v11947_v51 = vsel %vm2076_vm9, %v2044_v53, %v2108_v16  ;;  %vm2599_vm9 = vcmask 1044484  }
 0xae2   :  { %2851 = vrot.lane.b32.xlu1 %v2766_v59, %s11078_s28  ;;  %2821 = vrot.lane.b32.xlu0 %v2751_v62, %s11078_s28  ;;  %v2181_v62 = vmul.f32 %v11703_v57, %v11933_v13 }
 0xae6   :  { %3384 = vrot.lane.b32.xlu1 %v3319_v25, %s11079_s5  ;;  %2849 = vrot.lane.b32.xlu0 %v2765_v26, %s11078_s28  ;;  %v2754_v25 = vmul.f32 %v11798_v20, %v11813_v33  ;;  %v2180_v26 = vmul.f32 %v11703_v57, %v11947_v51 }
 0xaea   :  { %3388 = vrot.lane.b32.xlu1 %v3321_v38, %s11079_s5  ;;  %3382 = vrot.lane.b32.xlu0 %v3318_v39, %s11079_s5  ;;  %v1963_v38 = vrot.slane %v1882_v27, %v11560_v4  ;;  %v1929_v39 = vcombine.high %v11845_v12, %v11845_v12  ;;  %v3322_v12 = vmul.f32 %v11685_v40, %v11742_v37 }
 0xaec   :  { %v2033_v48 = vadd.f32 %v11691_v47, %v1963_v38  ;;  %v1991_v53 = vrot.slane %v1929_v39, %v11560_v4 }
 0xaee   :  { %2244 = vrot.lane.b32.xlu1 %v2167_v60, %s11072_s0  ;;  %3386 = vrot.lane.b32.xlu0 %v3320_v6, %s11079_s5  ;;  %v3335_v60 = vmul.f32 %v11685_v40, %v11740_v35  ;;  %v2097_v6 = vmul.f32 0.2, %v2033_v48  ;;  %v2047_v16 = vadd.f32 %v11691_v47, %v1991_v53  ;;  %vm2065_vm10 = vcmp.gt.f32.partialorder %v2033_v48, 0.0 }
 0xaef   :  { %v11939_v36 = vpop.f32.mrb[8].mxu0 }
 0xaf0   :  { %15380 = vst [vmem:[#allocation133_spill] sm:$0xff] %v11939_v36  ;;  %v11941_v59 = vpop.f32.mrb[9].mxu0  ;;  %v2111_v27 = vmul.f32 0.2, %v2047_v16  ;;  %vm2079_vm11 = vcmp.gt.f32.partialorder %v2047_v16, 0.0 }
 0xaf1   :  { %15381 = vst [vmem:[#allocation134_spill] sm:$0xff] %v11941_v59 }
 0xaf2   :  { %2272 = vrot.lane.b32.xlu1 %v2181_v62, %s11072_s0  ;;  %2242 = vrot.lane.b32.xlu0 %v2166_v24, %s11072_s0  ;;  %v2032_v62 = vadd.f32 %v11700_v55, %v1963_v38  ;;  %v3337_v24 = vmul.f32 %v11685_v40, %v11753_v44  ;;  %v3336_v38 = vmul.f32 %v11685_v40, %v11765_v54 }
 0xaf4   :  { %vm2064_vm12 = vcmp.gt.f32.partialorder %v2032_v62, 0.0 }
 0xaf6   :  { %2827 = vrot.lane.b32.xlu1 %v2754_v25, %s11078_s28  ;;  %2270 = vrot.lane.b32.xlu0 %v2180_v26, %s11072_s0  ;;  %v3334_v25 = vmul.f32 %v11685_v40, %v11755_v46  ;;  %v11988_v26 = vsel %vm2065_vm10, %v2033_v48, %v2097_v6  ;;  %vm2601_vm10 = vcmask 1045509  }
 0xaf7   :  { %v2169_v39 = vmul.f32 %v11703_v57, %v11988_v26 }
 0xafa   :  { %2855 = vrot.lane.b32.xlu1 %v2768_v29, %s11078_s28  ;;  %2825 = vrot.lane.b32.xlu0 %v2753_v32, %s11078_s28  ;;  %v2096_v29 = vmul.f32 0.2, %v2032_v62  ;;  %v2046_v32 = vadd.f32 %v11700_v55, %v1991_v53  ;;  %v12003_v53 = vpop.permute.xlu1 %3888 }
 0xafc   :  { %v2110_v48 = vmul.f32 0.2, %v2046_v32  ;;  %vm2078_vm13 = vcmp.gt.f32.partialorder %v2046_v32, 0.0 }
 0xafe   :  { %3392 = vrot.lane.b32.xlu1 %v3323_v42, %s11079_s5  ;;  %2853 = vrot.lane.b32.xlu0 %v2767_v50, %s11078_s28  ;;  %v11997_v42 = vsel %vm2079_vm11, %v2047_v16, %v2111_v27  ;;  %v11999_v50 = vsel %vm2064_vm12, %v2032_v62, %v2096_v29  ;;  %v12009_v6 = vsel %vm2078_vm13, %v2046_v32, %v2110_v48  ;;  %vm2603_vm11 = vcmask 1046534  }
 0xaff   :  { %v2756_v62 = vmul.f32 %v11798_v20, %v11868_v31  ;;  %v2770_v29 = vmul.f32 %v11798_v20, %v11877_v43  ;;  %v2755_v32 = vmul.f32 %v11798_v20, %v11879_v45  ;;  %vm2605_vm12 = vcmask 1047559  }
 0xb02   :  { %3416 = vrot.lane.b32.xlu1 %v3335_v60, %s11079_s5  ;;  %3390 = vrot.lane.b32.xlu0 %v3322_v12, %s11079_s5  ;;  %v2183_v60 = vmul.f32 %v11703_v57, %v11997_v42  ;;  %v2168_v12 = vmul.f32 %v11703_v57, %v11999_v50 }
 0xb06   :  { %3420 = vrot.lane.b32.xlu1 %v3337_v24, %s11079_s5  ;;  %3414 = vrot.lane.b32.xlu0 %v3334_v25, %s11079_s5  ;;  %v2182_v24 = vmul.f32 %v11703_v57, %v12009_v6 }
 0xb0a   :  { %3418 = vrot.lane.b32.xlu0 %v3336_v38, %s11079_s5  ;;  %2248 = vrot.lane.b32.xlu1 %v2169_v39, %s11072_s0  ;;  %v1931_v38 = vcombine.high %v11901_v19, %v11901_v19  ;;  %v3339_v19 = vmul.f32 %v11685_v40, %v11779_v7 }
 0xb0e   :  { %2276 = vrot.lane.b32.xlu1 %v2183_v60, %s11072_s0  ;;  %2246 = vrot.lane.b32.xlu0 %v2168_v12, %s11072_s0  ;;  %v3325_v60 = vmul.f32 %v11685_v40, %v11767_v56  ;;  %v2769_v12 = vmul.f32 %v11798_v20, %v11887_v61 }
 0xb10   :  { %v12013_v16 = vpop.permute.xlu1 %2220 }
 0xb12   :  { %2831 = vrot.lane.b32.xlu1 %v2756_v62, %s11078_s28  ;;  %2274 = vrot.lane.b32.xlu0 %v2182_v24, %s11072_s0  ;;  %v1995_v62 = vrot.slane %v1931_v38, %v11560_v4  ;;  %v3892_v38 = vmul.f32 %v12003_v53, %v11705_v58  ;;  %v3891_v58 = vmul.f32 %v12003_v53, %v11718_v14 }
 0xb13   :  { %v2758_v14 = vmul.f32 %v11798_v20, %v11924_v41 }
 0xb14   :  { %v12021_v25 = vpop.permute.xlu0 %2218  ;;  %v12023_v27 = vpop.permute.xlu1 %2224  ;;  %v2049_v1 = vadd.f32 %v11691_v47, %v1995_v62  ;;  %v2048_v34 = vadd.f32 %v11700_v55, %v1995_v62 }
 0xb15   :  { %15382 = vst [vmem:[#allocation135_spill] sm:$0xff] %v12021_v25 }
 0xb16   :  { %2859 = vrot.lane.b32.xlu1 %v2770_v29, %s11078_s28  ;;  %2829 = vrot.lane.b32.xlu0 %v2755_v32, %s11078_s28  ;;  %v3324_v32 = vmul.f32 %v11685_v40, %v11781_v9  ;;  %v2113_v0 = vmul.f32 0.2, %v2049_v1  ;;  %vm2081_vm14 = vcmp.gt.f32.partialorder %v2049_v1, 0.0  ;;  %v2112_v10 = vmul.f32 0.2, %v2048_v34 }
 0xb17   :  { %vm2080_vm15 = vcmp.gt.f32.partialorder %v2048_v34, 0.0 }
 0xb18   :  { %v12033_v39 = vpop.permute.xlu1 %2228  ;;  %v12035_v48 = vpop.permute.xlu0 %2222  ;;  %v12074_v11 = vsel %vm2081_vm14, %v2049_v1, %v2113_v0 }
 0xb19   :  { %15383 = vst [vmem:[#allocation136_spill] sm:$0xff] %v12035_v48  ;;  %v2185_v62 = vmul.f32 %v11703_v57, %v12074_v11 }
 0xb1a   :  { %3396 = vrot.lane.b32.xlu1 %v3325_v60, %s11079_s5  ;;  %2857 = vrot.lane.b32.xlu0 %v2769_v12, %s11078_s28 }
 0xb1c   :  { %v12044_v24 = vpop.permute.xlu1 %2252  ;;  %v12046_v29 = vpop.permute.xlu0 %2226 }
 0xb1e   :  { %3424 = vrot.lane.b32.xlu1 %v3339_v19, %s11079_s5  ;;  %3394 = vrot.lane.b32.xlu0 %v3324_v32, %s11079_s5  ;;  %v3894_v32 = vmul.f32 %v12003_v53, %v11714_v8  ;;  %v3893_v8 = vmul.f32 %v12003_v53, %v11728_v23  ;;  %v2772_v23 = vmul.f32 %v11798_v20, %v11933_v13 }
 0xb20   :  { %v12055_v60 = vpop.permute.xlu1 %2256  ;;  %v12057_v12 = vpop.permute.xlu0 %2250 }
 0xb22   :  { %3957 = vrot.lane.b32.xlu1 %v3892_v38, %s11080_s1  ;;  %3422 = vrot.lane.b32.xlu0 %v3338_v2, %s11079_s5  ;;  %v12086_v38 = vsel %vm2080_vm15, %v2048_v34, %v2112_v10  ;;  %vm13436_vm15 = vmpackc.low %vm2314_vm3, %vm2314_vm3 }
 0xb24   :  { %v12066_v47 = vpop.permute.xlu0 %2254  ;;  %v12068_v19 = vpop.permute.xlu1 %2232 }
 0xb26   :  { %3961 = vrot.lane.b32.xlu1 %v3894_v32, %s11080_s1  ;;  %3955 = vrot.lane.b32.xlu0 %v3891_v58, %s11080_s1  ;;  %v2184_v32 = vmul.f32 %v11703_v57, %v12086_v38  ;;  %v2757_v58 = vmul.f32 %v11798_v20, %v11935_v15 }
 0xb28   :  { %v12078_v2 = vpop.permute.xlu1 %2260  ;;  %v12080_v55 = vpop.permute.xlu0 %2230 }
 0xb2a   :  { %2280 = vrot.lane.b32.xlu1 %v2185_v62, %s11072_s0  ;;  %3959 = vrot.lane.b32.xlu0 %v3893_v8, %s11080_s1  ;;  %v3327_v8 = vmul.f32 %v11685_v40, %v11813_v33 }
 0xb2c   :  { %v12090_v0 = vpop.permute.xlu1 %2811  ;;  %v12092_v1 = vpop.permute.xlu0 %2258 }
 0xb2e   :  { %2835 = vrot.lane.b32.xlu1 %v2758_v14, %s11078_s28  ;;  %2278 = vrot.lane.b32.xlu0 %v2184_v32, %s11072_s0  ;;  %v2771_v14 = vmul.f32 %v11798_v20, %v11947_v51 }
 0xb30   :  { %v12100_v10 = vpop.permute.xlu1 %2815  ;;  %v12102_v34 = vpop.permute.xlu0 %2809 }
 0xb32   :  { %2863 = vrot.lane.b32.xlu1 %v2772_v23, %s11078_s28  ;;  %2833 = vrot.lane.b32.xlu0 %v2757_v58, %s11078_s28  ;;  %v3341_v23 = vmul.f32 %v11685_v40, %v11824_v49  ;;  %v3326_v58 = vmul.f32 %v11685_v40, %v11826_v52 }
 0xb34   :  { %v12110_v62 = vpop.permute.xlu0 %2813  ;;  %v12112_v57 = vpop.permute.xlu1 %2236 }
 0xb36   :  { %3400 = vrot.lane.b32.xlu1 %v3327_v8, %s11079_s5  ;;  %2861 = vrot.lane.b32.xlu0 %v2771_v14, %s11078_s28  ;;  %v3896_v8 = vmul.f32 %v12003_v53, %v11726_v21  ;;  %v3340_v14 = vmul.f32 %v11685_v40, %v11838_v63 }
 0xb38   :  { %v12120_v32 = vpop.permute.xlu1 %2264  ;;  %v12122_v59 = vpop.permute.xlu0 %2234 }
 0xb3a   :  { %3428 = vrot.lane.b32.xlu1 %v3341_v23, %s11079_s5  ;;  %3398 = vrot.lane.b32.xlu0 %v3326_v58, %s11079_s5  ;;  %v3908_v23 = vmul.f32 %v12003_v53, %v11740_v35  ;;  %v3895_v58 = vmul.f32 %v12003_v53, %v11742_v37 }
 0xb3c   :  { %v12130_v36 = vpop.permute.xlu1 %2819  ;;  %v12132_v22 = vpop.permute.xlu0 %2262 }
 0xb3e   :  { %3965 = vrot.lane.b32.xlu1 %v3896_v8, %s11080_s1  ;;  %3426 = vrot.lane.b32.xlu0 %v3340_v14, %s11079_s5  ;;  %v3910_v8 = vmul.f32 %v12003_v53, %v11753_v44  ;;  %v3907_v14 = vmul.f32 %v12003_v53, %v11755_v46 }
 0xb40   :  { %v12140_v18 = vpop.permute.xlu1 %2843  ;;  %v12142_v5 = vpop.permute.xlu0 %2817 }
 0xb42   :  { %3989 = vrot.lane.b32.xlu1 %v3908_v23, %s11080_s1  ;;  %3963 = vrot.lane.b32.xlu0 %v3895_v58, %s11080_s1  ;;  %v2760_v23 = vmul.f32 %v11798_v20, %v11988_v26  ;;  %v3909_v58 = vmul.f32 %v12003_v53, %v11765_v54 }
 0xb44   :  { %v12150_v21 = vpop.permute.xlu1 %2847  ;;  %v12152_v4 = vpop.permute.xlu0 %2841 }
 0xb46   :  { %3993 = vrot.lane.b32.xlu1 %v3910_v8, %s11080_s1  ;;  %3987 = vrot.lane.b32.xlu0 %v3907_v14, %s11080_s1  ;;  %v2774_v8 = vmul.f32 %v11798_v20, %v11997_v42  ;;  %v2759_v14 = vmul.f32 %v11798_v20, %v11999_v50 }
 0xb48   :  { %v12160_v35 = vpop.permute.xlu0 %2845  ;;  %v12162_v37 = vpop.permute.xlu1 %2240 }
 0xb4a   :  { %2839 = vrot.lane.b32.xlu1 %v2760_v23, %s11078_s28  ;;  %3991 = vrot.lane.b32.xlu0 %v3909_v58, %s11080_s1  ;;  %v3329_v23 = vmul.f32 %v11685_v40, %v11868_v31  ;;  %v2773_v58 = vmul.f32 %v11798_v20, %v12009_v6 }
 0xb4c   :  { %v12170_v44 = vpop.permute.xlu1 %2268  ;;  %v12172_v46 = vpop.permute.xlu0 %2238 }
 0xb4e   :  { %2867 = vrot.lane.b32.xlu1 %v2774_v8, %s11078_s28  ;;  %2837 = vrot.lane.b32.xlu0 %v2759_v14, %s11078_s28  ;;  %v3343_v8 = vmul.f32 %v11685_v40, %v11877_v43  ;;  %v3328_v14 = vmul.f32 %v11685_v40, %v11879_v45 }
 0xb50   :  { %v12180_v28 = vpop.permute.xlu1 %2823  ;;  %v12182_v54 = vpop.permute.xlu0 %2266 }
 0xb52   :  { %3404 = vrot.lane.b32.xlu1 %v3329_v23, %s11079_s5  ;;  %2865 = vrot.lane.b32.xlu0 %v2773_v58, %s11078_s28  ;;  %v3898_v23 = vmul.f32 %v12003_v53, %v11767_v56  ;;  %v3342_v58 = vmul.f32 %v11685_v40, %v11887_v61 }
 0xb54   :  { %v12190_v30 = vpop.permute.xlu1 %2851  ;;  %v12192_v48 = vpop.permute.xlu0 %2821 }
 0xb55   :  { %15384 = vst [vmem:[#allocation137_spill] sm:$0xff] %v12190_v30  ;;  %15385 = vst [vmem:[#allocation138_spill] sm:$0xff] %v12192_v48 }
 0xb56   :  { %3432 = vrot.lane.b32.xlu1 %v3343_v8, %s11079_s5  ;;  %3402 = vrot.lane.b32.xlu0 %v3328_v14, %s11079_s5  ;;  %v3912_v8 = vmul.f32 %v12003_v53, %v11779_v7  ;;  %v3897_v14 = vmul.f32 %v12003_v53, %v11781_v9 }
 0xb58   :  { %v12200_v25 = vpop.permute.xlu1 %3384  ;;  %v12202_v3 = vpop.permute.xlu0 %2849 }
 0xb59   :  { %15386 = vst [vmem:[#allocation139_spill] sm:$0xff] %v12200_v25 }
 0xb5a   :  { %3969 = vrot.lane.b32.xlu1 %v3898_v23, %s11080_s1  ;;  %3430 = vrot.lane.b32.xlu0 %v3342_v58, %s11079_s5  ;;  %v2776_v23 = vmul.f32 %v11798_v20, %v12074_v11  ;;  %v3911_v58 = vmul.f32 %v12003_v53, %v11793_v17 }
 0xb5c   :  { %v12210_v30 = vpop.permute.xlu1 %3388  ;;  %v12212_v48 = vpop.permute.xlu0 %3382 }
 0xb5e   :  { %3997 = vrot.lane.b32.xlu1 %v3912_v8, %s11080_s1  ;;  %3967 = vrot.lane.b32.xlu0 %v3897_v14, %s11080_s1  ;;  %v3331_v8 = vmul.f32 %v11685_v40, %v11924_v41  ;;  %v2775_v14 = vmul.f32 %v11798_v20, %v12086_v38 }
 0xb60   :  { %v12220_v56 = vpop.permute.xlu1 %2244  ;;  %v12222_v25 = vpop.permute.xlu0 %3386 }
 0xb61   :  { %15387 = vst [vmem:[#allocation140_spill] sm:$0xff] %v12220_v56 }
 0xb62   :  { %2871 = vrot.lane.b32.xlu1 %v2776_v23, %s11078_s28  ;;  %3995 = vrot.lane.b32.xlu0 %v3911_v58, %s11080_s1  ;;  %v3345_v23 = vmul.f32 %v11685_v40, %v11933_v13  ;;  %v3330_v58 = vmul.f32 %v11685_v40, %v11935_v15 }
 0xb64   :  { %v12230_v7 = vpop.permute.xlu1 %2272  ;;  %v12232_v9 = vpop.permute.xlu0 %2242 }
 0xb65   :  { %15388 = vst [vmem:[#allocation141_spill] sm:$0xff] %v12230_v7 }
 0xb66   :  { %3408 = vrot.lane.b32.xlu1 %v3331_v8, %s11079_s5  ;;  %2869 = vrot.lane.b32.xlu0 %v2775_v14, %s11078_s28  ;;  %v3900_v8 = vmul.f32 %v12003_v53, %v11813_v33  ;;  %v3344_v14 = vmul.f32 %v11685_v40, %v11947_v51 }
 0xb68   :  { %v12240_v56 = vpop.permute.xlu1 %2827  ;;  %v12242_v17 = vpop.permute.xlu0 %2270 }
 0xb69   :  { %15389 = vst [vmem:[#allocation142_spill] sm:$0xff] %v12240_v56  ;;  %15390 = vst [vmem:[#allocation143_spill] sm:$0xff] %v12242_v17 }
 0xb6a   :  { %3436 = vrot.lane.b32.xlu1 %v3345_v23, %s11079_s5  ;;  %3406 = vrot.lane.b32.xlu0 %v3330_v58, %s11079_s5  ;;  %v3914_v23 = vmul.f32 %v12003_v53, %v11824_v49  ;;  %v3899_v58 = vmul.f32 %v12003_v53, %v11826_v52 }
 0xb6c   :  { %v12250_v7 = vpop.permute.xlu1 %2855  ;;  %v12252_v20 = vpop.permute.xlu0 %2825 }
 0xb6d   :  { %15391 = vst [vmem:[#allocation144_spill] sm:$0xff] %v12250_v7 }
 0xb6e   :  { %3973 = vrot.lane.b32.xlu1 %v3900_v8, %s11080_s1  ;;  %3434 = vrot.lane.b32.xlu0 %v3344_v14, %s11079_s5  ;;  %v3333_v8 = vmul.f32 %v11685_v40, %v11988_v26  ;;  %v3913_v14 = vmul.f32 %v12003_v53, %v11838_v63 }
 0xb70   :  { %v12260_v56 = vpop.permute.xlu1 %3392  ;;  %v12262_v17 = vpop.permute.xlu0 %2853 }
 0xb72   :  { %4001 = vrot.lane.b32.xlu1 %v3914_v23, %s11080_s1  ;;  %3971 = vrot.lane.b32.xlu0 %v3899_v58, %s11080_s1  ;;  %v3347_v23 = vmul.f32 %v11685_v40, %v11997_v42  ;;  %v3332_v58 = vmul.f32 %v11685_v40, %v11999_v50 }
 0xb74   :  { %v12270_v33 = vpop.permute.xlu1 %3416  ;;  %v12272_v7 = vpop.permute.xlu0 %3390 }
 0xb75   :  { %15392 = vst [vmem:[#allocation145_spill] sm:$0xff] %v12270_v33 }
 0xb76   :  { %3412 = vrot.lane.b32.xlu1 %v3333_v8, %s11079_s5  ;;  %3999 = vrot.lane.b32.xlu0 %v3913_v14, %s11080_s1  ;;  %v3902_v8 = vmul.f32 %v12003_v53, %v11868_v31  ;;  %v3346_v14 = vmul.f32 %v11685_v40, %v12009_v6 }
 0xb78   :  { %v12280_v49 = vpop.permute.xlu1 %3420  ;;  %v12282_v52 = vpop.permute.xlu0 %3414 }
 0xb79   :  { %15393 = vst [vmem:[#allocation146_spill] sm:$0xff] %v12280_v49  ;;  %15394 = vst [vmem:[#allocation147_spill] sm:$0xff] %v12282_v52 }
 0xb7a   :  { %3440 = vrot.lane.b32.xlu1 %v3347_v23, %s11079_s5  ;;  %3410 = vrot.lane.b32.xlu0 %v3332_v58, %s11079_s5  ;;  %v3916_v23 = vmul.f32 %v12003_v53, %v11877_v43  ;;  %v3901_v58 = vmul.f32 %v12003_v53, %v11879_v45 }
 0xb7c   :  { %v12290_v33 = vpop.permute.xlu0 %3418  ;;  %v12292_v63 = vpop.permute.xlu1 %2248 }
 0xb7d   :  { %15395 = vst [vmem:[#allocation148_spill] sm:$0xff] %v12292_v63 }
 0xb7e   :  { %3977 = vrot.lane.b32.xlu1 %v3902_v8, %s11080_s1  ;;  %3438 = vrot.lane.b32.xlu0 %v3346_v14, %s11079_s5  ;;  %v3349_v8 = vmul.f32 %v11685_v40, %v12074_v11  ;;  %v3915_v14 = vmul.f32 %v12003_v53, %v11887_v61 }
 0xb80   :  { %v12300_v49 = vpop.permute.xlu1 %2276  ;;  %v12302_v52 = vpop.permute.xlu0 %2246 }
 0xb82   :  { %4005 = vrot.lane.b32.xlu1 %v3916_v23, %s11080_s1  ;;  %3975 = vrot.lane.b32.xlu0 %v3901_v58, %s11080_s1  ;;  %v3904_v23 = vmul.f32 %v12003_v53, %v11924_v41  ;;  %v3348_v58 = vmul.f32 %v11685_v40, %v12086_v38 }
 0xb84   :  { %v12310_v31 = vpop.permute.xlu1 %2831  ;;  %v12312_v63 = vpop.permute.xlu0 %2274 }
 0xb85   :  { %15396 = vst [vmem:[#allocation149_spill] sm:$0xff] %v12310_v31 }
 0xb86   :  { %3444 = vrot.lane.b32.xlu1 %v3349_v8, %s11079_s5  ;;  %4003 = vrot.lane.b32.xlu0 %v3915_v14, %s11080_s1  ;;  %v3918_v8 = vmul.f32 %v12003_v53, %v11933_v13  ;;  %v3903_v14 = vmul.f32 %v12003_v53, %v11935_v15 }
 0xb88   :  { %v12320_v43 = vpop.permute.xlu1 %2859  ;;  %v12322_v45 = vpop.permute.xlu0 %2829 }
 0xb8a   :  { %3981 = vrot.lane.b32.xlu1 %v3904_v23, %s11080_s1  ;;  %3442 = vrot.lane.b32.xlu0 %v3348_v58, %s11079_s5  ;;  %v3906_v23 = vmul.f32 %v12003_v53, %v11988_v26  ;;  %v3917_v58 = vmul.f32 %v12003_v53, %v11947_v51  ;;  %v3922_v51 = vmul.f32 %v12003_v53, %v12074_v11 }
 0xb8c   :  { %v12330_v31 = vpop.permute.xlu1 %3396  ;;  %v12332_v61 = vpop.permute.xlu0 %2857 }
 0xb8e   :  { %4009 = vrot.lane.b32.xlu1 %v3918_v8, %s11080_s1  ;;  %3979 = vrot.lane.b32.xlu0 %v3903_v14, %s11080_s1  ;;  %v3920_v8 = vmul.f32 %v12003_v53, %v11997_v42  ;;  %v3905_v14 = vmul.f32 %v12003_v53, %v11999_v50  ;;  %v3921_v50 = vmul.f32 %v12003_v53, %v12086_v38 }
 0xb90   :  { %v12340_v41 = vpop.permute.xlu1 %3424  ;;  %v12342_v40 = vpop.permute.xlu0 %3394 }
 0xb92   :  { %3985 = vrot.lane.b32.xlu1 %v3906_v23, %s11080_s1  ;;  %4007 = vrot.lane.b32.xlu0 %v3917_v58, %s11080_s1  ;;  %v3919_v23 = vmul.f32 %v12003_v53, %v12009_v6 }
 0xb94   :  { %v12350_v13 = vpop.permute.xlu1 %3957  ;;  %v12352_v15 = vpop.permute.xlu0 %3422 }
 0xb96   :  { %4013 = vrot.lane.b32.xlu1 %v3920_v8, %s11080_s1  ;;  %3983 = vrot.lane.b32.xlu0 %v3905_v14, %s11080_s1 }
 0xb98   :  { %v12360_v26 = vpop.permute.xlu0 %3955  ;;  %v12366_v58 = vpop.permute.xlu1 %3961 }
 0xb99   :  { %15397 = vst [vmem:[#allocation150_spill] sm:$0xff] %v12360_v26  ;;  %15398 = vst [vmem:[#allocation151_spill] sm:$0xff] %v12366_v58 }
 0xb9a   :  { %4017 = vrot.lane.b32.xlu1 %v3922_v51, %s11080_s1  ;;  %4011 = vrot.lane.b32.xlu0 %v3919_v23, %s11080_s1 }
 0xb9c   :  { %v12370_v42 = vpop.permute.xlu0 %3959  ;;  %v12375_v8 = vpop.permute.xlu1 %2280 }
 0xb9d   :  { %15399 = vst [vmem:[#allocation152_spill] sm:$0xff] %v12370_v42 }
 0xb9e   :  { %4015 = vrot.lane.b32.xlu0 %v3921_v50, %s11080_s1  ;;  %v2324_v50 = vsel %vm2314_vm3, %v12023_v27, 0.0  ;;  %v2366_v27 = vsel %vm2314_vm3, %v12044_v24, 0.0  ;;  %v2336_v24 = vsel %vm2314_vm3, %v12068_v19, 0.0  ;;  %v2908_v19 = vsel %vm2314_vm3, %v12090_v0, 0.0 }
 0xb9f   :  { %v2342_v0 = vsel %vm2314_vm3, %v12112_v57, 0.0  ;;  %v2920_v57 = vsel %vm2314_vm3, %v12130_v36, 0.0  ;;  %v2962_v36 = vsel %vm2314_vm3, %v12150_v21, 0.0  ;;  %v2390_v21 = vsel %vm2314_vm3, %v12170_v44, 0.0 }
 0xba0   :  { %v12377_v14 = vpop.permute.xlu0 %2278  ;;  %v12381_v6 = vpop.permute.xlu1 %2835 }
 0xba4   :  { %v12379_v11 = vpop.permute.xlu0 %2833  ;;  %v12385_v51 = vpop.permute.xlu1 %2863 }
 0xba5   :  { %15400 = vst [vmem:[#allocation153_spill] sm:$0xff] %v12379_v11 }
 0xba8   :  { %v12383_v58 = vpop.permute.xlu0 %2861  ;;  %v12389_v42 = vpop.permute.xlu1 %3400 }
 0xba9   :  { %15401 = vst [vmem:[#allocation154_spill] sm:$0xff] %v12383_v58  ;;  %v2318_v58 = vsel %vm2314_vm3, %v12013_v16, 0.0  ;;  %v2363_v16 = vsel %vm2314_vm3, %v12057_v12, 0.0  ;;  %v2333_v12 = vsel %vm2314_vm3, %v12080_v55, 0.0  ;;  %v2905_v55 = vsel %vm2314_vm3, %v12102_v34, 0.0 }
 0xbaa   :  { %v2339_v34 = vsel %vm2314_vm3, %v12122_v59, 0.0  ;;  %v2917_v59 = vsel %vm2314_vm3, %v12142_v5, 0.0  ;;  %v2959_v5 = vsel %vm2314_vm3, %v12160_v35, 0.0  ;;  %v2387_v35 = vsel %vm2314_vm3, %v12182_v54, 0.0 }
 0xbab   :  { %v2965_v54 = vsel %vm2314_vm3, %v12202_v3, 0.0  ;;  %v3484_v3 = vsel %vm2314_vm3, %v12222_v25, 0.0 }
 0xbac   :  { %v12387_v23 = vpop.permute.xlu0 %3398  ;;  %v12393_v53 = vpop.permute.xlu1 %3428 }
 0xbad   :  { %15402 = vst [vmem:[#allocation155_spill] sm:$0xff] %v12387_v23  ;;  %15404 = vst [vmem:[#allocation157_spill] sm:$0xff] %v12393_v53  ;;  %v2330_v23 = vsel %vm2314_vm3, %v12033_v39, 0.0  ;;  %v2372_v39 = vsel %vm2314_vm3, %v12055_v60, 0.0  ;;  %v2378_v60 = vsel %vm2314_vm3, %v12078_v2, 0.0  ;;  %v2914_v2 = vsel %vm2314_vm3, %v12100_v10, 0.0 }
 0xbae   :  { %v2384_v10 = vsel %vm2314_vm3, %v12120_v32, 0.0  ;;  %v2956_v32 = vsel %vm2314_vm3, %v12140_v18, 0.0  ;;  %v2348_v18 = vsel %vm2314_vm3, %v12162_v37, 0.0  ;;  %v2926_v37 = vsel %vm2314_vm3, %v12180_v28, 0.0  ;;  %v15408_v28 = vld [vmem:[#allocation139_spill] sm:$0xff] }
 0xbb0   :  { %v12391_v26 = vpop.permute.xlu0 %3426  ;;  %v12399_v11 = vpop.permute.xlu1 %3965 }
 0xbb1   :  { %15403 = vst [vmem:[#allocation156_spill] sm:$0xff] %v12391_v26  ;;  %v2327_v26 = vsel %vm2314_vm3, %v12046_v29, 0.0  ;;  %v2369_v29 = vsel %vm2314_vm3, %v12066_v47, 0.0  ;;  %v2375_v47 = vsel %vm2314_vm3, %v12092_v1, 0.0  ;;  %v2911_v1 = vsel %vm2314_vm3, %v12110_v62, 0.0 }
 0xbb2   :  { %v2381_v62 = vsel %vm2314_vm3, %v12132_v22, 0.0  ;;  %v2953_v22 = vsel %vm2314_vm3, %v12152_v4, 0.0  ;;  %v2345_v4 = vsel %vm2314_vm3, %v12172_v46, 0.0  ;;  %v15406_v46 = vld [vmem:[#allocation138_spill] sm:$0xff] }
 0xbb4   :  { %v12395_v38 = vpop.permute.xlu0 %3963 }
 0xbb5   :  { %15405 = vst [vmem:[#allocation158_spill] sm:$0xff] %v12395_v38  ;;  %v12409_v38 = vpop.permute.xlu1 %3989 }
 0xbb8   :  { %v12407_v53 = vpop.permute.xlu0 %3987 }
 0xbbd   :  { %2325 = vadd.xlane.f32.xlu0 %v2324_v50 }
 0xbbe   :  { %2319 = vadd.xlane.f32.xlu1 %v2318_v58  ;;  %v12415_v58 = vpop.permute.xlu0 %3991 }
 0xbc1   :  { %2331 = vadd.xlane.f32.xlu0 %v2330_v23  ;;  %v12419_v23 = vpop.permute.xlu1 %3993 }
 0xbc2   :  { %2328 = vadd.xlane.f32.xlu1 %v2327_v26  ;;  %v12427_v26 = vpop.permute.xlu0 %2837 }
 0xbc5   :  { %2367 = vadd.xlane.f32.xlu0 %v2366_v27  ;;  %v12429_v50 = vpop.permute.xlu1 %2839 }
 0xbc6   :  { %2364 = vadd.xlane.f32.xlu1 %v2363_v16  ;;  %v12435_v27 = vpop.permute.xlu0 %2865 }
 0xbc9   :  { %2373 = vadd.xlane.f32.xlu0 %v2372_v39  ;;  %v12439_v16 = vpop.permute.xlu1 %2867 }
 0xbca   :  { %2370 = vadd.xlane.f32.xlu1 %v2369_v29  ;;  %v12447_v39 = vpop.permute.xlu0 %3402 }
 0xbcd   :  { %2337 = vadd.xlane.f32.xlu0 %v2336_v24  ;;  %v12449_v29 = vpop.permute.xlu1 %3404 }
 0xbce   :  { %2334 = vadd.xlane.f32.xlu1 %v2333_v12  ;;  %v12455_v24 = vpop.permute.xlu0 %3430 }
 0xbd1   :  { %2379 = vadd.xlane.f32.xlu0 %v2378_v60  ;;  %v12459_v12 = vpop.permute.xlu1 %3432 }
 0xbd2   :  { %2376 = vadd.xlane.f32.xlu1 %v2375_v47  ;;  %v12467_v60 = vpop.permute.xlu0 %3967 }
 0xbd5   :  { %2909 = vadd.xlane.f32.xlu0 %v2908_v19  ;;  %v12469_v47 = vpop.permute.xlu1 %3969 }
 0xbd6   :  { %2906 = vadd.xlane.f32.xlu1 %v2905_v55  ;;  %v12475_v19 = vpop.permute.xlu0 %3995 }
 0xbd9   :  { %2915 = vadd.xlane.f32.xlu0 %v2914_v2  ;;  %v12479_v55 = vpop.permute.xlu1 %3997 }
 0xbda   :  { %2912 = vadd.xlane.f32.xlu1 %v2911_v1  ;;  %v12487_v2 = vpop.permute.xlu0 %2869 }
 0xbdd   :  { %2343 = vadd.xlane.f32.xlu0 %v2342_v0  ;;  %v12489_v1 = vpop.permute.xlu1 %2871 }
 0xbde   :  { %2340 = vadd.xlane.f32.xlu1 %v2339_v34  ;;  %v12495_v0 = vpop.permute.xlu0 %3406 }
 0xbe1   :  { %2385 = vadd.xlane.f32.xlu0 %v2384_v10  ;;  %v12499_v34 = vpop.permute.xlu1 %3408  ;;  %v2923_v10 = vsel %vm2314_vm3, %v15406_v46, 0.0 }
 0xbe2   :  { %2382 = vadd.xlane.f32.xlu1 %v2381_v62  ;;  %v15407_v62 = vld [vmem:[#allocation137_spill] sm:$0xff] }
 0xbe3   :  { %v2968_v44 = vsel %vm2314_vm3, %v15407_v62, 0.0 }
 0xbe5   :  { %2921 = vadd.xlane.f32.xlu0 %v2920_v57  ;;  %v12507_v57 = vpop.permute.xlu0 %3434 }
 0xbe6   :  { %2918 = vadd.xlane.f32.xlu1 %v2917_v59  ;;  %v12509_v59 = vpop.permute.xlu1 %3436 }
 0xbe9   :  { %2957 = vadd.xlane.f32.xlu0 %v2956_v32  ;;  %v3481_v32 = vsel %vm2314_vm3, %v15408_v28, 0.0 }
 0xbea   :  { %2954 = vadd.xlane.f32.xlu1 %v2953_v22  ;;  %v3478_v22 = vsel %vm2314_vm3, %v12212_v48, 0.0  ;;  %v2351_v48 = vsel %vm2314_vm3, %v12232_v9, 0.0  ;;  %v2929_v9 = vsel %vm2314_vm3, %v12252_v20, 0.0  ;;  %v3490_v20 = vsel %vm2314_vm3, %v12272_v7, 0.0 }
 0xbeb   :  { %v3532_v7 = vsel %vm2314_vm3, %v12290_v33, 0.0  ;;  %v2399_v33 = vsel %vm2314_vm3, %v12312_v63, 0.0  ;;  %v2977_v63 = vsel %vm2314_vm3, %v12332_v61, 0.0  ;;  %v3538_v61 = vsel %vm2314_vm3, %v12352_v15, 0.0  ;;  %v15421_v15 = vld [vmem:[#allocation152_spill] sm:$0xff] }
 0xbed   :  { %2963 = vadd.xlane.f32.xlu0 %v2962_v36  ;;  %v12515_v36 = vpop.permute.xlu0 %3971 }
 0xbee   :  { %2960 = vadd.xlane.f32.xlu1 %v2959_v5  ;;  %v3487_v5 = vsel %vm2314_vm3, %v12210_v30, 0.0  ;;  %v15410_v30 = vld [vmem:[#allocation141_spill] sm:$0xff] }
 0xbef   :  { %v2396_v46 = vsel %vm2314_vm3, %v15410_v30, 0.0  ;;  %v15414_v30 = vld [vmem:[#allocation145_spill] sm:$0xff] }
 0xbf1   :  { %2349 = vadd.xlane.f32.xlu0 %v2348_v18  ;;  %v12519_v18 = vpop.permute.xlu1 %3973 }
 0xbf2   :  { %2346 = vadd.xlane.f32.xlu1 %v2345_v4  ;;  %v15409_v4 = vld [vmem:[#allocation140_spill] sm:$0xff] }
 0xbf5   :  { %2391 = vadd.xlane.f32.xlu0 %v2390_v21  ;;  %v2354_v21 = vsel %vm2314_vm3, %v15409_v4, 0.0 }
 0xbf6   :  { %2388 = vadd.xlane.f32.xlu1 %v2387_v35  ;;  %v12527_v35 = vpop.permute.xlu0 %3999 }
 0xbf9   :  { %2927 = vadd.xlane.f32.xlu0 %v2926_v37  ;;  %v12529_v37 = vpop.permute.xlu1 %4001 }
 0xbfa   :  { %2924 = vadd.xlane.f32.xlu1 %v2923_v10  ;;  %v15411_v10 = vld [vmem:[#allocation143_spill] sm:$0xff]  ;;  %v12535_v62 = vpop.permute.xlu0 %3410 }
 0xbfb   :  { %v2393_v25 = vsel %vm2314_vm3, %v15411_v10, 0.0 }
 0xbfd   :  { %2969 = vadd.xlane.f32.xlu0 %v2968_v44  ;;  %v15412_v44 = vld [vmem:[#allocation142_spill] sm:$0xff]  ;;  %v12539_v28 = vpop.permute.xlu1 %3412 }
 0xbfe   :  { %2966 = vadd.xlane.f32.xlu1 %v2965_v54  ;;  %v2932_v54 = vsel %vm2314_vm3, %v15412_v44, 0.0  ;;  %v15416_v44 = vld [vmem:[#allocation146_spill] sm:$0xff] }
 0xc01   :  { %3482 = vadd.xlane.f32.xlu0 %v3481_v32  ;;  %v15413_v32 = vld [vmem:[#allocation144_spill] sm:$0xff]  ;;  %v12549_v4 = vpop.permute.xlu1 %3440 }
 0xc02   :  { %3479 = vadd.xlane.f32.xlu1 %v3478_v22  ;;  %v2974_v22 = vsel %vm2314_vm3, %v15413_v32, 0.0  ;;  %v15417_v32 = vld [vmem:[#allocation148_spill] sm:$0xff] }
 0xc05   :  { %3488 = vadd.xlane.f32.xlu0 %v3487_v5  ;;  %v2971_v5 = vsel %vm2314_vm3, %v12262_v17, 0.0  ;;  %v12559_v10 = vpop.permute.xlu1 %3977  ;;  %v15415_v17 = vld [vmem:[#allocation147_spill] sm:$0xff] }
 0xc06   :  { %3485 = vadd.xlane.f32.xlu1 %v3484_v3  ;;  %v12547_v3 = vpop.permute.xlu0 %3438 }
 0xc09   :  { %2355 = vadd.xlane.f32.xlu0 %v2354_v21  ;;  %v3493_v21 = vsel %vm2314_vm3, %v12260_v56, 0.0  ;;  %v3535_v56 = vsel %vm2314_vm3, %v15416_v44, 0.0 }
 0xc0a   :  { %2352 = vadd.xlane.f32.xlu1 %v2351_v48  ;;  %v12555_v48 = vpop.permute.xlu0 %3975 }
 0xc0d   :  { %2397 = vadd.xlane.f32.xlu0 %v2396_v46  ;;  %v3529_v46 = vsel %vm2314_vm3, %v15414_v30, 0.0 }
 0xc0e   :  { %2394 = vadd.xlane.f32.xlu1 %v2393_v25  ;;  %v3526_v25 = vsel %vm2314_vm3, %v15415_v17, 0.0 }
 0xc11   :  { %2933 = vadd.xlane.f32.xlu0 %v2932_v54  ;;  %v12567_v54 = vpop.permute.xlu0 %4003 }
 0xc12   :  { %2930 = vadd.xlane.f32.xlu1 %v2929_v9  ;;  %v12569_v9 = vpop.permute.xlu1 %4005 }
 0xc15   :  { %2975 = vadd.xlane.f32.xlu0 %v2974_v22  ;;  %v2360_v22 = vsel %vm2314_vm3, %v15417_v32, 0.0 }
 0xc16   :  { %2972 = vadd.xlane.f32.xlu1 %v2971_v5  ;;  %v2357_v5 = vsel %vm2314_vm3, %v12302_v52, 0.0  ;;  %v12579_v30 = vpop.permute.xlu1 %3444  ;;  %v2935_v52 = vsel %vm2314_vm3, %v12322_v45, 0.0  ;;  %v3496_v45 = vsel %vm2314_vm3, %v12342_v40, 0.0 }
 0xc19   :  { %3494 = vadd.xlane.f32.xlu0 %v3493_v21  ;;  %v12575_v21 = vpop.permute.xlu0 %3442 }
 0xc1a   :  { %3491 = vadd.xlane.f32.xlu1 %v3490_v20  ;;  %v2402_v20 = vsel %vm2314_vm3, %v12300_v49, 0.0  ;;  %v12589_v44 = vpop.permute.xlu1 %3981  ;;  %v2980_v49 = vsel %vm2314_vm3, %v12320_v43, 0.0  ;;  %v3541_v43 = vsel %vm2314_vm3, %v12340_v41, 0.0  ;;  %v15420_v41 = vld [vmem:[#allocation151_spill] sm:$0xff] }
 0xc1d   :  { %3530 = vadd.xlane.f32.xlu0 %v3529_v46  ;;  %v15418_v46 = vld [vmem:[#allocation149_spill] sm:$0xff] }
 0xc1e   :  { %3527 = vadd.xlane.f32.xlu1 %v3526_v25  ;;  %v2938_v17 = vsel %vm2314_vm3, %v15418_v46, 0.0  ;;  %v12587_v25 = vpop.permute.xlu0 %3979  ;;  %v12599_v32 = vpop.permute.xlu1 %4009  ;;  %v4060_v46 = vsel %vm2314_vm3, %v15420_v41, 0.0 }
 0xc21   :  { %3536 = vadd.xlane.f32.xlu0 %v3535_v56 }
 0xc22   :  { %3533 = vadd.xlane.f32.xlu1 %v3532_v7  ;;  %v12595_v56 = vpop.permute.xlu0 %4007  ;;  %v3499_v7 = vsel %vm2314_vm3, %v12330_v31, 0.0  ;;  %v4054_v31 = vsel %vm2314_vm3, %v12350_v13, 0.0  ;;  %v2408_v13 = vsel %vm2314_vm3, %v12375_v8, 0.0 }
 0xc25   :  { %2361 = vadd.xlane.f32.xlu0 %v2360_v22 }
 0xc26   :  { %2358 = vadd.xlane.f32.xlu1 %v2357_v5  ;;  %v12607_v22 = vpop.permute.xlu0 %3983  ;;  %v12609_v5 = vpop.permute.xlu1 %3985 }
 0xc29   :  { %2403 = vadd.xlane.f32.xlu0 %v2402_v20  ;;  %v15419_v20 = vld [vmem:[#allocation150_spill] sm:$0xff] }
 0xc2a   :  { %2400 = vadd.xlane.f32.xlu1 %v2399_v33  ;;  %v4051_v40 = vsel %vm2314_vm3, %v15419_v20, 0.0  ;;  %v12615_v33 = vpop.permute.xlu0 %4011  ;;  %v15423_v20 = vld [vmem:[#allocation153_spill] sm:$0xff] }
 0xc2d   :  { %2939 = vadd.xlane.f32.xlu0 %v2938_v17  ;;  %v12619_v17 = vpop.permute.xlu1 %4013 }
 0xc2e   :  { %2936 = vadd.xlane.f32.xlu1 %v2935_v52  ;;  %v4057_v52 = vsel %vm2314_vm3, %v15421_v15, 0.0  ;;  %v2986_v15 = vsel %vm2314_vm3, %v12385_v51, 0.0  ;;  %v15429_v51 = vld [vmem:[#allocation155_spill] sm:$0xff] }
 0xc31   :  { %2981 = vadd.xlane.f32.xlu0 %v2980_v49  ;;  %v15422_v49 = vlaneseq }
 0xc32   :  { %2978 = vadd.xlane.f32.xlu1 %v2977_v63 }
 0xc33   :  { %v2446_v63 = vand.u32 127, %v15422_v49 }
 0xc35   :  { %3500 = vadd.xlane.f32.xlu0 %v3499_v7  ;;  %v2405_v7 = vsel %vm2314_vm3, %v12377_v14, 0.0 }
 0xc36   :  { %3497 = vadd.xlane.f32.xlu1 %v3496_v45  ;;  %v12628_v45 = vpop.permute.xlu0 %4015 }
 0xc39   :  { %3542 = vadd.xlane.f32.xlu0 %v3541_v43  ;;  %v12630_v43 = vpop.permute.xlu1 %4017 }
 0xc3a   :  { %3539 = vadd.xlane.f32.xlu1 %v3538_v61  ;;  %v2944_v61 = vsel %vm2314_vm3, %v12381_v6, 0.0  ;;  %v15428_v6 = vld [vmem:[#allocation154_spill] sm:$0xff] }
 0xc3d   :  { %4055 = vadd.xlane.f32.xlu0 %v4054_v31  ;;  %v2451_v31 = vadd.s32 4294967288, %v2446_v63 }
 0xc3e   :  { %4052 = vadd.xlane.f32.xlu1 %v4051_v40  ;;  %v2941_v40 = vsel %vm2314_vm3, %v15423_v20, 0.0 }
 0xc41   :  { %4061 = vadd.xlane.f32.xlu0 %v4060_v46  ;;  %v15425_v46 = vld [vmem:[#allocation123_spill] sm:$0xff] }
 0xc42   :  { %4058 = vadd.xlane.f32.xlu1 %v4057_v52  ;;  %v12641_v14 = vsub.s32 %v2446_v63, %v15425_v46  ;;  %v12646_v52 = vsub.s32 %v2451_v31, %v15425_v46  ;;  %v3505_v63 = vsel %vm2314_vm3, %v12389_v42, 0.0  ;;  %v3502_v31 = vsel %vm2314_vm3, %v15429_v51, 0.0 }
 0xc44   :  { %15426 = vst [vmem:[#allocation137_spill] sm:$0xff] %v12641_v14  ;;  %15427 = vst [vmem:[#allocation139_spill] sm:$0xff] %v12646_v52 }
 0xc45   :  { %2409 = vadd.xlane.f32.xlu0 %v2408_v13  ;;  %v2983_v13 = vsel %vm2314_vm3, %v15428_v6, 0.0 }
 0xc46   :  { %2406 = vadd.xlane.f32.xlu1 %v2405_v7 }
 0xc49   :  { %2945 = vadd.xlane.f32.xlu0 %v2944_v61 }
 0xc4a   :  { %2942 = vadd.xlane.f32.xlu1 %v2941_v40  ;;  %v12636_v8 = vpop.xlane.xlu0 %2325 }
 0xc4b   :  { %v12638_v41 = vpop.xlane.xlu1 %2319 }
 0xc4c   :  { %15424 = vst [vmem:[#allocation138_spill] sm:$0xff] %v12638_v41  ;;  %v15432_v41 = vld [vmem:[#allocation156_spill] sm:$0xff] }
 0xc4d   :  { %2987 = vadd.xlane.f32.xlu0 %v2986_v15  ;;  %v3544_v42 = vsel %vm2314_vm3, %v15432_v41, 0.0 }
 0xc4e   :  { %2984 = vadd.xlane.f32.xlu1 %v2983_v13  ;;  %v2332_v49 = vpop.xlane.xlu0 %2331 }
 0xc4f   :  { %v2474_v7 = vrot.slane %v2332_v49, %v12646_v52  ;;  %v2329_v61 = vpop.xlane.xlu1 %2328  ;;  %v15431_v49 = vld [vmem:[#allocation157_spill] sm:$0xff] }
 0xc50   :  { %v2470_v20 = vrot.slane %v2329_v61, %v12641_v14  ;;  %v3547_v61 = vsel %vm2314_vm3, %v15431_v49, 0.0 }
 0xc51   :  { %3506 = vadd.xlane.f32.xlu0 %v3505_v63 }
 0xc52   :  { %v12657_v40 = vsel %vm2456_vm4, %v2474_v7, %v2470_v20  ;;  %3503 = vadd.xlane.f32.xlu1 %v3502_v31  ;;  %v2368_v46 = vpop.xlane.xlu0 %2367 }
 0xc53   :  { %15430 = vst [vmem:[#allocation140_spill] sm:$0xff] %v12657_v40  ;;  %v2528_v15 = vrot.slane %v2368_v46, %v12646_v52  ;;  %v2365_v6 = vpop.xlane.xlu1 %2364  ;;  %v4066_v46 = vsel %vm2314_vm3, %v12399_v11, 0.0  ;;  %v4099_v11 = vsel %vm2314_vm3, %v12407_v53, 0.0 }
 0xc54   :  { %v2524_v13 = vrot.slane %v2365_v6, %v12641_v14  ;;  %v15433_v6 = vld [vmem:[#allocation158_spill] sm:$0xff] }
 0xc55   :  { %3548 = vadd.xlane.f32.xlu0 %v3547_v61  ;;  %v4063_v49 = vsel %vm2314_vm3, %v15433_v6, 0.0 }
 0xc56   :  { %v2529_v63 = vsel %vm2456_vm4, %v2528_v15, %v2524_v13  ;;  %3545 = vadd.xlane.f32.xlu1 %v3544_v42  ;;  %v2374_v51 = vpop.xlane.xlu0 %2373 }
 0xc57   :  { %v2537_v7 = vrot.slane %v2374_v51, %v12646_v52  ;;  %v2371_v20 = vpop.xlane.xlu1 %2370 }
 0xc58   :  { %v2533_v31 = vrot.slane %v2371_v20, %v12641_v14  ;;  %v4102_v20 = vsel %vm2314_vm3, %v12409_v38, 0.0  ;;  %v4105_v38 = vsel %vm2314_vm3, %v12415_v58, 0.0 }
 0xc59   :  { %4067 = vadd.xlane.f32.xlu0 %v4066_v46 }
 0xc5a   :  { %v2538_v61 = vsel %vm2456_vm4, %v2537_v7, %v2533_v31  ;;  %4064 = vadd.xlane.f32.xlu1 %v4063_v49  ;;  %v2338_v41 = vpop.xlane.xlu0 %2337  ;;  %v4108_v49 = vsel %vm2314_vm3, %v12419_v23, 0.0  ;;  %v2947_v23 = vsel %vm2314_vm3, %v12427_v26, 0.0 }
 0xc5b   :  { %v2607_v15 = vsel %vm2593_vm5, %v2538_v61, %v2529_v63  ;;  %v2483_v13 = vrot.slane %v2338_v41, %v12646_v52  ;;  %v2335_v42 = vpop.xlane.xlu1 %2334 }
 0xc5c   :  { %v2479_v51 = vrot.slane %v2335_v42, %v12641_v14 }
 0xc5d   :  { %4103 = vadd.xlane.f32.xlu0 %v4102_v20  ;;  %v2950_v20 = vsel %vm2314_vm3, %v12429_v50, 0.0  ;;  %v2989_v50 = vsel %vm2314_vm3, %v12435_v27, 0.0 }
 0xc5e   :  { %v12681_v46 = vsel %vm2456_vm4, %v2483_v13, %v2479_v51  ;;  %4100 = vadd.xlane.f32.xlu1 %v4099_v11  ;;  %v2380_v7 = vpop.xlane.xlu0 %2379 }
 0xc5f   :  { %15434 = vst [vmem:[#allocation141_spill] sm:$0xff] %v12681_v46  ;;  %v2546_v31 = vrot.slane %v2380_v7, %v12646_v52  ;;  %v2377_v63 = vpop.xlane.xlu1 %2376 }
 0xc60   :  { %v2542_v6 = vrot.slane %v2377_v63, %v12641_v14  ;;  %v2992_v63 = vsel %vm2314_vm3, %v12439_v16, 0.0  ;;  %v3508_v16 = vsel %vm2314_vm3, %v12447_v39, 0.0 }
 0xc61   :  { %4109 = vadd.xlane.f32.xlu0 %v4108_v49 }
 0xc62   :  { %v2547_v53 = vsel %vm2456_vm4, %v2546_v31, %v2542_v6  ;;  %4106 = vadd.xlane.f32.xlu1 %v4105_v38  ;;  %v2910_v61 = vpop.xlane.xlu0 %2909 }
 0xc63   :  { %v2608_v41 = vsel %vm2595_vm6, %v2547_v53, %v2607_v15  ;;  %v3040_v13 = vrot.slane %v2910_v61, %v12646_v52  ;;  %v2907_v42 = vpop.xlane.xlu1 %2906 }
 0xc64   :  { %v3036_v51 = vrot.slane %v2907_v42, %v12641_v14 }
 0xc65   :  { %2951 = vadd.xlane.f32.xlu0 %v2950_v20 }
 0xc66   :  { %v3041_v58 = vsel %vm2456_vm4, %v3040_v13, %v3036_v51  ;;  %2948 = vadd.xlane.f32.xlu1 %v2947_v23  ;;  %v2916_v11 = vpop.xlane.xlu0 %2915  ;;  %v3511_v13 = vsel %vm2314_vm3, %v12449_v29, 0.0  ;;  %v3550_v29 = vsel %vm2314_vm3, %v12455_v24, 0.0 }
 0xc67   :  { %v3049_v7 = vrot.slane %v2916_v11, %v12646_v52  ;;  %v2913_v31 = vpop.xlane.xlu1 %2912 }
 0xc68   :  { %v3045_v15 = vrot.slane %v2913_v31, %v12641_v14 }
 0xc69   :  { %2993 = vadd.xlane.f32.xlu0 %v2992_v63 }
 0xc6a   :  { %v3050_v6 = vsel %vm2456_vm4, %v3049_v7, %v3045_v15  ;;  %2990 = vadd.xlane.f32.xlu1 %v2989_v50  ;;  %v2344_v26 = vpop.xlane.xlu0 %2343  ;;  %v4072_v50 = vsel %vm2314_vm3, %v12469_v47, 0.0  ;;  %v4111_v47 = vsel %vm2314_vm3, %v12475_v19, 0.0 }
 0xc6b   :  { %v3177_v49 = vsel %vm2593_vm5, %v3050_v6, %v3041_v58  ;;  %v2492_v38 = vrot.slane %v2344_v26, %v12646_v52  ;;  %v2341_v53 = vpop.xlane.xlu1 %2340  ;;  %v3553_v58 = vsel %vm2314_vm3, %v12459_v12, 0.0  ;;  %v4069_v12 = vsel %vm2314_vm3, %v12467_v60, 0.0 }
 0xc6c   :  { %v2488_v61 = vrot.slane %v2341_v53, %v12641_v14 }
 0xc6d   :  { %3512 = vadd.xlane.f32.xlu0 %v3511_v13 }
 0xc6e   :  { %v12713_v27 = vsel %vm2456_vm4, %v2492_v38, %v2488_v61  ;;  %3509 = vadd.xlane.f32.xlu1 %v3508_v16  ;;  %v2386_v42 = vpop.xlane.xlu0 %2385  ;;  %v4114_v61 = vsel %vm2314_vm3, %v12479_v55, 0.0  ;;  %v2995_v55 = vsel %vm2314_vm3, %v12487_v2, 0.0 }
 0xc6f   :  { %15435 = vst [vmem:[#allocation143_spill] sm:$0xff] %v12713_v27  ;;  %v2555_v51 = vrot.slane %v2386_v42, %v12646_v52  ;;  %v2383_v20 = vpop.xlane.xlu1 %2382 }
 0xc70   :  { %v2551_v23 = vrot.slane %v2383_v20, %v12641_v14 }
 0xc71   :  { %3554 = vadd.xlane.f32.xlu0 %v3553_v58 }
 0xc72   :  { %v2556_v39 = vsel %vm2456_vm4, %v2555_v51, %v2551_v23  ;;  %3551 = vadd.xlane.f32.xlu1 %v3550_v29  ;;  %v2922_v11 = vpop.xlane.xlu0 %2921  ;;  %v2998_v51 = vsel %vm2314_vm3, %v12489_v1, 0.0  ;;  %v3514_v1 = vsel %vm2314_vm3, %v12495_v0, 0.0 }
 0xc73   :  { %v2609_v7 = vsel %vm2597_vm8, %v2556_v39, %v2608_v41  ;;  %v3058_v31 = vrot.slane %v2922_v11, %v12646_v52  ;;  %v2919_v15 = vpop.xlane.xlu1 %2918  ;;  %v3517_v11 = vsel %vm2314_vm3, %v12499_v34, 0.0  ;;  %v3556_v34 = vsel %vm2314_vm3, %v12507_v57, 0.0 }
 0xc74   :  { %v3054_v63 = vrot.slane %v2919_v15, %v12641_v14 }
 0xc75   :  { %4073 = vadd.xlane.f32.xlu0 %v4072_v50 }
 0xc76   :  { %v3059_v24 = vsel %vm2456_vm4, %v3058_v31, %v3054_v63  ;;  %4070 = vadd.xlane.f32.xlu1 %v4069_v12  ;;  %v2958_v6 = vpop.xlane.xlu0 %2957  ;;  %v3559_v12 = vsel %vm2314_vm3, %v12509_v59, 0.0  ;;  %v4075_v59 = vsel %vm2314_vm3, %v12515_v36, 0.0 }
 0xc77   :  { %v3178_v26 = vsel %vm2595_vm6, %v3059_v24, %v3177_v49  ;;  %v3112_v41 = vrot.slane %v2958_v6, %v12646_v52  ;;  %v2955_v38 = vpop.xlane.xlu1 %2954 }
 0xc78   :  { %v3108_v53 = vrot.slane %v2955_v38, %v12641_v14 }
 0xc79   :  { %4115 = vadd.xlane.f32.xlu0 %v4114_v61  ;;  %v4078_v61 = vsel %vm2314_vm3, %v12519_v18, 0.0  ;;  %v4117_v18 = vsel %vm2314_vm3, %v12527_v35, 0.0  ;;  %v3565_v35 = vsel %vm2314_vm3, %v12549_v4, 0.0 }
 0xc7a   :  { %v3113_v60 = vsel %vm2456_vm4, %v3112_v41, %v3108_v53  ;;  %4112 = vadd.xlane.f32.xlu1 %v4111_v47  ;;  %v2964_v13 = vpop.xlane.xlu0 %2963 }
 0xc7b   :  { %v3121_v16 = vrot.slane %v2964_v13, %v12646_v52  ;;  %v2961_v42 = vpop.xlane.xlu1 %2960  ;;  %v4120_v13 = vsel %vm2314_vm3, %v12529_v37, 0.0 }
 0xc7c   :  { %v3117_v49 = vrot.slane %v2961_v42, %v12641_v14  ;;  %v3523_v42 = vsel %vm2314_vm3, %v12539_v28, 0.0 }
 0xc7d   :  { %2999 = vadd.xlane.f32.xlu0 %v2998_v51  ;;  %v3562_v51 = vsel %vm2314_vm3, %v12547_v3, 0.0  ;;  %v4126_v3 = vsel %vm2314_vm3, %v12569_v9, 0.0 }
 0xc7e   :  { %v3122_v20 = vsel %vm2456_vm4, %v3121_v16, %v3117_v49  ;;  %2996 = vadd.xlane.f32.xlu1 %v2995_v55  ;;  %v2350_v19 = vpop.xlane.xlu0 %2349 }
 0xc7f   :  { %v12746_v23 = vsel %vm2593_vm5, %v3122_v20, %v3113_v60  ;;  %v2501_v58 = vrot.slane %v2350_v19, %v12646_v52  ;;  %v2347_v29 = vpop.xlane.xlu1 %2346  ;;  %v4081_v20 = vsel %vm2314_vm3, %v12555_v48, 0.0  ;;  %v3571_v48 = vsel %vm2314_vm3, %v12579_v30, 0.0 }
 0xc80   :  { %v2497_v39 = vrot.slane %v2347_v29, %v12641_v14 }
 0xc81   :  { %3518 = vadd.xlane.f32.xlu0 %v3517_v11 }
 0xc82   :  { %v12755_v2 = vsel %vm2456_vm4, %v2501_v58, %v2497_v39  ;;  %3515 = vadd.xlane.f32.xlu1 %v3514_v1  ;;  %v2392_v31 = vpop.xlane.xlu0 %2391  ;;  %v4123_v58 = vsel %vm2314_vm3, %v12567_v54, 0.0  ;;  %v3568_v39 = vsel %vm2314_vm3, %v12575_v21, 0.0  ;;  %v4090_v54 = vsel %vm2314_vm3, %v12589_v44, 0.0 }
 0xc83   :  { %15436 = vst [vmem:[#allocation142_spill] sm:$0xff] %v12755_v2  ;;  %v2564_v15 = vrot.slane %v2392_v31, %v12646_v52  ;;  %v2389_v63 = vpop.xlane.xlu1 %2388  ;;  %v4087_v1 = vsel %vm2314_vm3, %v12587_v25, 0.0 }
 0xc84   :  { %v2560_v50 = vrot.slane %v2389_v63, %v12641_v14  ;;  %v4129_v63 = vsel %vm2314_vm3, %v12595_v56, 0.0  ;;  %v4132_v56 = vsel %vm2314_vm3, %v12599_v32, 0.0  ;;  %v4138_v32 = vsel %vm2314_vm3, %v12619_v17, 0.0 }
 0xc85   :  { %3560 = vadd.xlane.f32.xlu0 %v3559_v12  ;;  %v15438_v12 = vld [vmem:[#allocation136_spill] sm:$0xff] }
 0xc86   :  { %v2565_v0 = vsel %vm2456_vm4, %v2564_v15, %v2560_v50  ;;  %3557 = vadd.xlane.f32.xlu1 %v3556_v34  ;;  %v2928_v24 = vpop.xlane.xlu0 %2927  ;;  %v15437_v15 = vld [vmem:[#allocation135_spill] sm:$0xff]  ;;  %v2321_v25 = vsel %vm2314_vm3, %v15438_v12, 0.0  ;;  %v4093_v34 = vsel %vm2314_vm3, %v12607_v22, 0.0  ;;  %v4096_v22 = vsel %vm2314_vm3, %v12609_v5, 0.0 }
 0xc87   :  { %v12765_v6 = vsel %vm2599_vm9, %v2565_v0, %v2609_v7  ;;  %v3067_v41 = vrot.slane %v2928_v24, %v12646_v52  ;;  %v2925_v38 = vpop.xlane.xlu1 %2924  ;;  %v2315_v21 = vsel %vm2314_vm3, %v15437_v15, 0.0  ;;  %v12901_v15 = vld [vmem:[%s15439_s2 + $0x8] sm:$0xff] }
 0xc88   :  { %v3063_v53 = vrot.slane %v2925_v38, %v12641_v14  ;;  %15440 = vst [vmem:[#allocation144_spill] sm:$0xff] %v12901_v15  ;;  %vm2412_vm13 = vcmp.gt.f32.partialorder %v12901_v15, 0.0 }
 0xc89   :  { %4079 = vadd.xlane.f32.xlu0 %v4078_v61  ;;  %v4141_v61 = vsel %vm2314_vm3, %v12628_v45, 0.0 }
 0xc8a   :  { %v3068_v57 = vsel %vm2456_vm4, %v3067_v41, %v3063_v53  ;;  %4076 = vadd.xlane.f32.xlu1 %v4075_v59  ;;  %v12774_v47 = vpop.xlane.xlu0 %2969  ;;  %v4135_v41 = vsel %vm2314_vm3, %v12615_v33, 0.0 }
 0xc8b   :  { %v12777_v7 = vsel %vm2597_vm8, %v3068_v57, %v3178_v26  ;;  %v12779_v60 = vpop.xlane.xlu1 %2966  ;;  %v3520_v26 = vsel %vm2314_vm3, %v12535_v62, 0.0  ;;  %v4084_v62 = vsel %vm2314_vm3, %v12559_v10, 0.0  ;;  %v3130_v27 = vrot.slane %v12774_v47, %v12646_v52 }
 0xc8c   :  { %v3126_v46 = vrot.slane %v12779_v60, %v12641_v14 }
 0xc8d   :  { %4121 = vadd.xlane.f32.xlu0 %v4120_v13 }
 0xc8e   :  { %4118 = vadd.xlane.f32.xlu1 %v4117_v18  ;;  %v12785_v16 = vpop.xlane.xlu0 %3482  ;;  %v4144_v18 = vsel %vm2314_vm3, %v12630_v43, 0.0  ;;  %v3131_v60 = vsel %vm2456_vm4, %v3130_v27, %v3126_v46 }
 0xc8f   :  { %v12787_v36 = vpop.xlane.xlu1 %3479 }
 0xc91   :  { %3524 = vadd.xlane.f32.xlu0 %v3523_v42 }
 0xc92   :  { %3521 = vadd.xlane.f32.xlu1 %v3520_v26  ;;  %v12793_v49 = vpop.xlane.xlu0 %3488 }
 0xc93   :  { %v12795_v37 = vpop.xlane.xlu1 %3485 }
 0xc95   :  { %3566 = vadd.xlane.f32.xlu0 %v3565_v35 }
 0xc96   :  { %3563 = vadd.xlane.f32.xlu1 %v3562_v51  ;;  %v12801_v55 = vpop.xlane.xlu0 %2355 }
 0xc97   :  { %v12803_v28 = vpop.xlane.xlu1 %2352 }
 0xc99   :  { %4085 = vadd.xlane.f32.xlu0 %v4084_v62 }
 0xc9a   :  { %4082 = vadd.xlane.f32.xlu1 %v4081_v20  ;;  %v12809_v19 = vpop.xlane.xlu0 %2397 }
 0xc9b   :  { %v12811_v4 = vpop.xlane.xlu1 %2394  ;;  %v2573_v43 = vrot.slane %v12809_v19, %v12646_v52 }
 0xc9c   :  { %v2569_v20 = vrot.slane %v12811_v4, %v12641_v14 }
 0xc9d   :  { %4127 = vadd.xlane.f32.xlu0 %v4126_v3 }
 0xc9e   :  { %4124 = vadd.xlane.f32.xlu1 %v4123_v58  ;;  %v12817_v29 = vpop.xlane.xlu0 %2933 }
 0xc9f   :  { %v12819_v10 = vpop.xlane.xlu1 %2930 }
 0xca1   :  { %3572 = vadd.xlane.f32.xlu0 %v3571_v48 }
 0xca2   :  { %3569 = vadd.xlane.f32.xlu1 %v3568_v39  ;;  %v12825_v11 = vpop.xlane.xlu0 %2975 }
 0xca3   :  { %v12827_v9 = vpop.xlane.xlu1 %2972 }
 0xca5   :  { %4091 = vadd.xlane.f32.xlu0 %v4090_v54  ;;  %v2574_v54 = vsel %vm2456_vm4, %v2573_v43, %v2569_v20 }
 0xca6   :  { %4088 = vadd.xlane.f32.xlu1 %v4087_v1  ;;  %v12833_v31 = vpop.xlane.xlu0 %3494  ;;  %v2611_v12 = vsel %vm2601_vm10, %v2574_v54, %v12765_v6 }
 0xca7   :  { %v12835_v30 = vpop.xlane.xlu1 %3491 }
 0xca9   :  { %2316 = vadd.xlane.f32.xlu0 %v2315_v21 }
 0xcaa   :  { %4130 = vadd.xlane.f32.xlu1 %v4129_v63  ;;  %v12841_v50 = vpop.xlane.xlu0 %3530 }
 0xcab   :  { %v12843_v44 = vpop.xlane.xlu1 %3527 }
 0xcad   :  { %2322 = vadd.xlane.f32.xlu0 %v2321_v25 }
 0xcae   :  { %4094 = vadd.xlane.f32.xlu1 %v4093_v34  ;;  %v12849_v0 = vpop.xlane.xlu0 %3536 }
 0xcaf   :  { %v12851_v24 = vpop.xlane.xlu1 %3533 }
 0xcb1   :  { %4133 = vadd.xlane.f32.xlu0 %v4132_v56 }
 0xcb2   :  { %4136 = vadd.xlane.f32.xlu1 %v4135_v41  ;;  %v12857_v38 = vpop.xlane.xlu0 %2361 }
 0xcb3   :  { %v12859_v53 = vpop.xlane.xlu1 %2358 }
 0xcb5   :  { %4097 = vadd.xlane.f32.xlu0 %v4096_v22 }
 0xcb6   :  { %4142 = vadd.xlane.f32.xlu1 %v4141_v61  ;;  %v2404_v59 = vpop.xlane.xlu0 %2403 }
 0xcb7   :  { %v2401_v57 = vpop.xlane.xlu1 %2400  ;;  %v2582_v58 = vrot.slane %v2404_v59, %v12646_v52 }
 0xcb8   :  { %v2578_v48 = vrot.slane %v2401_v57, %v12641_v14 }
 0xcb9   :  { %4139 = vadd.xlane.f32.xlu0 %v4138_v32 }
 0xcba   :  { %v12867_v33 = vpop.xlane.xlu0 %2939  ;;  %v2583_v21 = vsel %vm2456_vm4, %v2582_v58, %v2578_v48 }
 0xcbb   :  { %v12869_v13 = vpop.xlane.xlu1 %2936  ;;  %v2612_v56 = vsel %vm2603_vm11, %v2583_v21, %v2611_v12 }
 0xcbd   :  { %4145 = vadd.xlane.f32.xlu0 %v4144_v18 }
 0xcbe   :  { %v12873_v5 = vpop.xlane.xlu0 %2981 }
 0xcbf   :  { %v12875_v42 = vpop.xlane.xlu1 %2978 }
 0xcc2   :  { %v12877_v45 = vpop.xlane.xlu0 %3500 }
 0xcc3   :  { %v12879_v26 = vpop.xlane.xlu1 %3497 }
 0xcc6   :  { %v12881_v35 = vpop.xlane.xlu0 %3542 }
 0xcc7   :  { %v12883_v17 = vpop.xlane.xlu1 %3539 }
 0xcca   :  { %v12885_v51 = vpop.xlane.xlu0 %4055 }
 0xccb   :  { %v12887_v62 = vpop.xlane.xlu1 %4052 }
 0xcce   :  { %v12893_v3 = vpop.xlane.xlu0 %4061 }
 0xccf   :  { %v12897_v39 = vpop.xlane.xlu1 %4058 }
 0xcd2   :  { %v2410_v1 = vpop.xlane.xlu0 %2409 }
 0xcd3   :  { %v2591_v19 = vrot.slane %v2410_v1, %v12646_v52  ;;  %v2407_v63 = vpop.xlane.xlu1 %2406 }
 0xcd4   :  { %v2587_v4 = vrot.slane %v2407_v63, %v12641_v14 }
 0xcd6   :  { %v12909_v25 = vpop.xlane.xlu0 %2945  ;;  %v2592_v34 = vsel %vm2456_vm4, %v2591_v19, %v2587_v4 }
 0xcd7   :  { %v12913_v41 = vpop.xlane.xlu1 %2942  ;;  %v2613_v22 = vsel %vm2605_vm12, %v2592_v34, %v2612_v56 }
 0xcd8   :  { %v12918_v61 = vsel %vm2412_vm13, %v2613_v22, -1e+09 }
 0xcd9   :  { %15441 = vst [vmem:[#allocation145_spill] sm:$0xff] %v12918_v61  ;;  %v2621_v59 = vsel %vm831_vm1, %v12918_v61, -inf }
 0xcda   :  { %2622 = vmax.xlane.f32.xlu0 %v2621_v59  ;;  %v2988_v57 = vpop.xlane.xlu0 %2987 }
 0xcdb   :  { %v2985_v6 = vpop.xlane.xlu1 %2984 }
 0xcdc   :  { %v3153_v47 = vrot.slane %v2985_v6, %v12641_v14 }
 0xcde   :  { %v12922_v32 = vpop.xlane.xlu0 %3506 }
 0xcdf   :  { %v12924_v18 = vpop.xlane.xlu1 %3503 }
 0xce2   :  { %v12926_v43 = vpop.xlane.xlu0 %3548 }
 0xce3   :  { %v12928_v20 = vpop.xlane.xlu1 %3545 }
 0xce6   :  { %v12930_v58 = vpop.xlane.xlu0 %4067 }
 0xce7   :  { %v12932_v48 = vpop.xlane.xlu1 %4064 }
 0xcea   :  { %v12934_v54 = vpop.xlane.xlu0 %4103 }
 0xceb   :  { %15442 = vst [vmem:[#allocation147_spill] sm:$0xff] %v12934_v54  ;;  %v12936_v1 = vpop.xlane.xlu1 %4100  ;;  %v3135_v54 = vrot.slane %v12827_v9, %v12641_v14 }
 0xcec   :  { %15443 = vst [vmem:[#allocation146_spill] sm:$0xff] %v12936_v1  ;;  %v3139_v1 = vrot.slane %v12825_v11, %v12646_v52 }
 0xcee   :  { %v12938_v21 = vpop.xlane.xlu0 %4109  ;;  %v3140_v9 = vsel %vm2456_vm4, %v3139_v1, %v3135_v54 }
 0xcef   :  { %15444 = vst [vmem:[#allocation148_spill] sm:$0xff] %v12938_v21  ;;  %v12940_v19 = vpop.xlane.xlu1 %4106 }
 0xcf0   :  { %15445 = vst [vmem:[#allocation149_spill] sm:$0xff] %v12940_v19 }
 0xcf2   :  { %v12942_v63 = vpop.xlane.xlu0 %2951 }
 0xcf3   :  { %v12944_v4 = vpop.xlane.xlu1 %2948 }
 0xcf6   :  { %v2994_v12 = vpop.xlane.xlu0 %2993 }
 0xcf7   :  { %v2991_v34 = vpop.xlane.xlu1 %2990 }
 0xcf8   :  { %v3162_v11 = vrot.slane %v2991_v34, %v12641_v14 }
 0xcfa   :  { %v12946_v56 = vpop.xlane.xlu0 %3512 }
 0xcfb   :  { %15446 = vst [vmem:[#allocation150_spill] sm:$0xff] %v12946_v56  ;;  %v12948_v22 = vpop.xlane.xlu1 %3509  ;;  %v3157_v56 = vrot.slane %v2988_v57, %v12646_v52 }
 0xcfc   :  { %15447 = vst [vmem:[#allocation151_spill] sm:$0xff] %v12948_v22  ;;  %v3148_v22 = vrot.slane %v12873_v5, %v12646_v52 }
 0xcfd   :  { %v3158_v57 = vsel %vm2456_vm4, %v3157_v56, %v3153_v47 }
 0xcfe   :  { %v12950_v59 = vpop.xlane.xlu0 %3554 }
 0xcff   :  { %v12952_v61 = vpop.xlane.xlu1 %3551 }
 0xd02   :  { %v12954_v2 = vpop.xlane.xlu0 %4073 }
 0xd03   :  { %15448 = vst [vmem:[#allocation152_spill] sm:$0xff] %v12954_v2  ;;  %v12960_v40 = vpop.xlane.xlu1 %4070  ;;  %v3144_v2 = vrot.slane %v12875_v42, %v12641_v14  ;;  %v3185_v42 = vsel %vm2595_vm6, %v3131_v60, %v12746_v23 }
 0xd04   :  { %15449 = vst [vmem:[#allocation153_spill] sm:$0xff] %v12960_v40  ;;  %v3166_v40 = vrot.slane %v2994_v12, %v12646_v52 }
 0xd05   :  { %v3149_v5 = vsel %vm2456_vm4, %v3148_v22, %v3144_v2 }
 0xd06   :  { %v12972_v19 = vpop.xlane.xlu0 %4115  ;;  %v3167_v46 = vsel %vm2456_vm4, %v3166_v40, %v3162_v11 }
 0xd07   :  { %15450 = vst [vmem:[#allocation123_spill] sm:$0xff] %v12972_v19  ;;  %v12977_v21 = vpop.xlane.xlu1 %4112  ;;  %v3186_v19 = vsel %vm2597_vm8, %v3140_v9, %v3185_v42 }
 0xd08   :  { %15451 = vst [vmem:[#allocation154_spill] sm:$0xff] %v12977_v21  ;;  %v3187_v34 = vsel %vm2599_vm9, %v3149_v5, %v3186_v19 }
 0xd09   :  { %v3188_v54 = vsel %vm2601_vm10, %v3158_v57, %v3187_v34 }
 0xd0a   :  { %v3000_v6 = vpop.xlane.xlu0 %2999  ;;  %v3189_v1 = vsel %vm2603_vm11, %v3167_v46, %v3188_v54  ;;  %v3618_v46 = vrot.slane %v12795_v37, %v12641_v14  ;;  %v3609_v37 = vrot.slane %v12787_v36, %v12641_v14  ;;  %v3631_v36 = vrot.slane %v12833_v31, %v12646_v52 }
 0xd0b   :  { %v3175_v27 = vrot.slane %v3000_v6, %v12646_v52  ;;  %v2997_v12 = vpop.xlane.xlu1 %2996  ;;  %v3622_v6 = vrot.slane %v12793_v49, %v12646_v52  ;;  %v3613_v49 = vrot.slane %v12785_v16, %v12646_v52  ;;  %v3712_v31 = vrot.slane %v12926_v43, %v12646_v52 }
 0xd0c   :  { %v3171_v21 = vrot.slane %v2997_v12, %v12641_v14  ;;  %v3072_v12 = vrot.slane %v12819_v10, %v12641_v14  ;;  %v2506_v10 = vrot.slane %v12803_v28, %v12641_v14  ;;  %v3699_v28 = vrot.slane %v12883_v17, %v12641_v14 }
 0xd0d   :  { %v3081_v17 = vrot.slane %v12869_v13, %v12641_v14 }
 0xd0e   :  { %v12990_v2 = vpop.xlane.xlu0 %3518  ;;  %v3176_v23 = vsel %vm2456_vm4, %v3175_v27, %v3171_v21  ;;  %v3076_v27 = vrot.slane %v12817_v29, %v12646_v52  ;;  %v2510_v29 = vrot.slane %v12801_v55, %v12646_v52  ;;  %v3703_v55 = vrot.slane %v12881_v35, %v12646_v52 }
 0xd0f   :  { %v12994_v56 = vpop.xlane.xlu1 %3515  ;;  %v3190_v22 = vsel %vm2605_vm12, %v3176_v23, %v3189_v1  ;;  %v15454_v1 = vld [vmem:[#allocation138_spill] sm:$0xff]  ;;  %v3694_v23 = vrot.slane %v12849_v0, %v12646_v52  ;;  %v3685_v0 = vrot.slane %v12841_v50, %v12646_v52  ;;  %v3085_v35 = vrot.slane %v12867_v33, %v12646_v52 }
 0xd10   :  { %v12999_v40 = vsel %vm2412_vm13, %v3190_v22, -1e+09  ;;  %v3690_v22 = vrot.slane %v12851_v24, %v12641_v14  ;;  %v3681_v24 = vrot.slane %v12843_v44, %v12641_v14  ;;  %v3717_v50 = vrot.slane %v12952_v61, %v12641_v14 }
 0xd11   :  { %15452 = vst [vmem:[#allocation155_spill] sm:$0xff] %v12999_v40  ;;  %v3198_v19 = vsel %vm831_vm1, %v12999_v40, -inf  ;;  %v3077_v40 = vsel %vm2456_vm4, %v3076_v27, %v3072_v12  ;;  %v3721_v27 = vrot.slane %v12950_v59, %v12646_v52  ;;  %v3614_v44 = vsel %vm2456_vm4, %v3613_v49, %v3609_v37 }
 0xd12   :  { %3199 = vmax.xlane.f32.xlu0 %v3198_v19  ;;  %v3561_v47 = vpop.xlane.xlu0 %3560  ;;  %v3623_v19 = vsel %vm2456_vm4, %v3622_v6, %v3618_v46  ;;  %v3627_v6 = vrot.slane %v12835_v30, %v12641_v14  ;;  %v3708_v30 = vrot.slane %v12928_v20, %v12641_v14  ;;  %v3695_v12 = vsel %vm2456_vm4, %v3694_v23, %v3690_v22 }
 0xd13   :  { %v3558_v60 = vpop.xlane.xlu1 %3557  ;;  %v3730_v43 = vrot.slane %v3561_v47, %v12646_v52  ;;  %v3750_v33 = vsel %vm2593_vm5, %v3623_v19, %v3614_v44  ;;  %v3704_v13 = vsel %vm2456_vm4, %v3703_v55, %v3699_v28  ;;  %v13082_v61 = vsel %vm2456_vm4, %v2510_v29, %v2506_v10 }
 0xd14   :  { %v3726_v20 = vrot.slane %v3558_v60, %v12641_v14  ;;  %v3180_v47 = vsel %vm2599_vm9, %v3077_v40, %v12777_v7  ;;  %v3686_v60 = vsel %vm2456_vm4, %v3685_v0, %v3681_v24  ;;  %v3713_v23 = vsel %vm2456_vm4, %v3712_v31, %v3708_v30 }
 0xd15   :  { %v3632_v22 = vsel %vm2456_vm4, %v3631_v36, %v3627_v6  ;;  %v3757_v49 = vsel %vm2593_vm5, %v3695_v12, %v3686_v60  ;;  %v3640_v37 = vrot.slane %v12877_v45, %v12646_v52  ;;  %v3094_v7 = vrot.slane %v12909_v25, %v12646_v52 }
 0xd16   :  { %v13003_v11 = vpop.xlane.xlu0 %4079  ;;  %v3758_v19 = vsel %vm2595_vm6, %v3704_v13, %v3757_v49  ;;  %v3731_v40 = vsel %vm2456_vm4, %v3730_v43, %v3726_v20  ;;  %v3090_v10 = vrot.slane %v12913_v41, %v12641_v14  ;;  %v3636_v45 = vrot.slane %v12879_v26, %v12641_v14  ;;  %v13146_v13 = vld [vmem:[%s15439_s2] sm:$0xff] }
 0xd17   :  { %v13005_v9 = vpop.xlane.xlu1 %4076  ;;  %v3759_v36 = vsel %vm2597_vm8, %v3713_v23, %v3758_v19  ;;  %v4195_v0 = vrot.slane %v12893_v3, %v12646_v52  ;;  %v4191_v41 = vrot.slane %v12897_v39, %v12641_v14  ;;  %v3103_v31 = vrot.slane %v12942_v63, %v12646_v52  ;;  %15457 = vst [vmem:[#allocation135_spill] sm:$0xff] %v13146_v13  ;;  %v15458_v49 = vld [vmem:[#allocation148_spill] sm:$0xff]  ;;  %v15460_v19 = vld [vmem:[#allocation150_spill] sm:$0xff] }
 0xd18   :  { %v3649_v26 = vrot.slane %v12922_v32, %v12646_v52  ;;  %v3645_v3 = vrot.slane %v12924_v18, %v12641_v14  ;;  %v2519_v63 = vrot.slane %v12857_v38, %v12646_v52  ;;  %v4186_v18 = vrot.slane %v12885_v51, %v12646_v52 }
 0xd19   :  { %v4182_v44 = vrot.slane %v12887_v62, %v12641_v14  ;;  %v4196_v43 = vsel %vm2456_vm4, %v4195_v0, %v4191_v41  ;;  %v4204_v62 = vrot.slane %v12930_v58, %v12646_v52  ;;  %v4200_v60 = vrot.slane %v12932_v48, %v12641_v14 }
 0xd1a   :  { %v13007_v21 = vpop.xlane.xlu0 %4121  ;;  %v3751_v48 = vsel %vm2595_vm6, %v3632_v22, %v3750_v33  ;;  %vm2411_vm14 = vcmp.gt.f32.partialorder %v13146_v13, 0.0  ;;  %v15462_v33 = vld [vmem:[#allocation147_spill] sm:$0xff] }
 0xd1b   :  { %v13009_v5 = vpop.xlane.xlu1 %4118  ;;  %v4258_v22 = vrot.slane %v15462_v33, %v12646_v52 }
 0xd1c   :  { %15453 = vst [vmem:[#allocation157_spill] sm:$0xff] %v13009_v5 }
 0xd1e   :  { %v13011_v42 = vpop.xlane.xlu0 %3524 }
 0xd1f   :  { %v13013_v57 = vpop.xlane.xlu1 %3521 }
 0xd22   :  { %v3567_v34 = vpop.xlane.xlu0 %3566 }
 0xd23   :  { %v3564_v54 = vpop.xlane.xlu1 %3563 }
 0xd24   :  { %v3735_v59 = vrot.slane %v3564_v54, %v12641_v14  ;;  %v3722_v54 = vsel %vm2456_vm4, %v3721_v27, %v3717_v50  ;;  %v3095_v27 = vsel %vm2456_vm4, %v3094_v7, %v3090_v10  ;;  %v3658_v7 = vrot.slane %v15460_v19, %v12646_v52  ;;  %v15471_v19 = vld [vmem:[#allocation141_spill] sm:$0xff] }
 0xd25   :  { %v3760_v25 = vsel %vm2599_vm9, %v3722_v54, %v3759_v36  ;;  %v15459_v54 = vld [vmem:[#allocation149_spill] sm:$0xff]  ;;  %v4187_v10 = vsel %vm2456_vm4, %v4186_v18, %v4182_v44  ;;  %v15467_v18 = vld [vmem:[#allocation154_spill] sm:$0xff] }
 0xd26   :  { %v13041_v16 = vpop.xlane.xlu0 %4085  ;;  %v3761_v30 = vsel %vm2601_vm10, %v3731_v40, %v3760_v25  ;;  %v15461_v40 = vld [vmem:[#allocation151_spill] sm:$0xff]  ;;  %v4205_v25 = vsel %vm2456_vm4, %v4204_v62, %v4200_v60  ;;  %v4272_v44 = vrot.slane %v15467_v18, %v12641_v14 }
 0xd27   :  { %15455 = vst [vmem:[#allocation156_spill] sm:$0xff] %v13041_v16  ;;  %v13051_v46 = vpop.xlane.xlu1 %4082  ;;  %v3739_v16 = vrot.slane %v3567_v34, %v12646_v52  ;;  %v3086_v34 = vsel %vm2456_vm4, %v3085_v35, %v3081_v17 }
 0xd28   :  { %15456 = vst [vmem:[#allocation158_spill] sm:$0xff] %v13051_v46  ;;  %v3181_v38 = vsel %vm2601_vm10, %v3086_v34, %v3180_v47  ;;  %v4267_v34 = vrot.slane %v15458_v49, %v12646_v52 }
 0xd29   :  { %v3740_v6 = vsel %vm2456_vm4, %v3739_v16, %v3735_v59  ;;  %v3099_v16 = vrot.slane %v12944_v4, %v12641_v14  ;;  %v2515_v4 = vrot.slane %v12859_v53, %v12641_v14  ;;  %v3641_v53 = vsel %vm2456_vm4, %v3640_v37, %v3636_v45 }
 0xd2a   :  { %v13073_v46 = vpop.xlane.xlu0 %4127  ;;  %v3762_v39 = vsel %vm2603_vm11, %v3740_v6, %v3761_v30  ;;  %v3650_v59 = vsel %vm2456_vm4, %v3649_v26, %v3645_v3  ;;  %v3182_v23 = vsel %vm2603_vm11, %v3095_v27, %v3181_v38  ;;  %v4263_v37 = vrot.slane %v15459_v54, %v12641_v14  ;;  %v15466_v27 = vld [vmem:[#allocation123_spill] sm:$0xff] }
 0xd2b   :  { %v13079_v5 = vpop.xlane.xlu1 %4124  ;;  %v3104_v51 = vsel %vm2456_vm4, %v3103_v31, %v3099_v16  ;;  %v3752_v6 = vsel %vm2597_vm8, %v3641_v53, %v3751_v48  ;;  %v2520_v45 = vsel %vm2456_vm4, %v2519_v63, %v2515_v4  ;;  %v15465_v63 = vld [vmem:[#allocation153_spill] sm:$0xff]  ;;  %v3667_v53 = vrot.slane %v12990_v2, %v12646_v52 }
 0xd2c   :  { %v3183_v36 = vsel %vm2605_vm12, %v3104_v51, %v3182_v23  ;;  %v3753_v0 = vsel %vm2599_vm9, %v3650_v59, %v3752_v6  ;;  %v4268_v16 = vsel %vm2456_vm4, %v4267_v34, %v4263_v37  ;;  %v4209_v4 = vrot.slane %v15465_v63, %v12641_v14  ;;  %v15470_v34 = vld [vmem:[#allocation140_spill] sm:$0xff] }
 0xd2d   :  { %v13184_v3 = vsel %vm2411_vm14, %v3183_v36, -1e+09  ;;  %v15469_v59 = vrot.slane %v12636_v8, %v12646_v52  ;;  %v3672_v2 = vrot.slane %v13013_v57, %v12641_v14  ;;  %v4218_v48 = vrot.slane %v13005_v9, %v12641_v14 }
 0xd2e   :  { %v3573_v29 = vpop.xlane.xlu0 %3572  ;;  %v3195_v54 = vsel %vm831_vm1, %v13184_v3, -inf  ;;  %v4285_v6 = vrot.slane %v13007_v21, %v12646_v52 }
 0xd2f   :  { %v3748_v55 = vrot.slane %v3573_v29, %v12646_v52  ;;  %v3570_v28 = vpop.xlane.xlu1 %3569  ;;  %v3654_v29 = vrot.slane %v15461_v40, %v12641_v14  ;;  %v15476_v9 = vld [vmem:[#allocation158_spill] sm:$0xff] }
 0xd30   :  { %v3744_v24 = vrot.slane %v3570_v28, %v12641_v14 }
 0xd31   :  { %v3659_v30 = vsel %vm2456_vm4, %v3658_v7, %v3654_v29  ;;  %v4222_v29 = vrot.slane %v13003_v11, %v12646_v52  ;;  %v15475_v11 = vld [vmem:[#allocation156_spill] sm:$0xff] }
 0xd32   :  { %v13120_v35 = vpop.xlane.xlu0 %4091  ;;  %v3749_v17 = vsel %vm2456_vm4, %v3748_v55, %v3744_v24  ;;  %v4323_v55 = vsel %vm2593_vm5, %v4196_v43, %v4187_v10  ;;  %v15463_v24 = vld [vmem:[#allocation146_spill] sm:$0xff]  ;;  %v3663_v43 = vrot.slane %v12994_v56, %v12641_v14  ;;  %v3754_v7 = vsel %vm2601_vm10, %v3659_v30, %v3753_v0  ;;  %v15472_v10 = vld [vmem:[#allocation143_spill] sm:$0xff] }
 0xd33   :  { %v13129_v50 = vpop.xlane.xlu1 %4088  ;;  %v3763_v32 = vsel %vm2605_vm12, %v3749_v17, %v3762_v39  ;;  %v4254_v41 = vrot.slane %v15463_v24, %v12641_v14  ;;  %v15464_v17 = vld [vmem:[#allocation152_spill] sm:$0xff]  ;;  %v15474_v0 = vld [vmem:[#allocation142_spill] sm:$0xff]  ;;  %v4290_v30 = vrot.slane %v13079_v5, %v12641_v14  ;;  %v4223_v5 = vsel %vm2456_vm4, %v4222_v29, %v4218_v48 }
 0xd34   :  { %v13138_v12 = vsel %vm2412_vm13, %v3763_v32, -1e+09  ;;  %v4213_v39 = vrot.slane %v15464_v17, %v12646_v52  ;;  %v4276_v32 = vrot.slane %v15466_v27, %v12646_v52  ;;  %v3668_v40 = vsel %vm2456_vm4, %v3667_v53, %v3663_v43 }
 0xd35   :  { %v3771_v20 = vsel %vm831_vm1, %v13138_v12, -inf  ;;  %v4259_v60 = vsel %vm2456_vm4, %v4258_v22, %v4254_v41  ;;  %v4231_v41 = vrot.slane %v15475_v11, %v12646_v52  ;;  %v4236_v17 = vrot.slane %v13129_v50, %v12641_v14 }
 0xd36   :  { %3772 = vmax.xlane.f32.xlu0 %v3771_v20  ;;  %v2317_v47 = vpop.xlane.xlu0 %2316  ;;  %v15468_v20 = vrot.slane %v15454_v1, %v12646_v52  ;;  %v4324_v1 = vsel %vm2595_vm6, %v4205_v25, %v4323_v55  ;;  %v4330_v49 = vsel %vm2593_vm5, %v4268_v16, %v4259_v60  ;;  %v4214_v37 = vsel %vm2456_vm4, %v4213_v39, %v4209_v4  ;;  %v15473_v55 = vld [vmem:[#allocation157_spill] sm:$0xff] }
 0xd37   :  { %v13163_v58 = vpop.xlane.xlu1 %4130  ;;  %v2450_v28 = vrot.slane %v2317_v47, %v12641_v14  ;;  %v3676_v47 = vrot.slane %v13011_v42, %v12646_v52  ;;  %v4277_v42 = vsel %vm2456_vm4, %v4276_v32, %v4272_v44  ;;  %v4294_v16 = vrot.slane %v13073_v46, %v12646_v52 }
 0xd38   :  { %v4299_v18 = vrot.slane %v13163_v58, %v12641_v14  ;;  %v4325_v43 = vsel %vm2597_vm8, %v4214_v37, %v4324_v1  ;;  %v4331_v60 = vsel %vm2595_vm6, %v4277_v42, %v4330_v49 }
 0xd39   :  { %v2457_v51 = vsel %vm2456_vm4, %v15468_v20, %v2450_v28  ;;  %v4281_v28 = vrot.slane %v15473_v55, %v12641_v14  ;;  %v3677_v24 = vsel %vm2456_vm4, %v3676_v47, %v3672_v2  ;;  %v4295_v20 = vsel %vm2456_vm4, %v4294_v16, %v4290_v30 }
 0xd3a   :  { %v2323_v31 = vpop.xlane.xlu0 %2322  ;;  %v4326_v47 = vsel %vm2599_vm9, %v4223_v5, %v4325_v43 }
 0xd3b   :  { %v2461_v26 = vrot.slane %v2323_v31, %v12641_v14  ;;  %v4095_v38 = vpop.xlane.xlu1 %4094  ;;  %v4227_v31 = vrot.slane %v15476_v9, %v12641_v14  ;;  %v4286_v27 = vsel %vm2456_vm4, %v4285_v6, %v4281_v28  ;;  %v15477_v28 = vld [vmem:[#allocation145_spill] sm:$0xff] }
 0xd3c   :  { %v4245_v44 = vrot.slane %v4095_v38, %v12641_v14  ;;  %v4332_v2 = vsel %vm2597_vm8, %v4286_v27, %v4331_v60 }
 0xd3d   :  { %v2466_v62 = vsel %vm2456_vm4, %v15469_v59, %v2461_v26  ;;  %v4240_v26 = vrot.slane %v13120_v35, %v12646_v52  ;;  %v4232_v32 = vsel %vm2456_vm4, %v4231_v41, %v4227_v31  ;;  %v15478_v41 = vld [vmem:[#allocation155_spill] sm:$0xff] }
 0xd3e   :  { %v2594_v56 = vsel %vm2593_vm5, %v2466_v62, %v2457_v51  ;;  %v4134_v23 = vpop.xlane.xlu0 %4133 }
 0xd3f   :  { %v2596_v8 = vsel %vm2595_vm6, %v15470_v34, %v2594_v56  ;;  %v4137_v25 = vpop.xlane.xlu1 %4136  ;;  %v4303_v63 = vrot.slane %v4134_v23, %v12646_v52  ;;  %v4241_v51 = vsel %vm2456_vm4, %v4240_v26, %v4236_v17  ;;  %v4327_v34 = vsel %vm2601_vm10, %v4232_v32, %v4326_v47 }
 0xd40   :  { %v2598_v57 = vsel %vm2597_vm8, %v15471_v19, %v2596_v8  ;;  %v4308_v59 = vrot.slane %v4137_v25, %v12641_v14  ;;  %v4333_v8 = vsel %vm2599_vm9, %v4295_v20, %v4332_v2  ;;  %v4328_v42 = vsel %vm2603_vm11, %v4241_v51, %v4327_v34 }
 0xd41   :  { %v2600_v36 = vsel %vm2599_vm9, %v15472_v10, %v2598_v57  ;;  %v4304_v58 = vsel %vm2456_vm4, %v4303_v63, %v4299_v18 }
 0xd42   :  { %v4098_v33 = vpop.xlane.xlu0 %4097  ;;  %v2602_v22 = vsel %vm2601_vm10, %v15474_v0, %v2600_v36  ;;  %v4334_v19 = vsel %vm2601_vm10, %v4304_v58, %v4333_v8 }
 0xd43   :  { %v2604_v21 = vsel %vm2603_vm11, %v13082_v61, %v2602_v22  ;;  %v4249_v4 = vrot.slane %v4098_v33, %v12646_v52  ;;  %v3755_v61 = vsel %vm2603_vm11, %v3668_v40, %v3754_v7  ;;  %v4143_v62 = vpop.xlane.xlu1 %4142 }
 0xd44   :  { %v2606_v39 = vsel %vm2605_vm12, %v2520_v45, %v2604_v21  ;;  %v3756_v45 = vsel %vm2605_vm12, %v3677_v24, %v3755_v61  ;;  %v4317_v49 = vrot.slane %v4143_v62, %v12641_v14 }
 0xd45   :  { %v13256_v46 = vsel %vm2411_vm14, %v2606_v39, -1e+09  ;;  %v4250_v38 = vsel %vm2456_vm4, %v4249_v4, %v4245_v44  ;;  %v3766_v1 = vsel %vm2411_vm14, %v3756_v45, -1e+09 }
 0xd46   :  { %v4140_v35 = vpop.xlane.xlu0 %4139  ;;  %v2618_v50 = vsel %vm831_vm1, %v13256_v46, -inf  ;;  %v4329_v57 = vsel %vm2605_vm12, %v4250_v38, %v4328_v42  ;;  %v3768_v29 = vsel %vm831_vm1, %v3766_v1, -inf }
 0xd47   :  { %v4312_v53 = vrot.slane %v4140_v35, %v12646_v52  ;;  %2619 = vmax.xlane.f32.xlu1 %v2618_v50 }
 0xd49   :  { %v4313_v56 = vsel %vm2456_vm4, %v4312_v53, %v4308_v59 }
 0xd4a   :  { %v4146_v23 = vpop.xlane.xlu0 %4145  ;;  %v4335_v40 = vsel %vm2603_vm11, %v4313_v56, %v4334_v19  ;;  %v15479_v19 = vld [vmem:[#allocation131_spill] sm:$0xff] }
 0xd4b   :  { %v4321_v37 = vrot.slane %v4146_v23, %v12646_v52  ;;  %3196 = vmax.xlane.f32.xlu1 %v3195_v54  ;;  %v4339_v54 = vsel %vm2411_vm14, %v4329_v57, -1e+09  ;;  %v15480_v57 = vld [vmem:[#allocation130_spill] sm:$0xff] }
 0xd4c   :  { %v4341_v6 = vsel %vm831_vm1, %v4339_v54, -inf }
 0xd4d   :  { %v4322_v7 = vsel %vm2456_vm4, %v4321_v37, %v4317_v49 }
 0xd4e   :  { %v4336_v48 = vsel %vm2605_vm12, %v4322_v7, %v4335_v40  ;;  %v9872_v7 = vpack.i.bf16 %v15480_v57, %v15479_v19 }
 0xd4f   :  { %3769 = vmax.xlane.f32.xlu1 %v3768_v29  ;;  %v4340_v10 = vsel %vm2412_vm13, %v4336_v48, -1e+09 }
 0xd50   :  { %v4344_v36 = vsel %vm831_vm1, %v4340_v10, -inf }
 0xd51   :  { %4345 = vmax.xlane.f32.xlu0 %v4344_v36 }
 0xd53   :  { %4342 = vmax.xlane.f32.xlu1 %v4341_v6 }
 0xd67   :  { %v2623_v55 = vpop.xlane.xlu0 %2622 }
 0xd68   :  { %v2625_v25 = vsub.f32 %v15477_v28, %v2623_v55 }
 0xd6a   :  { %v2628_v33 = vmul.f32 1.442695, %v2625_v25 }
 0xd6c   :  { %9919 = vpow2.f32 %v2628_v33 }
 0xd76   :  { %v9920_v0 = vpop.eup %9919 }
 0xd77   :  { %v13300_v22 = vmul.f32 %v9920_v0, %v12901_v15 }
 0xd79   :  { %v2635_v24 = vsel %vm831_vm1, %v13300_v22, 0.0 }
 0xd7a   :  { %2636 = vadd.xlane.f32.xlu0 %v2635_v24 }
 0xd9f   :  { %v3200_v11 = vpop.xlane.xlu0 %3199 }
 0xda0   :  { %v3202_v9 = vsub.f32 %v15478_v41, %v3200_v11 }
 0xda2   :  { %v3205_v31 = vmul.f32 1.442695, %v3202_v9 }
 0xda4   :  { %9921 = vpow2.f32 %v3205_v31 }
 0xdae   :  { %v9922_v16 = vpop.eup %9921 }
 0xdaf   :  { %v13306_v21 = vmul.f32 %v9922_v16, %v12901_v15 }
 0xdb1   :  { %v3212_v30 = vsel %vm831_vm1, %v13306_v21, 0.0 }
 0xdb2   :  { %3213 = vadd.xlane.f32.xlu0 %v3212_v30 }
 0xdc3   :  { %v3773_v26 = vpop.xlane.xlu0 %3772 }
 0xdc4   :  { %v3775_v17 = vsub.f32 %v13138_v12, %v3773_v26 }
 0xdc6   :  { %v3778_v39 = vmul.f32 1.442695, %v3775_v17 }
 0xdc8   :  { %9923 = vpow2.f32 %v3778_v39 }
 0xdd2   :  { %v9924_v63 = vpop.eup %9923 }
 0xdd3   :  { %v13312_v4 = vmul.f32 %v9924_v63, %v12901_v15 }
 0xdd4   :  { %v2620_v61 = vpop.xlane.xlu1 %2619 }
 0xdd5   :  { %v2624_v5 = vsub.f32 %v13256_v46, %v2620_v61  ;;  %v3785_v27 = vsel %vm831_vm1, %v13312_v4, 0.0 }
 0xdd6   :  { %3786 = vadd.xlane.f32.xlu0 %v3785_v27 }
 0xdd7   :  { %v2626_v35 = vmul.f32 1.442695, %v2624_v5 }
 0xdd8   :  { %v3197_v50 = vpop.xlane.xlu1 %3196 }
 0xdd9   :  { %9925 = vpow2.f32 %v2626_v35  ;;  %v3201_v45 = vsub.f32 %v13184_v3, %v3197_v50 }
 0xddb   :  { %v3203_v32 = vmul.f32 1.442695, %v3201_v45 }
 0xddc   :  { %v3770_v12 = vpop.xlane.xlu1 %3769 }
 0xddd   :  { %9927 = vpow2.f32 %v3203_v32  ;;  %v3774_v18 = vsub.f32 %v3766_v1, %v3770_v12 }
 0xdde   :  { %v4346_v44 = vpop.xlane.xlu0 %4345 }
 0xddf   :  { %v3776_v53 = vmul.f32 1.442695, %v3774_v18  ;;  %v4348_v43 = vsub.f32 %v4340_v10, %v4346_v44 }
 0xde0   :  { %v4343_v20 = vpop.xlane.xlu1 %4342 }
 0xde1   :  { %9929 = vpow2.f32 %v3776_v53  ;;  %v4351_v51 = vmul.f32 1.442695, %v4348_v43  ;;  %v4347_v46 = vsub.f32 %v4339_v54, %v4343_v20  ;;  %v15482_v20 = vmov 0.0  }
 0xde3   :  { %v9926_v59 = vpop.eup %9925  ;;  %9931 = vpow2.f32 %v4351_v51  ;;  %v4349_v62 = vmul.f32 1.442695, %v4347_v46  ;;  %v813_v51 = vld [vmem:[%s15481_s13] sm:$0xf]  ;;  %v15483_v46 = vld [vmem:[#allocation124_spill] sm:$0xff] }
 0xde4   :  { %v2630_v60 = vmul.f32 %v9926_v59, %v13146_v13  ;;  %v13354_v59 = vrot.slane %v813_v51, %v15483_v46 }
 0xde5   :  { %9933 = vpow2.f32 %v4349_v62 }
 0xde6   :  { %v2632_v47 = vsel %vm831_vm1, %v2630_v60, 0.0  ;;  %15484 = vst [vmem:[#allocation136_spill] sm:$0xff] %v13354_v59 }
 0xde7   :  { %v9928_v3 = vpop.eup %9927  ;;  %2633 = vadd.xlane.f32.xlu1 %v2632_v47 }
 0xde8   :  { %v3207_v58 = vmul.f32 %v9928_v3, %v13146_v13  ;;  %v15487_v3 = vld [vmem:[#allocation128_spill] sm:$0xff] }
 0xdea   :  { %v3209_v38 = vsel %vm831_vm1, %v3207_v58, 0.0 }
 0xdeb   :  { %v9930_v2 = vpop.eup %9929  ;;  %3210 = vadd.xlane.f32.xlu1 %v3209_v38 }
 0xdec   :  { %v3780_v56 = vmul.f32 %v9930_v2, %v13146_v13 }
 0xded   :  { %v9932_v23 = vpop.eup %9931 }
 0xdee   :  { %v3782_v1 = vsel %vm831_vm1, %v3780_v56, 0.0  ;;  %v13325_v34 = vmul.f32 %v9932_v23, %v12901_v15 }
 0xdef   :  { %v9934_v8 = vpop.eup %9933  ;;  %3783 = vadd.xlane.f32.xlu1 %v3782_v1  ;;  %v8988_v1 = vld [vmem:[#allocation29] ss:$0 sm:$0xff] }
 0xdf0   :  { %v4358_v49 = vsel %vm831_vm1, %v13325_v34, 0.0  ;;  %v4353_v37 = vmul.f32 %v9934_v8, %v13146_v13 }
 0xdf1   :  { %4359 = vadd.xlane.f32.xlu0 %v4358_v49 }
 0xdf2   :  { %v4355_v42 = vsel %vm831_vm1, %v4353_v37, 0.0 }
 0xdf3   :  { %4356 = vadd.xlane.f32.xlu1 %v4355_v42 }
 0xe04   :  { %9873 = vrot.lane.b32.xlu1 %v9872_v7, %s11081_s7 }
 0xe07   :  { %v2637_v40 = vpop.xlane.xlu0 %2636 }
 0xe08   :  { %v2639_v36 = vmax.f32 %v2637_v40, 1e-06 }
 0xe3f   :  { %v3214_v10 = vpop.xlane.xlu0 %3213 }
 0xe40   :  { %v3216_v55 = vmax.f32 %v3214_v10, 1e-06 }
 0xe63   :  { %v3787_v28 = vpop.xlane.xlu0 %3786 }
 0xe64   :  { %v3789_v33 = vmax.f32 %v3787_v28, 1e-06 }
 0xe74   :  { %v2634_v29 = vpop.xlane.xlu1 %2633 }
 0xe75   :  { %v2638_v48 = vmax.f32 %v2634_v29, 1e-06  ;;  %v15491_v29 = vld [vmem:[#allocation133_spill] sm:$0xff] }
 0xe77   :  { %9935 = vrcp.f32 %v2638_v48  ;;  %v1827_v48 = vadd.f32 %v15491_v29, %v8988_v1 }
 0xe78   :  { %v3211_v54 = vpop.xlane.xlu1 %3210 }
 0xe79   :  { %v3215_v6 = vmax.f32 %v3211_v54, 1e-06 }
 0xe7b   :  { %9937 = vrcp.f32 %v3215_v6  ;;  %v15492_v6 = vld [vmem:[#allocation134_spill] sm:$0xff] }
 0xe7c   :  { %v3784_v25 = vpop.xlane.xlu1 %3783  ;;  %9939 = vrcp.f32 %v2639_v36 }
 0xe7d   :  { %v3788_v0 = vmax.f32 %v3784_v25, 1e-06  ;;  %9941 = vrcp.f32 %v3216_v55  ;;  %v1822_v55 = vadd.f32 %v8988_v1, %v15492_v6  ;;  %v765_v1 = vld [vmem:[%s15493_s10 + $0x38] sm:$0xff] }
 0xe7e   :  { %v4360_v24 = vpop.xlane.xlu0 %4359 }
 0xe7f   :  { %9943 = vrcp.f32 %v3788_v0  ;;  %v4362_v11 = vmax.f32 %v4360_v24, 1e-06  ;;  %v8999_v24 = vld [vmem:[#allocation35] ss:$0 sm:$0xff] }
 0xe80   :  { %v4357_v41 = vpop.xlane.xlu1 %4356  ;;  %9945 = vrcp.f32 %v3789_v33 }
 0xe81   :  { %v9936_v9 = vpop.eup %9935  ;;  %v4361_v31 = vmax.f32 %v4357_v41, 1e-06  ;;  %9947 = vrcp.f32 %v4362_v11 }
 0xe82   :  { %v2642_v16 = vmul.f32 %v9936_v9, %v2630_v60  ;;  %v1831_v9 = vadd.f32 %v1827_v48, %v15480_v57 }
 0xe83   :  { %9949 = vrcp.f32 %v4361_v31 }
 0xe84   :  { %9345 = vmatprep.mubr.msk.f32.mxu1 %vm831_vm1, %v2642_v16  ;;  %v9874_v30 = vpop.permute.xlu1 %9873  ;;  %v1830_v16 = vadd.f32 %v1822_v55, %v15479_v19  ;;  %v752_v55 = vld [vmem:[#allocation37] sm:$0x3] }
 0xe85   :  { %v9938_v26 = vpop.eup %9937  ;;  %v9876_v17 = vunpack.i.h.bf16 %v9874_v30  ;;  %v9875_v39 = vunpack.i.l.bf16 %v9874_v30 }
 0xe86   :  { %v3219_v63 = vmul.f32 %v9938_v26, %v3207_v58  ;;  %v9940_v61 = vpop.eup %9939  ;;  %v13360_v58 = vrot.slane %v813_v51, %v15487_v3 }
 0xe87   :  { %v9618_v5 = vpack.c.bf16 %v9876_v17, %v9875_v39  ;;  %v9942_v27 = vpop.eup %9941  ;;  %v2643_v45 = vmul.f32 %v9940_v61, %v13300_v22  ;;  %v4465_v39 = vmul.f32 0.6, %v1831_v9  ;;  %v4464_v61 = vmul.f32 0.6, %v1830_v16 }
 0xe88   :  { %9352 = vmatprep.mubr.msk.f32.mxu0 %vm831_vm1, %v3219_v63  ;;  %v3220_v32 = vmul.f32 %v9942_v27, %v13306_v21  ;;  %v13347_v21 = vld [vmem:[%s15372_s17] sm:$0xff]  ;;  %15488 = vst [vmem:[#allocation148_spill] sm:$0xff] %v13360_v58 }
 0xe89   :  { %v9944_v35 = vpop.eup %9943  ;;  %9619 = vmatprep.subr.bf16.mxu1 %v9618_v5  ;;  %9623 = vmatprep.subr.bf16.mxu0 %v9618_v5 }
 0xe8a   :  { %9621 = vmatpush3.bf16.msra.mxu1 %v9618_v5  ;;  %9625 = vmatpush3.bf16.msra.mxu0 %v9618_v5  ;;  %v9946_v50 = vpop.eup %9945  ;;  %v3792_v18 = vmul.f32 %v9944_v35, %v3780_v56 }
 0xe8b   :  { %9627 = vmatprep.subr.bf16.mxu1 %v9618_v5  ;;  %9631 = vmatprep.subr.bf16.mxu0 %v9618_v5  ;;  %v9948_v12 = vpop.eup %9947  ;;  %v3793_v43 = vmul.f32 %v9946_v50, %v13312_v4  ;;  %v15485_v4 = vld [vmem:[#allocation125_spill] sm:$0xff] }
 0xe8c   :  { %v4366_v22 = vmul.f32 %v9948_v12, %v13325_v34  ;;  %v13357_v62 = vrot.slane %v813_v51, %v15485_v4 }
 0xe8d   :  { %v9950_v44 = vpop.eup %9949  ;;  %9346 = vmatmul.mubr.msk.f32.vlgmr.msra.gmra.mrb[12].mxu1 %vm831_vm1, %v2643_v45  ;;  %9353 = vmatmul.mubr.msk.f32.vlgmr.msra.gmra.mrb[10].mxu0 %vm831_vm1, %v3220_v32 }
 0xe8e   :  { %9629 = vmatpush3.bf16.msra.mxu1 %v9618_v5  ;;  %9359 = vmatprep.mubr.msk.f32.mxu1 %vm831_vm1, %v3792_v18  ;;  %v4365_v53 = vmul.f32 %v9950_v44, %v4353_v37  ;;  %15486 = vst [vmem:[#allocation138_spill] sm:$0xff] %v13357_v62  ;;  %v15489_v37 = vld [vmem:[#allocation129_spill] sm:$0xff] }
 0xe8f   :  { %9633 = vmatpush3.bf16.msra.mxu0 %v9618_v5  ;;  %v13367_v42 = vrot.slane %v813_v51, %v15489_v37 }
 0xe90   :  { %9366 = vmatprep.mubr.msk.f32.mxu0 %vm831_vm1, %v4365_v53 }
 0xe91   :  { %9360 = vmatmul.mubr.msk.f32.vlgmr.msra.gmra.mrb[14].mxu1 %vm831_vm1, %v3793_v43  ;;  %15490 = vst [vmem:[#allocation149_spill] sm:$0xff] %v13367_v42 }
 0xe92   :  { %9367 = vmatmul.mubr.msk.f32.vlgmr.msra.gmra.mrb[12].mxu0 %vm831_vm1, %v4366_v22  ;;  %9373 = vmatprep.mubr.msk.f32.mxu1 %vm831_vm1, %v13347_v21 }
 0xe93   :  { %4687 = vmatprep.mubr.f32.mxu0 %v15482_v20 }
 0xf60   :  { %v9347_v60 = vpop.f32.mrb[12].mxu1  ;;  %v9354_v47 = vpop.f32.mrb[10].mxu0 }
 0xf61   :  { %v2736_v38 = vmul.f32 %v9347_v60, %v13354_v59  ;;  %v3307_v2 = vmul.f32 %v9354_v47, %v13357_v62  ;;  %v2722_v56 = vpop.f32.mrb[13].mxu1  ;;  %v3293_v23 = vpop.f32.mrb[11].mxu0  ;;  %v759_v60 = vld [vmem:[%s15493_s10 + $0x8] sm:$0xff]  ;;  %v761_v47 = vld [vmem:[%s15493_s10 + $0x18] sm:$0xff] }
 0xf62   :  { %v2735_v34 = vmul.f32 %v13354_v59, %v2722_v56  ;;  %v3306_v8 = vmul.f32 %v13357_v62, %v3293_v23  ;;  %v760_v56 = vld [vmem:[%s15493_s10 + $0x10] sm:$0xff]  ;;  %v763_v23 = vld [vmem:[%s15493_s10 + $0x28] sm:$0xff] }
 0xf63   :  { %v3309_v49 = vadd.f32 %v3307_v2, %v2736_v38  ;;  %v758_v38 = vld [vmem:[%s15493_s10] sm:$0xff]  ;;  %v9638_v2 = vpack.c.bf16 %v761_v47, %v759_v60 }
 0xf64   :  { %v3308_v7 = vadd.f32 %v3306_v8, %v2735_v34  ;;  %v9361_v40 = vpop.f32.mrb[14].mxu1  ;;  %v9640_v34 = vpack.c.bf16 %v760_v56, %v758_v38  ;;  %v9642_v8 = vpack.c.bf16 %v765_v1, %v763_v23  ;;  %v15495_v60 = vld [vmem:[#allocation127_spill] sm:$0xff]  ;;  %v13405_v56 = vld [vmem:[%s15372_s17 + $0x8] sm:$0xff] }
 0xf65   :  { %v3880_v10 = vmul.f32 %v9361_v40, %v13360_v58  ;;  %v9368_v54 = vpop.f32.mrb[12].mxu0  ;;  %v3866_v36 = vpop.f32.mrb[15].mxu1  ;;  %9639 = vmatprep.subr.bf16.mxu0 %v9638_v2  ;;  %v4528_v47 = vmul.f32 0.8, %v15495_v60  ;;  %v753_v23 = vld [vmem:[#allocation38] sm:$0xff]  ;;  %v754_v1 = vld [vmem:[#allocation38 + $0x8] sm:$0xff] }
 0xf66   :  { %v3879_v28 = vmul.f32 %v13360_v58, %v3866_v36  ;;  %v4439_v25 = vpop.f32.mrb[13].mxu0  ;;  %v4453_v0 = vmul.f32 %v9368_v54, %v13367_v42  ;;  %9641 = vmatpush1.bf16.msra.mxu0 %v9640_v34  ;;  %v9646_v34 = vpack.c.bf16 %v754_v1, %v753_v23 }
 0xf67   :  { %v3882_v33 = vadd.f32 %v3880_v10, %v3309_v49  ;;  %v4452_v41 = vmul.f32 %v13367_v42, %v4439_v25  ;;  %v762_v49 = vld [vmem:[%s15493_s10 + $0x20] sm:$0xff]  ;;  %9643 = vmatprep.subr.bf16.mxu0 %v9642_v8 }
 0xf68   :  { %v3881_v11 = vadd.f32 %v3879_v28, %v3308_v7  ;;  %v764_v7 = vld [vmem:[%s15493_s10 + $0x30] sm:$0xff]  ;;  %v4500_v28 = vrot.slane %v752_v55, %v15483_v46  ;;  %v755_v8 = vld [vmem:[#allocation38 + $0x10] sm:$0xff] }
 0xf69   :  { %v4455_v31 = vadd.f32 %v4453_v0, %v3882_v33  ;;  %v9644_v40 = vpack.c.bf16 %v764_v7, %v762_v49  ;;  %v4506_v33 = vrot.slane %v752_v55, %v15485_v4  ;;  %v756_v49 = vld [vmem:[#allocation38 + $0x18] sm:$0xff] }
 0xf6a   :  { %v4454_v30 = vadd.f32 %v4452_v41, %v3881_v11  ;;  %v9650_v7 = vpack.c.bf16 %v756_v49, %v755_v8 }
 0xf6b   :  { %v4463_v26 = vadd.f32 %v8999_v24, %v4455_v31  ;;  %9645 = vmatpush1.bf16.msra.mxu0 %v9644_v40  ;;  %v13409_v40 = vld [vmem:[#allocation41] sm:$0x3] }
 0xf6c   :  { %v4462_v17 = vadd.f32 %v8999_v24, %v4454_v30 }
 0xf6d   :  { %v4467_v63 = vmul.f32 0.4, %v4463_v26 }
 0xf6e   :  { %v4466_v5 = vmul.f32 0.4, %v4462_v17 }
 0xf6f   :  { %v4469_v27 = vadd.f32 %v4467_v63, %v4465_v39 }
 0xf70   :  { %v4468_v35 = vadd.f32 %v4466_v5, %v4464_v61 }
 0xf71   :  { %v4473_v45 = vsel %vm15279_vm2, %v4469_v27, 0.0 }
 0xf72   :  { %v4470_v50 = vsel %vm15279_vm2, %v4468_v35, 0.0 }
 0xf73   :  { %4471 = vadd.xlane.f32.xlu0 %v4470_v50 }
 0xf77   :  { %4474 = vadd.xlane.f32.xlu0 %v4473_v45 }
0x1000   :  { %v4472_v57 = vpop.xlane.xlu0 %4471 }
0x1001   :  { %v4477_v19 = vmul.f32 0.03125, %v4472_v57 }
0x1003   :  { %v4479_v32 = vsub.f32 %v4468_v35, %v4477_v19 }
0x1004   :  { %v4475_v12 = vpop.xlane.xlu0 %4474 }
0x1005   :  { %v4478_v18 = vmul.f32 0.03125, %v4475_v12  ;;  %v4481_v44 = vmul.f32 %v4479_v32, %v4479_v32 }
0x1007   :  { %v4480_v53 = vsub.f32 %v4469_v27, %v4478_v18  ;;  %v4483_v43 = vsel %vm15279_vm2, %v4481_v44, 0.0 }
0x1008   :  { %4484 = vadd.xlane.f32.xlu0 %v4483_v43 }
0x1009   :  { %v4482_v22 = vmul.f32 %v4480_v53, %v4480_v53 }
0x100b   :  { %v4486_v51 = vsel %vm15279_vm2, %v4482_v22, 0.0 }
0x100c   :  { %4487 = vadd.xlane.f32.xlu0 %v4486_v51 }
0x1095   :  { %v4485_v29 = vpop.xlane.xlu0 %4484 }
0x1096   :  { %v4489_v48 = vmul.f32 0.03125, %v4485_v29  ;;  %v4610_v29 = vrot.slane %v13409_v40, %v15483_v46 }
0x1098   :  { %v4491_v10 = vadd.f32 1e-05, %v4489_v48 }
0x1099   :  { %v4488_v54 = vpop.xlane.xlu0 %4487 }
0x109a   :  { %9951 = vrsqrt.f32 %v4491_v10  ;;  %v4490_v36 = vmul.f32 0.03125, %v4488_v54 }
0x109c   :  { %v4492_v6 = vadd.f32 1e-05, %v4490_v36 }
0x109e   :  { %9953 = vrsqrt.f32 %v4492_v6 }
0x10a4   :  { %v9952_v25 = vpop.eup %9951 }
0x10a5   :  { %v4495_v0 = vmul.f32 %v9952_v25, %v4479_v32  ;;  %v15494_v32 = vld [vmem:[#allocation126_spill] sm:$0xff] }
0x10a6   :  { %v4527_v12 = vmul.f32 0.8, %v15494_v32 }
0x10a7   :  { %v4501_v24 = vmul.f32 %v4500_v28, %v4495_v0 }
0x10a8   :  { %v9954_v11 = vpop.eup %9953 }
0x10a9   :  { %v4507_v41 = vadd.f32 %v4506_v33, %v4501_v24  ;;  %v4496_v9 = vmul.f32 %v9954_v11, %v4480_v53 }
0x10ab   :  { %v4502_v31 = vmul.f32 %v4500_v28, %v4496_v9  ;;  %v4511_v16 = vmul.f32 0.044715, %v4507_v41  ;;  %v4509_v57 = vmul.f32 0.5, %v4507_v41 }
0x10ad   :  { %v4508_v30 = vadd.f32 %v4506_v33, %v4502_v31  ;;  %v4513_v26 = vmul.f32 %v4511_v16, %v4507_v41 }
0x10af   :  { %v4515_v17 = vmul.f32 %v4513_v26, %v4507_v41  ;;  %v4512_v39 = vmul.f32 0.044715, %v4508_v30  ;;  %v4510_v43 = vmul.f32 0.5, %v4508_v30 }
0x10b1   :  { %v4517_v63 = vadd.f32 %v4515_v17, %v4507_v41  ;;  %v4514_v61 = vmul.f32 %v4512_v39, %v4508_v30  ;;  %v13450_v17 = vld [vmem:[%s15496_s20 + $0x8] sm:$0xff]  ;;  %v13453_v39 = vld [vmem:[%s15496_s20] sm:$0xff] }
0x10b2   :  { %vm4885_vm7 = vcmp.gt.f32.partialorder %v13450_v17, 0.0  ;;  %vm4884_vm0 = vcmp.gt.f32.partialorder %v13453_v39, 0.0 }
0x10b3   :  { %v4519_v5 = vmul.f32 0.7978846, %v4517_v63  ;;  %v4516_v27 = vmul.f32 %v4514_v61, %v4508_v30 }
0x10b5   :  { %9955 = vtanh.f32 %v4519_v5  ;;  %v4518_v35 = vadd.f32 %v4516_v27, %v4508_v30 }
0x10b7   :  { %v4520_v50 = vmul.f32 0.7978846, %v4518_v35 }
0x10b9   :  { %9957 = vtanh.f32 %v4520_v50 }
0x10bf   :  { %v9956_v45 = vpop.eup %9955 }
0x10c0   :  { %v4523_v19 = vadd.f32 1.0, %v9956_v45 }
0x10c2   :  { %v4525_v18 = vmul.f32 %v4523_v19, %v4509_v57 }
0x10c3   :  { %v9958_v44 = vpop.eup %9957 }
0x10c4   :  { %v13392_v53 = vadd.f32 %v4527_v12, %v4525_v18  ;;  %v4524_v22 = vadd.f32 1.0, %v9958_v44 }
0x10c6   :  { %9002 = vmatmul.mubr.msk.f32.vlgmr.msra.gmra.mrb[14].mxu0 %vm15279_vm2, %v13392_v53  ;;  %v4526_v51 = vmul.f32 %v4524_v22, %v4510_v43 }
0x10c7   :  { %4693 = vmatprep.mubr.f32.mxu0 %v15482_v20 }
0x10c8   :  { %v13398_v38 = vadd.f32 %v4528_v47, %v4526_v51 }
0x10ca   :  { %9003 = vmatmul.mubr.msk.f32.gmra.mrb[16].mxu0 %vm15279_vm2, %v13398_v38  ;;  %v9634_v2 = vpack.c.bf16 %v13398_v38, %v13392_v53 }
0x10cc   :  { %9635 = vmatprep.subr.bf16.mxu1 %v9634_v2 }
0x10cd   :  { %9637 = vmatpush3.bf16.msra.mxu1 %v9634_v2 }
0x10ce   :  { %9647 = vmatprep.subr.bf16.mxu1 %v9646_v34 }
0x10d0   :  { %9374 = vmatmul.mubr.msk.f32.vlgmr.msra.gmra.mrb[16].mxu1 %vm831_vm1, %v13405_v56 }
0x10d1   :  { %9649 = vmatpush3.bf16.msra.mxu1 %v9646_v34 }
0x10d2   :  { %9651 = vmatprep.subr.bf16.mxu1 %v9650_v7 }
0x10d5   :  { %9653 = vmatpush3.bf16.msra.mxu1 %v9650_v7 }
0x1199   :  { %v4689_v48 = vpop.f32.mrb[14].mxu0 }
0x119a   :  { %v13413_v10 = vadd.f32 %v4689_v48, %v4610_v29  ;;  %v13415_v54 = vpop.f32.mrb[15].mxu0 }
0x119c   :  { %4791 = vrot.lane.b32.xlu0 %v13413_v10, %s11081_s7 }
0x119d   :  { %v4695_v36 = vpop.f32.mrb[16].mxu0 }
0x119e   :  { %v13419_v6 = vadd.f32 %v4695_v36, %v4610_v29  ;;  %v13421_v55 = vpop.f32.mrb[17].mxu0 }
0x11a0   :  { %v13425_v28 = vpack.i.bf16 %v13419_v6, %v13413_v10 }
0x11a2   :  { %9878 = vrot.lane.b32.xlu1 %v13425_v28, %s11072_s0 }
0x11a3   :  { %v9375_v25 = vpop.f32.mrb[16].mxu1 }
0x11a4   :  { %v4597_v33 = vpop.f32.mrb[17].mxu1 }
0x11a5   :  { %9384 = vmatprep.mubr.msk.f32.mxu1 %vm15279_vm2, %v4597_v33 }
0x11a6   :  { %4793 = vrot.lane.b32.xlu1 %v13419_v6, %s11081_s7  ;;  %9385 = vmatmul.mubr.msk.f32.vlgmr.msra.gmra.mrb[18].mxu1 %vm15279_vm2, %v9375_v25 }
0x120e   :  { %v4792_v0 = vpop.permute.xlu0 %4791 }
0x120f   :  { %9391 = vmatprep.mubr.msk.f32.mxu0 %vm2314_vm3, %v4792_v0 }
0x1214   :  { %v9879_v24 = vpop.permute.xlu1 %9878 }
0x1215   :  { %v9881_v11 = vunpack.i.h.bf16 %v9879_v24  ;;  %v9880_v41 = vunpack.i.l.bf16 %v9879_v24 }
0x1217   :  { %v9654_v31 = vpack.c.bf16 %v9881_v11, %v9880_v41 }
0x1218   :  { %v4794_v16 = vpop.permute.xlu1 %4793 }
0x1219   :  { %9656 = vmatprep.subr.msk.bf16.mxu0 %vm13436_vm15, %v9654_v31 }
0x121a   :  { %9659 = vmatpush3.bf16.xpose.msk.msra.mxu0 %vm13436_vm15, %v9654_v31 }
0x1221   :  { %9392 = vmatmul.mubr.msk.f32.vlgmr.msra.gmra.mrb[18].mxu0 %vm2314_vm3, %v4794_v16 }
0x1279   :  { %v13445_v30 = vpop.f32.mrb[18].mxu1 }
0x127a   :  { %v13447_v26 = vpop.f32.mrb[19].mxu1 }
0x12f4   :  { %v9393_v63 = vpop.f32.mrb[18].mxu0 }
0x12f5   :  { %v4883_v61 = vmul.f32 0.35355338, %v9393_v63  ;;  %v4873_v5 = vpop.f32.mrb[19].mxu0 }
0x12f6   :  { %v4882_v27 = vmul.f32 0.35355338, %v4873_v5 }
0x12f7   :  { %v4887_v35 = vsel %vm4885_vm7, %v4883_v61, -1e+09 }
0x12f8   :  { %v4886_v50 = vsel %vm4884_vm0, %v4882_v27, -1e+09  ;;  %v4891_v45 = vsel %vm831_vm1, %v4887_v35, -inf }
0x12f9   :  { %4892 = vmax.xlane.f32.xlu0 %v4891_v45  ;;  %v4888_v57 = vsel %vm831_vm1, %v4886_v50, -inf }
0x12fa   :  { %4889 = vmax.xlane.f32.xlu1 %v4888_v57 }
0x130b   :  { %9883 = vrot.lane.b32.xlu1 %v13425_v28, %s11076_s6 }
0x130f   :  { %9888 = vrot.lane.b32.xlu0 %v13425_v28, %s11078_s28 }
0x1386   :  { %v4893_v19 = vpop.xlane.xlu0 %4892 }
0x1387   :  { %v4895_v12 = vsub.f32 %v4887_v35, %v4893_v19  ;;  %v4890_v18 = vpop.xlane.xlu1 %4889 }
0x1388   :  { %v4894_v44 = vsub.f32 %v4886_v50, %v4890_v18 }
0x1389   :  { %v4898_v43 = vmul.f32 1.442695, %v4895_v12 }
0x138a   :  { %v4896_v22 = vmul.f32 1.442695, %v4894_v44  ;;  %v9889_v51 = vpop.permute.xlu0 %9888 }
0x138b   :  { %9959 = vpow2.f32 %v4898_v43  ;;  %v9891_v60 = vunpack.i.h.bf16 %v9889_v51  ;;  %v9884_v47 = vpop.permute.xlu1 %9883  ;;  %v9890_v2 = vunpack.i.l.bf16 %v9889_v51 }
0x138c   :  { %9961 = vpow2.f32 %v4896_v22  ;;  %v9886_v23 = vunpack.i.h.bf16 %v9884_v47  ;;  %v9885_v1 = vunpack.i.l.bf16 %v9884_v47 }
0x138d   :  { %v9664_v8 = vpack.c.bf16 %v9891_v60, %v9890_v2 }
0x138e   :  { %v13467_v34 = vpack.c.bf16 %v9886_v23, %v9885_v1 }
0x1390   :  { %9661 = vmatprep.subr.bf16.mxu1 %v13467_v34  ;;  %9671 = vmatprep.subr.bf16.mxu0 %v13467_v34 }
0x1391   :  { %9663 = vmatpush3.bf16.msra.mxu1 %v13467_v34  ;;  %9673 = vmatpush3.bf16.msra.mxu0 %v13467_v34 }
0x1392   :  { %9666 = vmatprep.subr.msk.bf16.mxu1 %vm13436_vm15, %v9664_v8 }
0x1395   :  { %v9960_v49 = vpop.eup %9959 }
0x1396   :  { %v9962_v7 = vpop.eup %9961  ;;  %v4901_v29 = vmul.f32 %v9960_v49, %v13450_v17 }
0x1397   :  { %v4900_v36 = vmul.f32 %v9962_v7, %v13453_v39 }
0x1398   :  { %v4905_v48 = vsel %vm831_vm1, %v4901_v29, 0.0 }
0x1399   :  { %4906 = vadd.xlane.f32.xlu1 %v4905_v48  ;;  %v4902_v25 = vsel %vm831_vm1, %v4900_v36, 0.0 }
0x139d   :  { %4903 = vadd.xlane.f32.xlu1 %v4902_v25 }
0x13ae   :  { %5003 = vrot.lane.b32.xlu1 %v13413_v10, %s11075_s26 }
0x13b2   :  { %5005 = vrot.lane.b32.xlu1 %v13419_v6, %s11075_s26 }
0x1426   :  { %v4907_v33 = vpop.xlane.xlu1 %4906 }
0x1427   :  { %v4909_v0 = vmax.f32 %v4907_v33, 1e-06 }
0x1429   :  { %9963 = vrcp.f32 %v4909_v0 }
0x142a   :  { %v4904_v24 = vpop.xlane.xlu1 %4903 }
0x142b   :  { %v4908_v11 = vmax.f32 %v4904_v24, 1e-06 }
0x142d   :  { %9965 = vrcp.f32 %v4908_v11 }
0x142e   :  { %v5004_v61 = vpop.permute.xlu1 %5003 }
0x1432   :  { %v5006_v5 = vpop.permute.xlu1 %5005 }
0x1433   :  { %v9964_v41 = vpop.eup %9963 }
0x1434   :  { %v4913_v63 = vmul.f32 %v9964_v41, %v4901_v29 }
0x1437   :  { %v9966_v31 = vpop.eup %9965 }
0x1438   :  { %v4912_v16 = vmul.f32 %v9966_v31, %v4900_v36 }
0x143a   :  { %9398 = vmatprep.mubr.msk.f32.mxu1 %vm831_vm1, %v4912_v16 }
0x143b   :  { %9399 = vmatmul.mubr.msk.f32.vlgmr.msra.gmra.mrb[20].mxu1 %vm831_vm1, %v4913_v63 }
0x143c   :  { %9669 = vmatpush3.bf16.xpose.msk.msra.mxu1 %vm13436_vm15, %v9664_v8  ;;  %9405 = vmatprep.mubr.msk.f32.mxu1 %vm2314_vm3, %v5004_v61 }
0x143d   :  { %9681 = vmatprep.subr.bf16.mxu1 %v13467_v34 }
0x1443   :  { %9406 = vmatmul.mubr.msk.f32.vlgmr.msra.gmra.mrb[22].mxu1 %vm2314_vm3, %v5006_v5 }
0x1444   :  { %9683 = vmatpush3.bf16.msra.mxu1 %v13467_v34 }
0x150e   :  { %v9400_v27 = vpop.f32.mrb[20].mxu1 }
0x150f   :  { %v4992_v35 = vpop.f32.mrb[21].mxu1 }
0x1516   :  { %v9407_v50 = vpop.f32.mrb[22].mxu1 }
0x1517   :  { %v5095_v45 = vmul.f32 0.35355338, %v9407_v50  ;;  %v5085_v57 = vpop.f32.mrb[23].mxu1 }
0x1518   :  { %v5094_v19 = vmul.f32 0.35355338, %v5085_v57 }
0x1519   :  { %v5097_v12 = vsel %vm4885_vm7, %v5095_v45, -1e+09 }
0x151a   :  { %v5096_v18 = vsel %vm4884_vm0, %v5094_v19, -1e+09  ;;  %v5101_v44 = vsel %vm831_vm1, %v5097_v12, -inf  ;;  %v5002_v19 = vmul.f32 %v9400_v27, %v13354_v59 }
0x151b   :  { %5102 = vmax.xlane.f32.xlu1 %v5101_v44  ;;  %v5098_v43 = vsel %vm831_vm1, %v5096_v18, -inf  ;;  %v5001_v44 = vmul.f32 %v4992_v35, %v13354_v59 }
0x151c   :  { %5099 = vmax.xlane.f32.xlu0 %v5098_v43 }
0x152c   :  { %9893 = vrot.lane.b32.xlu1 %v13425_v28, %s11079_s5 }
0x1530   :  { %5211 = vrot.lane.b32.xlu1 %v13419_v6, %s11073_s30 }
0x15a8   :  { %v5103_v22 = vpop.xlane.xlu1 %5102 }
0x15a9   :  { %v5105_v51 = vsub.f32 %v5097_v12, %v5103_v22  ;;  %v5100_v60 = vpop.xlane.xlu0 %5099 }
0x15aa   :  { %v5104_v47 = vsub.f32 %v5096_v18, %v5100_v60 }
0x15ab   :  { %v5108_v2 = vmul.f32 1.442695, %v5105_v51 }
0x15ac   :  { %v5106_v23 = vmul.f32 1.442695, %v5104_v47  ;;  %v9894_v1 = vpop.permute.xlu1 %9893 }
0x15ad   :  { %9967 = vpow2.f32 %v5108_v2  ;;  %v9896_v8 = vunpack.i.h.bf16 %v9894_v1  ;;  %v9895_v49 = vunpack.i.l.bf16 %v9894_v1 }
0x15ae   :  { %9969 = vpow2.f32 %v5106_v23 }
0x15af   :  { %v9674_v7 = vpack.c.bf16 %v9896_v8, %v9895_v49 }
0x15b0   :  { %v5212_v45 = vpop.permute.xlu1 %5211 }
0x15b1   :  { %9676 = vmatprep.subr.msk.bf16.mxu0 %vm13436_vm15, %v9674_v7 }
0x15b7   :  { %v9968_v29 = vpop.eup %9967 }
0x15b8   :  { %v9970_v48 = vpop.eup %9969  ;;  %v5111_v33 = vmul.f32 %v9968_v29, %v13450_v17 }
0x15b9   :  { %v5110_v36 = vmul.f32 %v9970_v48, %v13453_v39 }
0x15ba   :  { %v5115_v0 = vsel %vm831_vm1, %v5111_v33, 0.0 }
0x15bb   :  { %v5112_v25 = vsel %vm831_vm1, %v5110_v36, 0.0 }
0x15bc   :  { %5113 = vadd.xlane.f32.xlu0 %v5112_v25 }
0x15c0   :  { %5116 = vadd.xlane.f32.xlu0 %v5115_v0 }
0x15d6   :  { %5209 = vrot.lane.b32.xlu0 %v13413_v10, %s11073_s30 }
0x1649   :  { %v5114_v24 = vpop.xlane.xlu0 %5113 }
0x164a   :  { %v5118_v11 = vmax.f32 %v5114_v24, 1e-06 }
0x164c   :  { %9971 = vrcp.f32 %v5118_v11 }
0x164d   :  { %v5117_v41 = vpop.xlane.xlu0 %5116 }
0x164e   :  { %v5119_v31 = vmax.f32 %v5117_v41, 1e-06 }
0x1650   :  { %9973 = vrcp.f32 %v5119_v31 }
0x1651   :  { %v5210_v50 = vpop.permute.xlu0 %5209 }
0x1656   :  { %v9972_v16 = vpop.eup %9971 }
0x1657   :  { %v5122_v63 = vmul.f32 %v9972_v16, %v5110_v36 }
0x1659   :  { %9412 = vmatprep.mubr.msk.f32.mxu0 %vm831_vm1, %v5122_v63 }
0x165a   :  { %v9974_v61 = vpop.eup %9973 }
0x165b   :  { %v5123_v5 = vmul.f32 %v9974_v61, %v5111_v33 }
0x165d   :  { %9413 = vmatmul.mubr.msk.f32.vlgmr.msra.gmra.mrb[20].mxu0 %vm831_vm1, %v5123_v5 }
0x165e   :  { %9679 = vmatpush3.bf16.xpose.msk.msra.mxu0 %vm13436_vm15, %v9674_v7  ;;  %9419 = vmatprep.mubr.msk.f32.mxu0 %vm2314_vm3, %v5210_v50 }
0x165f   :  { %9691 = vmatprep.subr.bf16.mxu0 %v13467_v34 }
0x1665   :  { %9420 = vmatmul.mubr.msk.f32.vlgmr.msra.gmra.mrb[22].mxu0 %vm2314_vm3, %v5212_v45 }
0x1666   :  { %9693 = vmatpush3.bf16.msra.mxu0 %v13467_v34 }
0x1730   :  { %v9414_v57 = vpop.f32.mrb[20].mxu0 }
0x1731   :  { %v5206_v12 = vmul.f32 %v9414_v57, %v13357_v62  ;;  %v5196_v18 = vpop.f32.mrb[21].mxu0 }
0x1732   :  { %v5205_v43 = vmul.f32 %v5196_v18, %v13357_v62 }
0x1733   :  { %v5208_v22 = vadd.f32 %v5206_v12, %v5002_v19 }
0x1734   :  { %v5207_v51 = vadd.f32 %v5205_v43, %v5001_v44 }
0x1738   :  { %v9421_v60 = vpop.f32.mrb[22].mxu0 }
0x1739   :  { %v5301_v47 = vmul.f32 0.35355338, %v9421_v60  ;;  %v5291_v2 = vpop.f32.mrb[23].mxu0 }
0x173a   :  { %v5300_v23 = vmul.f32 0.35355338, %v5291_v2 }
0x173b   :  { %v5303_v1 = vsel %vm4885_vm7, %v5301_v47, -1e+09 }
0x173c   :  { %v5302_v34 = vsel %vm4884_vm0, %v5300_v23, -1e+09  ;;  %v5307_v27 = vsel %vm831_vm1, %v5303_v1, -inf }
0x173d   :  { %5308 = vmax.xlane.f32.xlu0 %v5307_v27  ;;  %v5304_v8 = vsel %vm831_vm1, %v5302_v34, -inf }
0x173e   :  { %5305 = vmax.xlane.f32.xlu1 %v5304_v8 }
0x17ca   :  { %v5309_v35 = vpop.xlane.xlu0 %5308 }
0x17cb   :  { %v5311_v49 = vsub.f32 %v5303_v1, %v5309_v35  ;;  %v5306_v7 = vpop.xlane.xlu1 %5305 }
0x17cc   :  { %v5310_v29 = vsub.f32 %v5302_v34, %v5306_v7 }
0x17cd   :  { %v5314_v48 = vmul.f32 1.442695, %v5311_v49 }
0x17ce   :  { %v5312_v36 = vmul.f32 1.442695, %v5310_v29 }
0x17cf   :  { %9975 = vpow2.f32 %v5314_v48 }
0x17d0   :  { %9977 = vpow2.f32 %v5312_v36 }
0x17d9   :  { %v9976_v25 = vpop.eup %9975 }
0x17da   :  { %v9978_v33 = vpop.eup %9977  ;;  %v5317_v0 = vmul.f32 %v9976_v25, %v13450_v17 }
0x17db   :  { %v5316_v24 = vmul.f32 %v9978_v33, %v13453_v39 }
0x17dc   :  { %v5321_v11 = vsel %vm831_vm1, %v5317_v0, 0.0 }
0x17dd   :  { %5322 = vadd.xlane.f32.xlu1 %v5321_v11  ;;  %v5318_v41 = vsel %vm831_vm1, %v5316_v24, 0.0 }
0x17de   :  { %5319 = vadd.xlane.f32.xlu0 %v5318_v41 }
0x17ee   :  { %5415 = vrot.lane.b32.xlu1 %v13413_v10, %s11074_s25 }
0x17f2   :  { %5417 = vrot.lane.b32.xlu1 %v13419_v6, %s11074_s25 }
0x17f4   :  { %9898 = vrot.lane.b32.xlu0 %v13425_v28, %s11080_s1 }
0x186a   :  { %v5323_v31 = vpop.xlane.xlu1 %5322 }
0x186b   :  { %v5325_v16 = vmax.f32 %v5323_v31, 1e-06  ;;  %v5320_v63 = vpop.xlane.xlu0 %5319 }
0x186c   :  { %v5324_v61 = vmax.f32 %v5320_v63, 1e-06 }
0x186d   :  { %9979 = vrcp.f32 %v5325_v16 }
0x186e   :  { %9981 = vrcp.f32 %v5324_v61  ;;  %v5416_v28 = vpop.permute.xlu1 %5415  ;;  %v778_v61 = vld [vmem:[#allocation49] sm:$0xf] }
0x186f   :  { %v9899_v5 = vpop.permute.xlu0 %9898 }
0x1870   :  { %v9901_v50 = vunpack.i.h.bf16 %v9899_v5  ;;  %v9900_v45 = vunpack.i.l.bf16 %v9899_v5  ;;  %v6255_v5 = vrot.slane %v778_v61, %v15483_v46 }
0x1872   :  { %v9684_v57 = vpack.c.bf16 %v9901_v50, %v9900_v45  ;;  %v5418_v43 = vpop.permute.xlu1 %5417  ;;  %v7392_v50 = vrot.slane %v778_v61, %v15487_v3  ;;  %v6826_v45 = vrot.slane %v778_v61, %v15485_v4 }
0x1874   :  { %9686 = vmatprep.subr.msk.bf16.mxu1 %vm13436_vm15, %v9684_v57 }
0x1877   :  { %v9980_v19 = vpop.eup %9979 }
0x1878   :  { %v9982_v12 = vpop.eup %9981  ;;  %v5329_v44 = vmul.f32 %v9980_v19, %v5317_v0 }
0x1879   :  { %v5328_v18 = vmul.f32 %v9982_v12, %v5316_v24 }
0x187b   :  { %9426 = vmatprep.mubr.msk.f32.mxu1 %vm831_vm1, %v5328_v18 }
0x187c   :  { %9427 = vmatmul.mubr.msk.f32.vlgmr.msra.gmra.mrb[24].mxu1 %vm831_vm1, %v5329_v44 }
0x187d   :  { %9689 = vmatpush3.bf16.xpose.msk.msra.mxu1 %vm13436_vm15, %v9684_v57  ;;  %9433 = vmatprep.mubr.msk.f32.mxu1 %vm2314_vm3, %v5416_v28 }
0x1884   :  { %9434 = vmatmul.mubr.msk.f32.vlgmr.msra.gmra.mrb[26].mxu1 %vm2314_vm3, %v5418_v43 }
0x194f   :  { %v9428_v60 = vpop.f32.mrb[24].mxu1 }
0x1950   :  { %v5412_v47 = vmul.f32 %v9428_v60, %v13360_v58  ;;  %v5402_v2 = vpop.f32.mrb[25].mxu1  ;;  %v4614_v60 = vrot.slane %v13409_v40, %v15485_v4 }
0x1951   :  { %v5411_v23 = vmul.f32 %v5402_v2, %v13360_v58 }
0x1952   :  { %v5414_v1 = vadd.f32 %v5412_v47, %v5208_v22 }
0x1953   :  { %v5413_v34 = vadd.f32 %v5411_v23, %v5207_v51 }
0x1957   :  { %v9435_v27 = vpop.f32.mrb[26].mxu1 }
0x1958   :  { %v5507_v8 = vmul.f32 0.35355338, %v9435_v27  ;;  %v5497_v35 = vpop.f32.mrb[27].mxu1 }
0x1959   :  { %v5506_v49 = vmul.f32 0.35355338, %v5497_v35  ;;  %v4698_v35 = vadd.f32 %v13421_v55, %v4614_v60 }
0x195a   :  { %v5509_v9 = vsel %vm4885_vm7, %v5507_v8, -1e+09 }
0x195b   :  { %v5508_v7 = vsel %vm4884_vm0, %v5506_v49, -1e+09  ;;  %v5513_v29 = vsel %vm831_vm1, %v5509_v9, -inf }
0x195c   :  { %5514 = vmax.xlane.f32.xlu1 %v5513_v29  ;;  %v5510_v48 = vsel %vm831_vm1, %v5508_v7, -inf }
0x195d   :  { %5511 = vmax.xlane.f32.xlu0 %v5510_v48 }
0x196d   :  { %6257 = vrot.lane.b32.xlu1 %v6255_v5, %s11072_s0 }
0x1971   :  { %6828 = vrot.lane.b32.xlu1 %v6826_v45, %s11074_s25  ;;  %v774_v45 = vld [vmem:[#allocation46 + $0x8] sm:$0xff] }
0x19e9   :  { %v5515_v36 = vpop.xlane.xlu1 %5514 }
0x19ea   :  { %v5517_v25 = vsub.f32 %v5509_v9, %v5515_v36  ;;  %v5512_v22 = vpop.xlane.xlu0 %5511 }
0x19eb   :  { %v5516_v51 = vsub.f32 %v5508_v7, %v5512_v22 }
0x19ec   :  { %v5520_v33 = vmul.f32 1.442695, %v5517_v25 }
0x19ed   :  { %v5518_v0 = vmul.f32 1.442695, %v5516_v51 }
0x19ee   :  { %9983 = vpow2.f32 %v5520_v33 }
0x19ef   :  { %9985 = vpow2.f32 %v5518_v0 }
0x19f8   :  { %v9984_v24 = vpop.eup %9983 }
0x19f9   :  { %v9986_v11 = vpop.eup %9985  ;;  %v5523_v16 = vmul.f32 %v9984_v24, %v13450_v17 }
0x19fa   :  { %v5522_v41 = vmul.f32 %v9986_v11, %v13453_v39  ;;  %v7958_v39 = vrot.slane %v778_v61, %v15489_v37  ;;  %v9004_v37 = vld [vmem:[#allocation40] ss:$0 sm:$0xff] }
0x19fb   :  { %v5527_v63 = vsel %vm831_vm1, %v5523_v16, 0.0  ;;  %v4784_v43 = vadd.f32 %v13445_v30, %v9004_v37  ;;  %v4779_v47 = vadd.f32 %v9004_v37, %v13447_v26 }
0x19fc   :  { %v5524_v31 = vsel %vm831_vm1, %v5522_v41, 0.0  ;;  %7960 = vrot.lane.b32.xlu1 %v7958_v39, %s11075_s26  ;;  %v775_v39 = vld [vmem:[#allocation46 + $0x10] sm:$0xff] }
0x19fd   :  { %5525 = vadd.xlane.f32.xlu0 %v5524_v31  ;;  %v4788_v49 = vadd.f32 %v4784_v43, %v13419_v6  ;;  %v4787_v30 = vadd.f32 %v4779_v47, %v13413_v10  ;;  %v13581_v6 = vpop.permute.xlu1 %6257  ;;  %v767_v43 = vld [vmem:[#allocation43] sm:$0x3] }
0x19ff   :  { %v5624_v48 = vmul.f32 0.6, %v4788_v49  ;;  %v5623_v36 = vmul.f32 0.6, %v4787_v30 }
0x1a01   :  { %5528 = vadd.xlane.f32.xlu0 %v5527_v63 }
0x1a17   :  { %7394 = vrot.lane.b32.xlu0 %v7392_v50, %s11073_s30  ;;  %v773_v50 = vld [vmem:[#allocation46] sm:$0xff] }
0x1a8a   :  { %v5526_v17 = vpop.xlane.xlu0 %5525 }
0x1a8b   :  { %v5530_v57 = vmax.f32 %v5526_v17, 1e-06  ;;  %v9698_v17 = vpack.c.bf16 %v774_v45, %v773_v50  ;;  %v769_v45 = vld [vmem:[%s15499_s9 + $0x8] sm:$0xff] }
0x1a8d   :  { %9987 = vrcp.f32 %v5530_v57  ;;  %v776_v57 = vld [vmem:[#allocation46 + $0x18] sm:$0xff]  ;;  %9699 = vmatprep.subr.bf16.mxu1 %v9698_v17 }
0x1a8e   :  { %v5529_v19 = vpop.xlane.xlu0 %5528  ;;  %9701 = vmatpush3.bf16.msra.mxu1 %v9698_v17  ;;  %v770_v17 = vld [vmem:[%s15499_s9 + $0x10] sm:$0xff] }
0x1a8f   :  { %v5531_v12 = vmax.f32 %v5529_v19, 1e-06  ;;  %v9702_v19 = vpack.c.bf16 %v776_v57, %v775_v39 }
0x1a91   :  { %9989 = vrcp.f32 %v5531_v12  ;;  %9703 = vmatprep.subr.bf16.mxu1 %v9702_v19 }
0x1a92   :  { %v13585_v10 = vpop.permute.xlu0 %7394  ;;  %9705 = vmatpush3.bf16.msra.mxu1 %v9702_v19  ;;  %v9033_v19 = vld [vmem:[#allocation47] ss:$0 sm:$0xff] }
0x1a97   :  { %v9988_v18 = vpop.eup %9987 }
0x1a98   :  { %v5534_v3 = vmul.f32 %v9988_v18, %v5522_v41 }
0x1a9a   :  { %9440 = vmatprep.mubr.msk.f32.mxu0 %vm831_vm1, %v5534_v3 }
0x1a9b   :  { %v9990_v44 = vpop.eup %9989 }
0x1a9c   :  { %v5535_v28 = vmul.f32 %v9990_v44, %v5523_v16 }
0x1a9e   :  { %9441 = vmatmul.mubr.msk.f32.vlgmr.msra.gmra.mrb[24].mxu0 %vm831_vm1, %v5535_v28 }
0x1a9f   :  { %9447 = vmatprep.mubr.msk.f32.mxu0 %vm831_vm1, %v13347_v21  ;;  %v4692_v21 = vadd.f32 %v13415_v54, %v4614_v60  ;;  %v13583_v54 = vpop.permute.xlu1 %6828  ;;  %v5658_v60 = vrot.slane %v767_v43, %v15483_v46 }
0x1b71   :  { %v9442_v2 = vpop.f32.mrb[24].mxu0 }
0x1b72   :  { %v5618_v23 = vmul.f32 %v9442_v2, %v13367_v42  ;;  %v5608_v27 = vpop.f32.mrb[25].mxu0 }
0x1b73   :  { %v5617_v8 = vmul.f32 %v5608_v27, %v13367_v42 }
0x1b74   :  { %v5620_v9 = vadd.f32 %v5618_v23, %v5414_v1  ;;  %v13587_v1 = vpop.permute.xlu1 %7960  ;;  %v5664_v23 = vrot.slane %v767_v43, %v15485_v4 }
0x1b75   :  { %v5619_v7 = vadd.f32 %v5617_v8, %v5413_v34 }
0x1b76   :  { %v5622_v29 = vadd.f32 %v5620_v9, %v4698_v35 }
0x1b77   :  { %v5621_v40 = vadd.f32 %v5619_v7, %v4692_v21 }
0x1b78   :  { %v5626_v26 = vmul.f32 0.4, %v5622_v29 }
0x1b79   :  { %v5625_v25 = vmul.f32 0.4, %v5621_v40 }
0x1b7a   :  { %v5628_v22 = vadd.f32 %v5626_v26, %v5624_v48 }
0x1b7b   :  { %v5627_v51 = vadd.f32 %v5625_v25, %v5623_v36 }
0x1b7c   :  { %v5632_v33 = vsel %vm15279_vm2, %v5628_v22, 0.0 }
0x1b7d   :  { %5633 = vadd.xlane.f32.xlu0 %v5632_v33  ;;  %v5629_v55 = vsel %vm15279_vm2, %v5627_v51, 0.0 }
0x1b7e   :  { %5630 = vadd.xlane.f32.xlu1 %v5629_v55 }
0x1c0a   :  { %v5634_v34 = vpop.xlane.xlu0 %5633 }
0x1c0b   :  { %v5636_v0 = vmul.f32 0.03125, %v5634_v34  ;;  %v5631_v24 = vpop.xlane.xlu1 %5630 }
0x1c0c   :  { %v5635_v11 = vmul.f32 0.03125, %v5631_v24 }
0x1c0d   :  { %v5638_v41 = vsub.f32 %v5628_v22, %v5636_v0 }
0x1c0e   :  { %v5637_v31 = vsub.f32 %v5627_v51, %v5635_v11 }
0x1c0f   :  { %v5640_v16 = vmul.f32 %v5638_v41, %v5638_v41 }
0x1c10   :  { %v5639_v63 = vmul.f32 %v5637_v31, %v5637_v31 }
0x1c11   :  { %v5644_v61 = vsel %vm15279_vm2, %v5640_v16, 0.0 }
0x1c12   :  { %5645 = vadd.xlane.f32.xlu0 %v5644_v61  ;;  %v5641_v5 = vsel %vm15279_vm2, %v5639_v63, 0.0  ;;  %v5685_v63 = vmul.f32 0.8, %v13392_v53  ;;  %v771_v53 = vld [vmem:[%s15499_s9 + $0x18] sm:$0xff] }
0x1c13   :  { %5642 = vadd.xlane.f32.xlu1 %v5641_v5  ;;  %v9710_v57 = vpack.c.bf16 %v771_v53, %v770_v17 }
0x1c9f   :  { %v5646_v12 = vpop.xlane.xlu0 %5645 }
0x1ca0   :  { %v5648_v18 = vmul.f32 0.03125, %v5646_v12  ;;  %v5643_v3 = vpop.xlane.xlu1 %5642 }
0x1ca1   :  { %v5647_v44 = vmul.f32 0.03125, %v5643_v3 }
0x1ca2   :  { %v5650_v28 = vadd.f32 1e-05, %v5648_v18 }
0x1ca3   :  { %v5649_v37 = vadd.f32 1e-05, %v5647_v44 }
0x1ca4   :  { %9991 = vrsqrt.f32 %v5650_v28 }
0x1ca5   :  { %9993 = vrsqrt.f32 %v5649_v37  ;;  %v15503_v37 = vld [vmem:[#allocation132_spill] sm:$0xff] }
0x1cae   :  { %v9992_v47 = vpop.eup %9991 }
0x1caf   :  { %v9994_v2 = vpop.eup %9993  ;;  %v5654_v27 = vmul.f32 %v9992_v47, %v5638_v41  ;;  %v5686_v41 = vmul.f32 0.8, %v13398_v38  ;;  %v768_v38 = vld [vmem:[%s15499_s9] sm:$0xff] }
0x1cb0   :  { %v5653_v8 = vmul.f32 %v9994_v2, %v5637_v31  ;;  %v9706_v39 = vpack.c.bf16 %v769_v45, %v768_v38 }
0x1cb1   :  { %v5660_v35 = vmul.f32 %v5658_v60, %v5654_v27 }
0x1cb2   :  { %v5659_v49 = vmul.f32 %v5658_v60, %v5653_v8 }
0x1cb3   :  { %v5666_v9 = vadd.f32 %v5664_v23, %v5660_v35 }
0x1cb4   :  { %v5665_v21 = vadd.f32 %v5664_v23, %v5659_v49 }
0x1cb5   :  { %v5670_v30 = vmul.f32 0.044715, %v5666_v9  ;;  %v5668_v34 = vmul.f32 0.5, %v5666_v9 }
0x1cb6   :  { %v5669_v7 = vmul.f32 0.044715, %v5665_v21  ;;  %v5667_v24 = vmul.f32 0.5, %v5665_v21 }
0x1cb7   :  { %v5672_v29 = vmul.f32 %v5670_v30, %v5666_v9 }
0x1cb8   :  { %v5671_v40 = vmul.f32 %v5669_v7, %v5665_v21 }
0x1cb9   :  { %v5674_v48 = vmul.f32 %v5672_v29, %v5666_v9 }
0x1cba   :  { %v5673_v26 = vmul.f32 %v5671_v40, %v5665_v21 }
0x1cbb   :  { %v5676_v36 = vadd.f32 %v5674_v48, %v5666_v9 }
0x1cbc   :  { %v5675_v25 = vadd.f32 %v5673_v26, %v5665_v21 }
0x1cbd   :  { %v5678_v22 = vmul.f32 0.7978846, %v5676_v36 }
0x1cbe   :  { %v5677_v51 = vmul.f32 0.7978846, %v5675_v25 }
0x1cbf   :  { %9995 = vtanh.f32 %v5678_v22 }
0x1cc0   :  { %9997 = vtanh.f32 %v5677_v51 }
0x1cc9   :  { %v9996_v33 = vpop.eup %9995 }
0x1cca   :  { %v9998_v55 = vpop.eup %9997  ;;  %v5682_v0 = vadd.f32 1.0, %v9996_v33 }
0x1ccb   :  { %v5681_v11 = vadd.f32 1.0, %v9998_v55 }
0x1ccc   :  { %v5684_v31 = vmul.f32 %v5682_v0, %v5668_v34 }
0x1ccd   :  { %v5683_v16 = vmul.f32 %v5681_v11, %v5667_v24 }
0x1cce   :  { %v5688_v61 = vadd.f32 %v5686_v41, %v5684_v31 }
0x1ccf   :  { %v13595_v5 = vadd.f32 %v5685_v63, %v5683_v16 }
0x1cd1   :  { %15500 = vst [vmem:[#allocation150_spill] sm:$0xff] %v13595_v5  ;;  %9458 = vmatprep.mubr.msk.f32.mxu1 %vm15279_vm2, %v13595_v5  ;;  %v9694_v50 = vpack.c.bf16 %v5688_v61, %v13595_v5 }
0x1cd2   :  { %9459 = vmatmul.mubr.msk.f32.vlgmr.msra.gmra.mrb[28].mxu1 %vm15279_vm2, %v5688_v61 }
0x1cd3   :  { %9695 = vmatprep.subr.bf16.mxu0 %v9694_v50 }
0x1cd4   :  { %9697 = vmatpush3.bf16.msra.mxu0 %v9694_v50 }
0x1cd5   :  { %9707 = vmatprep.subr.bf16.mxu0 %v9706_v39 }
0x1cd7   :  { %9448 = vmatmul.mubr.msk.f32.vlgmr.msra.gmra.mrb[26].mxu0 %vm831_vm1, %v13405_v56 }
0x1cd8   :  { %9709 = vmatpush3.bf16.msra.mxu0 %v9706_v39 }
0x1cd9   :  { %9711 = vmatprep.subr.bf16.mxu0 %v9710_v57 }
0x1cdc   :  { %9713 = vmatpush3.bf16.msra.mxu0 %v9710_v57 }
0x1da5   :  { %v9460_v12 = vpop.f32.mrb[28].mxu1 }
0x1da6   :  { %v13607_v18 = vadd.f32 %v9460_v12, %v9033_v19  ;;  %v5842_v3 = vpop.f32.mrb[29].mxu1 }
0x1da7   :  { %v13609_v44 = vadd.f32 %v9033_v19, %v5842_v3 }
0x1da8   :  { %15501 = vst [vmem:[#allocation151_spill] sm:$0xff] %v13607_v18  ;;  %6120 = vrot.lane.b32.xlu0 %v13607_v18, %s11076_s6  ;;  %v5996_v27 = vrot.slane %v13607_v18, %v15503_v37 }
0x1da9   :  { %15502 = vst [vmem:[#allocation147_spill] sm:$0xff] %v13609_v44  ;;  %6118 = vrot.lane.b32.xlu1 %v13609_v44, %s11076_s6  ;;  %v5947_v43 = vrot.slane %v13609_v44, %v15503_v37 }
0x1daa   :  { %v9449_v56 = vpop.f32.mrb[26].mxu0  ;;  %v6004_v21 = vcombine.high %v5996_v27, %v5996_v27  ;;  %v6012_v30 = vrot.slane %v5996_v27, %v15503_v37 }
0x1dab   :  { %v5755_v28 = vpop.f32.mrb[27].mxu0  ;;  %v5955_v60 = vcombine.high %v5947_v43, %v5947_v43  ;;  %v5963_v47 = vrot.slane %v5947_v43, %v15503_v37 }
0x1dac   :  { %9469 = vmatprep.mubr.msk.f32.mxu0 %vm15279_vm2, %v5755_v28  ;;  %v13638_v34 = vrot.slane %v6004_v21, %v15503_v37  ;;  %v6073_v0 = vrot.slane %v6012_v30, %v15483_v46 }
0x1dad   :  { %9470 = vmatmul.mubr.msk.f32.vlgmr.msra.gmra.mrb[28].mxu0 %vm15279_vm2, %v9449_v56  ;;  %v5977_v2 = vrot.slane %v5955_v60, %v15503_v37  ;;  %v5985_v23 = vcombine.high %v5963_v47, %v5963_v47  ;;  %v6041_v8 = vrot.slane %v5963_v47, %v15483_v46  ;;  %v6034_v60 = vcombine.high %v6012_v30, %v6012_v30 }
0x1dae   :  { %v6077_v39 = vrot.slane %v13638_v34, %v15483_v46 }
0x1daf   :  { %v6045_v35 = vrot.slane %v5977_v2, %v15483_v46  ;;  %v6049_v9 = vrot.slane %v5985_v23, %v15483_v46  ;;  %v5987_v17 = vcombine.high %v5977_v2, %v5977_v2 }
0x1db1   :  { %v6053_v47 = vrot.slane %v5987_v17, %v15483_v46 }
0x1e1a   :  { %v13625_v49 = vpop.permute.xlu0 %6120 }
0x1e1b   :  { %v13629_v7 = vpop.permute.xlu1 %6118  ;;  %v6125_v29 = vadd.f32 %v13625_v49, %v6041_v8  ;;  %v6127_v40 = vadd.f32 %v13625_v49, %v6045_v35  ;;  %v6129_v36 = vadd.f32 %v13625_v49, %v6049_v9  ;;  %v6141_v61 = vadd.f32 %v13625_v49, %v6073_v0 }
0x1e1c   :  { %v6124_v48 = vadd.f32 %v13629_v7, %v6041_v8  ;;  %v6126_v26 = vadd.f32 %v13629_v7, %v6045_v35  ;;  %v6128_v51 = vadd.f32 %v13629_v7, %v6049_v9  ;;  %v6140_v45 = vadd.f32 %v13629_v7, %v6073_v0 }
0x1e1d   :  { %vm6157_vm0 = vcmp.gt.f32.partialorder %v6125_v29, 0.0  ;;  %v6189_v25 = vmul.f32 0.2, %v6125_v29  ;;  %v6191_v22 = vmul.f32 0.2, %v6127_v40  ;;  %vm6159_vm15 = vcmp.gt.f32.partialorder %v6127_v40, 0.0 }
0x1e1e   :  { %vm6156_vm7 = vcmp.gt.f32.partialorder %v6124_v48, 0.0  ;;  %v6188_v33 = vmul.f32 0.2, %v6124_v48  ;;  %v6190_v55 = vmul.f32 0.2, %v6126_v26  ;;  %vm6158_vm2 = vcmp.gt.f32.partialorder %v6126_v26, 0.0 }
0x1e1f   :  { %v13641_v24 = vsel %vm6157_vm0, %v6125_v29, %v6189_v25  ;;  %v13649_v16 = vsel %vm6159_vm15, %v6127_v40, %v6191_v22  ;;  %v6193_v63 = vmul.f32 0.2, %v6129_v36  ;;  %vm6161_vm0 = vcmp.gt.f32.partialorder %v6129_v36, 0.0 }
0x1e20   :  { %v6261_v11 = vmul.f32 %v13581_v6, %v13641_v24  ;;  %v13645_v41 = vsel %vm6156_vm7, %v6124_v48, %v6188_v33  ;;  %v13653_v50 = vsel %vm6158_vm2, %v6126_v26, %v6190_v55  ;;  %v6192_v38 = vmul.f32 0.2, %v6128_v51 }
0x1e21   :  { %v6260_v31 = vmul.f32 %v13581_v6, %v13645_v41  ;;  %vm6160_vm7 = vcmp.gt.f32.partialorder %v6128_v51, 0.0  ;;  %v6263_v53 = vmul.f32 %v13581_v6, %v13649_v16  ;;  %v6262_v57 = vmul.f32 %v13581_v6, %v13653_v50 }
0x1e22   :  { %6326 = vrot.lane.b32.xlu1 %v6261_v11, %s11072_s0  ;;  %v13663_v19 = vsel %vm6161_vm0, %v6129_v36, %v6193_v63  ;;  %v6205_v12 = vmul.f32 0.2, %v6141_v61  ;;  %v6143_v3 = vadd.f32 %v13625_v49, %v6077_v39  ;;  %v13667_v56 = vsel %vm6160_vm7, %v6128_v51, %v6192_v38 }
0x1e23   :  { %6324 = vrot.lane.b32.xlu0 %v6260_v31, %s11072_s0  ;;  %vm6173_vm2 = vcmp.gt.f32.partialorder %v6141_v61, 0.0  ;;  %v6204_v28 = vmul.f32 0.2, %v6140_v45  ;;  %v6142_v43 = vadd.f32 %v13629_v7, %v6077_v39  ;;  %vm6172_vm15 = vcmp.gt.f32.partialorder %v6140_v45, 0.0 }
0x1e24   :  { %v6265_v2 = vmul.f32 %v13581_v6, %v13663_v19  ;;  %v6264_v23 = vmul.f32 %v13581_v6, %v13667_v56  ;;  %v13676_v27 = vsel %vm6173_vm2, %v6141_v61, %v6205_v12  ;;  %v6207_v8 = vmul.f32 0.2, %v6143_v3 }
0x1e25   :  { %v6131_v35 = vadd.f32 %v13625_v49, %v6053_v47  ;;  %v13680_v9 = vsel %vm6172_vm15, %v6140_v45, %v6204_v28  ;;  %vm6175_vm0 = vcmp.gt.f32.partialorder %v6143_v3, 0.0  ;;  %v6206_v21 = vmul.f32 0.2, %v6142_v43 }
0x1e26   :  { %6330 = vrot.lane.b32.xlu1 %v6263_v53, %s11072_s0  ;;  %v6130_v30 = vadd.f32 %v13629_v7, %v6053_v47  ;;  %v6081_v29 = vrot.slane %v6034_v60, %v15483_v46  ;;  %v5940_v40 = vcombine.high %v13609_v44, %v13609_v44  ;;  %vm6174_vm7 = vcmp.gt.f32.partialorder %v6142_v43, 0.0 }
0x1e27   :  { %6328 = vrot.lane.b32.xlu0 %v6262_v57, %s11072_s0  ;;  %v6277_v48 = vmul.f32 %v13581_v6, %v13676_v27  ;;  %v6276_v26 = vmul.f32 %v13581_v6, %v13680_v9  ;;  %v13691_v36 = vsel %vm6175_vm0, %v6143_v3, %v6207_v8  ;;  %v6195_v25 = vmul.f32 0.2, %v6131_v35 }
0x1e28   :  { %v6145_v22 = vadd.f32 %v13625_v49, %v6081_v29  ;;  %v13695_v51 = vsel %vm6174_vm7, %v6142_v43, %v6206_v21  ;;  %vm6163_vm2 = vcmp.gt.f32.partialorder %v6131_v35, 0.0  ;;  %v6194_v33 = vmul.f32 0.2, %v6130_v30 }
0x1e29   :  { %v6144_v55 = vadd.f32 %v13629_v7, %v6081_v29  ;;  %v5954_v0 = vrot.slane %v5940_v40, %v15503_v37  ;;  %vm6162_vm15 = vcmp.gt.f32.partialorder %v6130_v30, 0.0  ;;  %v6279_v11 = vmul.f32 %v13581_v6, %v13691_v36 }
0x1e2a   :  { %6334 = vrot.lane.b32.xlu1 %v6265_v2, %s11072_s0  ;;  %v6278_v31 = vmul.f32 %v13581_v6, %v13695_v51  ;;  %v13704_v63 = vsel %vm6163_vm2, %v6131_v35, %v6195_v25  ;;  %v6209_v61 = vmul.f32 0.2, %v6145_v22  ;;  %v13707_v38 = vsel %vm6162_vm15, %v6130_v30, %v6194_v33 }
0x1e2b   :  { %6332 = vrot.lane.b32.xlu0 %v6264_v23, %s11072_s0  ;;  %vm6177_vm0 = vcmp.gt.f32.partialorder %v6145_v22, 0.0  ;;  %v6208_v45 = vmul.f32 0.2, %v6144_v55  ;;  %v13710_v39 = vrot.slane %v5954_v0, %v15503_v37  ;;  %vm6176_vm7 = vcmp.gt.f32.partialorder %v6144_v55, 0.0 }
0x1e2c   :  { %v6267_v17 = vmul.f32 %v13581_v6, %v13704_v63  ;;  %v6266_v53 = vmul.f32 %v13581_v6, %v13707_v38  ;;  %v13717_v57 = vsel %vm6177_vm0, %v6145_v22, %v6209_v61  ;;  %v6036_v3 = vcombine.high %v13638_v34, %v13638_v34 }
0x1e2d   :  { %v13720_v12 = vsel %vm6176_vm7, %v6144_v55, %v6208_v45  ;;  %v6057_v28 = vrot.slane %v13710_v39, %v15483_v46  ;;  %v6281_v43 = vmul.f32 %v13581_v6, %v13717_v57  ;;  %v6832_v34 = vmul.f32 %v13583_v54, %v13641_v24 }
0x1e2e   :  { %6358 = vrot.lane.b32.xlu1 %v6277_v48, %s11072_s0  ;;  %v6280_v60 = vmul.f32 %v13581_v6, %v13720_v12  ;;  %v6085_v23 = vrot.slane %v6036_v3, %v15483_v46  ;;  %v6831_v8 = vmul.f32 %v13583_v54, %v13645_v41  ;;  %v6834_v40 = vmul.f32 %v13583_v54, %v13649_v16 }
0x1e2f   :  { %6356 = vrot.lane.b32.xlu0 %v6276_v26, %s11072_s0  ;;  %v6133_v47 = vadd.f32 %v13625_v49, %v6057_v28  ;;  %v6132_v2 = vadd.f32 %v13629_v7, %v6057_v28  ;;  %v6833_v48 = vmul.f32 %v13583_v54, %v13653_v50  ;;  %v5989_v55 = vcombine.high %v13607_v18, %v13607_v18 }
0x1e30   :  { %v6147_v21 = vadd.f32 %v13625_v49, %v6085_v23  ;;  %v6146_v29 = vadd.f32 %v13629_v7, %v6085_v23  ;;  %v7417_v4 = vmul.f32 %v13585_v10, %v13720_v12  ;;  %v7963_v42 = vmul.f32 %v13587_v1, %v13645_v41 }
0x1e31   :  { %v6197_v35 = vmul.f32 0.2, %v6133_v47  ;;  %vm6165_vm2 = vcmp.gt.f32.partialorder %v6133_v47, 0.0  ;;  %v6196_v30 = vmul.f32 0.2, %v6132_v2  ;;  %vm6164_vm15 = vcmp.gt.f32.partialorder %v6132_v2, 0.0 }
0x1e32   :  { %6362 = vrot.lane.b32.xlu1 %v6279_v11, %s11072_s0  ;;  %v6211_v25 = vmul.f32 0.2, %v6147_v21  ;;  %vm6179_vm0 = vcmp.gt.f32.partialorder %v6147_v21, 0.0  ;;  %v6210_v33 = vmul.f32 0.2, %v6146_v29  ;;  %v5956_v11 = vcombine.high %v5954_v0, %v5954_v0 }
0x1e33   :  { %6360 = vrot.lane.b32.xlu0 %v6278_v31, %s11072_s0  ;;  %v13748_v26 = vsel %vm6165_vm2, %v6133_v47, %v6197_v35  ;;  %v13751_v22 = vsel %vm6164_vm15, %v6132_v2, %v6196_v30  ;;  %vm6178_vm7 = vcmp.gt.f32.partialorder %v6146_v29, 0.0  ;;  %v6836_v47 = vmul.f32 %v13583_v54, %v13663_v19 }
0x1e34   :  { %v6269_v31 = vmul.f32 %v13581_v6, %v13748_v26  ;;  %v6268_v61 = vmul.f32 %v13581_v6, %v13751_v22  ;;  %v13760_v45 = vsel %vm6179_vm0, %v6147_v21, %v6211_v25  ;;  %v13767_v3 = vrot.slane %v5956_v11, %v15503_v37 }
0x1e35   :  { %v6283_v0 = vmul.f32 %v13581_v6, %v13760_v45  ;;  %v6835_v2 = vmul.f32 %v13583_v54, %v13667_v56  ;;  %v6848_v35 = vmul.f32 %v13583_v54, %v13676_v27  ;;  %v6847_v21 = vmul.f32 %v13583_v54, %v13680_v9 }
0x1e36   :  { %6338 = vrot.lane.b32.xlu1 %v6267_v17, %s11072_s0  ;;  %v13763_v17 = vsel %vm6178_vm7, %v6146_v29, %v6210_v33  ;;  %v6850_v25 = vmul.f32 %v13583_v54, %v13691_v36  ;;  %v6849_v33 = vmul.f32 %v13583_v54, %v13695_v51  ;;  %v7967_v18 = vmul.f32 %v13587_v1, %v13667_v56 }
0x1e37   :  { %6336 = vrot.lane.b32.xlu0 %v6266_v53, %s11072_s0  ;;  %v6003_v53 = vrot.slane %v5989_v55, %v15503_v37  ;;  %v6282_v28 = vmul.f32 %v13581_v6, %v13763_v17  ;;  %v7419_v59 = vmul.f32 %v13585_v10, %v13763_v17  ;;  %v7979_v13 = vmul.f32 %v13587_v1, %v13680_v9 }
0x1e3a   :  { %6366 = vrot.lane.b32.xlu1 %v6281_v43, %s11072_s0  ;;  %v13776_v43 = vrot.slane %v6003_v53, %v15503_v37 }
0x1e3b   :  { %6364 = vrot.lane.b32.xlu0 %v6280_v60, %s11072_s0  ;;  %v6061_v60 = vrot.slane %v13767_v3, %v15483_v46 }
0x1e3d   :  { %v6135_v23 = vadd.f32 %v13625_v49, %v6061_v60 }
0x1e3e   :  { %6897 = vrot.lane.b32.xlu1 %v6832_v34, %s11078_s28  ;;  %v6134_v34 = vadd.f32 %v13629_v7, %v6061_v60 }
0x1e3f   :  { %6895 = vrot.lane.b32.xlu0 %v6831_v8, %s11078_s28  ;;  %v6089_v8 = vrot.slane %v13776_v43, %v15483_v46  ;;  %v6199_v30 = vmul.f32 0.2, %v6135_v23  ;;  %vm6167_vm2 = vcmp.gt.f32.partialorder %v6135_v23, 0.0 }
0x1e40   :  { %vm6166_vm15 = vcmp.gt.f32.partialorder %v6134_v34, 0.0 }
0x1e41   :  { %v6149_v29 = vadd.f32 %v13625_v49, %v6089_v8  ;;  %v13803_v55 = vsel %vm6167_vm2, %v6135_v23, %v6199_v30 }
0x1e42   :  { %6901 = vrot.lane.b32.xlu1 %v6834_v40, %s11078_s28  ;;  %v6198_v40 = vmul.f32 0.2, %v6134_v34 }
0x1e43   :  { %6899 = vrot.lane.b32.xlu0 %v6833_v48, %s11078_s28  ;;  %v6148_v48 = vadd.f32 %v13629_v7, %v6089_v8  ;;  %v6213_v11 = vmul.f32 0.2, %v6149_v29  ;;  %vm6181_vm0 = vcmp.gt.f32.partialorder %v6149_v29, 0.0  ;;  %v5986_v8 = vcombine.high %v13710_v39, %v13710_v39 }
0x1e44   :  { %v6852_v39 = vmul.f32 %v13583_v54, %v13717_v57 }
0x1e45   :  { %vm6180_vm7 = vcmp.gt.f32.partialorder %v6148_v48, 0.0  ;;  %v13813_v60 = vsel %vm6181_vm0, %v6149_v29, %v6213_v11  ;;  %v6851_v29 = vmul.f32 %v13583_v54, %v13720_v12 }
0x1e46   :  { %6342 = vrot.lane.b32.xlu1 %v6269_v31, %s11072_s0  ;;  %v13806_v31 = vsel %vm6166_vm15, %v6134_v34, %v6198_v40  ;;  %v6005_v34 = vcombine.high %v6003_v53, %v6003_v53  ;;  %v6065_v53 = vrot.slane %v5986_v8, %v15483_v46 }
0x1e47   :  { %6340 = vrot.lane.b32.xlu0 %v6268_v61, %s11072_s0  ;;  %v6212_v61 = vmul.f32 0.2, %v6148_v48 }
0x1e48   :  { %v13833_v30 = vrot.slane %v6005_v34, %v15503_v37  ;;  %v6137_v40 = vadd.f32 %v13625_v49, %v6065_v53 }
0x1e4a   :  { %6370 = vrot.lane.b32.xlu1 %v6283_v0, %s11072_s0  ;;  %v6271_v0 = vmul.f32 %v13581_v6, %v13803_v55  ;;  %v6093_v37 = vrot.slane %v13833_v30, %v15483_v46  ;;  %v6201_v11 = vmul.f32 0.2, %v6137_v40  ;;  %vm6169_vm2 = vcmp.gt.f32.partialorder %v6137_v40, 0.0 }
0x1e4b   :  { %6368 = vrot.lane.b32.xlu0 %v6282_v28, %s11072_s0  ;;  %v6270_v28 = vmul.f32 %v13581_v6, %v13806_v31 }
0x1e4c   :  { %v13859_v34 = vsel %vm6169_vm2, %v6137_v40, %v6201_v11  ;;  %v5988_v11 = vcombine.high %v13767_v3, %v13767_v3 }
0x1e4e   :  { %6905 = vrot.lane.b32.xlu1 %v6836_v47, %s11078_s28  ;;  %v13816_v47 = vsel %vm6180_vm7, %v6148_v48, %v6212_v61  ;;  %v6136_v48 = vadd.f32 %v13629_v7, %v6065_v53  ;;  %v6151_v61 = vadd.f32 %v13625_v49, %v6093_v37  ;;  %v6273_v53 = vmul.f32 %v13581_v6, %v13859_v34 }
0x1e4f   :  { %6903 = vrot.lane.b32.xlu0 %v6835_v2, %s11078_s28  ;;  %v6285_v2 = vmul.f32 %v13581_v6, %v13813_v60  ;;  %v6284_v23 = vmul.f32 %v13581_v6, %v13816_v47  ;;  %v7421_v14 = vmul.f32 %v13585_v10, %v13816_v47 }
0x1e50   :  { %vm6168_vm15 = vcmp.gt.f32.partialorder %v6136_v48, 0.0  ;;  %v6215_v8 = vmul.f32 0.2, %v6151_v61  ;;  %vm6183_vm0 = vcmp.gt.f32.partialorder %v6151_v61, 0.0 }
0x1e52   :  { %6929 = vrot.lane.b32.xlu1 %v6848_v35, %s11078_s28  ;;  %v6838_v35 = vmul.f32 %v13583_v54, %v13704_v63 }
0x1e53   :  { %6927 = vrot.lane.b32.xlu0 %v6847_v21, %s11078_s28  ;;  %v6837_v21 = vmul.f32 %v13583_v54, %v13707_v38 }
0x1e56   :  { %6933 = vrot.lane.b32.xlu1 %v6850_v25, %s11078_s28  ;;  %v7398_v25 = vmul.f32 %v13585_v10, %v13641_v24 }
0x1e57   :  { %6931 = vrot.lane.b32.xlu0 %v6849_v33, %s11078_s28  ;;  %v7397_v33 = vmul.f32 %v13585_v10, %v13645_v41 }
0x1e5a   :  { %6346 = vrot.lane.b32.xlu1 %v6271_v0, %s11072_s0  ;;  %v6200_v0 = vmul.f32 0.2, %v6136_v48 }
0x1e5b   :  { %6344 = vrot.lane.b32.xlu0 %v6270_v28, %s11072_s0  ;;  %v6150_v28 = vadd.f32 %v13629_v7, %v6093_v37 }
0x1e5d   :  { %vm6182_vm7 = vcmp.gt.f32.partialorder %v6150_v28, 0.0 }
0x1e5e   :  { %6374 = vrot.lane.b32.xlu1 %v6285_v2, %s11072_s0  ;;  %v7400_v2 = vmul.f32 %v13585_v10, %v13649_v16 }
0x1e5f   :  { %6372 = vrot.lane.b32.xlu0 %v6284_v23, %s11072_s0  ;;  %v7399_v23 = vmul.f32 %v13585_v10, %v13653_v50 }
0x1e62   :  { %6909 = vrot.lane.b32.xlu1 %v6838_v35, %s11078_s28  ;;  %v13862_v35 = vsel %vm6168_vm15, %v6136_v48, %v6200_v0  ;;  %v6853_v0 = vmul.f32 %v13583_v54, %v13763_v17 }
0x1e63   :  { %6907 = vrot.lane.b32.xlu0 %v6837_v21, %s11078_s28  ;;  %v6214_v21 = vmul.f32 0.2, %v6150_v28 }
0x1e65   :  { %v13872_v40 = vsel %vm6182_vm7, %v6150_v28, %v6214_v21  ;;  %v6035_v28 = vcombine.high %v13776_v43, %v13776_v43  ;;  %v7401_v21 = vmul.f32 %v13585_v10, %v13667_v56  ;;  %v7982_v56 = vmul.f32 %v13587_v1, %v13691_v36 }
0x1e66   :  { %6937 = vrot.lane.b32.xlu1 %v6852_v39, %s11078_s28  ;;  %v6272_v39 = vmul.f32 %v13581_v6, %v13862_v35  ;;  %v6286_v37 = vmul.f32 %v13581_v6, %v13872_v40 }
0x1e67   :  { %6935 = vrot.lane.b32.xlu0 %v6851_v29, %s11078_s28  ;;  %v13869_v29 = vsel %vm6183_vm0, %v6151_v61, %v6215_v8  ;;  %v6854_v61 = vmul.f32 %v13583_v54, %v13760_v45  ;;  %v7402_v8 = vmul.f32 %v13585_v10, %v13663_v19  ;;  %v6097_v43 = vrot.slane %v6035_v28, %v15483_v46 }
0x1e68   :  { %v6287_v48 = vmul.f32 %v13581_v6, %v13869_v29  ;;  %v7415_v28 = vmul.f32 %v13585_v10, %v13695_v51 }
0x1e6a   :  { %7463 = vrot.lane.b32.xlu1 %v7398_v25, %s11079_s5  ;;  %v6840_v25 = vmul.f32 %v13583_v54, %v13748_v26 }
0x1e6b   :  { %7461 = vrot.lane.b32.xlu0 %v7397_v33, %s11079_s5  ;;  %v6839_v33 = vmul.f32 %v13583_v54, %v13751_v22 }
0x1e6e   :  { %7467 = vrot.lane.b32.xlu1 %v7400_v2, %s11079_s5  ;;  %v6069_v2 = vrot.slane %v5988_v11, %v15483_v46 }
0x1e6f   :  { %7465 = vrot.lane.b32.xlu0 %v7399_v23, %s11079_s5 }
0x1e72   :  { %6350 = vrot.lane.b32.xlu1 %v6273_v53, %s11072_s0  ;;  %v6139_v53 = vadd.f32 %v13625_v49, %v6069_v2 }
0x1e73   :  { %6348 = vrot.lane.b32.xlu0 %v6272_v39, %s11072_s0  ;;  %v6138_v39 = vadd.f32 %v13629_v7, %v6069_v2 }
0x1e74   :  { %vm6171_vm2 = vcmp.gt.f32.partialorder %v6139_v53, 0.0 }
0x1e75   :  { %v6202_v11 = vmul.f32 0.2, %v6138_v39  ;;  %vm6170_vm15 = vcmp.gt.f32.partialorder %v6138_v39, 0.0 }
0x1e76   :  { %6378 = vrot.lane.b32.xlu1 %v6287_v48, %s11072_s0  ;;  %v7414_v48 = vmul.f32 %v13585_v10, %v13676_v27 }
0x1e77   :  { %6376 = vrot.lane.b32.xlu0 %v6286_v37, %s11072_s0  ;;  %v7413_v37 = vmul.f32 %v13585_v10, %v13680_v9 }
0x1e7a   :  { %6913 = vrot.lane.b32.xlu1 %v6840_v25, %s11078_s28  ;;  %v6203_v25 = vmul.f32 0.2, %v6139_v53 }
0x1e7b   :  { %6911 = vrot.lane.b32.xlu0 %v6839_v33, %s11078_s28  ;;  %v6153_v33 = vadd.f32 %v13625_v49, %v6097_v43 }
0x1e7c   :  { %v13921_v2 = vsel %vm6171_vm2, %v6139_v53, %v6203_v25 }
0x1e7d   :  { %vm6185_vm0 = vcmp.gt.f32.partialorder %v6153_v33, 0.0  ;;  %v6846_v9 = vmul.f32 %v13583_v54, %v13921_v2 }
0x1e7e   :  { %6941 = vrot.lane.b32.xlu1 %v6854_v61, %s11078_s28  ;;  %v6152_v61 = vadd.f32 %v13629_v7, %v6097_v43  ;;  %v6275_v43 = vmul.f32 %v13581_v6, %v13921_v2 }
0x1e7f   :  { %6939 = vrot.lane.b32.xlu0 %v6853_v0, %s11078_s28  ;;  %v7416_v0 = vmul.f32 %v13585_v10, %v13691_v36 }
0x1e80   :  { %v9471_v23 = vpop.f32.mrb[28].mxu0  ;;  %vm6184_vm7 = vcmp.gt.f32.partialorder %v6152_v61, 0.0 }
0x1e81   :  { %v13900_v3 = vpop.f32.mrb[29].mxu0  ;;  %v6217_v23 = vmul.f32 0.2, %v6153_v33 }
0x1e82   :  { %15504 = vst [vmem:[#allocation146_spill] sm:$0xff] %v13900_v3  ;;  %7471 = vrot.lane.b32.xlu1 %v7402_v8, %s11079_s5  ;;  %v13924_v8 = vsel %vm6170_vm15, %v6138_v39, %v6202_v11 }
0x1e83   :  { %7469 = vrot.lane.b32.xlu0 %v7401_v21, %s11079_s5  ;;  %v6216_v21 = vmul.f32 0.2, %v6152_v61 }
0x1e85   :  { %v13934_v53 = vsel %vm6184_vm7, %v6152_v61, %v6216_v21  ;;  %v6841_v61 = vmul.f32 %v13583_v54, %v13806_v31 }
0x1e86   :  { %7495 = vrot.lane.b32.xlu1 %v7414_v48, %s11079_s5  ;;  %v6274_v48 = vmul.f32 %v13581_v6, %v13924_v8  ;;  %v6288_v25 = vmul.f32 %v13581_v6, %v13934_v53 }
0x1e87   :  { %7493 = vrot.lane.b32.xlu0 %v7413_v37, %s11079_s5  ;;  %v13931_v37 = vsel %vm6185_vm0, %v6153_v33, %v6217_v23  ;;  %v6842_v33 = vmul.f32 %v13583_v54, %v13803_v55  ;;  %v6856_v23 = vmul.f32 %v13583_v54, %v13813_v60 }
0x1e88   :  { %v6289_v39 = vmul.f32 %v13581_v6, %v13931_v37 }
0x1e8a   :  { %7499 = vrot.lane.b32.xlu1 %v7416_v0, %s11079_s5 }
0x1e8b   :  { %7497 = vrot.lane.b32.xlu0 %v7415_v28, %s11079_s5 }
0x1e8e   :  { %6354 = vrot.lane.b32.xlu1 %v6275_v43, %s11072_s0  ;;  %v6855_v43 = vmul.f32 %v13583_v54, %v13816_v47 }
0x1e8f   :  { %6352 = vrot.lane.b32.xlu0 %v6274_v48, %s11072_s0  ;;  %v6037_v48 = vcombine.high %v13833_v30, %v13833_v30  ;;  %v7418_v30 = vmul.f32 %v13585_v10, %v13717_v57 }
0x1e92   :  { %6382 = vrot.lane.b32.xlu1 %v6289_v39, %s11072_s0 }
0x1e93   :  { %6380 = vrot.lane.b32.xlu0 %v6288_v25, %s11072_s0  ;;  %v7404_v25 = vmul.f32 %v13585_v10, %v13704_v63 }
0x1e94   :  { %v13943_v11 = vpop.permute.xlu1 %6326 }
0x1e95   :  { %v13947_v0 = vpop.permute.xlu0 %6324 }
0x1e96   :  { %15505 = vst [vmem:[#allocation152_spill] sm:$0xff] %v13947_v0  ;;  %6917 = vrot.lane.b32.xlu1 %v6842_v33, %s11078_s28 }
0x1e97   :  { %6915 = vrot.lane.b32.xlu0 %v6841_v61, %s11078_s28  ;;  %v7403_v61 = vmul.f32 %v13585_v10, %v13707_v38 }
0x1e98   :  { %v13953_v28 = vpop.permute.xlu1 %6330 }
0x1e99   :  { %v13957_v21 = vpop.permute.xlu0 %6328 }
0x1e9a   :  { %15506 = vst [vmem:[#allocation153_spill] sm:$0xff] %v13957_v21  ;;  %6945 = vrot.lane.b32.xlu1 %v6856_v23, %s11078_s28  ;;  %v6101_v23 = vrot.slane %v6037_v48, %v15483_v46  ;;  %v7964_v48 = vmul.f32 %v13587_v1, %v13641_v24  ;;  %v7965_v24 = vmul.f32 %v13587_v1, %v13653_v50 }
0x1e9b   :  { %6943 = vrot.lane.b32.xlu0 %v6855_v43, %s11078_s28  ;;  %v7407_v21 = vmul.f32 %v13585_v10, %v13806_v31 }
0x1e9c   :  { %v13965_v39 = vpop.permute.xlu1 %6334  ;;  %v6155_v32 = vadd.f32 %v13625_v49, %v6101_v23 }
0x1e9d   :  { %v13969_v33 = vpop.permute.xlu0 %6332 }
0x1e9e   :  { %7475 = vrot.lane.b32.xlu1 %v7404_v25, %s11079_s5  ;;  %v6154_v25 = vadd.f32 %v13629_v7, %v6101_v23  ;;  %v6219_v58 = vmul.f32 0.2, %v6155_v32  ;;  %vm6187_vm2 = vcmp.gt.f32.partialorder %v6155_v32, 0.0 }
0x1e9f   :  { %7473 = vrot.lane.b32.xlu0 %v7403_v61, %s11079_s5 }
0x1ea0   :  { %v13976_v5 = vpop.permute.xlu1 %6358  ;;  %v6218_v49 = vmul.f32 0.2, %v6154_v25  ;;  %vm6186_vm15 = vcmp.gt.f32.partialorder %v6154_v25, 0.0 }
0x1ea1   :  { %v13980_v43 = vpop.permute.xlu0 %6356 }
0x1ea2   :  { %7503 = vrot.lane.b32.xlu1 %v7418_v30, %s11079_s5  ;;  %v14006_v30 = vsel %vm6187_vm2, %v6155_v32, %v6219_v58  ;;  %v14009_v41 = vsel %vm6186_vm15, %v6154_v25, %v6218_v49  ;;  %v6844_v32 = vmul.f32 %v13583_v54, %v13859_v34  ;;  %v6843_v25 = vmul.f32 %v13583_v54, %v13862_v35 }
0x1ea3   :  { %7501 = vrot.lane.b32.xlu0 %v7417_v4, %s11079_s5  ;;  %v7966_v4 = vmul.f32 %v13587_v1, %v13649_v16  ;;  %v6290_v16 = vmul.f32 %v13581_v6, %v14009_v41 }
0x1ea4   :  { %v13988_v61 = vpop.permute.xlu1 %6362 }
0x1ea5   :  { %v13992_v46 = vpop.permute.xlu0 %6360 }
0x1ea6   :  { %8029 = vrot.lane.b32.xlu1 %v7964_v48, %s11080_s1  ;;  %v6291_v48 = vmul.f32 %v13581_v6, %v14006_v30  ;;  %v6858_v6 = vmul.f32 %v13583_v54, %v13869_v29 }
0x1ea7   :  { %8027 = vrot.lane.b32.xlu0 %v7963_v42, %s11080_s1 }
0x1ea8   :  { %v13998_v7 = vpop.permute.xlu1 %6338 }
0x1ea9   :  { %v14002_v23 = vpop.permute.xlu0 %6336 }
0x1eaa   :  { %8033 = vrot.lane.b32.xlu1 %v7966_v4, %s11080_s1 }
0x1eab   :  { %8031 = vrot.lane.b32.xlu0 %v7965_v24, %s11080_s1  ;;  %v6857_v24 = vmul.f32 %v13583_v54, %v13872_v40 }
0x1eac   :  { %v14012_v42 = vpop.permute.xlu1 %6366 }
0x1ead   :  { %v14016_v3 = vpop.permute.xlu0 %6364 }
0x1eae   :  { %6386 = vrot.lane.b32.xlu1 %v6291_v48, %s11072_s0 }
0x1eaf   :  { %6384 = vrot.lane.b32.xlu0 %v6290_v16, %s11072_s0  ;;  %v7406_v16 = vmul.f32 %v13585_v10, %v13748_v26 }
0x1eb0   :  { %v14022_v58 = vpop.permute.xlu1 %6897 }
0x1eb1   :  { %v14026_v50 = vpop.permute.xlu0 %6895 }
0x1eb2   :  { %6921 = vrot.lane.b32.xlu1 %v6844_v32, %s11078_s28 }
0x1eb3   :  { %6919 = vrot.lane.b32.xlu0 %v6843_v25, %s11078_s28  ;;  %v7405_v25 = vmul.f32 %v13585_v10, %v13751_v22 }
0x1eb4   :  { %v14032_v49 = vpop.permute.xlu1 %6901 }
0x1eb5   :  { %v14036_v4 = vpop.permute.xlu0 %6899 }
0x1eb6   :  { %6949 = vrot.lane.b32.xlu1 %v6858_v6, %s11078_s28  ;;  %v7420_v6 = vmul.f32 %v13585_v10, %v13760_v45 }
0x1eb7   :  { %6947 = vrot.lane.b32.xlu0 %v6857_v24, %s11078_s28 }
0x1eb8   :  { %v14042_v48 = vpop.permute.xlu1 %6342 }
0x1eb9   :  { %v14046_v32 = vpop.permute.xlu0 %6340 }
0x1eba   :  { %7479 = vrot.lane.b32.xlu1 %v7406_v16, %s11079_s5  ;;  %v7968_v16 = vmul.f32 %v13587_v1, %v13663_v19 }
0x1ebb   :  { %7477 = vrot.lane.b32.xlu0 %v7405_v25, %s11079_s5 }
0x1ebc   :  { %v14052_v62 = vpop.permute.xlu1 %6370 }
0x1ebd   :  { %v14056_v24 = vpop.permute.xlu0 %6368 }
0x1ebe   :  { %7507 = vrot.lane.b32.xlu1 %v7420_v6, %s11079_s5  ;;  %v7980_v6 = vmul.f32 %v13587_v1, %v13676_v27 }
0x1ebf   :  { %7505 = vrot.lane.b32.xlu0 %v7419_v59, %s11079_s5 }
0x1ec0   :  { %v14062_v20 = vpop.permute.xlu1 %6905 }
0x1ec1   :  { %v14066_v25 = vpop.permute.xlu0 %6903 }
0x1ec2   :  { %8037 = vrot.lane.b32.xlu1 %v7968_v16, %s11080_s1  ;;  %v7981_v16 = vmul.f32 %v13587_v1, %v13695_v51  ;;  %v6860_v51 = vmul.f32 %v13583_v54, %v13931_v37 }
0x1ec3   :  { %8035 = vrot.lane.b32.xlu0 %v7967_v18, %s11080_s1 }
0x1ec4   :  { %v14072_v44 = vpop.permute.xlu1 %6929 }
0x1ec5   :  { %v14076_v59 = vpop.permute.xlu0 %6927 }
0x1ec6   :  { %8061 = vrot.lane.b32.xlu1 %v7980_v6, %s11080_s1  ;;  %v6845_v6 = vmul.f32 %v13583_v54, %v13924_v8 }
0x1ec7   :  { %8059 = vrot.lane.b32.xlu0 %v7979_v13, %s11080_s1 }
0x1ec8   :  { %v14082_v19 = vpop.permute.xlu1 %6933 }
0x1ec9   :  { %v14086_v18 = vpop.permute.xlu0 %6931 }
0x1eca   :  { %8065 = vrot.lane.b32.xlu1 %v7982_v56, %s11080_s1 }
0x1ecb   :  { %8063 = vrot.lane.b32.xlu0 %v7981_v16, %s11080_s1  ;;  %v6859_v16 = vmul.f32 %v13583_v54, %v13934_v53 }
0x1ecc   :  { %v14092_v27 = vpop.permute.xlu1 %6346 }
0x1ecd   :  { %v14096_v13 = vpop.permute.xlu0 %6344 }
0x1ece   :  { %6925 = vrot.lane.b32.xlu1 %v6846_v9, %s11078_s28  ;;  %v7408_v9 = vmul.f32 %v13585_v10, %v13803_v55 }
0x1ecf   :  { %6923 = vrot.lane.b32.xlu0 %v6845_v6, %s11078_s28 }
0x1ed0   :  { %v14102_v36 = vpop.permute.xlu1 %6374 }
0x1ed1   :  { %v14106_v56 = vpop.permute.xlu0 %6372 }
0x1ed2   :  { %6953 = vrot.lane.b32.xlu1 %v6860_v51, %s11078_s28  ;;  %v7422_v51 = vmul.f32 %v13585_v10, %v13813_v60 }
0x1ed3   :  { %6951 = vrot.lane.b32.xlu0 %v6859_v16, %s11078_s28 }
0x1ed4   :  { %v14112_v15 = vpop.permute.xlu1 %6909 }
0x1ed5   :  { %v14116_v6 = vpop.permute.xlu0 %6907 }
0x1ed6   :  { %7483 = vrot.lane.b32.xlu1 %v7408_v9, %s11079_s5  ;;  %v7970_v9 = vmul.f32 %v13587_v1, %v13704_v63 }
0x1ed7   :  { %7481 = vrot.lane.b32.xlu0 %v7407_v21, %s11079_s5 }
0x1ed8   :  { %v14122_v0 = vpop.permute.xlu1 %6937 }
0x1ed9   :  { %15507 = vst [vmem:[#allocation123_spill] sm:$0xff] %v14122_v0  ;;  %v14126_v16 = vpop.permute.xlu0 %6935  ;;  %v7969_v0 = vmul.f32 %v13587_v1, %v13707_v38  ;;  %v6862_v38 = vmul.f32 %v13583_v54, %v14006_v30 }
0x1eda   :  { %15508 = vst [vmem:[#allocation154_spill] sm:$0xff] %v14126_v16  ;;  %7511 = vrot.lane.b32.xlu1 %v7422_v51, %s11079_s5  ;;  %v7984_v51 = vmul.f32 %v13587_v1, %v13717_v57 }
0x1edb   :  { %7509 = vrot.lane.b32.xlu0 %v7421_v14, %s11079_s5 }
0x1edc   :  { %v14132_v52 = vpop.permute.xlu1 %7463 }
0x1edd   :  { %15509 = vst [vmem:[#allocation140_spill] sm:$0xff] %v14132_v52  ;;  %v14136_v21 = vpop.permute.xlu0 %7461  ;;  %v7983_v52 = vmul.f32 %v13587_v1, %v13720_v12  ;;  %v7410_v12 = vmul.f32 %v13585_v10, %v13859_v34 }
0x1ede   :  { %8041 = vrot.lane.b32.xlu1 %v7970_v9, %s11080_s1  ;;  %v6861_v9 = vmul.f32 %v13583_v54, %v14009_v41  ;;  %v7424_v54 = vmul.f32 %v13585_v10, %v13869_v29 }
0x1edf   :  { %8039 = vrot.lane.b32.xlu0 %v7969_v0, %s11080_s1 }
0x1ee0   :  { %v14142_v16 = vpop.permute.xlu1 %7467 }
0x1ee1   :  { %v14146_v14 = vpop.permute.xlu0 %7465 }
0x1ee2   :  { %8069 = vrot.lane.b32.xlu1 %v7984_v51, %s11080_s1  ;;  %v7409_v51 = vmul.f32 %v13585_v10, %v13862_v35 }
0x1ee3   :  { %8067 = vrot.lane.b32.xlu0 %v7983_v52, %s11080_s1 }
0x1ee4   :  { %v14152_v63 = vpop.permute.xlu1 %6350 }
0x1ee5   :  { %v14156_v0 = vpop.permute.xlu0 %6348 }
0x1ee6   :  { %15510 = vst [vmem:[#allocation141_spill] sm:$0xff] %v14156_v0  ;;  %6957 = vrot.lane.b32.xlu1 %v6862_v38, %s11078_s28 }
0x1ee7   :  { %6955 = vrot.lane.b32.xlu0 %v6861_v9, %s11078_s28  ;;  %v7423_v9 = vmul.f32 %v13585_v10, %v13872_v40 }
0x1ee8   :  { %v14162_v57 = vpop.permute.xlu1 %6378 }
0x1ee9   :  { %v14166_v52 = vpop.permute.xlu0 %6376 }
0x1eea   :  { %15511 = vst [vmem:[#allocation143_spill] sm:$0xff] %v14166_v52  ;;  %7487 = vrot.lane.b32.xlu1 %v7410_v12, %s11079_s5  ;;  %v7972_v12 = vmul.f32 %v13587_v1, %v13748_v26 }
0x1eeb   :  { %7485 = vrot.lane.b32.xlu0 %v7409_v51, %s11079_s5 }
0x1eec   :  { %v14172_v0 = vpop.permute.xlu1 %6913 }
0x1eed   :  { %15512 = vst [vmem:[#allocation157_spill] sm:$0xff] %v14172_v0  ;;  %v14176_v38 = vpop.permute.xlu0 %6911  ;;  %v7971_v0 = vmul.f32 %v13587_v1, %v13751_v22  ;;  %v7412_v22 = vmul.f32 %v13585_v10, %v13921_v2 }
0x1eee   :  { %15513 = vst [vmem:[#allocation142_spill] sm:$0xff] %v14176_v38  ;;  %7515 = vrot.lane.b32.xlu1 %v7424_v54, %s11079_s5  ;;  %v7986_v54 = vmul.f32 %v13587_v1, %v13760_v45 }
0x1eef   :  { %7513 = vrot.lane.b32.xlu0 %v7423_v9, %s11079_s5 }
0x1ef0   :  { %v14182_v52 = vpop.permute.xlu1 %6941 }
0x1ef1   :  { %15514 = vst [vmem:[#allocation156_spill] sm:$0xff] %v14182_v52  ;;  %v14186_v51 = vpop.permute.xlu0 %6939  ;;  %v7985_v52 = vmul.f32 %v13587_v1, %v13763_v17  ;;  %v7426_v17 = vmul.f32 %v13585_v10, %v13931_v37 }
0x1ef2   :  { %8045 = vrot.lane.b32.xlu1 %v7972_v12, %s11080_s1  ;;  %v7411_v12 = vmul.f32 %v13585_v10, %v13924_v8 }
0x1ef3   :  { %8043 = vrot.lane.b32.xlu0 %v7971_v0, %s11080_s1 }
0x1ef4   :  { %v14192_v38 = vpop.permute.xlu1 %7471 }
0x1ef5   :  { %v14196_v9 = vpop.permute.xlu0 %7469 }
0x1ef6   :  { %8073 = vrot.lane.b32.xlu1 %v7986_v54, %s11080_s1  ;;  %v7425_v54 = vmul.f32 %v13585_v10, %v13934_v53 }
0x1ef7   :  { %8071 = vrot.lane.b32.xlu0 %v7985_v52, %s11080_s1 }
0x1ef8   :  { %v14202_v26 = vpop.permute.xlu1 %7495 }
0x1ef9   :  { %v14206_v0 = vpop.permute.xlu0 %7493 }
0x1efa   :  { %15515 = vst [vmem:[#allocation158_spill] sm:$0xff] %v14206_v0  ;;  %7491 = vrot.lane.b32.xlu1 %v7412_v22, %s11079_s5  ;;  %v7974_v22 = vmul.f32 %v13587_v1, %v13803_v55 }
0x1efb   :  { %7489 = vrot.lane.b32.xlu0 %v7411_v12, %s11079_s5 }
0x1efc   :  { %v14212_v45 = vpop.permute.xlu1 %7499 }
0x1efd   :  { %15516 = vst [vmem:[#allocation145_spill] sm:$0xff] %v14212_v45  ;;  %v14216_v52 = vpop.permute.xlu0 %7497  ;;  %v7973_v45 = vmul.f32 %v13587_v1, %v13806_v31  ;;  %v7428_v31 = vmul.f32 %v13585_v10, %v14006_v30 }
0x1efe   :  { %15517 = vst [vmem:[#allocation155_spill] sm:$0xff] %v14216_v52  ;;  %7519 = vrot.lane.b32.xlu1 %v7426_v17, %s11079_s5  ;;  %v7988_v17 = vmul.f32 %v13587_v1, %v13813_v60 }
0x1eff   :  { %7517 = vrot.lane.b32.xlu0 %v7425_v54, %s11079_s5 }
0x1f00   :  { %v14222_v0 = vpop.permute.xlu1 %6354 }
0x1f01   :  { %15518 = vst [vmem:[#allocation131_spill] sm:$0xff] %v14222_v0  ;;  %v14226_v12 = vpop.permute.xlu0 %6352  ;;  %v7987_v0 = vmul.f32 %v13587_v1, %v13816_v47  ;;  %v7976_v47 = vmul.f32 %v13587_v1, %v13859_v34 }
0x1f02   :  { %8049 = vrot.lane.b32.xlu1 %v7974_v22, %s11080_s1  ;;  %v7427_v22 = vmul.f32 %v13585_v10, %v14009_v41  ;;  %v7990_v10 = vmul.f32 %v13587_v1, %v13869_v29 }
0x1f03   :  { %8047 = vrot.lane.b32.xlu0 %v7973_v45, %s11080_s1 }
0x1f04   :  { %v14232_v52 = vpop.permute.xlu1 %6382 }
0x1f05   :  { %v14236_v54 = vpop.permute.xlu0 %6380 }
0x1f06   :  { %8077 = vrot.lane.b32.xlu1 %v7988_v17, %s11080_s1  ;;  %v7975_v17 = vmul.f32 %v13587_v1, %v13862_v35  ;;  %v7978_v35 = vmul.f32 %v13587_v1, %v13921_v2  ;;  %v7994_v2 = vmul.f32 %v13587_v1, %v14006_v30 }
0x1f07   :  { %8075 = vrot.lane.b32.xlu0 %v7987_v0, %s11080_s1 }
0x1f08   :  { %v14242_v55 = vpop.permute.xlu1 %6917 }
0x1f09   :  { %v14246_v45 = vpop.permute.xlu0 %6915 }
0x1f0a   :  { %15519 = vst [vmem:[#allocation130_spill] sm:$0xff] %v14246_v45  ;;  %7523 = vrot.lane.b32.xlu1 %v7428_v31, %s11079_s5 }
0x1f0b   :  { %7521 = vrot.lane.b32.xlu0 %v7427_v22, %s11079_s5  ;;  %v7989_v22 = vmul.f32 %v13587_v1, %v13872_v40  ;;  %v7992_v40 = vmul.f32 %v13587_v1, %v13931_v37 }
0x1f0c   :  { %v14252_v60 = vpop.permute.xlu1 %6945 }
0x1f0d   :  { %v14256_v0 = vpop.permute.xlu0 %6943 }
0x1f0e   :  { %8053 = vrot.lane.b32.xlu1 %v7976_v47, %s11080_s1 }
0x1f0f   :  { %8051 = vrot.lane.b32.xlu0 %v7975_v17, %s11080_s1  ;;  %v7977_v17 = vmul.f32 %v13587_v1, %v13924_v8 }
0x1f10   :  { %v14262_v45 = vpop.permute.xlu1 %7475 }
0x1f11   :  { %v14266_v31 = vpop.permute.xlu0 %7473 }
0x1f12   :  { %8081 = vrot.lane.b32.xlu1 %v7990_v10, %s11080_s1 }
0x1f13   :  { %8079 = vrot.lane.b32.xlu0 %v7989_v22, %s11080_s1  ;;  %v7991_v22 = vmul.f32 %v13587_v1, %v13934_v53 }
0x1f14   :  { %v14272_v34 = vpop.permute.xlu1 %7503 }
0x1f15   :  { %v14276_v47 = vpop.permute.xlu0 %7501 }
0x1f16   :  { %8057 = vrot.lane.b32.xlu1 %v7978_v35, %s11080_s1 }
0x1f17   :  { %8055 = vrot.lane.b32.xlu0 %v7977_v17, %s11080_s1  ;;  %v7993_v17 = vmul.f32 %v13587_v1, %v14009_v41 }
0x1f18   :  { %v14282_v29 = vpop.permute.xlu1 %8029 }
0x1f19   :  { %v14286_v10 = vpop.permute.xlu0 %8027 }
0x1f1a   :  { %15520 = vst [vmem:[#allocation128_spill] sm:$0xff] %v14286_v10  ;;  %8085 = vrot.lane.b32.xlu1 %v7992_v40, %s11080_s1 }
0x1f1b   :  { %8083 = vrot.lane.b32.xlu0 %v7991_v22, %s11080_s1 }
0x1f1c   :  { %v14294_v8 = vpop.permute.xlu1 %8033 }
0x1f1d   :  { %15521 = vst [vmem:[#allocation129_spill] sm:$0xff] %v14294_v8  ;;  %v14296_v35 = vpop.permute.xlu0 %8031 }
0x1f1e   :  { %15522 = vst [vmem:[#allocation133_spill] sm:$0xff] %v14296_v35  ;;  %8089 = vrot.lane.b32.xlu1 %v7994_v2, %s11080_s1 }
0x1f1f   :  { %8087 = vrot.lane.b32.xlu0 %v7993_v17, %s11080_s1  ;;  %v6429_v17 = vsel %vm2314_vm3, %v13953_v28, 0.0 }
0x1f20   :  { %v14304_v53 = vpop.permute.xlu1 %6386 }
0x1f21   :  { %v14302_v37 = vpop.permute.xlu0 %6384 }
0x1f24   :  { %v14308_v22 = vpop.permute.xlu1 %6921 }
0x1f25   :  { %v14306_v40 = vpop.permute.xlu0 %6919 }
0x1f26   :  { %15523 = vst [vmem:[#allocation134_spill] sm:$0xff] %v14306_v40 }
0x1f28   :  { %v14312_v8 = vpop.permute.xlu1 %6949 }
0x1f29   :  { %v14310_v30 = vpop.permute.xlu0 %6947 }
0x1f2a   :  { %15524 = vst [vmem:[#allocation127_spill] sm:$0xff] %v14310_v30  ;;  %v6423_v30 = vsel %vm2314_vm3, %v13943_v11, 0.0  ;;  %v6468_v11 = vsel %vm2314_vm3, %v13980_v43, 0.0  ;;  %v6438_v43 = vsel %vm2314_vm3, %v14002_v23, 0.0  ;;  %v6991_v23 = vsel %vm2314_vm3, %v14026_v50, 0.0 }
0x1f2b   :  { %v6444_v50 = vsel %vm2314_vm3, %v14046_v32, 0.0  ;;  %v7003_v32 = vsel %vm2314_vm3, %v14066_v25, 0.0  ;;  %v7045_v25 = vsel %vm2314_vm3, %v14086_v18, 0.0  ;;  %v6492_v18 = vsel %vm2314_vm3, %v14106_v56, 0.0 }
0x1f2c   :  { %v14316_v10 = vpop.permute.xlu1 %7479 }
0x1f2d   :  { %v14314_v35 = vpop.permute.xlu0 %7477  ;;  %15526 = vst [vmem:[#allocation159_spill] sm:$0xff] %v14316_v10 }
0x1f2e   :  { %15525 = vst [vmem:[#allocation132_spill] sm:$0xff] %v14314_v35  ;;  %v6435_v35 = vsel %vm2314_vm3, %v13965_v39, 0.0  ;;  %v6477_v39 = vsel %vm2314_vm3, %v13988_v61, 0.0  ;;  %v6483_v61 = vsel %vm2314_vm3, %v14012_v42, 0.0  ;;  %v7000_v42 = vsel %vm2314_vm3, %v14032_v49, 0.0 }
0x1f2f   :  { %v6489_v49 = vsel %vm2314_vm3, %v14052_v62, 0.0  ;;  %v7042_v62 = vsel %vm2314_vm3, %v14072_v44, 0.0  ;;  %v6453_v44 = vsel %vm2314_vm3, %v14092_v27, 0.0  ;;  %v7012_v27 = vsel %vm2314_vm3, %v14112_v15, 0.0 }
0x1f30   :  { %v14320_v41 = vpop.permute.xlu1 %7507 }
0x1f31   :  { %v14318_v1 = vpop.permute.xlu0 %7505 }
0x1f32   :  { %15527 = vst [vmem:[#allocation160_spill] sm:$0xff] %v14318_v1  ;;  %v6432_v1 = vsel %vm2314_vm3, %v13969_v33, 0.0  ;;  %v6474_v33 = vsel %vm2314_vm3, %v13992_v46, 0.0  ;;  %v6480_v46 = vsel %vm2314_vm3, %v14016_v3, 0.0  ;;  %v6997_v3 = vsel %vm2314_vm3, %v14036_v4, 0.0 }
0x1f33   :  { %v6486_v4 = vsel %vm2314_vm3, %v14056_v24, 0.0  ;;  %v7039_v24 = vsel %vm2314_vm3, %v14076_v59, 0.0  ;;  %v6450_v59 = vsel %vm2314_vm3, %v14096_v13, 0.0  ;;  %v7009_v13 = vsel %vm2314_vm3, %v14116_v6, 0.0 }
0x1f34   :  { %v14326_v40 = vpop.permute.xlu1 %8037  ;;  %v7557_v6 = vsel %vm2314_vm3, %v14136_v21, 0.0 }
0x1f35   :  { %v14322_v2 = vpop.permute.xlu0 %8035 }
0x1f36   :  { %15528 = vst [vmem:[#allocation161_spill] sm:$0xff] %v14322_v2  ;;  %v6471_v2 = vsel %vm2314_vm3, %v13976_v5, 0.0  ;;  %v6441_v5 = vsel %vm2314_vm3, %v13998_v7, 0.0  ;;  %v6994_v7 = vsel %vm2314_vm3, %v14022_v58, 0.0  ;;  %v6447_v58 = vsel %vm2314_vm3, %v14042_v48, 0.0 }
0x1f37   :  { %v7006_v48 = vsel %vm2314_vm3, %v14062_v20, 0.0  ;;  %v7048_v20 = vsel %vm2314_vm3, %v14082_v19, 0.0  ;;  %v6495_v19 = vsel %vm2314_vm3, %v14102_v36, 0.0  ;;  %v15529_v36 = vld [vmem:[#allocation123_spill] sm:$0xff] }
0x1f38   :  { %v14338_v28 = vpop.permute.xlu1 %8061 }
0x1f39   :  { %v14332_v10 = vpop.permute.xlu0 %8059 }
0x1f3e   :  { %6430 = vadd.xlane.f32.xlu0 %v6429_v17  ;;  %v14340_v17 = vpop.permute.xlu0 %8063 }
0x1f42   :  { %6424 = vadd.xlane.f32.xlu1 %v6423_v30  ;;  %6436 = vadd.xlane.f32.xlu0 %v6435_v35  ;;  %v14346_v35 = vpop.permute.xlu1 %8065  ;;  %v14352_v30 = vpop.permute.xlu0 %6923 }
0x1f46   :  { %6433 = vadd.xlane.f32.xlu1 %v6432_v1  ;;  %6472 = vadd.xlane.f32.xlu0 %v6471_v2  ;;  %v14358_v1 = vpop.permute.xlu1 %6925  ;;  %v14360_v2 = vpop.permute.xlu0 %6951 }
0x1f4a   :  { %6469 = vadd.xlane.f32.xlu1 %v6468_v11  ;;  %6478 = vadd.xlane.f32.xlu0 %v6477_v39  ;;  %v14366_v11 = vpop.permute.xlu1 %6953  ;;  %v14372_v39 = vpop.permute.xlu0 %7481 }
0x1f4e   :  { %6475 = vadd.xlane.f32.xlu1 %v6474_v33  ;;  %6442 = vadd.xlane.f32.xlu0 %v6441_v5  ;;  %v14378_v33 = vpop.permute.xlu1 %7483  ;;  %v14380_v5 = vpop.permute.xlu0 %7509 }
0x1f52   :  { %6439 = vadd.xlane.f32.xlu1 %v6438_v43  ;;  %6484 = vadd.xlane.f32.xlu0 %v6483_v61  ;;  %v14386_v43 = vpop.permute.xlu1 %7511  ;;  %v14392_v61 = vpop.permute.xlu0 %8039 }
0x1f56   :  { %6481 = vadd.xlane.f32.xlu1 %v6480_v46  ;;  %6995 = vadd.xlane.f32.xlu0 %v6994_v7  ;;  %v14398_v46 = vpop.permute.xlu1 %8041  ;;  %v14400_v7 = vpop.permute.xlu0 %8067 }
0x1f5a   :  { %6992 = vadd.xlane.f32.xlu1 %v6991_v23  ;;  %7001 = vadd.xlane.f32.xlu0 %v7000_v42  ;;  %v14406_v23 = vpop.permute.xlu1 %8069  ;;  %v14412_v42 = vpop.permute.xlu0 %6955 }
0x1f5e   :  { %6998 = vadd.xlane.f32.xlu1 %v6997_v3  ;;  %6448 = vadd.xlane.f32.xlu0 %v6447_v58  ;;  %v14418_v3 = vpop.permute.xlu1 %6957  ;;  %v14420_v58 = vpop.permute.xlu0 %7485 }
0x1f62   :  { %6445 = vadd.xlane.f32.xlu1 %v6444_v50  ;;  %6490 = vadd.xlane.f32.xlu0 %v6489_v49  ;;  %v14426_v50 = vpop.permute.xlu1 %7487  ;;  %v7054_v49 = vsel %vm2314_vm3, %v15529_v36, 0.0 }
0x1f66   :  { %6487 = vadd.xlane.f32.xlu1 %v6486_v4  ;;  %7007 = vadd.xlane.f32.xlu0 %v7006_v48  ;;  %v14432_v4 = vpop.permute.xlu0 %7513  ;;  %v15530_v48 = vld [vmem:[#allocation154_spill] sm:$0xff] }
0x1f67   :  { %v7051_v56 = vsel %vm2314_vm3, %v15530_v48, 0.0 }
0x1f6a   :  { %7004 = vadd.xlane.f32.xlu1 %v7003_v32  ;;  %7043 = vadd.xlane.f32.xlu0 %v7042_v62  ;;  %v15531_v32 = vld [vmem:[#allocation140_spill] sm:$0xff]  ;;  %v14438_v62 = vpop.permute.xlu1 %7515 }
0x1f6b   :  { %v7560_v15 = vsel %vm2314_vm3, %v15531_v32, 0.0 }
0x1f6e   :  { %7040 = vadd.xlane.f32.xlu1 %v7039_v24  ;;  %7049 = vadd.xlane.f32.xlu0 %v7048_v20  ;;  %v14440_v24 = vpop.permute.xlu0 %8043  ;;  %v7566_v20 = vsel %vm2314_vm3, %v14142_v16, 0.0  ;;  %v6501_v16 = vsel %vm2314_vm3, %v14162_v57, 0.0  ;;  %v15536_v57 = vld [vmem:[#allocation156_spill] sm:$0xff] }
0x1f72   :  { %7046 = vadd.xlane.f32.xlu1 %v7045_v25  ;;  %6454 = vadd.xlane.f32.xlu0 %v6453_v44  ;;  %v14446_v25 = vpop.permute.xlu1 %8045  ;;  %v7563_v44 = vsel %vm2314_vm3, %v14146_v14, 0.0  ;;  %v15533_v14 = vld [vmem:[#allocation143_spill] sm:$0xff] }
0x1f73   :  { %v6498_v36 = vsel %vm2314_vm3, %v15533_v14, 0.0 }
0x1f76   :  { %6451 = vadd.xlane.f32.xlu1 %v6450_v59  ;;  %6496 = vadd.xlane.f32.xlu0 %v6495_v19  ;;  %v6459_v59 = vsel %vm2314_vm3, %v14152_v63, 0.0  ;;  %v14452_v19 = vpop.permute.xlu0 %8071  ;;  %v15534_v63 = vld [vmem:[#allocation157_spill] sm:$0xff] }
0x1f7a   :  { %6493 = vadd.xlane.f32.xlu1 %v6492_v18  ;;  %7013 = vadd.xlane.f32.xlu0 %v7012_v27  ;;  %v15532_v18 = vld [vmem:[#allocation141_spill] sm:$0xff]  ;;  %v14458_v27 = vpop.permute.xlu1 %8073 }
0x1f7b   :  { %v6456_v21 = vsel %vm2314_vm3, %v15532_v18, 0.0 }
0x1f7e   :  { %7010 = vadd.xlane.f32.xlu1 %v7009_v13  ;;  %7055 = vadd.xlane.f32.xlu0 %v7054_v49  ;;  %v14460_v13 = vpop.permute.xlu0 %7489  ;;  %v7018_v49 = vsel %vm2314_vm3, %v15534_v63, 0.0  ;;  %v14466_v48 = vpop.permute.xlu1 %7491 }
0x1f82   :  { %7052 = vadd.xlane.f32.xlu1 %v7051_v56  ;;  %7561 = vadd.xlane.f32.xlu0 %v7560_v15  ;;  %v15535_v56 = vld [vmem:[#allocation142_spill] sm:$0xff]  ;;  %v7060_v15 = vsel %vm2314_vm3, %v15536_v57, 0.0 }
0x1f83   :  { %v7015_v32 = vsel %vm2314_vm3, %v15535_v56, 0.0  ;;  %v15539_v56 = vld [vmem:[#allocation155_spill] sm:$0xff] }
0x1f86   :  { %7558 = vadd.xlane.f32.xlu1 %v7557_v6  ;;  %7567 = vadd.xlane.f32.xlu0 %v7566_v20  ;;  %v14472_v6 = vpop.permute.xlu0 %7517  ;;  %v7057_v20 = vsel %vm2314_vm3, %v14186_v51, 0.0  ;;  %v15537_v51 = vld [vmem:[#allocation158_spill] sm:$0xff] }
0x1f8a   :  { %7564 = vadd.xlane.f32.xlu1 %v7563_v44  ;;  %6460 = vadd.xlane.f32.xlu0 %v6459_v59  ;;  %v7572_v44 = vsel %vm2314_vm3, %v14192_v38, 0.0  ;;  %v14478_v59 = vpop.permute.xlu1 %7519  ;;  %v14480_v18 = vpop.permute.xlu0 %8047  ;;  %v15538_v38 = vld [vmem:[#allocation145_spill] sm:$0xff] }
0x1f8b   :  { %v7614_v63 = vsel %vm2314_vm3, %v15538_v38, 0.0  ;;  %v15541_v38 = vld [vmem:[#allocation130_spill] sm:$0xff] }
0x1f8e   :  { %6457 = vadd.xlane.f32.xlu1 %v6456_v21  ;;  %6502 = vadd.xlane.f32.xlu0 %v6501_v16  ;;  %v7569_v21 = vsel %vm2314_vm3, %v14196_v9, 0.0  ;;  %v7608_v16 = vsel %vm2314_vm3, %v14202_v26, 0.0  ;;  %v14486_v14 = vpop.permute.xlu1 %8049  ;;  %v7611_v9 = vsel %vm2314_vm3, %v15539_v56, 0.0 }
0x1f92   :  { %6499 = vadd.xlane.f32.xlu1 %v6498_v36  ;;  %7019 = vadd.xlane.f32.xlu0 %v7018_v49  ;;  %v7605_v36 = vsel %vm2314_vm3, %v15537_v51, 0.0  ;;  %v14492_v49 = vpop.permute.xlu0 %8075  ;;  %v14498_v57 = vpop.permute.xlu1 %8077  ;;  %v7024_v51 = vsel %vm2314_vm3, %v14242_v55, 0.0  ;;  %v7578_v55 = vsel %vm2314_vm3, %v14262_v45, 0.0  ;;  %v8126_v45 = vsel %vm2314_vm3, %v14282_v29, 0.0 }
0x1f93   :  { %v6513_v29 = vsel %vm2314_vm3, %v14304_v53, 0.0  ;;  %v7072_v53 = vsel %vm2314_vm3, %v14312_v8, 0.0  ;;  %v15552_v8 = vld [vmem:[#allocation132_spill] sm:$0xff] }
0x1f96   :  { %7016 = vadd.xlane.f32.xlu1 %v7015_v32  ;;  %7061 = vadd.xlane.f32.xlu0 %v7060_v15  ;;  %v15540_v32 = vld [vmem:[#allocation131_spill] sm:$0xff]  ;;  %v14500_v15 = vpop.permute.xlu0 %7521 }
0x1f97   :  { %v6465_v26 = vsel %vm2314_vm3, %v15540_v32, 0.0  ;;  %v7575_v32 = vsel %vm2314_vm3, %v14266_v31, 0.0  ;;  %v15542_v31 = vld [vmem:[#allocation128_spill] sm:$0xff] }
0x1f9a   :  { %7058 = vadd.xlane.f32.xlu1 %v7057_v20  ;;  %7573 = vadd.xlane.f32.xlu0 %v7572_v44  ;;  %v6462_v20 = vsel %vm2314_vm3, %v14226_v12, 0.0  ;;  %v6507_v44 = vsel %vm2314_vm3, %v14232_v52, 0.0  ;;  %v7021_v12 = vsel %vm2314_vm3, %v15541_v38, 0.0  ;;  %v7066_v52 = vsel %vm2314_vm3, %v14252_v60, 0.0 }
0x1f9b   :  { %v7620_v60 = vsel %vm2314_vm3, %v14272_v34, 0.0  ;;  %v15543_v34 = vld [vmem:[#allocation129_spill] sm:$0xff] }
0x1f9e   :  { %7570 = vadd.xlane.f32.xlu1 %v7569_v21  ;;  %7609 = vadd.xlane.f32.xlu0 %v7608_v16  ;;  %v14506_v21 = vpop.permute.xlu1 %7523  ;;  %v6504_v16 = vsel %vm2314_vm3, %v14236_v54, 0.0  ;;  %v7063_v54 = vsel %vm2314_vm3, %v14256_v0, 0.0  ;;  %v7617_v0 = vsel %vm2314_vm3, %v14276_v47, 0.0  ;;  %v15544_v47 = vld [vmem:[#allocation133_spill] sm:$0xff] }
0x1fa2   :  { %7606 = vadd.xlane.f32.xlu1 %v7605_v36  ;;  %7615 = vadd.xlane.f32.xlu0 %v7614_v63  ;;  %v14512_v36 = vpop.permute.xlu0 %8051  ;;  %v14518_v63 = vpop.permute.xlu1 %8053 }
0x1fa6   :  { %7612 = vadd.xlane.f32.xlu1 %v7611_v9  ;;  %6466 = vadd.xlane.f32.xlu0 %v6465_v26  ;;  %v14520_v56 = vpop.permute.xlu0 %8079  ;;  %v14526_v9 = vpop.permute.xlu1 %8081 }
0x1faa   :  { %6463 = vadd.xlane.f32.xlu1 %v6462_v20  ;;  %6508 = vadd.xlane.f32.xlu0 %v6507_v44  ;;  %v14532_v26 = vpop.permute.xlu0 %8055  ;;  %v14538_v20 = vpop.permute.xlu1 %8057 }
0x1fae   :  { %6505 = vadd.xlane.f32.xlu1 %v6504_v16  ;;  %7025 = vadd.xlane.f32.xlu0 %v7024_v51  ;;  %v14540_v44 = vpop.permute.xlu0 %8083  ;;  %v8123_v16 = vsel %vm2314_vm3, %v15542_v31, 0.0  ;;  %v8132_v51 = vsel %vm2314_vm3, %v15543_v34, 0.0  ;;  %v14546_v38 = vpop.permute.xlu1 %8085  ;;  %v15549_v34 = vld [vmem:[#allocation159_spill] sm:$0xff] }
0x1fb2   :  { %7022 = vadd.xlane.f32.xlu1 %v7021_v12  ;;  %7067 = vadd.xlane.f32.xlu0 %v7066_v52  ;;  %v8129_v12 = vsel %vm2314_vm3, %v15544_v47, 0.0  ;;  %v14552_v52 = vpop.permute.xlu0 %8087 }
0x1fb6   :  { %7064 = vadd.xlane.f32.xlu1 %v7063_v54  ;;  %7579 = vadd.xlane.f32.xlu0 %v7578_v55  ;;  %v6510_v54 = vsel %vm2314_vm3, %v14302_v37, 0.0  ;;  %v7030_v55 = vsel %vm2314_vm3, %v14308_v22, 0.0 }
0x1fba   :  { %7576 = vadd.xlane.f32.xlu1 %v7575_v32  ;;  %7621 = vadd.xlane.f32.xlu0 %v7620_v60  ;;  %v14558_v32 = vpop.permute.xlu1 %8089 }
0x1fbe   :  { %7618 = vadd.xlane.f32.xlu1 %v7617_v0  ;;  %8127 = vadd.xlane.f32.xlu0 %v8126_v45  ;;  %v15546_v0 = vld [vmem:[#allocation134_spill] sm:$0xff] }
0x1fbf   :  { %v7027_v45 = vsel %vm2314_vm3, %v15546_v0, 0.0 }
0x1fc2   :  { %8124 = vadd.xlane.f32.xlu1 %v8123_v16  ;;  %8133 = vadd.xlane.f32.xlu0 %v8132_v51  ;;  %v15548_v16 = vld [vmem:[#allocation127_spill] sm:$0xff]  ;;  %v7584_v51 = vsel %vm2314_vm3, %v15549_v34, 0.0 }
0x1fc3   :  { %v7069_v22 = vsel %vm2314_vm3, %v15548_v16, 0.0 }
0x1fc6   :  { %8130 = vadd.xlane.f32.xlu1 %v8129_v12  ;;  %6514 = vadd.xlane.f32.xlu0 %v6513_v29  ;;  %v15550_v29 = vld [vmem:[#allocation139_spill] sm:$0xff] }
0x1fca   :  { %6511 = vadd.xlane.f32.xlu1 %v6510_v54  ;;  %7031 = vadd.xlane.f32.xlu0 %v7030_v55  ;;  %v15551_v55 = vld [vmem:[#allocation137_spill] sm:$0xff] }
0x1fcb   :  { %v14560_v60 = vpop.xlane.xlu0 %6430 }
0x1fcc   :  { %15545 = vst [vmem:[#allocation123_spill] sm:$0xff] %v14560_v60 }
0x1fce   :  { %7028 = vadd.xlane.f32.xlu1 %v7027_v45  ;;  %7073 = vadd.xlane.f32.xlu0 %v7072_v53  ;;  %v7581_v45 = vsel %vm2314_vm3, %v15552_v8, 0.0  ;;  %v7626_v53 = vsel %vm2314_vm3, %v14320_v41, 0.0  ;;  %v8138_v8 = vsel %vm2314_vm3, %v14326_v40, 0.0 }
0x1fcf   :  { %v14566_v31 = vpop.xlane.xlu1 %6424  ;;  %v6437_v37 = vpop.xlane.xlu0 %6436 }
0x1fd0   :  { %15547 = vst [vmem:[#allocation154_spill] sm:$0xff] %v14566_v31  ;;  %v6573_v54 = vrot.slane %v6437_v37, %v15550_v29  ;;  %v15553_v37 = vld [vmem:[#allocation160_spill] sm:$0xff] }
0x1fd2   :  { %7070 = vadd.xlane.f32.xlu1 %v7069_v22  ;;  %7585 = vadd.xlane.f32.xlu0 %v7584_v51 }
0x1fd3   :  { %v6434_v47 = vpop.xlane.xlu1 %6433  ;;  %v6473_v12 = vpop.xlane.xlu0 %6472 }
0x1fd4   :  { %v6569_v0 = vrot.slane %v6434_v47, %v15551_v55  ;;  %v6627_v34 = vrot.slane %v6473_v12, %v15550_v29  ;;  %v7623_v47 = vsel %vm2314_vm3, %v15553_v37, 0.0 }
0x1fd6   :  { %v14579_v31 = vsel %vm2456_vm4, %v6573_v54, %v6569_v0  ;;  %7582 = vadd.xlane.f32.xlu1 %v7581_v45  ;;  %7627 = vadd.xlane.f32.xlu0 %v7626_v53  ;;  %v15554_v53 = vld [vmem:[#allocation161_spill] sm:$0xff] }
0x1fd7   :  { %v6470_v16 = vpop.xlane.xlu1 %6469  ;;  %v6479_v22 = vpop.xlane.xlu0 %6478  ;;  %v8135_v12 = vsel %vm2314_vm3, %v15554_v53, 0.0 }
0x1fd8   :  { %v6623_v51 = vrot.slane %v6470_v16, %v15551_v55  ;;  %v6636_v0 = vrot.slane %v6479_v22, %v15550_v29  ;;  %v8174_v16 = vsel %vm2314_vm3, %v14338_v28, 0.0 }
0x1fda   :  { %v6628_v60 = vsel %vm2456_vm4, %v6627_v34, %v6623_v51  ;;  %7624 = vadd.xlane.f32.xlu1 %v7623_v47  ;;  %8139 = vadd.xlane.f32.xlu0 %v8138_v8  ;;  %v8171_v8 = vsel %vm2314_vm3, %v14332_v10, 0.0  ;;  %v7036_v10 = vsel %vm2314_vm3, %v14358_v1, 0.0 }
0x1fdb   :  { %v6476_v41 = vpop.xlane.xlu1 %6475  ;;  %v6443_v54 = vpop.xlane.xlu0 %6442 }
0x1fdc   :  { %v6632_v45 = vrot.slane %v6476_v41, %v15551_v55  ;;  %v6582_v47 = vrot.slane %v6443_v54, %v15550_v29  ;;  %v8180_v41 = vsel %vm2314_vm3, %v14346_v35, 0.0  ;;  %v8177_v54 = vsel %vm2314_vm3, %v14340_v17, 0.0 }
0x1fdd   :  { %v7078_v17 = vsel %vm2314_vm3, %v14366_v11, 0.0 }
0x1fde   :  { %v6637_v37 = vsel %vm2456_vm4, %v6636_v0, %v6632_v45  ;;  %8136 = vadd.xlane.f32.xlu1 %v8135_v12  ;;  %8175 = vadd.xlane.f32.xlu0 %v8174_v16 }
0x1fdf   :  { %v6699_v40 = vsel %vm2593_vm5, %v6637_v37, %v6628_v60  ;;  %v6440_v34 = vpop.xlane.xlu1 %6439  ;;  %v6485_v51 = vpop.xlane.xlu0 %6484 }
0x1fe0   :  { %v6578_v22 = vrot.slane %v6440_v34, %v15551_v55  ;;  %v6645_v60 = vrot.slane %v6485_v51, %v15550_v29 }
0x1fe2   :  { %v14603_v28 = vsel %vm2456_vm4, %v6582_v47, %v6578_v22  ;;  %8172 = vadd.xlane.f32.xlu1 %v8171_v8  ;;  %8181 = vadd.xlane.f32.xlu0 %v8180_v41  ;;  %v7033_v47 = vsel %vm2314_vm3, %v14352_v30, 0.0 }
0x1fe3   :  { %v6482_v0 = vpop.xlane.xlu1 %6481  ;;  %v6996_v45 = vpop.xlane.xlu0 %6995 }
0x1fe4   :  { %v6641_v53 = vrot.slane %v6482_v0, %v15551_v55  ;;  %v7126_v34 = vrot.slane %v6996_v45, %v15550_v29  ;;  %v7075_v0 = vsel %vm2314_vm3, %v14360_v2, 0.0  ;;  %v7590_v45 = vsel %vm2314_vm3, %v14378_v33, 0.0 }
0x1fe5   :  { %v7632_v2 = vsel %vm2314_vm3, %v14386_v43, 0.0 }
0x1fe6   :  { %v6646_v12 = vsel %vm2456_vm4, %v6645_v60, %v6641_v53  ;;  %8178 = vadd.xlane.f32.xlu1 %v8177_v54  ;;  %7037 = vadd.xlane.f32.xlu0 %v7036_v10 }
0x1fe7   :  { %v6700_v35 = vsel %vm2595_vm6, %v6646_v12, %v6699_v40  ;;  %v6993_v16 = vpop.xlane.xlu1 %6992  ;;  %v7002_v37 = vpop.xlane.xlu0 %7001  ;;  %v7587_v12 = vsel %vm2314_vm3, %v14372_v39, 0.0  ;;  %v8144_v39 = vsel %vm2314_vm3, %v14398_v46, 0.0 }
0x1fe8   :  { %v7122_v51 = vrot.slane %v6993_v16, %v15551_v55  ;;  %v7135_v40 = vrot.slane %v7002_v37, %v15550_v29 }
0x1fea   :  { %v7127_v1 = vsel %vm2456_vm4, %v7126_v34, %v7122_v51  ;;  %7034 = vadd.xlane.f32.xlu1 %v7033_v47  ;;  %7079 = vadd.xlane.f32.xlu0 %v7078_v17  ;;  %v7629_v47 = vsel %vm2314_vm3, %v14380_v5, 0.0  ;;  %v8186_v5 = vsel %vm2314_vm3, %v14406_v23, 0.0 }
0x1feb   :  { %v6999_v22 = vpop.xlane.xlu1 %6998  ;;  %v6449_v8 = vpop.xlane.xlu0 %6448 }
0x1fec   :  { %v7131_v41 = vrot.slane %v6999_v22, %v15551_v55  ;;  %v6591_v54 = vrot.slane %v6449_v8, %v15550_v29 }
0x1fee   :  { %v7136_v30 = vsel %vm2456_vm4, %v7135_v40, %v7131_v41  ;;  %7076 = vadd.xlane.f32.xlu1 %v7075_v0  ;;  %7591 = vadd.xlane.f32.xlu0 %v7590_v45  ;;  %v8141_v41 = vsel %vm2314_vm3, %v14392_v61, 0.0  ;;  %v7084_v61 = vsel %vm2314_vm3, %v14418_v3, 0.0 }
0x1fef   :  { %v7263_v11 = vsel %vm2593_vm5, %v7136_v30, %v7127_v1  ;;  %v6446_v60 = vpop.xlane.xlu1 %6445  ;;  %v6491_v53 = vpop.xlane.xlu0 %6490 }
0x1ff0   :  { %v6587_v10 = vrot.slane %v6446_v60, %v15551_v55  ;;  %v6654_v34 = vrot.slane %v6491_v53, %v15550_v29  ;;  %v8183_v53 = vsel %vm2314_vm3, %v14400_v7, 0.0 }
0x1ff2   :  { %v14635_v33 = vsel %vm2456_vm4, %v6591_v54, %v6587_v10  ;;  %7588 = vadd.xlane.f32.xlu1 %v7587_v12  ;;  %7633 = vadd.xlane.f32.xlu0 %v7632_v2  ;;  %v7081_v2 = vsel %vm2314_vm3, %v14412_v42, 0.0  ;;  %v7638_v42 = vsel %vm2314_vm3, %v14438_v62, 0.0 }
0x1ff3   :  { %v6488_v16 = vpop.xlane.xlu1 %6487  ;;  %v7008_v37 = vpop.xlane.xlu0 %7007 }
0x1ff4   :  { %v6650_v51 = vrot.slane %v6488_v16, %v15551_v55  ;;  %v7144_v8 = vrot.slane %v7008_v37, %v15550_v29  ;;  %v7596_v16 = vsel %vm2314_vm3, %v14426_v50, 0.0 }
0x1ff6   :  { %v6655_v17 = vsel %vm2456_vm4, %v6654_v34, %v6650_v51  ;;  %7630 = vadd.xlane.f32.xlu1 %v7629_v47  ;;  %8145 = vadd.xlane.f32.xlu0 %v8144_v39  ;;  %v7593_v39 = vsel %vm2314_vm3, %v14420_v58, 0.0  ;;  %v8150_v58 = vsel %vm2314_vm3, %v14446_v25, 0.0  ;;  %v8192_v25 = vsel %vm2314_vm3, %v14458_v27, 0.0 }
0x1ff7   :  { %v6701_v43 = vsel %vm2597_vm8, %v6655_v17, %v6700_v35  ;;  %v7005_v1 = vpop.xlane.xlu1 %7004  ;;  %v7044_v22 = vpop.xlane.xlu0 %7043 }
0x1ff8   :  { %v7140_v40 = vrot.slane %v7005_v1, %v15551_v55  ;;  %v7198_v30 = vrot.slane %v7044_v22, %v15550_v29 }
0x1ffa   :  { %v7145_v46 = vsel %vm2456_vm4, %v7144_v8, %v7140_v40  ;;  %8142 = vadd.xlane.f32.xlu1 %v8141_v41  ;;  %8187 = vadd.xlane.f32.xlu0 %v8186_v5  ;;  %v7635_v40 = vsel %vm2314_vm3, %v14432_v4, 0.0  ;;  %v8147_v4 = vsel %vm2314_vm3, %v14440_v24, 0.0  ;;  %v7602_v24 = vsel %vm2314_vm3, %v14466_v48, 0.0 }
0x1ffb   :  { %v7264_v0 = vsel %vm2595_vm6, %v7145_v46, %v7263_v11  ;;  %v7041_v45 = vpop.xlane.xlu1 %7040  ;;  %v7050_v35 = vpop.xlane.xlu0 %7049  ;;  %v7641_v48 = vsel %vm2314_vm3, %v14472_v6, 0.0 }
0x1ffc   :  { %v7194_v60 = vrot.slane %v7041_v45, %v15551_v55  ;;  %v7207_v11 = vrot.slane %v7050_v35, %v15550_v29 }
0x1ffe   :  { %v7199_v23 = vsel %vm2456_vm4, %v7198_v30, %v7194_v60  ;;  %8184 = vadd.xlane.f32.xlu1 %v8183_v53  ;;  %7085 = vadd.xlane.f32.xlu0 %v7084_v61  ;;  %v8189_v61 = vsel %vm2314_vm3, %v14452_v19, 0.0 }
0x1fff   :  { %v7047_v54 = vpop.xlane.xlu1 %7046  ;;  %v6455_v10 = vpop.xlane.xlu0 %6454 }
0x2000   :  { %v7203_v12 = vrot.slane %v7047_v54, %v15551_v55  ;;  %v6600_v51 = vrot.slane %v6455_v10, %v15550_v29  ;;  %v7644_v54 = vsel %vm2314_vm3, %v14478_v59, 0.0  ;;  %v8153_v59 = vsel %vm2314_vm3, %v14480_v18, 0.0 }
0x2001   :  { %v7647_v18 = vsel %vm2314_vm3, %v14500_v15, 0.0  ;;  %v8201_v15 = vsel %vm2314_vm3, %v14520_v56, 0.0 }
0x2002   :  { %v7208_v7 = vsel %vm2456_vm4, %v7207_v11, %v7203_v12  ;;  %7082 = vadd.xlane.f32.xlu1 %v7081_v2  ;;  %7597 = vadd.xlane.f32.xlu0 %v7596_v16  ;;  %v8156_v11 = vsel %vm2314_vm3, %v14486_v14, 0.0  ;;  %v8198_v2 = vsel %vm2314_vm3, %v14498_v57, 0.0  ;;  %v8195_v14 = vsel %vm2314_vm3, %v14492_v49, 0.0 }
0x2003   :  { %v14668_v3 = vsel %vm2593_vm5, %v7208_v7, %v7199_v23  ;;  %v6452_v37 = vpop.xlane.xlu1 %6451  ;;  %v6497_v34 = vpop.xlane.xlu0 %6496  ;;  %v7650_v7 = vsel %vm2314_vm3, %v14506_v21, 0.0  ;;  %v8162_v57 = vsel %vm2314_vm3, %v14518_v63, 0.0  ;;  %v8159_v49 = vsel %vm2314_vm3, %v14512_v36, 0.0  ;;  %v15556_v63 = vld [vmem:[#allocation153_spill] sm:$0xff] }
0x2004   :  { %v6596_v47 = vrot.slane %v6452_v37, %v15551_v55  ;;  %v6663_v22 = vrot.slane %v6497_v34, %v15550_v29  ;;  %v8165_v36 = vsel %vm2314_vm3, %v14532_v26, 0.0  ;;  %v8168_v26 = vsel %vm2314_vm3, %v14538_v20, 0.0 }
0x2006   :  { %v14677_v50 = vsel %vm2456_vm4, %v6600_v51, %v6596_v47  ;;  %7594 = vadd.xlane.f32.xlu1 %v7593_v39  ;;  %7639 = vadd.xlane.f32.xlu0 %v7638_v42  ;;  %v15555_v39 = vld [vmem:[#allocation152_spill] sm:$0xff] }
0x2007   :  { %v6494_v17 = vpop.xlane.xlu1 %6493  ;;  %v7014_v1 = vpop.xlane.xlu0 %7013  ;;  %v6420_v21 = vsel %vm2314_vm3, %v15555_v39, 0.0 }
0x2008   :  { %v6659_v8 = vrot.slane %v6494_v17, %v15551_v55  ;;  %v7153_v45 = vrot.slane %v7014_v1, %v15550_v29  ;;  %v6426_v1 = vsel %vm2314_vm3, %v15556_v63, 0.0 }
0x200a   :  { %v6664_v41 = vsel %vm2456_vm4, %v6663_v22, %v6659_v8  ;;  %7636 = vadd.xlane.f32.xlu1 %v7635_v40  ;;  %8151 = vadd.xlane.f32.xlu0 %v8150_v58  ;;  %v8204_v40 = vsel %vm2314_vm3, %v14526_v9, 0.0 }
0x200b   :  { %v14687_v62 = vsel %vm2599_vm9, %v6664_v41, %v6701_v43  ;;  %v7011_v5 = vpop.xlane.xlu1 %7010  ;;  %v14689_v46 = vpop.xlane.xlu0 %7055 }
0x200c   :  { %v7149_v35 = vrot.slane %v7011_v5, %v15551_v55 }
0x200e   :  { %v7154_v30 = vsel %vm2456_vm4, %v7153_v45, %v7149_v35  ;;  %8148 = vadd.xlane.f32.xlu1 %v8147_v4  ;;  %8193 = vadd.xlane.f32.xlu0 %v8192_v25  ;;  %v8207_v4 = vsel %vm2314_vm3, %v14540_v44, 0.0  ;;  %v8210_v44 = vsel %vm2314_vm3, %v14546_v38, 0.0 }
0x200f   :  { %v14699_v43 = vsel %vm2597_vm8, %v7154_v30, %v7264_v0  ;;  %v14701_v60 = vpop.xlane.xlu1 %7052  ;;  %v14703_v53 = vpop.xlane.xlu0 %7561  ;;  %v7599_v0 = vsel %vm2314_vm3, %v14460_v13, 0.0 }
0x2012   :  { %8190 = vadd.xlane.f32.xlu1 %v8189_v61  ;;  %7603 = vadd.xlane.f32.xlu0 %v7602_v24 }
0x2013   :  { %v14709_v27 = vpop.xlane.xlu1 %7558  ;;  %v14711_v23 = vpop.xlane.xlu0 %7567 }
0x2016   :  { %7600 = vadd.xlane.f32.xlu1 %v7599_v0  ;;  %7645 = vadd.xlane.f32.xlu0 %v7644_v54  ;;  %v8213_v0 = vsel %vm2314_vm3, %v14552_v52, 0.0 }
0x2017   :  { %v14717_v10 = vpop.xlane.xlu1 %7564  ;;  %v14719_v19 = vpop.xlane.xlu0 %6460 }
0x201a   :  { %7642 = vadd.xlane.f32.xlu1 %v7641_v48  ;;  %8157 = vadd.xlane.f32.xlu0 %v8156_v11 }
0x201b   :  { %v14725_v12 = vpop.xlane.xlu1 %6457  ;;  %v14727_v13 = vpop.xlane.xlu0 %6502 }
0x201e   :  { %8154 = vadd.xlane.f32.xlu1 %v8153_v59  ;;  %8199 = vadd.xlane.f32.xlu0 %v8198_v2  ;;  %v8216_v59 = vsel %vm2314_vm3, %v14558_v32, 0.0  ;;  %v7212_v2 = vrot.slane %v14701_v60, %v15551_v55  ;;  %vm15565_vm3 = vmmov 0  }
0x201f   :  { %v14733_v16 = vpop.xlane.xlu1 %6499  ;;  %v7020_v6 = vpop.xlane.xlu0 %7019 }
0x2020   :  { %v7162_v11 = vrot.slane %v7020_v6, %v15550_v29 }
0x2022   :  { %8196 = vadd.xlane.f32.xlu1 %v8195_v14  ;;  %7651 = vadd.xlane.f32.xlu0 %v7650_v7 }
0x2023   :  { %v7017_v37 = vpop.xlane.xlu1 %7016  ;;  %v7062_v34 = vpop.xlane.xlu0 %7061 }
0x2024   :  { %v7158_v20 = vrot.slane %v7017_v37, %v15551_v55  ;;  %v7216_v37 = vrot.slane %v14689_v46, %v15550_v29 }
0x2026   :  { %7648 = vadd.xlane.f32.xlu1 %v7647_v18  ;;  %8163 = vadd.xlane.f32.xlu0 %v8162_v57  ;;  %v7163_v52 = vsel %vm2456_vm4, %v7162_v11, %v7158_v20  ;;  %v7225_v57 = vrot.slane %v7062_v34, %v15550_v29  ;;  %v7217_v32 = vsel %vm2456_vm4, %v7216_v37, %v7212_v2 }
0x2027   :  { %v7059_v51 = vpop.xlane.xlu1 %7058  ;;  %v14743_v47 = vpop.xlane.xlu0 %7573  ;;  %v7266_v60 = vsel %vm2599_vm9, %v7163_v52, %v14699_v43  ;;  %v7271_v34 = vsel %vm2595_vm6, %v7217_v32, %v14668_v3  ;;  %v6672_v2 = vrot.slane %v14727_v13, %v15550_v29 }
0x2028   :  { %v7221_v14 = vrot.slane %v7059_v51, %v15551_v55 }
0x202a   :  { %8160 = vadd.xlane.f32.xlu1 %v8159_v49  ;;  %6421 = vadd.xlane.f32.xlu0 %v6420_v21  ;;  %v7226_v51 = vsel %vm2456_vm4, %v7225_v57, %v7221_v14 }
0x202b   :  { %v14749_v42 = vpop.xlane.xlu1 %7570  ;;  %v7610_v17 = vpop.xlane.xlu0 %7609  ;;  %v7272_v63 = vsel %vm2597_vm8, %v7226_v51, %v7271_v34 }
0x202c   :  { %v7764_v56 = vrot.slane %v7610_v17, %v15550_v29 }
0x202e   :  { %8202 = vadd.xlane.f32.xlu1 %v8201_v15  ;;  %6427 = vadd.xlane.f32.xlu0 %v6426_v1 }
0x202f   :  { %v7607_v22 = vpop.xlane.xlu1 %7606  ;;  %v7616_v8 = vpop.xlane.xlu0 %7615 }
0x2030   :  { %v7760_v58 = vrot.slane %v7607_v22, %v15551_v55  ;;  %v7773_v45 = vrot.slane %v7616_v8, %v15550_v29 }
0x2032   :  { %8166 = vadd.xlane.f32.xlu1 %v8165_v36  ;;  %8205 = vadd.xlane.f32.xlu0 %v8204_v40  ;;  %v7765_v9 = vsel %vm2456_vm4, %v7764_v56, %v7760_v58 }
0x2033   :  { %v7613_v41 = vpop.xlane.xlu1 %7612  ;;  %v14760_v5 = vpop.xlane.xlu0 %6466 }
0x2034   :  { %v7769_v35 = vrot.slane %v7613_v41, %v15551_v55 }
0x2036   :  { %v7774_v25 = vsel %vm2456_vm4, %v7773_v45, %v7769_v35  ;;  %8208 = vadd.xlane.f32.xlu1 %v8207_v4  ;;  %8169 = vadd.xlane.f32.xlu0 %v8168_v26 }
0x2037   :  { %v7836_v30 = vsel %vm2593_vm5, %v7774_v25, %v7765_v9  ;;  %v14772_v61 = vpop.xlane.xlu1 %6463  ;;  %v6509_v24 = vpop.xlane.xlu0 %6508 }
0x2038   :  { %v6681_v14 = vrot.slane %v6509_v24, %v15550_v29 }
0x203a   :  { %8214 = vadd.xlane.f32.xlu1 %v8213_v0  ;;  %8211 = vadd.xlane.f32.xlu0 %v8210_v44  ;;  %v6668_v44 = vrot.slane %v14733_v16, %v15551_v55 }
0x203b   :  { %v6506_v54 = vpop.xlane.xlu1 %6505  ;;  %v7026_v48 = vpop.xlane.xlu0 %7025 }
0x203c   :  { %v7171_v18 = vrot.slane %v7026_v48, %v15550_v29  ;;  %v6677_v48 = vrot.slane %v6506_v54, %v15551_v55 }
0x203e   :  { %8217 = vadd.xlane.f32.xlu0 %v8216_v59  ;;  %v6682_v16 = vsel %vm2456_vm4, %v6681_v14, %v6677_v48 }
0x203f   :  { %v7023_v38 = vpop.xlane.xlu1 %7022  ;;  %v7068_v7 = vpop.xlane.xlu0 %7067 }
0x2040   :  { %v7167_v6 = vrot.slane %v7023_v38, %v15551_v55  ;;  %v7234_v46 = vrot.slane %v7068_v7, %v15550_v29  ;;  %v6673_v38 = vsel %vm2456_vm4, %v6672_v2, %v6668_v44 }
0x2041   :  { %v6703_v57 = vsel %vm2601_vm10, %v6673_v38, %v14687_v62  ;;  %v7697_v62 = vrot.slane %v14717_v10, %v15551_v55 }
0x2042   :  { %v7172_v49 = vsel %vm2456_vm4, %v7171_v18, %v7167_v6  ;;  %v6704_v24 = vsel %vm2603_vm11, %v6682_v16, %v6703_v57 }
0x2043   :  { %v7267_v39 = vsel %vm2601_vm10, %v7172_v49, %v7266_v60  ;;  %v7065_v21 = vpop.xlane.xlu1 %7064  ;;  %v7580_v17 = vpop.xlane.xlu0 %7579 }
0x2044   :  { %v7230_v15 = vrot.slane %v7065_v21, %v15551_v55  ;;  %v7719_v36 = vrot.slane %v7580_v17, %v15550_v29 }
0x2046   :  { %v7235_v1 = vsel %vm2456_vm4, %v7234_v46, %v7230_v15 }
0x2047   :  { %v14804_v43 = vsel %vm2599_vm9, %v7235_v1, %v7272_v63  ;;  %v7577_v22 = vpop.xlane.xlu1 %7576  ;;  %v7622_v8 = vpop.xlane.xlu0 %7621  ;;  %v7706_v63 = vrot.slane %v14749_v42, %v15551_v55  ;;  %v7692_v42 = vrot.slane %v14703_v53, %v15550_v29 }
0x2048   :  { %v7715_v40 = vrot.slane %v7577_v22, %v15551_v55  ;;  %v7782_v45 = vrot.slane %v7622_v8, %v15550_v29  ;;  %v7688_v22 = vrot.slane %v14709_v27, %v15551_v55  ;;  %v7701_v8 = vrot.slane %v14711_v23, %v15550_v29 }
0x204a   :  { %v7720_v58 = vsel %vm2456_vm4, %v7719_v36, %v7715_v40  ;;  %v7693_v27 = vsel %vm2456_vm4, %v7692_v42, %v7688_v22 }
0x204b   :  { %v7619_v41 = vpop.xlane.xlu1 %7618  ;;  %v8128_v56 = vpop.xlane.xlu0 %8127 }
0x204c   :  { %v7778_v3 = vrot.slane %v7619_v41, %v15551_v55  ;;  %v8258_v25 = vrot.slane %v8128_v56, %v15550_v29  ;;  %v7710_v41 = vrot.slane %v14743_v47, %v15550_v29  ;;  %v7702_v56 = vsel %vm2456_vm4, %v7701_v8, %v7697_v62 }
0x204d   :  { %v7829_v23 = vsel %vm2593_vm5, %v7702_v56, %v7693_v27 }
0x204e   :  { %v7783_v35 = vsel %vm2456_vm4, %v7782_v45, %v7778_v3  ;;  %v7711_v45 = vsel %vm2456_vm4, %v7710_v41, %v7706_v63 }
0x204f   :  { %v7837_v4 = vsel %vm2595_vm6, %v7783_v35, %v7836_v30  ;;  %v8125_v26 = vpop.xlane.xlu1 %8124  ;;  %v8134_v9 = vpop.xlane.xlu0 %8133 }
0x2050   :  { %v8254_v0 = vrot.slane %v8125_v26, %v15551_v55  ;;  %v8267_v30 = vrot.slane %v8134_v9, %v15550_v29  ;;  %v7830_v9 = vsel %vm2595_vm6, %v7711_v45, %v7829_v23 }
0x2051   :  { %v7831_v47 = vsel %vm2597_vm8, %v7720_v58, %v7830_v9 }
0x2052   :  { %v8259_v20 = vsel %vm2456_vm4, %v8258_v25, %v8254_v0 }
0x2053   :  { %v8131_v11 = vpop.xlane.xlu1 %8130  ;;  %v6515_v59 = vpop.xlane.xlu0 %6514 }
0x2054   :  { %v8263_v52 = vrot.slane %v8131_v11, %v15551_v55  ;;  %v6690_v6 = vrot.slane %v6515_v59, %v15550_v29 }
0x2056   :  { %v8268_v7 = vsel %vm2456_vm4, %v8267_v30, %v8263_v52 }
0x2057   :  { %v8395_v37 = vsel %vm2593_vm5, %v8268_v7, %v8259_v20  ;;  %v6512_v54 = vpop.xlane.xlu1 %6511  ;;  %v7032_v18 = vpop.xlane.xlu0 %7031 }
0x2058   :  { %v6686_v13 = vrot.slane %v6512_v54, %v15551_v55  ;;  %v7180_v21 = vrot.slane %v7032_v18, %v15550_v29 }
0x205a   :  { %v6691_v32 = vsel %vm2456_vm4, %v6690_v6, %v6686_v13 }
0x205b   :  { %v7029_v60 = vpop.xlane.xlu1 %7028  ;;  %v14834_v49 = vpop.xlane.xlu0 %7073  ;;  %v6705_v51 = vsel %vm2605_vm12, %v6691_v32, %v6704_v24 }
0x205c   :  { %v7176_v17 = vrot.slane %v7029_v60, %v15551_v55  ;;  %v14841_v15 = vsel %vm2412_vm13, %v6705_v51, -1e+09 }
0x205d   :  { %v6713_v34 = vsel %vm831_vm1, %v14841_v15, -inf }
0x205e   :  { %v7181_v1 = vsel %vm2456_vm4, %v7180_v21, %v7176_v17  ;;  %6714 = vmax.xlane.f32.xlu0 %v6713_v34 }
0x205f   :  { %v14854_v36 = vpop.xlane.xlu1 %7070  ;;  %v7586_v40 = vpop.xlane.xlu0 %7585  ;;  %v7268_v10 = vsel %vm2603_vm11, %v7181_v1, %v7267_v39 }
0x2060   :  { %v7728_v26 = vrot.slane %v7586_v40, %v15550_v29 }
0x2063   :  { %v7583_v3 = vpop.xlane.xlu1 %7582  ;;  %v7628_v35 = vpop.xlane.xlu0 %7627 }
0x2064   :  { %v7724_v39 = vrot.slane %v7583_v3, %v15551_v55  ;;  %v7791_v20 = vrot.slane %v7628_v35, %v15550_v29 }
0x2066   :  { %v7729_v53 = vsel %vm2456_vm4, %v7728_v26, %v7724_v39  ;;  %v7239_v26 = vrot.slane %v14854_v36, %v15551_v55 }
0x2067   :  { %v7832_v25 = vsel %vm2599_vm9, %v7729_v53, %v7831_v47  ;;  %v7625_v0 = vpop.xlane.xlu1 %7624  ;;  %v8140_v44 = vpop.xlane.xlu0 %8139 }
0x2068   :  { %v7787_v48 = vrot.slane %v7625_v0, %v15551_v55  ;;  %v8276_v52 = vrot.slane %v8140_v44, %v15550_v29  ;;  %v7243_v0 = vrot.slane %v14834_v49, %v15550_v29 }
0x206a   :  { %v7792_v11 = vsel %vm2456_vm4, %v7791_v20, %v7787_v48  ;;  %v7244_v20 = vsel %vm2456_vm4, %v7243_v0, %v7239_v26 }
0x206b   :  { %v14875_v59 = vsel %vm2597_vm8, %v7792_v11, %v7837_v4  ;;  %v8137_v2 = vpop.xlane.xlu1 %8136  ;;  %v8176_v30 = vpop.xlane.xlu0 %8175 }
0x206c   :  { %v8272_v58 = vrot.slane %v8137_v2, %v15551_v55  ;;  %v8330_v54 = vrot.slane %v8176_v30, %v15550_v29 }
0x206e   :  { %v8277_v14 = vsel %vm2456_vm4, %v8276_v52, %v8272_v58  ;;  %v7274_v52 = vsel %vm2601_vm10, %v7244_v20, %v14804_v43 }
0x206f   :  { %v8396_v38 = vsel %vm2595_vm6, %v8277_v14, %v8395_v37  ;;  %v8173_v7 = vpop.xlane.xlu1 %8172  ;;  %v8182_v16 = vpop.xlane.xlu0 %8181 }
0x2070   :  { %v8326_v18 = vrot.slane %v8173_v7, %v15551_v55  ;;  %v8339_v57 = vrot.slane %v8182_v16, %v15550_v29 }
0x2072   :  { %v8331_v6 = vsel %vm2456_vm4, %v8330_v54, %v8326_v18 }
0x2073   :  { %v8179_v4 = vpop.xlane.xlu1 %8178  ;;  %v7038_v13 = vpop.xlane.xlu0 %7037 }
0x2074   :  { %v8335_v32 = vrot.slane %v8179_v4, %v15551_v55  ;;  %v7189_v21 = vrot.slane %v7038_v13, %v15550_v29 }
0x2076   :  { %v8340_v24 = vsel %vm2456_vm4, %v8339_v57, %v8335_v32 }
0x2077   :  { %v14888_v60 = vsel %vm2593_vm5, %v8340_v24, %v8331_v6  ;;  %v7035_v37 = vpop.xlane.xlu1 %7034  ;;  %v7080_v51 = vpop.xlane.xlu0 %7079 }
0x2078   :  { %v7185_v17 = vrot.slane %v7035_v37, %v15551_v55  ;;  %v7252_v44 = vrot.slane %v7080_v51, %v15550_v29 }
0x207a   :  { %v7190_v62 = vsel %vm2456_vm4, %v7189_v21, %v7185_v17 }
0x207b   :  { %v7077_v34 = vpop.xlane.xlu1 %7076  ;;  %v7592_v63 = vpop.xlane.xlu0 %7591  ;;  %v14894_v1 = vsel %vm2605_vm12, %v7190_v62, %v7268_v10 }
0x207c   :  { %v7737_v40 = vrot.slane %v7592_v63, %v15550_v29  ;;  %v7248_v9 = vrot.slane %v7077_v34, %v15551_v55 }
0x207e   :  { %v7253_v48 = vsel %vm2456_vm4, %v7252_v44, %v7248_v9 }
0x207f   :  { %v7589_v22 = vpop.xlane.xlu1 %7588  ;;  %v7634_v8 = vpop.xlane.xlu0 %7633  ;;  %v7275_v49 = vsel %vm2603_vm11, %v7253_v48, %v7274_v52  ;;  %v6605_v52 = vrot.slane %v14725_v12, %v15551_v55  ;;  %v6614_v12 = vrot.slane %v14772_v61, %v15551_v55 }
0x2080   :  { %v7733_v41 = vrot.slane %v7589_v22, %v15551_v55  ;;  %v7800_v63 = vrot.slane %v7634_v8, %v15550_v29 }
0x2082   :  { %v7738_v42 = vsel %vm2456_vm4, %v7737_v40, %v7733_v41 }
0x2083   :  { %v14900_v56 = vsel %vm2601_vm10, %v7738_v42, %v7832_v25  ;;  %v7631_v45 = vpop.xlane.xlu1 %7630  ;;  %v8146_v27 = vpop.xlane.xlu0 %8145 }
0x2084   :  { %v8285_v23 = vrot.slane %v8146_v27, %v15550_v29  ;;  %v7796_v62 = vrot.slane %v7631_v45, %v15551_v55 }
0x2086   :  { %v7801_v27 = vsel %vm2456_vm4, %v7800_v63, %v7796_v62  ;;  %v6609_v62 = vrot.slane %v14719_v19, %v15550_v29 }
0x2087   :  { %v8143_v3 = vpop.xlane.xlu1 %8142  ;;  %v14902_v35 = vpop.xlane.xlu0 %8187  ;;  %v7839_v8 = vsel %vm2599_vm9, %v7801_v27, %v14875_v59 }
0x2088   :  { %v8281_v10 = vrot.slane %v8143_v3, %v15551_v55 }
0x208a   :  { %v8286_v39 = vsel %vm2456_vm4, %v8285_v23, %v8281_v10 }
0x208b   :  { %v14911_v47 = vsel %vm2597_vm8, %v8286_v39, %v8396_v38  ;;  %v14913_v53 = vpop.xlane.xlu1 %8184  ;;  %v7086_v25 = vpop.xlane.xlu0 %7085 }
0x208c   :  { %v7261_v2 = vrot.slane %v7086_v25, %v15550_v29 }
0x208f   :  { %v7083_v36 = vpop.xlane.xlu1 %7082  ;;  %v14920_v11 = vpop.xlane.xlu0 %7597 }
0x2090   :  { %v7257_v30 = vrot.slane %v7083_v36, %v15551_v55 }
0x2092   :  { %v7262_v58 = vsel %vm2456_vm4, %v7261_v2, %v7257_v30 }
0x2093   :  { %v14928_v14 = vpop.xlane.xlu1 %7594  ;;  %v7640_v38 = vpop.xlane.xlu0 %7639  ;;  %v7276_v7 = vsel %vm2605_vm12, %v7262_v58, %v7275_v49 }
0x2094   :  { %v14933_v16 = vsel %vm2412_vm13, %v7276_v7, -1e+09  ;;  %v7809_v42 = vrot.slane %v7640_v38, %v15550_v29  ;;  %v15558_v38 = vld [vmem:[#allocation123_spill] sm:$0xff] }
0x2095   :  { %v7284_v54 = vsel %vm831_vm1, %v14933_v16, -inf  ;;  %v6564_v7 = vrot.slane %v15558_v38, %v15550_v29 }
0x2096   :  { %7285 = vmax.xlane.f32.xlu0 %v7284_v54  ;;  %v15559_v54 = vld [vmem:[#allocation154_spill] sm:$0xff] }
0x2097   :  { %v7637_v18 = vpop.xlane.xlu1 %7636  ;;  %v14937_v6 = vpop.xlane.xlu0 %8151 }
0x2098   :  { %v7805_v34 = vrot.slane %v7637_v18, %v15551_v55  ;;  %v6555_v18 = vrot.slane %v15559_v54, %v15550_v29 }
0x209a   :  { %v7810_v23 = vsel %vm2456_vm4, %v7809_v42, %v7805_v34  ;;  %v7746_v34 = vrot.slane %v14920_v11, %v15550_v29  ;;  %v8344_v42 = vrot.slane %v14913_v53, %v15551_v55  ;;  %v8348_v53 = vrot.slane %v14902_v35, %v15550_v29 }
0x209b   :  { %v14939_v43 = vpop.xlane.xlu1 %8148  ;;  %v14941_v4 = vpop.xlane.xlu0 %8193  ;;  %v7840_v25 = vsel %vm2601_vm10, %v7810_v23, %v7839_v8 }
0x209c   :  { %v8290_v11 = vrot.slane %v14939_v43, %v15551_v55  ;;  %v8294_v43 = vrot.slane %v14937_v6, %v15550_v29  ;;  %v8349_v35 = vsel %vm2456_vm4, %v8348_v53, %v8344_v42 }
0x209f   :  { %v14943_v13 = vpop.xlane.xlu1 %8190  ;;  %v14945_v57 = vpop.xlane.xlu0 %7603 }
0x20a3   :  { %v14947_v32 = vpop.xlane.xlu1 %7600  ;;  %v7646_v24 = vpop.xlane.xlu0 %7645 }
0x20a4   :  { %v7818_v3 = vrot.slane %v7646_v24, %v15550_v29  ;;  %v7742_v24 = vrot.slane %v14928_v14, %v15551_v55  ;;  %v6618_v14 = vrot.slane %v14760_v5, %v15550_v29  ;;  %v7751_v23 = vrot.slane %v14947_v32, %v15551_v55 }
0x20a5   :  { %v7755_v32 = vrot.slane %v14945_v57, %v15550_v29 }
0x20a6   :  { %v7747_v61 = vsel %vm2456_vm4, %v7746_v34, %v7742_v24  ;;  %v6619_v5 = vsel %vm2456_vm4, %v6618_v14, %v6614_v12  ;;  %v8403_v12 = vsel %vm2595_vm6, %v8349_v35, %v14888_v60 }
0x20a7   :  { %v7643_v37 = vpop.xlane.xlu1 %7642  ;;  %v14949_v51 = vpop.xlane.xlu0 %8157  ;;  %v7834_v57 = vsel %vm2603_vm11, %v7747_v61, %v14900_v56 }
0x20a8   :  { %v7814_v22 = vrot.slane %v7643_v37, %v15551_v55  ;;  %v8303_v56 = vrot.slane %v14949_v51, %v15550_v29 }
0x20aa   :  { %v7819_v10 = vsel %vm2456_vm4, %v7818_v3, %v7814_v22 }
0x20ab   :  { %v14951_v21 = vpop.xlane.xlu1 %8154  ;;  %v14953_v17 = vpop.xlane.xlu0 %8199  ;;  %v7841_v44 = vsel %vm2603_vm11, %v7819_v10, %v7840_v25 }
0x20af   :  { %v14959_v40 = vpop.xlane.xlu1 %8196  ;;  %v7652_v41 = vpop.xlane.xlu0 %7651 }
0x20b0   :  { %v7827_v39 = vrot.slane %v7652_v41, %v15550_v29  ;;  %v6610_v41 = vsel %vm2456_vm4, %v6609_v62, %v6605_v52  ;;  %v8366_v52 = vrot.slane %v14953_v17, %v15550_v29 }
0x20b3   :  { %v7649_v45 = vpop.xlane.xlu1 %7648  ;;  %v14966_v26 = vpop.xlane.xlu0 %8163 }
0x20b4   :  { %v7823_v9 = vrot.slane %v7649_v45, %v15551_v55  ;;  %v8353_v45 = vrot.slane %v14943_v13, %v15551_v55  ;;  %v8357_v13 = vrot.slane %v14941_v4, %v15550_v29  ;;  %v8362_v4 = vrot.slane %v14959_v40, %v15551_v55 }
0x20b5   :  { %v8312_v40 = vrot.slane %v14966_v26, %v15550_v29 }
0x20b6   :  { %v7828_v0 = vsel %vm2456_vm4, %v7827_v39, %v7823_v9  ;;  %v15033_v9 = vsel %vm2411_vm14, %v14894_v1, -1e+09  ;;  %v8299_v1 = vrot.slane %v14951_v21, %v15551_v55  ;;  %v8367_v17 = vsel %vm2456_vm4, %v8366_v52, %v8362_v4 }
0x20b7   :  { %v14975_v20 = vpop.xlane.xlu1 %8160  ;;  %v6422_v48 = vpop.xlane.xlu0 %6421  ;;  %v7842_v36 = vsel %vm2605_vm12, %v7828_v0, %v7841_v44  ;;  %v7756_v0 = vsel %vm2456_vm4, %v7755_v32, %v7751_v23  ;;  %v7281_v62 = vsel %vm831_vm1, %v15033_v9, -inf }
0x20b8   :  { %v14980_v2 = vsel %vm2412_vm13, %v7842_v36, -1e+09  ;;  %v6551_v30 = vrot.slane %v6422_v48, %v15551_v55  ;;  %v8358_v48 = vsel %vm2456_vm4, %v8357_v13, %v8353_v45  ;;  %v7835_v51 = vsel %vm2605_vm12, %v7756_v0, %v7834_v57  ;;  %v10047_v13 = vld [vmem:[%s15439_s2 + $0x8] sm:$0xff] }
0x20b9   :  { %v7850_v59 = vsel %vm831_vm1, %v14980_v2, -inf  ;;  %v8304_v38 = vsel %vm2456_vm4, %v8303_v56, %v8299_v1 }
0x20ba   :  { %7851 = vmax.xlane.f32.xlu0 %v7850_v59  ;;  %v6556_v63 = vsel %vm2456_vm4, %v6555_v18, %v6551_v30 }
0x20bb   :  { %v14987_v58 = vpop.xlane.xlu1 %8202  ;;  %v6428_v49 = vpop.xlane.xlu0 %6427 }
0x20bc   :  { %v6560_v37 = vrot.slane %v6428_v49, %v15551_v55 }
0x20be   :  { %v6565_v22 = vsel %vm2456_vm4, %v6564_v7, %v6560_v37  ;;  %v8371_v7 = vrot.slane %v14987_v58, %v15551_v55 }
0x20bf   :  { %v6692_v19 = vsel %vm2593_vm5, %v6565_v22, %v6556_v63  ;;  %v8167_v27 = vpop.xlane.xlu1 %8166  ;;  %v8206_v3 = vpop.xlane.xlu0 %8205  ;;  %v8404_v22 = vsel %vm2597_vm8, %v8358_v48, %v8403_v12 }
0x20c0   :  { %v6693_v10 = vsel %vm2595_vm6, %v14579_v31, %v6692_v19  ;;  %v8375_v59 = vrot.slane %v8206_v3, %v15550_v29  ;;  %v8317_v54 = vrot.slane %v8167_v27, %v15551_v55  ;;  %v7845_v19 = vsel %vm2411_vm14, %v7835_v51, -1e+09 }
0x20c1   :  { %v6694_v8 = vsel %vm2597_vm8, %v14603_v28, %v6693_v10  ;;  %v8405_v27 = vsel %vm2599_vm9, %v8367_v17, %v8404_v22  ;;  %v10048_v17 = vld [vmem:[%s15439_s2] sm:$0xff]  ;;  %vm15580_vm6 = vcmask 523264  }
0x20c2   :  { %v6695_v31 = vsel %vm2599_vm9, %v14635_v33, %v6694_v8  ;;  %v8295_v33 = vsel %vm2456_vm4, %v8294_v43, %v8290_v11  ;;  %v8376_v34 = vsel %vm2456_vm4, %v8375_v59, %v8371_v7  ;;  %vm15581_vm8 = vmmov %vm15580_vm6 }
0x20c3   :  { %v8209_v28 = vpop.xlane.xlu1 %8208  ;;  %v8170_v25 = vpop.xlane.xlu0 %8169  ;;  %v6696_v6 = vsel %vm2601_vm10, %v14677_v50, %v6695_v31  ;;  %v8308_v50 = vrot.slane %v14975_v20, %v15551_v55  ;;  %v8398_v58 = vsel %vm2599_vm9, %v8295_v33, %v14911_v47  ;;  %v8406_v61 = vsel %vm2601_vm10, %v8376_v34, %v8405_v27  ;;  %v15561_v27 = vld [vmem:[#allocation147_spill] sm:$0xff] }
0x20c4   :  { %v6697_v44 = vsel %vm2603_vm11, %v6610_v41, %v6696_v6  ;;  %v8321_v30 = vrot.slane %v8170_v25, %v15550_v29  ;;  %v8380_v24 = vrot.slane %v8209_v28, %v15551_v55  ;;  %v8399_v41 = vsel %vm2601_vm10, %v8304_v38, %v8398_v58 }
0x20c5   :  { %v6698_v36 = vsel %vm2605_vm12, %v6619_v5, %v6697_v44  ;;  %v8313_v26 = vsel %vm2456_vm4, %v8312_v40, %v8308_v50  ;;  %v7847_v5 = vsel %vm831_vm1, %v7845_v19, -inf  ;;  %vm8844_vm10 = vcmask 39936  }
0x20c6   :  { %v15059_v21 = vsel %vm2411_vm14, %v6698_v36, -1e+09  ;;  %v8322_v63 = vsel %vm2456_vm4, %v8321_v30, %v8317_v54  ;;  %v8400_v3 = vsel %vm2603_vm11, %v8313_v26, %v8399_v41 }
0x20c7   :  { %v8212_v20 = vpop.xlane.xlu0 %8211  ;;  %v6710_v49 = vsel %vm831_vm1, %v15059_v21, -inf  ;;  %v8215_v37 = vpop.xlane.xlu1 %8214  ;;  %v8401_v11 = vsel %vm2605_vm12, %v8322_v63, %v8400_v3 }
0x20c8   :  { %v8384_v18 = vrot.slane %v8212_v20, %v15550_v29  ;;  %6711 = vmax.xlane.f32.xlu1 %v6710_v49  ;;  %v8389_v60 = vrot.slane %v8215_v37, %v15551_v55  ;;  %v8411_v55 = vsel %vm2411_vm14, %v8401_v11, -1e+09 }
0x20c9   :  { %v8413_v8 = vsel %vm831_vm1, %v8411_v55, -inf }
0x20ca   :  { %v8385_v14 = vsel %vm2456_vm4, %v8384_v18, %v8380_v24 }
0x20cb   :  { %v8218_v42 = vpop.xlane.xlu0 %8217  ;;  %v8407_v10 = vsel %vm2603_vm11, %v8385_v14, %v8406_v61 }
0x20cc   :  { %v8393_v47 = vrot.slane %v8218_v42, %v15550_v29  ;;  %7282 = vmax.xlane.f32.xlu1 %v7281_v62 }
0x20ce   :  { %v8394_v23 = vsel %vm2456_vm4, %v8393_v47, %v8389_v60  ;;  %v15562_v60 = vld [vmem:[#allocation151_spill] sm:$0xff] }
0x20cf   :  { %v8408_v53 = vsel %vm2605_vm12, %v8394_v23, %v8407_v10  ;;  %v9902_v47 = vpack.i.bf16 %v15562_v60, %v15561_v27 }
0x20d0   :  { %7848 = vmax.xlane.f32.xlu1 %v7847_v5  ;;  %v8412_v29 = vsel %vm2412_vm13, %v8408_v53, -1e+09 }
0x20d1   :  { %v8416_v45 = vsel %vm831_vm1, %v8412_v29, -inf }
0x20d2   :  { %8417 = vmax.xlane.f32.xlu0 %v8416_v45 }
0x20d4   :  { %8414 = vmax.xlane.f32.xlu1 %v8413_v8 }
0x20eb   :  { %v6715_v43 = vpop.xlane.xlu0 %6714 }
0x20ec   :  { %v6717_v32 = vsub.f32 %v14841_v15, %v6715_v43 }
0x20ee   :  { %v6720_v31 = vmul.f32 1.442695, %v6717_v32 }
0x20f0   :  { %9999 = vpow2.f32 %v6720_v31 }
0x20fa   :  { %v10000_v35 = vpop.eup %9999 }
0x20fb   :  { %v15107_v28 = vmul.f32 %v10047_v13, %v10000_v35 }
0x20fd   :  { %v6727_v46 = vsel %vm831_vm1, %v15107_v28, 0.0 }
0x20fe   :  { %6728 = vadd.xlane.f32.xlu0 %v6727_v46 }
0x2123   :  { %v7286_v39 = vpop.xlane.xlu0 %7285 }
0x2124   :  { %v7288_v25 = vsub.f32 %v14933_v16, %v7286_v39 }
0x2126   :  { %v7291_v6 = vmul.f32 1.442695, %v7288_v25 }
0x2128   :  { %10001 = vpow2.f32 %v7291_v6 }
0x2132   :  { %v10002_v57 = vpop.eup %10001 }
0x2133   :  { %v15112_v33 = vmul.f32 %v10047_v13, %v10002_v57 }
0x2135   :  { %v7298_v15 = vsel %vm831_vm1, %v15112_v33, 0.0 }
0x2136   :  { %7299 = vadd.xlane.f32.xlu0 %v7298_v15 }
0x2147   :  { %v7852_v0 = vpop.xlane.xlu0 %7851 }
0x2148   :  { %v7854_v1 = vsub.f32 %v14980_v2, %v7852_v0 }
0x214a   :  { %v7857_v44 = vmul.f32 1.442695, %v7854_v1 }
0x214c   :  { %10003 = vpow2.f32 %v7857_v44 }
0x2155   :  { %v6712_v48 = vpop.xlane.xlu1 %6711 }
0x2156   :  { %v10004_v4 = vpop.eup %10003  ;;  %v6716_v50 = vsub.f32 %v15059_v21, %v6712_v48 }
0x2157   :  { %v15118_v36 = vmul.f32 %v10047_v13, %v10004_v4 }
0x2158   :  { %v6718_v16 = vmul.f32 1.442695, %v6716_v50 }
0x2159   :  { %v7283_v56 = vpop.xlane.xlu1 %7282  ;;  %v7864_v59 = vsel %vm831_vm1, %v15118_v36, 0.0 }
0x215a   :  { %10005 = vpow2.f32 %v6718_v16  ;;  %v7287_v30 = vsub.f32 %v15033_v9, %v7283_v56  ;;  %7865 = vadd.xlane.f32.xlu0 %v7864_v59 }
0x215c   :  { %v7289_v52 = vmul.f32 1.442695, %v7287_v30 }
0x215d   :  { %v7849_v2 = vpop.xlane.xlu1 %7848 }
0x215e   :  { %10007 = vpow2.f32 %v7289_v52  ;;  %v7853_v40 = vsub.f32 %v7845_v19, %v7849_v2 }
0x215f   :  { %v8418_v20 = vpop.xlane.xlu0 %8417 }
0x2160   :  { %v7855_v49 = vmul.f32 1.442695, %v7853_v40  ;;  %v8420_v51 = vsub.f32 %v8412_v29, %v8418_v20  ;;  %v15563_v20 = vmov 0.0|0.0  }
0x2161   :  { %v8415_v21 = vpop.xlane.xlu1 %8414 }
0x2162   :  { %10009 = vpow2.f32 %v7855_v49  ;;  %v8423_v38 = vmul.f32 1.442695, %v8420_v51  ;;  %v8419_v7 = vsub.f32 %v8411_v55, %v8415_v21 }
0x2164   :  { %v10006_v54 = vpop.eup %10005  ;;  %10011 = vpow2.f32 %v8423_v38  ;;  %v8421_v18 = vmul.f32 1.442695, %v8419_v7  ;;  %v15566_v38 = vld [vmem:[#allocation136_spill] sm:$0xff] }
0x2165   :  { %v6722_v26 = vmul.f32 %v10048_v17, %v10006_v54  ;;  %v15567_v54 = vld [vmem:[#allocation138_spill] sm:$0xff] }
0x2166   :  { %10013 = vpow2.f32 %v8421_v18 }
0x2167   :  { %v6724_v9 = vsel %vm831_vm1, %v6722_v26, 0.0 }
0x2168   :  { %v10008_v24 = vpop.eup %10007  ;;  %6725 = vadd.xlane.f32.xlu1 %v6724_v9 }
0x2169   :  { %v7293_v37 = vmul.f32 %v10048_v17, %v10008_v24 }
0x216b   :  { %v7295_v62 = vsel %vm831_vm1, %v7293_v37, 0.0 }
0x216c   :  { %v10010_v12 = vpop.eup %10009  ;;  %7296 = vadd.xlane.f32.xlu1 %v7295_v62  ;;  %v15568_v62 = vld [vmem:[#allocation146_spill] sm:$0xff] }
0x216d   :  { %v7859_v58 = vmul.f32 %v10048_v17, %v10010_v12 }
0x216e   :  { %v10012_v34 = vpop.eup %10011 }
0x216f   :  { %v7861_v63 = vsel %vm831_vm1, %v7859_v58, 0.0  ;;  %v15127_v22 = vmul.f32 %v10047_v13, %v10012_v34 }
0x2170   :  { %v10014_v41 = vpop.eup %10013  ;;  %7862 = vadd.xlane.f32.xlu1 %v7861_v63 }
0x2171   :  { %v8430_v14 = vsel %vm831_vm1, %v15127_v22, 0.0  ;;  %v8425_v42 = vmul.f32 %v10048_v17, %v10014_v41  ;;  %v9036_v17 = vld [vmem:[#allocation44] ss:$0 sm:$0xff]  ;;  %v15570_v41 = vld [vmem:[#allocation149_spill] sm:$0xff] }
0x2172   :  { %8431 = vadd.xlane.f32.xlu0 %v8430_v14  ;;  %v5930_v12 = vadd.f32 %v9036_v17, %v15568_v62  ;;  %v793_v62 = vld [vmem:[%s15577_s11 + $0x10] sm:$0xff] }
0x2173   :  { %v8427_v19 = vsel %vm831_vm1, %v8425_v42, 0.0 }
0x2174   :  { %8428 = vadd.xlane.f32.xlu1 %v8427_v19  ;;  %v5937_v19 = vadd.f32 %v5930_v12, %v15561_v27  ;;  %v15574_v27 = vld [vmem:[#allocation126_spill] sm:$0xff] }
0x2185   :  { %9903 = vrot.lane.b32.xlu1 %v9902_v47, %s11081_s7 }
0x218b   :  { %v6729_v3 = vpop.xlane.xlu0 %6728 }
0x218c   :  { %v6731_v5 = vmax.f32 %v6729_v3, 1e-06  ;;  %v8528_v3 = vmul.f32 0.6, %v5937_v19 }
0x21c3   :  { %v7300_v23 = vpop.xlane.xlu0 %7299 }
0x21c4   :  { %v7302_v29 = vmax.f32 %v7300_v23, 1e-06 }
0x21e7   :  { %v7866_v55 = vpop.xlane.xlu0 %7865 }
0x21e8   :  { %v7868_v8 = vmax.f32 %v7866_v55, 1e-06 }
0x21f5   :  { %v6726_v61 = vpop.xlane.xlu1 %6725 }
0x21f6   :  { %v6730_v11 = vmax.f32 %v6726_v61, 1e-06 }
0x21f8   :  { %10015 = vrcp.f32 %v6730_v11 }
0x21f9   :  { %v7297_v10 = vpop.xlane.xlu1 %7296 }
0x21fa   :  { %v7301_v53 = vmax.f32 %v7297_v10, 1e-06 }
0x21fc   :  { %10017 = vrcp.f32 %v7301_v53 }
0x21fd   :  { %v7863_v45 = vpop.xlane.xlu1 %7862  ;;  %10019 = vrcp.f32 %v6731_v5 }
0x21fe   :  { %v7867_v43 = vmax.f32 %v7863_v45, 1e-06  ;;  %10021 = vrcp.f32 %v7302_v29  ;;  %v781_v45 = vld [vmem:[%s15571_s14] sm:$0xff] }
0x21ff   :  { %v8432_v32 = vpop.xlane.xlu0 %8431 }
0x2200   :  { %10023 = vrcp.f32 %v7867_v43  ;;  %v8434_v31 = vmax.f32 %v8432_v32, 1e-06  ;;  %v783_v43 = vld [vmem:[%s15571_s14 + $0x10] sm:$0xff] }
0x2201   :  { %v8429_v35 = vpop.xlane.xlu1 %8428  ;;  %10025 = vrcp.f32 %v7868_v8  ;;  %v782_v8 = vld [vmem:[%s15571_s14 + $0x8] sm:$0xff] }
0x2202   :  { %v10016_v13 = vpop.eup %10015  ;;  %v8433_v46 = vmax.f32 %v8429_v35, 1e-06  ;;  %10027 = vrcp.f32 %v8434_v31  ;;  %v9731_v32 = vpack.c.bf16 %v782_v8, %v781_v45  ;;  %v784_v31 = vld [vmem:[%s15571_s14 + $0x18] sm:$0xff] }
0x2203   :  { %v6734_v39 = vmul.f32 %v10016_v13, %v6722_v26  ;;  %v9734_v35 = vpack.c.bf16 %v784_v31, %v783_v43  ;;  %v785_v13 = vld [vmem:[%s15571_s14 + $0x20] sm:$0xff] }
0x2204   :  { %10029 = vrcp.f32 %v8433_v46  ;;  %v786_v46 = vld [vmem:[%s15571_s14 + $0x28] sm:$0xff] }
0x2205   :  { %9476 = vmatprep.mubr.msk.f32.mxu1 %vm831_vm1, %v6734_v39  ;;  %v9904_v25 = vpop.permute.xlu1 %9903  ;;  %v9737_v39 = vpack.c.bf16 %v786_v46, %v785_v13  ;;  %v802_v13 = vld [vmem:[%s11356_s8 + $0x8] sm:$0xff]  ;;  %v803_v46 = vld [vmem:[%s11356_s8 + $0x10] sm:$0xff] }
0x2206   :  { %v10018_v6 = vpop.eup %10017  ;;  %v9906_v57 = vunpack.i.h.bf16 %v9904_v25  ;;  %v9905_v15 = vunpack.i.l.bf16 %v9904_v25  ;;  %v787_v25 = vld [vmem:[%s15571_s14 + $0x30] sm:$0xff] }
0x2207   :  { %v7305_v0 = vmul.f32 %v10018_v6, %v7293_v37  ;;  %v10020_v1 = vpop.eup %10019  ;;  %v788_v6 = vld [vmem:[%s15571_s14 + $0x38] sm:$0xff] }
0x2208   :  { %v9714_v44 = vpack.c.bf16 %v9906_v57, %v9905_v15  ;;  %v10022_v48 = vpop.eup %10021  ;;  %v6735_v16 = vmul.f32 %v10020_v1, %v15107_v28  ;;  %v9740_v57 = vpack.c.bf16 %v788_v6, %v787_v25  ;;  %v804_v25 = vld [vmem:[%s11356_s8 + $0x18] sm:$0xff] }
0x2209   :  { %9483 = vmatprep.mubr.msk.f32.mxu0 %vm831_vm1, %v7305_v0  ;;  %v7306_v56 = vmul.f32 %v10022_v48, %v15112_v33  ;;  %v15564_v33 = vmov 0.0   ;;  %v15575_v48 = vld [vmem:[#allocation124_spill] sm:$0xff]  ;;  %v9758_v6 = vpack.c.bf16 %v804_v25, %v803_v46 }
0x220a   :  { %v10024_v4 = vpop.eup %10023  ;;  %9715 = vmatprep.subr.bf16.mxu1 %v9714_v44  ;;  %9719 = vmatprep.subr.bf16.mxu0 %v9714_v44 }
0x220b   :  { %9717 = vmatpush3.bf16.msra.mxu1 %v9714_v44  ;;  %9721 = vmatpush3.bf16.msra.mxu0 %v9714_v44  ;;  %v10026_v50 = vpop.eup %10025  ;;  %v7871_v30 = vmul.f32 %v10024_v4, %v7859_v58  ;;  %v15569_v58 = vld [vmem:[#allocation148_spill] sm:$0xff] }
0x220c   :  { %9723 = vmatprep.subr.bf16.mxu1 %v9714_v44  ;;  %9727 = vmatprep.subr.bf16.mxu0 %v9714_v44  ;;  %v10028_v59 = vpop.eup %10027  ;;  %v7872_v40 = vmul.f32 %v10026_v50, %v15118_v36 }
0x220d   :  { %v8438_v28 = vmul.f32 %v10028_v59, %v15127_v22 }
0x220e   :  { %v10030_v52 = vpop.eup %10029  ;;  %9477 = vmatmul.mubr.msk.f32.vlgmr.msra.gmra.mrb[30].mxu1 %vm831_vm1, %v6735_v16  ;;  %9484 = vmatmul.mubr.msk.f32.vlgmr.msra.gmra.mrb[30].mxu0 %vm831_vm1, %v7306_v56  ;;  %v15576_v16 = vld [vmem:[#allocation125_spill] sm:$0xff] }
0x220f   :  { %9725 = vmatpush3.bf16.msra.mxu1 %v9714_v44  ;;  %9490 = vmatprep.mubr.msk.f32.mxu1 %vm831_vm1, %v7871_v30  ;;  %v8437_v2 = vmul.f32 %v10030_v52, %v8425_v42  ;;  %v9047_v42 = vld [vmem:[#allocation50] ss:$0 sm:$0xff] }
0x2210   :  { %9729 = vmatpush3.bf16.msra.mxu0 %v9714_v44  ;;  %9730 = vmatprep.subr.bf16.mxu1 %v15563_v20  ;;  %v780_v44 = vld [vmem:[#allocation52] sm:$0x3] }
0x2211   :  { %9497 = vmatprep.mubr.msk.f32.mxu0 %vm831_vm1, %v8437_v2  ;;  %9742 = vmatprep.subr.bf16.mxu0 %v15563_v20  ;;  %v8547_v4 = vrot.slane %v780_v44, %v15575_v48  ;;  %v8552_v56 = vrot.slane %v780_v44, %v15576_v16 }
0x2212   :  { %9491 = vmatmul.mubr.msk.f32.vlgmr.msra.gmra.mrb[32].mxu1 %vm831_vm1, %v7872_v40 }
0x2213   :  { %9498 = vmatmul.mubr.msk.f32.vlgmr.msra.gmra.mrb[32].mxu0 %vm831_vm1, %v8438_v28  ;;  %9516 = vmatprep.mubr.msk.f32.mxu1 %vm15565_vm3, %v15564_v33  ;;  %vm15572_vm1 = vcmask 261120  }
0x2214   :  { %9535 = vmatprep.mubr.msk.f32.mxu0 %vm15565_vm3, %v15564_v33  ;;  %vm15573_vm4 = vmmov %vm15572_vm1  ;;  %9732 = vmatpush3.bf16.msra.mxu1 %v9731_v32 }
0x2215   :  { %9733 = vmatprep.subr.bf16.mxu1 %v15563_v20  ;;  %vm15579_vm5 = vmmov %vm15572_vm1 }
0x2216   :  { %vm15582_vm9 = vmmov %vm15572_vm1 }
0x2218   :  { %9735 = vmatpush3.bf16.msra.mxu1 %v9734_v35  ;;  %v801_v35 = vld [vmem:[%s11356_s8] sm:$0xff]  ;;  %s11082_s8 = smov [#allocation62]  }
0x2219   :  { %9736 = vmatprep.subr.bf16.mxu1 %v15563_v20  ;;  %s8882_s15 = sshll.u32 %s11082_s8, 4  ;;  %s8883_s15 = int_to_ptr.vmem [resolvable:$true] %s8882_s15 }
0x221a   :  { %s10907_s24 = scalar_lea.vmem %s8883_s15, 128  ;;  %p10912_p5 = scmp.lt.s32.totalorder %s8883_s15, %s8883_s15 }
0x221b   :  { %p10908_p4 = scmp.ne.s32.totalorder %s8883_s15, %s10907_s24  ;;  %p10913_p6 = scmp.lt.s32.totalorder %s10907_s24, %s10907_s24 }
0x221c   :  { %9738 = vmatpush3.bf16.msra.mxu1 %v9737_v39  ;;  %v9755_v39 = vpack.c.bf16 %v802_v13, %v801_v35 }
0x221d   :  { %9739 = vmatprep.subr.bf16.mxu1 %v15563_v20  ;;  %p10914_p7 = por %p10913_p6, %p10912_p5 }
0x221f   :  { %p10915_p8 = pnand %p10914_p7, %p10908_p4 }
0x2220   :  { %9741 = vmatpush3.bf16.msra.mxu1 %v9740_v57  ;;  %v800_v57 = vld [vmem:[#allocation58] sm:$0x3] }
0x2221   :  { %9754 = vmatprep.subr.bf16.mxu1 %v15563_v20 }
0x22e1   :  { %v9478_v49 = vpop.f32.mrb[30].mxu1  ;;  %v9485_v36 = vpop.f32.mrb[30].mxu0 }
0x22e2   :  { %v6814_v51 = vpop.f32.mrb[31].mxu1  ;;  %v7379_v21 = vpop.f32.mrb[31].mxu0 }
0x22e3   :  { %v6822_v7 = vmul.f32 %v6814_v51, %v15566_v38  ;;  %v7387_v18 = vmul.f32 %v7379_v21, %v15567_v54  ;;  %v15578_v54 = vld [vmem:[#allocation150_spill] sm:$0xff] }
0x22e5   :  { %v7388_v26 = vadd.f32 %v7387_v18, %v6822_v7  ;;  %v9492_v9 = vpop.f32.mrb[32].mxu1  ;;  %v8563_v18 = vmul.f32 0.8, %v15578_v54 }
0x22e6   :  { %v9499_v24 = vpop.f32.mrb[32].mxu0  ;;  %v7945_v37 = vpop.f32.mrb[33].mxu1 }
0x22e7   :  { %v7953_v34 = vmul.f32 %v7945_v37, %v15569_v58  ;;  %v8511_v63 = vpop.f32.mrb[33].mxu0  ;;  %v791_v24 = vld [vmem:[%s15577_s11] sm:$0xff]  ;;  %v792_v37 = vld [vmem:[%s15577_s11 + $0x8] sm:$0xff]  ;;  %v794_v58 = vld [vmem:[%s15577_s11 + $0x18] sm:$0xff] }
0x22e8   :  { %v8519_v14 = vmul.f32 %v8511_v63, %v15570_v41  ;;  %v9743_v12 = vpack.c.bf16 %v792_v37, %v791_v24  ;;  %v795_v63 = vld [vmem:[%s15577_s11 + $0x20] sm:$0xff] }
0x22e9   :  { %v7954_v22 = vadd.f32 %v7953_v34, %v7388_v26  ;;  %v9746_v34 = vpack.c.bf16 %v794_v58, %v793_v62 }
0x22ea   :  { %9744 = vmatpush3.bf16.msra.mxu0 %v9743_v12 }
0x22eb   :  { %v8520_v60 = vadd.f32 %v8519_v14, %v7954_v22  ;;  %9745 = vmatprep.subr.bf16.mxu0 %v15563_v20  ;;  %v796_v22 = vld [vmem:[%s15577_s11 + $0x28] sm:$0xff]  ;;  %v797_v14 = vld [vmem:[%s15577_s11 + $0x30] sm:$0xff] }
0x22ec   :  { %v9749_v41 = vpack.c.bf16 %v796_v22, %v795_v63 }
0x22ed   :  { %v8527_v47 = vadd.f32 %v9047_v42, %v8520_v60  ;;  %v798_v42 = vld [vmem:[%s15577_s11 + $0x38] sm:$0xff]  ;;  %v9048_v60 = vld [vmem:[#allocation53] ss:$0 sm:$0xff] }
0x22ee   :  { %9747 = vmatpush3.bf16.msra.mxu0 %v9746_v34  ;;  %v9752_v19 = vpack.c.bf16 %v798_v42, %v797_v14  ;;  %v806_v34 = vld [vmem:[#allocation61] sm:$0x3] }
0x22ef   :  { %v8529_v61 = vmul.f32 0.4, %v8527_v47  ;;  %9748 = vmatprep.subr.bf16.mxu0 %v15563_v20  ;;  %v8862_v63 = vrot.slane %v806_v34, %v15575_v48 }
0x22f1   :  { %v8530_v11 = vadd.f32 %v8529_v61, %v8528_v3 }
0x22f2   :  { %9750 = vmatpush3.bf16.msra.mxu0 %v9749_v41  ;;  %v8867_v41 = vrot.slane %v806_v34, %v15576_v16 }
0x22f3   :  { %v8531_v23 = vsel %vm15572_vm1, %v8530_v11, 0.0  ;;  %9751 = vmatprep.subr.bf16.mxu0 %v15563_v20 }
0x22f4   :  { %8532 = vadd.xlane.f32.xlu0 %v8531_v23 }
0x22f6   :  { %9753 = vmatpush3.bf16.msra.mxu0 %v9752_v19 }
0x2381   :  { %v8533_v10 = vpop.xlane.xlu0 %8532 }
0x2382   :  { %v8534_v5 = vmul.f32 0.03125, %v8533_v10 }
0x2384   :  { %v8535_v53 = vsub.f32 %v8530_v11, %v8534_v5 }
0x2386   :  { %v8536_v29 = vmul.f32 %v8535_v53, %v8535_v53 }
0x2388   :  { %v8537_v55 = vsel %vm15573_vm4, %v8536_v29, 0.0 }
0x2389   :  { %8538 = vadd.xlane.f32.xlu0 %v8537_v55 }
0x239f   :  { %8565 = vrot.lane.b32.xlu0 %v15574_v27, %s11076_s6 }
0x2416   :  { %v8539_v15 = vpop.xlane.xlu0 %8538 }
0x2417   :  { %v8540_v0 = vmul.f32 0.03125, %v8539_v15  ;;  %v9050_v15 = vld [vmem:[#allocation56] ss:$0 sm:$0xff] }
0x2419   :  { %v8541_v1 = vadd.f32 1e-05, %v8540_v0  ;;  %v8749_v0 = vrot.slane %v800_v57, %v15575_v48 }
0x241a   :  { %v8566_v26 = vpop.permute.xlu0 %8565 }
0x241b   :  { %10031 = vrsqrt.f32 %v8541_v1 }
0x2425   :  { %v10032_v50 = vpop.eup %10031 }
0x2426   :  { %v8543_v59 = vmul.f32 %v10032_v50, %v8535_v53 }
0x2428   :  { %v8548_v30 = vmul.f32 %v8547_v4, %v8543_v59  ;;  %v8754_v4 = vrot.slane %v800_v57, %v15576_v16 }
0x242a   :  { %v8553_v52 = vadd.f32 %v8552_v56, %v8548_v30 }
0x242c   :  { %v8555_v2 = vmul.f32 0.044715, %v8553_v52  ;;  %v8554_v21 = vmul.f32 0.5, %v8553_v52 }
0x242e   :  { %v8556_v40 = vmul.f32 %v8555_v2, %v8553_v52 }
0x2430   :  { %v8557_v28 = vmul.f32 %v8556_v40, %v8553_v52 }
0x2432   :  { %v8558_v49 = vadd.f32 %v8557_v28, %v8553_v52 }
0x2434   :  { %v8559_v36 = vmul.f32 0.7978846, %v8558_v49 }
0x2436   :  { %10033 = vtanh.f32 %v8559_v36 }
0x2440   :  { %v10034_v51 = vpop.eup %10033 }
0x2441   :  { %v8561_v38 = vadd.f32 1.0, %v10034_v51 }
0x2443   :  { %v8562_v7 = vmul.f32 %v8561_v38, %v8554_v21  ;;  %v9052_v21 = vld [vmem:[#allocation59] ss:$0 sm:$0xff] }
0x2445   :  { %v8564_v17 = vadd.f32 %v8563_v18, %v8562_v7 }
0x2447   :  { %v8568_v9 = vsel %vm15579_vm5, %v8564_v17, %v8566_v26 }
0x2448   :  { %9517 = vmatmul.mubr.msk.f32.vlgmr.msra.gmra.mrb[34].mxu1 %vm15580_vm6, %v8568_v9 }
0x2449   :  { %9546 = vmatprep.mubr.msk.f32.mxu1 %vm15565_vm3, %v15564_v33  ;;  %v790_v33 = vld [vmem:[#allocation55] sm:$0x3]  ;;  %9756 = vmatpush3.bf16.msra.mxu1 %v9755_v39 }
0x244a   :  { %v8651_v47 = vrot.slane %v790_v33, %v15575_v48  ;;  %v8656_v11 = vrot.slane %v790_v33, %v15576_v16  ;;  %9757 = vmatprep.subr.bf16.mxu1 %v15563_v20 }
0x244d   :  { %9759 = vmatpush3.bf16.msra.mxu1 %v9758_v6 }
0x251b   :  { %v8644_v3 = vpop.f32.mrb[34].mxu1 }
0x251c   :  { %v8645_v61 = vadd.f32 %v9048_v60, %v8644_v3  ;;  %v9518_v23 = vpop.f32.mrb[35].mxu1 }
0x251e   :  { %v8652_v10 = vmul.f32 %v8651_v47, %v8645_v61 }
0x2520   :  { %v8657_v5 = vadd.f32 %v8656_v11, %v8652_v10 }
0x2522   :  { %v8659_v53 = vmul.f32 0.044715, %v8657_v5  ;;  %v8658_v43 = vmul.f32 0.5, %v8657_v5 }
0x2524   :  { %v8660_v29 = vmul.f32 %v8659_v53, %v8657_v5 }
0x2526   :  { %v8661_v55 = vmul.f32 %v8660_v29, %v8657_v5 }
0x2528   :  { %v8662_v27 = vadd.f32 %v8661_v55, %v8657_v5 }
0x252a   :  { %v8663_v45 = vmul.f32 0.7978846, %v8662_v27 }
0x252c   :  { %10035 = vtanh.f32 %v8663_v45 }
0x2536   :  { %v10036_v8 = vpop.eup %10035 }
0x2537   :  { %v8665_v32 = vadd.f32 1.0, %v10036_v8 }
0x2539   :  { %v8666_v31 = vmul.f32 %v8665_v32, %v8658_v43 }
0x253b   :  { %9536 = vmatmul.mubr.msk.f32.vlgmr.msra.gmra.mrb[34].mxu0 %vm15581_vm8, %v8666_v31 }
0x260e   :  { %v8742_v1 = vpop.f32.mrb[34].mxu0 }
0x260f   :  { %v8743_v44 = vadd.f32 %v9050_v15, %v8742_v1  ;;  %v9537_v50 = vpop.f32.mrb[35].mxu0 }
0x2611   :  { %v8750_v56 = vmul.f32 %v8749_v0, %v8743_v44 }
0x2613   :  { %v8755_v59 = vadd.f32 %v8754_v4, %v8750_v56 }
0x2615   :  { %v8757_v30 = vmul.f32 0.044715, %v8755_v59  ;;  %v8756_v20 = vmul.f32 0.5, %v8755_v59 }
0x2617   :  { %v8758_v52 = vmul.f32 %v8757_v30, %v8755_v59 }
0x2619   :  { %v8759_v2 = vmul.f32 %v8758_v52, %v8755_v59 }
0x261b   :  { %v8760_v40 = vadd.f32 %v8759_v2, %v8755_v59 }
0x261d   :  { %v8761_v28 = vmul.f32 0.7978846, %v8760_v40 }
0x261f   :  { %10037 = vtanh.f32 %v8761_v28 }
0x2629   :  { %v10038_v49 = vpop.eup %10037 }
0x262a   :  { %v8763_v36 = vadd.f32 1.0, %v10038_v49 }
0x262c   :  { %v8764_v51 = vmul.f32 %v8763_v36, %v8756_v20 }
0x262e   :  { %9547 = vmatmul.mubr.msk.f32.vlgmr.msra.gmra.mrb[36].mxu1 %vm15582_vm9, %v8764_v51 }
0x2701   :  { %v8840_v38 = vpop.f32.mrb[36].mxu1 }
0x2702   :  { %v8841_v7 = vadd.f32 %v9052_v21, %v8840_v38  ;;  %v9548_v54 = vpop.f32.mrb[37].mxu1 }
0x2704   :  { %v8845_v18 = vsel %vm8844_vm10, %v8841_v7, 0.0 }
0x2705   :  { %8846 = vadd.xlane.f32.xlu1 %v8845_v18 }
0x2792   :  { %v8847_v17 = vpop.xlane.xlu1 %8846 }
0x2793   :  { %v8849_v26 = vmul.f32 0.2, %v8847_v17 }
0x2795   :  { %v8850_v9 = vsub.f32 %v8841_v7, %v8849_v26 }
0x2797   :  { %v8851_v24 = vmul.f32 %v8850_v9, %v8850_v9 }
0x2799   :  { %v8852_v37 = vsel %vm8844_vm10, %v8851_v24, 0.0 }
0x279a   :  { %8853 = vadd.xlane.f32.xlu0 %v8852_v37 }
0x2827   :  { %v8854_v62 = vpop.xlane.xlu0 %8853 }
0x2828   :  { %v8855_v12 = vmul.f32 0.2, %v8854_v62 }
0x282a   :  { %v8856_v58 = vadd.f32 1e-05, %v8855_v12 }
0x282c   :  { %10039 = vrsqrt.f32 %v8856_v58 }
0x2836   :  { %v10040_v22 = vpop.eup %10039 }
0x2837   :  { %v8858_v14 = vmul.f32 %v10040_v22, %v8850_v9 }
0x2839   :  { %v8863_v42 = vmul.f32 %v8862_v63, %v8858_v14 }
0x283b   :  { %v8868_v19 = vadd.f32 %v8867_v41, %v8863_v42 }
0x283d   :  { %v9054_v33 = vmul.f32 -1.442695, %v8868_v19 }
0x283f   :  { %10041 = vpow2.f32 %v9054_v33 }
0x2849   :  { %v10042_v60 = vpop.eup %10041 }
0x284a   :  { %v8872_v47 = vadd.f32 1.0, %v10042_v60 }
0x284c   :  { %10043 = vrcp.f32 %v8872_v47 }
0x2856   :  { %v10044_v3 = vpop.eup %10043 }
0x2857   :  { %8875 = vst.msk [vmem:[#allocation62] sm:$0xff] %vm8844_vm10, %v10044_v3 }
0x2858   :  { %10918 = shalt.err (!%p10915_p8)
}
0x2859   :  { %s10919_s4 = scalar_lea.hbm %s11371_s3, 128 }
0x285a   :  { %p10920_p9 = scmp.ne.s32.totalorder %s11371_s3, %s10919_s4  ;;  %p10923_p10 = scmp.lt.u32.totalorder %s10919_s4, %s11371_s3 }
0x285c   :  { %p10925_p11 = pnand %p10923_p10, %p10920_p9 }
0x285e   :  { %10928 = shalt.err (!%p10925_p11)
}
0x285f   :  { %8885 = dma.vmem_to_hbm [thread:$0]  %s8883_s15, 128, %s11371_s3, [#allocation4]  }
0x2860   :  { %10969 = dma.done.wait [#allocation4], 128  }
0x2861   :  { %10970 = vsyncadd [#allocation4], 4294967168 }
0x2862   :  { %8889 = vsyncpa [#allocation3], 1 }
0x2863   :  { %8890 = vsyncpa [#allocation6], 1 }
0x2864   :  { %8891 = vsyncpa [#allocation9], 1 }
0x2865   :  { %8892 = vsyncpa [#allocation12], 1 }
0x2866   :  { %8893 = vsyncpa [#allocation15], 1 }
0x2867   :  { %8894 = vsyncpa [#allocation18], 1 }
0x2868   :  { %8895 = vsyncpa [#allocation21], 1 }
0x2869   :  { %8896 = vsyncpa [#allocation24], 1 }
0x286a   :  { %8897 = vsyncpa [#allocation27], 1 }
0x286b   :  { %8898 = vsyncpa [#allocation30], 1 }
0x286c   :  { %8899 = vsyncpa [#allocation33], 1 }
0x286d   :  { %8900 = vsyncpa [#allocation36], 1 }
0x286e   :  { %8901 = vsyncpa [#allocation39], 1 }
0x286f   :  { %8902 = vsyncpa [#allocation42], 1 }
0x2870   :  { %8903 = vsyncpa [#allocation45], 1 }
0x2871   :  { %8904 = vsyncpa [#allocation48], 1 }
0x2872   :  { %8905 = vsyncpa [#allocation51], 1 }
0x2873   :  { %8906 = vsyncpa [#allocation54], 1 }
0x2874   :  { %8907 = vsyncpa [#allocation57], 1 }
0x2875   :  { %8908 = vsyncpa [#allocation60], 1 }
0x2876   :  { %8909 = vsyncpa [#allocation4], 1 }

</bundles_post_ra>
